<compile_context>
chip_gen: v5e
topology: v5e:2x2
jax: 0.10.0
libtpu: 0.0.40
codegen_flags: <defaults>
</compile_context>

<pallas_src>
import math
from functools import partial

import numpy as np
import jax
import jax.numpy as jnp
from jax.experimental import pallas as pl
from jax.experimental.pallas import tpu as pltpu


# --------------------------------------------------------------------------- #
# In-kernel building blocks
# --------------------------------------------------------------------------- #
def _conv3x3_acc(src_ref, w_ref, b_ref, acc_ref, H, W):
    """3x3 'same' conv via 9 accumulated per-tap MXU matmuls (no im2col buffer).

    src_ref : (B, H+2, W+2, K)  bf16 with a zero spatial border
    w_ref   : (9, K, Cout)      bf16, tap t = ky*3 + kx
    b_ref   : (1, Cout)         f32
    acc_ref : (B*H*W, Cout)     f32 VMEM accumulator (overwritten here)
    returns : (B*H*W, Cout)     f32 value
    """
    B = src_ref.shape[0]
    K = src_ref.shape[-1]
    for ky in range(3):
        for kx in range(3):
            t = ky * 3 + kx
            tap = src_ref[:, ky:ky + H, kx:kx + W, :].reshape(B * H * W, K)
            contrib = jnp.dot(tap, w_ref[t], preferred_element_type=jnp.float32)
            if t == 0:
                acc_ref[...] = contrib
            else:
                acc_ref[...] += contrib
    return acc_ref[...] + b_ref[...]


def _zero_border(ref):
    """Zero only the 1-pixel spatial border of a (B, H+2, W+2, C) scratch (full C)."""
    B, Hp, Wp, C = ref.shape
    zrow = jnp.zeros((B, 1, Wp, C), ref.dtype)
    zcol = jnp.zeros((B, Hp, 1, C), ref.dtype)
    ref[:, 0:1, :, :] = zrow
    ref[:, Hp - 1:Hp, :, :] = zrow
    ref[:, :, 0:1, :] = zcol
    ref[:, :, Wp - 1:Wp, :] = zcol


def _pool2x2_sum(y, buf_ref):
    """2x2 stride-2 SUM pool of (B, H, W, C); the 0.25 is folded into the weights."""
    B, H, W, C = y.shape
    Ho, Wo = H // 2, W // 2
    # H direction: free leading-dim split + VPU sum.
    buf_ref[...] = y.reshape(B, Ho, 2, W, C).sum(axis=2)          # (B, Ho, W, C)
    # W direction: stride-2 sublane reads.
    return (buf_ref[:, :, pl.ds(0, Wo, 2), :]
            + buf_ref[:, :, pl.ds(1, Wo, 2), :])                  # (B, Ho, Wo, C)


# --------------------------------------------------------------------------- #
# Pallas kernels
# --------------------------------------------------------------------------- #
def _resblock_s1_kernel(x_ref, w1_ref, b1_ref, w2_ref, b2_ref, o_ref,
                        c1_ref, c2_ref, acc_ref):
    """stride == 1: relu -> SN(conv1) -> relu -> SN(conv2); bypass = identity."""
    B, Hp, Wp, _ = x_ref.shape
    H, W = Hp - 2, Wp - 2
    Cpo = o_ref.shape[-1]
    # ReLU + bf16 cast fused into the conv1 input store; the zero spatial border comes
    # from the wrapper-side pad (relu(0) == 0), so no border maintenance is needed.
    c1_ref[...] = jnp.maximum(x_ref[...], 0.0).astype(jnp.bfloat16)
    h1 = _conv3x3_acc(c1_ref, w1_ref, b1_ref, acc_ref, H, W)      # (B*H*W, Cpo) f32
    _zero_border(c2_ref)
    c2_ref[:, 1:H + 1, 1:W + 1, :] = (
        jnp.maximum(h1, 0.0).astype(jnp.bfloat16).reshape(B, H, W, Cpo))
    h2 = _conv3x3_acc(c2_ref, w2_ref, b2_ref, acc_ref, H, W)
    # identity residual (Cin == Cout); kept in f32
    o_ref[...] = h2.reshape(B, H, W, Cpo) + x_ref[:, 1:H + 1, 1:W + 1, :]


def _resblock_s2_kernel(x_ref, w1_ref, b1_ref, w2_ref, b2_ref, wb_ref, bb_ref,
                        o_ref, c1_ref, c2_ref, acc_ref, mpool_ref, bpool_ref):
    """stride == 2: main = relu->conv1->relu->conv2->avgpool; bypass = SN(1x1)->avgpool."""
    B, Hp, Wp, Cpi = x_ref.shape
    H, W = Hp - 2, Wp - 2
    Ho, Wo = H // 2, W // 2
    Cpo = o_ref.shape[-1]
    c1_ref[...] = jnp.maximum(x_ref[...], 0.0).astype(jnp.bfloat16)
    h1 = _conv3x3_acc(c1_ref, w1_ref, b1_ref, acc_ref, H, W)
    _zero_border(c2_ref)
    c2_ref[:, 1:H + 1, 1:W + 1, :] = (
        jnp.maximum(h1, 0.0).astype(jnp.bfloat16).reshape(B, H, W, Cpo))
    h2 = _conv3x3_acc(c2_ref, w2_ref, b2_ref, acc_ref, H, W)      # 0.25 folded into w2/b2
    main = _pool2x2_sum(h2.reshape(B, H, W, Cpo), mpool_ref)      # (B, Ho, Wo, Cpo)
    # Bypass: pool x first (commutes with a 1x1 conv; 0.25 folded into wb), then one
    # (B*Ho*Wo, Cpi) @ (Cpi, Cpo) MXU matmul. Separate pool scratch from the main path.
    xs = _pool2x2_sum(x_ref[:, 1:H + 1, 1:W + 1, :], bpool_ref)   # (B, Ho, Wo, Cpi) f32
    byp = jnp.dot(xs.reshape(B * Ho * Wo, Cpi).astype(jnp.bfloat16), wb_ref[...],
                  preferred_element_type=jnp.float32) + bb_ref[...]
    o_ref[...] = main + byp.reshape(B, Ho, Wo, Cpo)


# --------------------------------------------------------------------------- #
# Parameter setup / glue (plain JAX)
# --------------------------------------------------------------------------- #
def l2normalize(v, eps=1e-12):
    return v / (jnp.linalg.norm(v) + eps)


def spectral_norm_weight(w, u, v):
    """One power iteration (as SpectralNorm._update_u_v does per forward)."""
    height = w.shape[0]
    w2d = w.reshape(height, -1)
    v = l2normalize(w2d.T @ u)
    u = l2normalize(w2d @ v)
    sigma = u @ (w2d @ v)
    return w / sigma


def xavier_uniform(key, shape, gain):
    fan_in = shape[1] * shape[2] * shape[3]
    fan_out = shape[0] * shape[2] * shape[3]
    bound = gain * math.sqrt(6.0 / (fan_in + fan_out))
    return jax.random.uniform(key, shape, jnp.float32, -bound, bound)


def conv_bias_init(key, out_channels, fan_in):
    bound = 1.0 / math.sqrt(fan_in)
    return jax.random.uniform(key, (out_channels,), jnp.float32, -bound, bound)


def init_params(key, in_channels, out_channels, stride):
    ks = jax.random.split(key, 12)
    p = {}
    p["w1"] = xavier_uniform(ks[0], (out_channels, in_channels, 3, 3), 1.0)
    p["b1"] = conv_bias_init(ks[1], out_channels, in_channels * 9)
    p["u1"] = l2normalize(jax.random.normal(ks[2], (out_channels,), jnp.float32))
    p["v1"] = l2normalize(jax.random.normal(ks[3], (in_channels * 9,), jnp.float32))
    p["w2"] = xavier_uniform(ks[4], (out_channels, out_channels, 3, 3), 1.0)
    p["b2"] = conv_bias_init(ks[5], out_channels, out_channels * 9)
    p["u2"] = l2normalize(jax.random.normal(ks[6], (out_channels,), jnp.float32))
    p["v2"] = l2normalize(jax.random.normal(ks[7], (out_channels * 9,), jnp.float32))
    if stride != 1:
        p["wb"] = xavier_uniform(ks[8], (out_channels, in_channels, 1, 1), math.sqrt(2.0))
        p["bb"] = conv_bias_init(ks[9], out_channels, in_channels)
        p["ub"] = l2normalize(jax.random.normal(ks[10], (out_channels,), jnp.float32))
        p["vb"] = l2normalize(jax.random.normal(ks[11], (in_channels,), jnp.float32))
    return p


def _round_up(n, m):
    return (n + m - 1) // m * m


def _pick_batch_tile(n, per_image_bytes, budget_bytes=16 * 1024 * 1024):
    """Largest batch tile dividing n that fits the VMEM budget, preferring an even
    number of grid steps so both v7x TensorCores get equal work."""
    divs = [d for d in range(1, n + 1)
            if n % d == 0 and d * per_image_bytes <= budget_bytes]
    if not divs:
        return 1
    even = [d for d in divs if (n // d) % 2 == 0]
    return max(even) if even else max(divs)


# --------------------------------------------------------------------------- #
# Forward wrappers
# --------------------------------------------------------------------------- #
@partial(jax.jit, static_argnames=("stride",))
def resblock_forward_pallas(x_nchw, params, stride):
    N, Cin, H, W = x_nchw.shape
    Cout = params["w1"].shape[0]
    if stride == 1 and Cin != Cout:
        raise ValueError("stride=1 uses an identity bypass; requires Cin == Cout")
    Cpi = _round_up(Cin, 128)      # lane-dense / MXU-aligned channel padding
    Cpo = _round_up(Cout, 128)
    Ho, Wo = H // 2, W // 2

    # spectral-normalized weights (one power iteration, as the torch module does per forward)
    w1 = spectral_norm_weight(params["w1"], params["u1"], params["v1"])
    w2 = spectral_norm_weight(params["w2"], params["u2"], params["v2"])

    pool_scale = 0.25 if stride != 1 else 1.0   # fold AvgPool2d(2)'s scale into weights

    def conv_taps(w, cin, cout, cpi, cpo, scale):
        # (Cout, Cin, 3, 3) -> (9, cpi, cpo) bf16, tap t = ky*3 + kx
        wt = jnp.transpose(w, (2, 3, 1, 0)).reshape(9, cin, cout) * scale
        wt = jnp.pad(wt, ((0, 0), (0, cpi - cin), (0, cpo - cout)))
        return wt.astype(jnp.bfloat16)

    w1_t = conv_taps(w1, Cin, Cout, Cpi, Cpo, 1.0)
    w2_t = conv_taps(w2, Cout, Cout, Cpo, Cpo, pool_scale)
    b1 = jnp.pad(params["b1"], (0, Cpo - Cout)).reshape(1, Cpo)
    b2 = (jnp.pad(params["b2"], (0, Cpo - Cout)) * pool_scale).reshape(1, Cpo)

    # NCHW -> channels-last; channel pad to Cpi and 1-px spatial halo (zeros) so the
    # kernel never zero-fills / interior-copies the conv1 pad buffer. Kept f32
    # (residual add and bypass input stay full precision).
    x = jnp.transpose(x_nchw, (0, 2, 3, 1))
    x = jnp.pad(x, ((0, 0), (1, 1), (1, 1), (0, Cpi - Cin)))

    per_img = ((H + 2) * (W + 2) * Cpi * 4 * 2            # input tile, double-buffered f32
               + (H + 2) * (W + 2) * (Cpi + Cpo) * 2      # bf16 conv-input scratches
               + H * W * Cpo * 4                          # f32 conv accumulator
               + (H * W if stride == 1 else Ho * Wo) * Cpo * 4 * 2   # output tile
               + (0 if stride == 1 else Ho * W * (Cpi + Cpo) * 4))   # pool scratches
    B = _pick_batch_tile(N, per_img)
    G = N // B

    cparams = pltpu.CompilerParams(
        dimension_semantics=("parallel",),                # batch tiles independent (v7x: 2 TCs)
        vmem_limit_bytes=48 * 1024 * 1024,                # headroom under v7x's 64 MiB physical
    )

    x_spec = pl.BlockSpec((B, H + 2, W + 2, Cpi), lambda n: (n, 0, 0, 0))
    b_spec = pl.BlockSpec((1, Cpo), lambda n: (0, 0))

    def w_spec(k):
        return pl.BlockSpec((9, k, Cpo), lambda n: (0, 0, 0))

    if stride == 1:
        out = pl.pallas_call(
            _resblock_s1_kernel,
            out_shape=jax.ShapeDtypeStruct((N, H, W, Cpo), jnp.float32),
            grid=(G,),
            in_specs=[x_spec, w_spec(Cpi), b_spec, w_spec(Cpo), b_spec],
            out_specs=pl.BlockSpec((B, H, W, Cpo), lambda n: (n, 0, 0, 0)),
            scratch_shapes=[
                pltpu.VMEM((B, H + 2, W + 2, Cpi), jnp.bfloat16),   # conv1 input (relu(x), padded)
                pltpu.VMEM((B, H + 2, W + 2, Cpo), jnp.bfloat16),   # conv2 input (relu(h1), padded)
                pltpu.VMEM((B * H * W, Cpo), jnp.float32),          # shared f32 conv accumulator
            ],
            compiler_params=cparams,
        )(x, w1_t, b1, w2_t, b2)
    else:
        wb = spectral_norm_weight(params["wb"], params["ub"], params["vb"])
        wb_mat = (jnp.pad(wb.reshape(Cout, Cin).T, ((0, Cpi - Cin), (0, Cpo - Cout)))
                  * pool_scale).astype(jnp.bfloat16)
        bb = jnp.pad(params["bb"], (0, Cpo - Cout)).reshape(1, Cpo)  # not scaled (pool commuted)
        out = pl.pallas_call(
            _resblock_s2_kernel,
            out_shape=jax.ShapeDtypeStruct((N, Ho, Wo, Cpo), jnp.float32),
            grid=(G,),
            in_specs=[x_spec, w_spec(Cpi), b_spec, w_spec(Cpo), b_spec,
                      pl.BlockSpec((Cpi, Cpo), lambda n: (0, 0)), b_spec],
            out_specs=pl.BlockSpec((B, Ho, Wo, Cpo), lambda n: (n, 0, 0, 0)),
            scratch_shapes=[
                pltpu.VMEM((B, H + 2, W + 2, Cpi), jnp.bfloat16),
                pltpu.VMEM((B, H + 2, W + 2, Cpo), jnp.bfloat16),
                pltpu.VMEM((B * H * W, Cpo), jnp.float32),
                pltpu.VMEM((B, Ho, W, Cpo), jnp.float32),           # main-path pool scratch
                pltpu.VMEM((B, Ho, W, Cpi), jnp.float32),           # bypass pool scratch
            ],
            compiler_params=cparams,
        )(x, w1_t, b1, w2_t, b2, wb_mat, bb)

    # strip channel padding, back to NCHW (for drop-in torch-shape parity).
    # TODO(synk): if the downstream consumer takes NHWC, skip this epilogue transpose.
    return jnp.transpose(out[:, :, :, :Cout], (0, 3, 1, 2))


def resblock_forward_ref(x, params, stride):
    """Pure-JAX NCHW reference mirroring the PyTorch module exactly."""
    def conv(h, w, b, pad):
        y = jax.lax.conv_general_dilated(
            h, w, (1, 1), [(pad, pad), (pad, pad)],
            dimension_numbers=("NCHW", "OIHW", "NCHW"),
            precision=jax.lax.Precision.HIGHEST)
        return y + b[None, :, None, None]

    def avgpool(h):
        N, C, H, W = h.shape
        return h.reshape(N, C, H // 2, 2, W // 2, 2).mean(axis=(3, 5))

    w1 = spectral_norm_weight(params["w1"], params["u1"], params["v1"])
    w2 = spectral_norm_weight(params["w2"], params["u2"], params["v2"])
    h = jax.nn.relu(x)
    h = conv(h, w1, params["b1"], 1)
    h = jax.nn.relu(h)
    h = conv(h, w2, params["b2"], 1)
    if stride != 1:
        h = avgpool(h)
        wb = spectral_norm_weight(params["wb"], params["ub"], params["vb"])
        byp = avgpool(conv(x, wb, params["bb"], 0))
    else:
        byp = x
    return h + byp


# --------------------------------------------------------------------------- #
if __name__ == "__main__":
    key = jax.random.PRNGKey(0)
    kx1, kx2, kp1, kp2 = jax.random.split(key, 4)

    # --- stride=2 path: SN convs + AvgPool2d + SN 1x1 bypass conv ---
    N, Cin, Cout, H, W = 2, 4, 8, 16, 16
    x = jax.random.normal(kx1, (N, Cin, H, W), jnp.float32)
    params = init_params(kp1, Cin, Cout, stride=2)
    out = resblock_forward_pallas(x, params, stride=2)
    jax.block_until_ready(out)
    ref = resblock_forward_ref(x, params, 2)
    assert out.shape == ref.shape == (N, Cout, H // 2, W // 2)
    np.testing.assert_allclose(np.asarray(out), np.asarray(ref), rtol=2e-2, atol=2e-2)

    # --- stride=1 path (module default): identity bypass, needs Cin == Cout ---
    x1 = jax.random.normal(kx2, (N, Cin, H, W), jnp.float32)
    params1 = init_params(kp2, Cin, Cin, stride=1)
    out1 = resblock_forward_pallas(x1, params1, stride=1)
    jax.block_until_ready(out1)
    ref1 = resblock_forward_ref(x1, params1, 1)
    assert out1.shape == ref1.shape == (N, Cin, H, W)
    np.testing.assert_allclose(np.asarray(out1), np.asarray(ref1), rtol=2e-2, atol=2e-2)

    print("KERNEL_OK")
</pallas_src>

<mosaic_0001>
module attributes {stable_mosaic.version = 11 : i64} {
  func.func @_resblock_s2_kernel(%arg0: i32, %arg1: memref<1x18x18x128xf32, #tpu.memory_space<vmem>>, %arg2: memref<9x128x128xbf16, #tpu.memory_space<vmem>>, %arg3: memref<1x128xf32, #tpu.memory_space<vmem>>, %arg4: memref<9x128x128xbf16, #tpu.memory_space<vmem>>, %arg5: memref<1x128xf32, #tpu.memory_space<vmem>>, %arg6: memref<128x128xbf16, #tpu.memory_space<vmem>>, %arg7: memref<1x128xf32, #tpu.memory_space<vmem>>, %arg8: memref<1x8x8x128xf32, #tpu.memory_space<vmem>>, %arg9: memref<1x18x18x128xbf16, #tpu.memory_space<vmem>>, %arg10: memref<1x18x18x128xbf16, #tpu.memory_space<vmem>>, %arg11: memref<256x128xf32, #tpu.memory_space<vmem>>, %arg12: memref<1x8x16x128xf32, #tpu.memory_space<vmem>>, %arg13: memref<1x8x16x128xf32, #tpu.memory_space<vmem>>) attributes {dimension_semantics = [#tpu.dimension_semantics<parallel>], iteration_bounds = array<i64: 2>, scalar_prefetch = 0 : i64, scratch_operands = 5 : i64, tpu.core_type = #tpu.core_type<tc>, window_params = [{transform_indices = @transform_0, window_bounds = array<i64: 1, 18, 18, 128>}, {pipeline_mode = #tpu.pipeline_mode<synchronous>, transform_indices = @transform_1, window_bounds = array<i64: 9, 128, 128>}, {pipeline_mode = #tpu.pipeline_mode<synchronous>, transform_indices = @transform_2, window_bounds = array<i64: 1, 128>}, {pipeline_mode = #tpu.pipeline_mode<synchronous>, transform_indices = @transform_3, window_bounds = array<i64: 9, 128, 128>}, {pipeline_mode = #tpu.pipeline_mode<synchronous>, transform_indices = @transform_4, window_bounds = array<i64: 1, 128>}, {pipeline_mode = #tpu.pipeline_mode<synchronous>, transform_indices = @transform_5, window_bounds = array<i64: 128, 128>}, {pipeline_mode = #tpu.pipeline_mode<synchronous>, transform_indices = @transform_6, window_bounds = array<i64: 1, 128>}, {transform_indices = @transform_7, window_bounds = array<i64: 1, 8, 8, 128>}]} {
    %c0 = arith.constant 0 : index
    %c0_0 = arith.constant 0 : index
    %c0_1 = arith.constant 0 : index
    %c0_2 = arith.constant 0 : index
    %0 = vector.load %arg1[%c0, %c0_0, %c0_1, %c0_2] : memref<1x18x18x128xf32, #tpu.memory_space<vmem>>, vector<1x18x18x128xf32>
    %cst = arith.constant 0.000000e+00 : f32
    %1 = vector.broadcast %cst : f32 to vector<1x18x18x128xf32>
    %2 = arith.maximumf %0, %1 : vector<1x18x18x128xf32>
    %3 = arith.truncf %2 : vector<1x18x18x128xf32> to vector<1x18x18x128xbf16>
    %c0_3 = arith.constant 0 : index
    %c0_4 = arith.constant 0 : index
    %c0_5 = arith.constant 0 : index
    %c0_6 = arith.constant 0 : index
    %4 = vector.load %arg9[%c0_3, %c0_4, %c0_5, %c0_6] : memref<1x18x18x128xbf16, #tpu.memory_space<vmem>>, vector<1x18x18x128xbf16>
    tpu.vector_store %arg9[%c0_3, %c0_4, %c0_5, %c0_6], %3 {strides = array<i32>} : memref<1x18x18x128xbf16, #tpu.memory_space<vmem>>, vector<1x18x18x128xbf16>,
    %c0_7 = arith.constant 0 : index
    %c0_8 = arith.constant 0 : index
    %c0_9 = arith.constant 0 : index
    %c0_10 = arith.constant 0 : index
    %5 = vector.load %arg9[%c0_7, %c0_8, %c0_9, %c0_10] : memref<1x18x18x128xbf16, #tpu.memory_space<vmem>>, vector<1x16x16x128xbf16>
    %6 = vector.shape_cast %5 : vector<1x16x16x128xbf16> to vector<256x128xbf16>
    %c0_11 = arith.constant 0 : index
    %c0_12 = arith.constant 0 : index
    %c0_13 = arith.constant 0 : index
    %7 = vector.load %arg2[%c0_11, %c0_12, %c0_13] : memref<9x128x128xbf16, #tpu.memory_space<vmem>>, vector<1x128x128xbf16>
    %8 = vector.shape_cast %7 : vector<1x128x128xbf16> to vector<128x128xbf16>
    %cst_14 = arith.constant dense<0.000000e+00> : vector<256x128xf32>
    %9 = tpu.matmul %6, %8, %cst_14 {dimension_numbers = #tpu.dot_dimension_numbers<[1], [0], [0], [1], [0, 0, 1, 1], [], []>} : vector<256x128xbf16>, vector<128x128xbf16>, vector<256x128xf32> -> vector<256x128xf32>
    %c0_15 = arith.constant 0 : index
    %c0_16 = arith.constant 0 : index
    %10 = vector.load %arg11[%c0_15, %c0_16] : memref<256x128xf32, #tpu.memory_space<vmem>>, vector<256x128xf32>
    tpu.vector_store %arg11[%c0_15, %c0_16], %9 {strides = array<i32>} : memref<256x128xf32, #tpu.memory_space<vmem>>, vector<256x128xf32>,
    %c0_17 = arith.constant 0 : index
    %c0_18 = arith.constant 0 : index
    %c1 = arith.constant 1 : index
    %c0_19 = arith.constant 0 : index
    %11 = vector.load %arg9[%c0_17, %c0_18, %c1, %c0_19] : memref<1x18x18x128xbf16, #tpu.memory_space<vmem>>, vector<1x16x16x128xbf16>
    %12 = vector.shape_cast %11 : vector<1x16x16x128xbf16> to vector<256x128xbf16>
    %c1_20 = arith.constant 1 : index
    %c0_21 = arith.constant 0 : index
    %c0_22 = arith.constant 0 : index
    %13 = vector.load %arg2[%c1_20, %c0_21, %c0_22] : memref<9x128x128xbf16, #tpu.memory_space<vmem>>, vector<1x128x128xbf16>
    %14 = vector.shape_cast %13 : vector<1x128x128xbf16> to vector<128x128xbf16>
    %cst_23 = arith.constant dense<0.000000e+00> : vector<256x128xf32>
    %15 = tpu.matmul %12, %14, %cst_23 {dimension_numbers = #tpu.dot_dimension_numbers<[1], [0], [0], [1], [0, 0, 1, 1], [], []>} : vector<256x128xbf16>, vector<128x128xbf16>, vector<256x128xf32> -> vector<256x128xf32>
    %c0_24 = arith.constant 0 : index
    %c0_25 = arith.constant 0 : index
    %16 = vector.load %arg11[%c0_24, %c0_25] : memref<256x128xf32, #tpu.memory_space<vmem>>, vector<256x128xf32>
    %17 = arith.addf %16, %15 : vector<256x128xf32>
    %c0_26 = arith.constant 0 : index
    %c0_27 = arith.constant 0 : index
    %18 = vector.load %arg11[%c0_26, %c0_27] : memref<256x128xf32, #tpu.memory_space<vmem>>, vector<256x128xf32>
    tpu.vector_store %arg11[%c0_26, %c0_27], %17 {strides = array<i32>} : memref<256x128xf32, #tpu.memory_space<vmem>>, vector<256x128xf32>,
    %c0_28 = arith.constant 0 : index
    %c0_29 = arith.constant 0 : index
    %c2 = arith.constant 2 : index
    %c0_30 = arith.constant 0 : index
    %19 = vector.load %arg9[%c0_28, %c0_29, %c2, %c0_30] : memref<1x18x18x128xbf16, #tpu.memory_space<vmem>>, vector<1x16x16x128xbf16>
    %20 = vector.shape_cast %19 : vector<1x16x16x128xbf16> to vector<256x128xbf16>
    %c2_31 = arith.constant 2 : index
    %c0_32 = arith.constant 0 : index
    %c0_33 = arith.constant 0 : index
    %21 = vector.load %arg2[%c2_31, %c0_32, %c0_33] : memref<9x128x128xbf16, #tpu.memory_space<vmem>>, vector<1x128x128xbf16>
    %22 = vector.shape_cast %21 : vector<1x128x128xbf16> to vector<128x128xbf16>
    %cst_34 = arith.constant dense<0.000000e+00> : vector<256x128xf32>
    %23 = tpu.matmul %20, %22, %cst_34 {dimension_numbers = #tpu.dot_dimension_numbers<[1], [0], [0], [1], [0, 0, 1, 1], [], []>} : vector<256x128xbf16>, vector<128x128xbf16>, vector<256x128xf32> -> vector<256x128xf32>
    %c0_35 = arith.constant 0 : index
    %c0_36 = arith.constant 0 : index
    %24 = vector.load %arg11[%c0_35, %c0_36] : memref<256x128xf32, #tpu.memory_space<vmem>>, vector<256x128xf32>
    %25 = arith.addf %24, %23 : vector<256x128xf32>
    %c0_37 = arith.constant 0 : index
    %c0_38 = arith.constant 0 : index
    %26 = vector.load %arg11[%c0_37, %c0_38] : memref<256x128xf32, #tpu.memory_space<vmem>>, vector<256x128xf32>
    tpu.vector_store %arg11[%c0_37, %c0_38], %25 {strides = array<i32>} : memref<256x128xf32, #tpu.memory_space<vmem>>, vector<256x128xf32>,
    %c0_39 = arith.constant 0 : index
    %c1_40 = arith.constant 1 : index
    %c0_41 = arith.constant 0 : index
    %c0_42 = arith.constant 0 : index
    %27 = vector.load %arg9[%c0_39, %c1_40, %c0_41, %c0_42] : memref<1x18x18x128xbf16, #tpu.memory_space<vmem>>, vector<1x16x16x128xbf16>
    %28 = vector.shape_cast %27 : vector<1x16x16x128xbf16> to vector<256x128xbf16>
    %c3 = arith.constant 3 : index
    %c0_43 = arith.constant 0 : index
    %c0_44 = arith.constant 0 : index
    %29 = vector.load %arg2[%c3, %c0_43, %c0_44] : memref<9x128x128xbf16, #tpu.memory_space<vmem>>, vector<1x128x128xbf16>
    %30 = vector.shape_cast %29 : vector<1x128x128xbf16> to vector<128x128xbf16>
    %cst_45 = arith.constant dense<0.000000e+00> : vector<256x128xf32>
    %31 = tpu.matmul %28, %30, %cst_45 {dimension_numbers = #tpu.dot_dimension_numbers<[1], [0], [0], [1], [0, 0, 1, 1], [], []>} : vector<256x128xbf16>, vector<128x128xbf16>, vector<256x128xf32> -> vector<256x128xf32>
    %c0_46 = arith.constant 0 : index
    %c0_47 = arith.constant 0 : index
    %32 = vector.load %arg11[%c0_46, %c0_47] : memref<256x128xf32, #tpu.memory_space<vmem>>, vector<256x128xf32>
    %33 = arith.addf %32, %31 : vector<256x128xf32>
    %c0_48 = arith.constant 0 : index
    %c0_49 = arith.constant 0 : index
    %34 = vector.load %arg11[%c0_48, %c0_49] : memref<256x128xf32, #tpu.memory_space<vmem>>, vector<256x128xf32>
    tpu.vector_store %arg11[%c0_48, %c0_49], %33 {strides = array<i32>} : memref<256x128xf32, #tpu.memory_space<vmem>>, vector<256x128xf32>,
    %c0_50 = arith.constant 0 : index
    %c1_51 = arith.constant 1 : index
    %c1_52 = arith.constant 1 : index
    %c0_53 = arith.constant 0 : index
    %35 = vector.load %arg9[%c0_50, %c1_51, %c1_52, %c0_53] : memref<1x18x18x128xbf16, #tpu.memory_space<vmem>>, vector<1x16x16x128xbf16>
    %36 = vector.shape_cast %35 : vector<1x16x16x128xbf16> to vector<256x128xbf16>
    %c4 = arith.constant 4 : index
    %c0_54 = arith.constant 0 : index
    %c0_55 = arith.constant 0 : index
    %37 = vector.load %arg2[%c4, %c0_54, %c0_55] : memref<9x128x128xbf16, #tpu.memory_space<vmem>>, vector<1x128x128xbf16>
    %38 = vector.shape_cast %37 : vector<1x128x128xbf16> to vector<128x128xbf16>
    %cst_56 = arith.constant dense<0.000000e+00> : vector<256x128xf32>
    %39 = tpu.matmul %36, %38, %cst_56 {dimension_numbers = #tpu.dot_dimension_numbers<[1], [0], [0], [1], [0, 0, 1, 1], [], []>} : vector<256x128xbf16>, vector<128x128xbf16>, vector<256x128xf32> -> vector<256x128xf32>
    %c0_57 = arith.constant 0 : index
    %c0_58 = arith.constant 0 : index
    %40 = vector.load %arg11[%c0_57, %c0_58] : memref<256x128xf32, #tpu.memory_space<vmem>>, vector<256x128xf32>
    %41 = arith.addf %40, %39 : vector<256x128xf32>
    %c0_59 = arith.constant 0 : index
    %c0_60 = arith.constant 0 : index
    %42 = vector.load %arg11[%c0_59, %c0_60] : memref<256x128xf32, #tpu.memory_space<vmem>>, vector<256x128xf32>
    tpu.vector_store %arg11[%c0_59, %c0_60], %41 {strides = array<i32>} : memref<256x128xf32, #tpu.memory_space<vmem>>, vector<256x128xf32>,
    %c0_61 = arith.constant 0 : index
    %c1_62 = arith.constant 1 : index
    %c2_63 = arith.constant 2 : index
    %c0_64 = arith.constant 0 : index
    %43 = vector.load %arg9[%c0_61, %c1_62, %c2_63, %c0_64] : memref<1x18x18x128xbf16, #tpu.memory_space<vmem>>, vector<1x16x16x128xbf16>
    %44 = vector.shape_cast %43 : vector<1x16x16x128xbf16> to vector<256x128xbf16>
    %c5 = arith.constant 5 : index
    %c0_65 = arith.constant 0 : index
    %c0_66 = arith.constant 0 : index
    %45 = vector.load %arg2[%c5, %c0_65, %c0_66] : memref<9x128x128xbf16, #tpu.memory_space<vmem>>, vector<1x128x128xbf16>
    %46 = vector.shape_cast %45 : vector<1x128x128xbf16> to vector<128x128xbf16>
    %cst_67 = arith.constant dense<0.000000e+00> : vector<256x128xf32>
    %47 = tpu.matmul %44, %46, %cst_67 {dimension_numbers = #tpu.dot_dimension_numbers<[1], [0], [0], [1], [0, 0, 1, 1], [], []>} : vector<256x128xbf16>, vector<128x128xbf16>, vector<256x128xf32> -> vector<256x128xf32>
    %c0_68 = arith.constant 0 : index
    %c0_69 = arith.constant 0 : index
    %48 = vector.load %arg11[%c0_68, %c0_69] : memref<256x128xf32, #tpu.memory_space<vmem>>, vector<256x128xf32>
    %49 = arith.addf %48, %47 : vector<256x128xf32>
    %c0_70 = arith.constant 0 : index
    %c0_71 = arith.constant 0 : index
    %50 = vector.load %arg11[%c0_70, %c0_71] : memref<256x128xf32, #tpu.memory_space<vmem>>, vector<256x128xf32>
    tpu.vector_store %arg11[%c0_70, %c0_71], %49 {strides = array<i32>} : memref<256x128xf32, #tpu.memory_space<vmem>>, vector<256x128xf32>,
    %c0_72 = arith.constant 0 : index
    %c2_73 = arith.constant 2 : index
    %c0_74 = arith.constant 0 : index
    %c0_75 = arith.constant 0 : index
    %51 = vector.load %arg9[%c0_72, %c2_73, %c0_74, %c0_75] : memref<1x18x18x128xbf16, #tpu.memory_space<vmem>>, vector<1x16x16x128xbf16>
    %52 = vector.shape_cast %51 : vector<1x16x16x128xbf16> to vector<256x128xbf16>
    %c6 = arith.constant 6 : index
    %c0_76 = arith.constant 0 : index
    %c0_77 = arith.constant 0 : index
    %53 = vector.load %arg2[%c6, %c0_76, %c0_77] : memref<9x128x128xbf16, #tpu.memory_space<vmem>>, vector<1x128x128xbf16>
    %54 = vector.shape_cast %53 : vector<1x128x128xbf16> to vector<128x128xbf16>
    %cst_78 = arith.constant dense<0.000000e+00> : vector<256x128xf32>
    %55 = tpu.matmul %52, %54, %cst_78 {dimension_numbers = #tpu.dot_dimension_numbers<[1], [0], [0], [1], [0, 0, 1, 1], [], []>} : vector<256x128xbf16>, vector<128x128xbf16>, vector<256x128xf32> -> vector<256x128xf32>
    %c0_79 = arith.constant 0 : index
    %c0_80 = arith.constant 0 : index
    %56 = vector.load %arg11[%c0_79, %c0_80] : memref<256x128xf32, #tpu.memory_space<vmem>>, vector<256x128xf32>
    %57 = arith.addf %56, %55 : vector<256x128xf32>
    %c0_81 = arith.constant 0 : index
    %c0_82 = arith.constant 0 : index
    %58 = vector.load %arg11[%c0_81, %c0_82] : memref<256x128xf32, #tpu.memory_space<vmem>>, vector<256x128xf32>
    tpu.vector_store %arg11[%c0_81, %c0_82], %57 {strides = array<i32>} : memref<256x128xf32, #tpu.memory_space<vmem>>, vector<256x128xf32>,
    %c0_83 = arith.constant 0 : index
    %c2_84 = arith.constant 2 : index
    %c1_85 = arith.constant 1 : index
    %c0_86 = arith.constant 0 : index
    %59 = vector.load %arg9[%c0_83, %c2_84, %c1_85, %c0_86] : memref<1x18x18x128xbf16, #tpu.memory_space<vmem>>, vector<1x16x16x128xbf16>
    %60 = vector.shape_cast %59 : vector<1x16x16x128xbf16> to vector<256x128xbf16>
    %c7 = arith.constant 7 : index
    %c0_87 = arith.constant 0 : index
    %c0_88 = arith.constant 0 : index
    %61 = vector.load %arg2[%c7, %c0_87, %c0_88] : memref<9x128x128xbf16, #tpu.memory_space<vmem>>, vector<1x128x128xbf16>
    %62 = vector.shape_cast %61 : vector<1x128x128xbf16> to vector<128x128xbf16>
    %cst_89 = arith.constant dense<0.000000e+00> : vector<256x128xf32>
    %63 = tpu.matmul %60, %62, %cst_89 {dimension_numbers = #tpu.dot_dimension_numbers<[1], [0], [0], [1], [0, 0, 1, 1], [], []>} : vector<256x128xbf16>, vector<128x128xbf16>, vector<256x128xf32> -> vector<256x128xf32>
    %c0_90 = arith.constant 0 : index
    %c0_91 = arith.constant 0 : index
    %64 = vector.load %arg11[%c0_90, %c0_91] : memref<256x128xf32, #tpu.memory_space<vmem>>, vector<256x128xf32>
    %65 = arith.addf %64, %63 : vector<256x128xf32>
    %c0_92 = arith.constant 0 : index
    %c0_93 = arith.constant 0 : index
    %66 = vector.load %arg11[%c0_92, %c0_93] : memref<256x128xf32, #tpu.memory_space<vmem>>, vector<256x128xf32>
    tpu.vector_store %arg11[%c0_92, %c0_93], %65 {strides = array<i32>} : memref<256x128xf32, #tpu.memory_space<vmem>>, vector<256x128xf32>,
    %c0_94 = arith.constant 0 : index
    %c2_95 = arith.constant 2 : index
    %c2_96 = arith.constant 2 : index
    %c0_97 = arith.constant 0 : index
    %67 = vector.load %arg9[%c0_94, %c2_95, %c2_96, %c0_97] : memref<1x18x18x128xbf16, #tpu.memory_space<vmem>>, vector<1x16x16x128xbf16>
    %68 = vector.shape_cast %67 : vector<1x16x16x128xbf16> to vector<256x128xbf16>
    %c8 = arith.constant 8 : index
    %c0_98 = arith.constant 0 : index
    %c0_99 = arith.constant 0 : index
    %69 = vector.load %arg2[%c8, %c0_98, %c0_99] : memref<9x128x128xbf16, #tpu.memory_space<vmem>>, vector<1x128x128xbf16>
    %70 = vector.shape_cast %69 : vector<1x128x128xbf16> to vector<128x128xbf16>
    %cst_100 = arith.constant dense<0.000000e+00> : vector<256x128xf32>
    %71 = tpu.matmul %68, %70, %cst_100 {dimension_numbers = #tpu.dot_dimension_numbers<[1], [0], [0], [1], [0, 0, 1, 1], [], []>} : vector<256x128xbf16>, vector<128x128xbf16>, vector<256x128xf32> -> vector<256x128xf32>
    %c0_101 = arith.constant 0 : index
    %c0_102 = arith.constant 0 : index
    %72 = vector.load %arg11[%c0_101, %c0_102] : memref<256x128xf32, #tpu.memory_space<vmem>>, vector<256x128xf32>
    %73 = arith.addf %72, %71 : vector<256x128xf32>
    %c0_103 = arith.constant 0 : index
    %c0_104 = arith.constant 0 : index
    %74 = vector.load %arg11[%c0_103, %c0_104] : memref<256x128xf32, #tpu.memory_space<vmem>>, vector<256x128xf32>
    tpu.vector_store %arg11[%c0_103, %c0_104], %73 {strides = array<i32>} : memref<256x128xf32, #tpu.memory_space<vmem>>, vector<256x128xf32>,
    %c0_105 = arith.constant 0 : index
    %c0_106 = arith.constant 0 : index
    %75 = vector.load %arg11[%c0_105, %c0_106] : memref<256x128xf32, #tpu.memory_space<vmem>>, vector<256x128xf32>
    %c0_107 = arith.constant 0 : index
    %c0_108 = arith.constant 0 : index
    %76 = vector.load %arg3[%c0_107, %c0_108] : memref<1x128xf32, #tpu.memory_space<vmem>>, vector<1x128xf32>
    %77 = vector.broadcast %76 : vector<1x128xf32> to vector<256x128xf32>
    %78 = arith.addf %75, %77 : vector<256x128xf32>
    %cst_109 = arith.constant 0.000000e+00 : bf16
    %79 = vector.broadcast %cst_109 : bf16 to vector<1x1x18x128xbf16>
    %cst_110 = arith.constant 0.000000e+00 : bf16
    %80 = vector.broadcast %cst_110 : bf16 to vector<1x18x1x128xbf16>
    %c0_111 = arith.constant 0 : index
    %c0_112 = arith.constant 0 : index
    %c0_113 = arith.constant 0 : index
    %c0_114 = arith.constant 0 : index
    %81 = vector.load %arg10[%c0_111, %c0_112, %c0_113, %c0_114] : memref<1x18x18x128xbf16, #tpu.memory_space<vmem>>, vector<1x1x18x128xbf16>
    tpu.vector_store %arg10[%c0_111, %c0_112, %c0_113, %c0_114], %79 {strides = array<i32>} : memref<1x18x18x128xbf16, #tpu.memory_space<vmem>>, vector<1x1x18x128xbf16>,
    %c0_115 = arith.constant 0 : index
    %c17 = arith.constant 17 : index
    %c0_116 = arith.constant 0 : index
    %c0_117 = arith.constant 0 : index
    %82 = vector.load %arg10[%c0_115, %c17, %c0_116, %c0_117] : memref<1x18x18x128xbf16, #tpu.memory_space<vmem>>, vector<1x1x18x128xbf16>
    tpu.vector_store %arg10[%c0_115, %c17, %c0_116, %c0_117], %79 {strides = array<i32>} : memref<1x18x18x128xbf16, #tpu.memory_space<vmem>>, vector<1x1x18x128xbf16>,
    %c0_118 = arith.constant 0 : index
    %c0_119 = arith.constant 0 : index
    %c0_120 = arith.constant 0 : index
    %c0_121 = arith.constant 0 : index
    %83 = vector.load %arg10[%c0_118, %c0_119, %c0_120, %c0_121] : memref<1x18x18x128xbf16, #tpu.memory_space<vmem>>, vector<1x18x1x128xbf16>
    tpu.vector_store %arg10[%c0_118, %c0_119, %c0_120, %c0_121], %80 {strides = array<i32>} : memref<1x18x18x128xbf16, #tpu.memory_space<vmem>>, vector<1x18x1x128xbf16>,
    %c0_122 = arith.constant 0 : index
    %c0_123 = arith.constant 0 : index
    %c17_124 = arith.constant 17 : index
    %c0_125 = arith.constant 0 : index
    %84 = vector.load %arg10[%c0_122, %c0_123, %c17_124, %c0_125] : memref<1x18x18x128xbf16, #tpu.memory_space<vmem>>, vector<1x18x1x128xbf16>
    tpu.vector_store %arg10[%c0_122, %c0_123, %c17_124, %c0_125], %80 {strides = array<i32>} : memref<1x18x18x128xbf16, #tpu.memory_space<vmem>>, vector<1x18x1x128xbf16>,
    %cst_126 = arith.constant 0.000000e+00 : f32
    %85 = vector.broadcast %cst_126 : f32 to vector<256x128xf32>
    %86 = arith.maximumf %78, %85 : vector<256x128xf32>
    %87 = arith.truncf %86 : vector<256x128xf32> to vector<256x128xbf16>
    %88 = vector.shape_cast %87 : vector<256x128xbf16> to vector<1x16x16x128xbf16>
    %c0_127 = arith.constant 0 : index
    %c1_128 = arith.constant 1 : index
    %c1_129 = arith.constant 1 : index
    %c0_130 = arith.constant 0 : index
    %89 = vector.load %arg10[%c0_127, %c1_128, %c1_129, %c0_130] : memref<1x18x18x128xbf16, #tpu.memory_space<vmem>>, vector<1x16x16x128xbf16>
    tpu.vector_store %arg10[%c0_127, %c1_128, %c1_129, %c0_130], %88 {strides = array<i32>} : memref<1x18x18x128xbf16, #tpu.memory_space<vmem>>, vector<1x16x16x128xbf16>,
    %c0_131 = arith.constant 0 : index
    %c0_132 = arith.constant 0 : index
    %c0_133 = arith.constant 0 : index
    %c0_134 = arith.constant 0 : index
    %90 = vector.load %arg10[%c0_131, %c0_132, %c0_133, %c0_134] : memref<1x18x18x128xbf16, #tpu.memory_space<vmem>>, vector<1x16x16x128xbf16>
    %91 = vector.shape_cast %90 : vector<1x16x16x128xbf16> to vector<256x128xbf16>
    %c0_135 = arith.constant 0 : index
    %c0_136 = arith.constant 0 : index
    %c0_137 = arith.constant 0 : index
    %92 = vector.load %arg4[%c0_135, %c0_136, %c0_137] : memref<9x128x128xbf16, #tpu.memory_space<vmem>>, vector<1x128x128xbf16>
    %93 = vector.shape_cast %92 : vector<1x128x128xbf16> to vector<128x128xbf16>
    %cst_138 = arith.constant dense<0.000000e+00> : vector<256x128xf32>
    %94 = tpu.matmul %91, %93, %cst_138 {dimension_numbers = #tpu.dot_dimension_numbers<[1], [0], [0], [1], [0, 0, 1, 1], [], []>} : vector<256x128xbf16>, vector<128x128xbf16>, vector<256x128xf32> -> vector<256x128xf32>
    %c0_139 = arith.constant 0 : index
    %c0_140 = arith.constant 0 : index
    %95 = vector.load %arg11[%c0_139, %c0_140] : memref<256x128xf32, #tpu.memory_space<vmem>>, vector<256x128xf32>
    tpu.vector_store %arg11[%c0_139, %c0_140], %94 {strides = array<i32>} : memref<256x128xf32, #tpu.memory_space<vmem>>, vector<256x128xf32>,
    %c0_141 = arith.constant 0 : index
    %c0_142 = arith.constant 0 : index
    %c1_143 = arith.constant 1 : index
    %c0_144 = arith.constant 0 : index
    %96 = vector.load %arg10[%c0_141, %c0_142, %c1_143, %c0_144] : memref<1x18x18x128xbf16, #tpu.memory_space<vmem>>, vector<1x16x16x128xbf16>
    %97 = vector.shape_cast %96 : vector<1x16x16x128xbf16> to vector<256x128xbf16>
    %c1_145 = arith.constant 1 : index
    %c0_146 = arith.constant 0 : index
    %c0_147 = arith.constant 0 : index
    %98 = vector.load %arg4[%c1_145, %c0_146, %c0_147] : memref<9x128x128xbf16, #tpu.memory_space<vmem>>, vector<1x128x128xbf16>
    %99 = vector.shape_cast %98 : vector<1x128x128xbf16> to vector<128x128xbf16>
    %cst_148 = arith.constant dense<0.000000e+00> : vector<256x128xf32>
    %100 = tpu.matmul %97, %99, %cst_148 {dimension_numbers = #tpu.dot_dimension_numbers<[1], [0], [0], [1], [0, 0, 1, 1], [], []>} : vector<256x128xbf16>, vector<128x128xbf16>, vector<256x128xf32> -> vector<256x128xf32>
    %c0_149 = arith.constant 0 : index
    %c0_150 = arith.constant 0 : index
    %101 = vector.load %arg11[%c0_149, %c0_150] : memref<256x128xf32, #tpu.memory_space<vmem>>, vector<256x128xf32>
    %102 = arith.addf %101, %100 : vector<256x128xf32>
    %c0_151 = arith.constant 0 : index
    %c0_152 = arith.constant 0 : index
    %103 = vector.load %arg11[%c0_151, %c0_152] : memref<256x128xf32, #tpu.memory_space<vmem>>, vector<256x128xf32>
    tpu.vector_store %arg11[%c0_151, %c0_152], %102 {strides = array<i32>} : memref<256x128xf32, #tpu.memory_space<vmem>>, vector<256x128xf32>,
    %c0_153 = arith.constant 0 : index
    %c0_154 = arith.constant 0 : index
    %c2_155 = arith.constant 2 : index
    %c0_156 = arith.constant 0 : index
    %104 = vector.load %arg10[%c0_153, %c0_154, %c2_155, %c0_156] : memref<1x18x18x128xbf16, #tpu.memory_space<vmem>>, vector<1x16x16x128xbf16>
    %105 = vector.shape_cast %104 : vector<1x16x16x128xbf16> to vector<256x128xbf16>
    %c2_157 = arith.constant 2 : index
    %c0_158 = arith.constant 0 : index
    %c0_159 = arith.constant 0 : index
    %106 = vector.load %arg4[%c2_157, %c0_158, %c0_159] : memref<9x128x128xbf16, #tpu.memory_space<vmem>>, vector<1x128x128xbf16>
    %107 = vector.shape_cast %106 : vector<1x128x128xbf16> to vector<128x128xbf16>
    %cst_160 = arith.constant dense<0.000000e+00> : vector<256x128xf32>
    %108 = tpu.matmul %105, %107, %cst_160 {dimension_numbers = #tpu.dot_dimension_numbers<[1], [0], [0], [1], [0, 0, 1, 1], [], []>} : vector<256x128xbf16>, vector<128x128xbf16>, vector<256x128xf32> -> vector<256x128xf32>
    %c0_161 = arith.constant 0 : index
    %c0_162 = arith.constant 0 : index
    %109 = vector.load %arg11[%c0_161, %c0_162] : memref<256x128xf32, #tpu.memory_space<vmem>>, vector<256x128xf32>
    %110 = arith.addf %109, %108 : vector<256x128xf32>
    %c0_163 = arith.constant 0 : index
    %c0_164 = arith.constant 0 : index
    %111 = vector.load %arg11[%c0_163, %c0_164] : memref<256x128xf32, #tpu.memory_space<vmem>>, vector<256x128xf32>
    tpu.vector_store %arg11[%c0_163, %c0_164], %110 {strides = array<i32>} : memref<256x128xf32, #tpu.memory_space<vmem>>, vector<256x128xf32>,
    %c0_165 = arith.constant 0 : index
    %c1_166 = arith.constant 1 : index
    %c0_167 = arith.constant 0 : index
    %c0_168 = arith.constant 0 : index
    %112 = vector.load %arg10[%c0_165, %c1_166, %c0_167, %c0_168] : memref<1x18x18x128xbf16, #tpu.memory_space<vmem>>, vector<1x16x16x128xbf16>
    %113 = vector.shape_cast %112 : vector<1x16x16x128xbf16> to vector<256x128xbf16>
    %c3_169 = arith.constant 3 : index
    %c0_170 = arith.constant 0 : index
    %c0_171 = arith.constant 0 : index
    %114 = vector.load %arg4[%c3_169, %c0_170, %c0_171] : memref<9x128x128xbf16, #tpu.memory_space<vmem>>, vector<1x128x128xbf16>
    %115 = vector.shape_cast %114 : vector<1x128x128xbf16> to vector<128x128xbf16>
    %cst_172 = arith.constant dense<0.000000e+00> : vector<256x128xf32>
    %116 = tpu.matmul %113, %115, %cst_172 {dimension_numbers = #tpu.dot_dimension_numbers<[1], [0], [0], [1], [0, 0, 1, 1], [], []>} : vector<256x128xbf16>, vector<128x128xbf16>, vector<256x128xf32> -> vector<256x128xf32>
    %c0_173 = arith.constant 0 : index
    %c0_174 = arith.constant 0 : index
    %117 = vector.load %arg11[%c0_173, %c0_174] : memref<256x128xf32, #tpu.memory_space<vmem>>, vector<256x128xf32>
    %118 = arith.addf %117, %116 : vector<256x128xf32>
    %c0_175 = arith.constant 0 : index
    %c0_176 = arith.constant 0 : index
    %119 = vector.load %arg11[%c0_175, %c0_176] : memref<256x128xf32, #tpu.memory_space<vmem>>, vector<256x128xf32>
    tpu.vector_store %arg11[%c0_175, %c0_176], %118 {strides = array<i32>} : memref<256x128xf32, #tpu.memory_space<vmem>>, vector<256x128xf32>,
    %c0_177 = arith.constant 0 : index
    %c1_178 = arith.constant 1 : index
    %c1_179 = arith.constant 1 : index
    %c0_180 = arith.constant 0 : index
    %120 = vector.load %arg10[%c0_177, %c1_178, %c1_179, %c0_180] : memref<1x18x18x128xbf16, #tpu.memory_space<vmem>>, vector<1x16x16x128xbf16>
    %121 = vector.shape_cast %120 : vector<1x16x16x128xbf16> to vector<256x128xbf16>
    %c4_181 = arith.constant 4 : index
    %c0_182 = arith.constant 0 : index
    %c0_183 = arith.constant 0 : index
    %122 = vector.load %arg4[%c4_181, %c0_182, %c0_183] : memref<9x128x128xbf16, #tpu.memory_space<vmem>>, vector<1x128x128xbf16>
    %123 = vector.shape_cast %122 : vector<1x128x128xbf16> to vector<128x128xbf16>
    %cst_184 = arith.constant dense<0.000000e+00> : vector<256x128xf32>
    %124 = tpu.matmul %121, %123, %cst_184 {dimension_numbers = #tpu.dot_dimension_numbers<[1], [0], [0], [1], [0, 0, 1, 1], [], []>} : vector<256x128xbf16>, vector<128x128xbf16>, vector<256x128xf32> -> vector<256x128xf32>
    %c0_185 = arith.constant 0 : index
    %c0_186 = arith.constant 0 : index
    %125 = vector.load %arg11[%c0_185, %c0_186] : memref<256x128xf32, #tpu.memory_space<vmem>>, vector<256x128xf32>
    %126 = arith.addf %125, %124 : vector<256x128xf32>
    %c0_187 = arith.constant 0 : index
    %c0_188 = arith.constant 0 : index
    %127 = vector.load %arg11[%c0_187, %c0_188] : memref<256x128xf32, #tpu.memory_space<vmem>>, vector<256x128xf32>
    tpu.vector_store %arg11[%c0_187, %c0_188], %126 {strides = array<i32>} : memref<256x128xf32, #tpu.memory_space<vmem>>, vector<256x128xf32>,
    %c0_189 = arith.constant 0 : index
    %c1_190 = arith.constant 1 : index
    %c2_191 = arith.constant 2 : index
    %c0_192 = arith.constant 0 : index
    %128 = vector.load %arg10[%c0_189, %c1_190, %c2_191, %c0_192] : memref<1x18x18x128xbf16, #tpu.memory_space<vmem>>, vector<1x16x16x128xbf16>
    %129 = vector.shape_cast %128 : vector<1x16x16x128xbf16> to vector<256x128xbf16>
    %c5_193 = arith.constant 5 : index
    %c0_194 = arith.constant 0 : index
    %c0_195 = arith.constant 0 : index
    %130 = vector.load %arg4[%c5_193, %c0_194, %c0_195] : memref<9x128x128xbf16, #tpu.memory_space<vmem>>, vector<1x128x128xbf16>
    %131 = vector.shape_cast %130 : vector<1x128x128xbf16> to vector<128x128xbf16>
    %cst_196 = arith.constant dense<0.000000e+00> : vector<256x128xf32>
    %132 = tpu.matmul %129, %131, %cst_196 {dimension_numbers = #tpu.dot_dimension_numbers<[1], [0], [0], [1], [0, 0, 1, 1], [], []>} : vector<256x128xbf16>, vector<128x128xbf16>, vector<256x128xf32> -> vector<256x128xf32>
    %c0_197 = arith.constant 0 : index
    %c0_198 = arith.constant 0 : index
    %133 = vector.load %arg11[%c0_197, %c0_198] : memref<256x128xf32, #tpu.memory_space<vmem>>, vector<256x128xf32>
    %134 = arith.addf %133, %132 : vector<256x128xf32>
    %c0_199 = arith.constant 0 : index
    %c0_200 = arith.constant 0 : index
    %135 = vector.load %arg11[%c0_199, %c0_200] : memref<256x128xf32, #tpu.memory_space<vmem>>, vector<256x128xf32>
    tpu.vector_store %arg11[%c0_199, %c0_200], %134 {strides = array<i32>} : memref<256x128xf32, #tpu.memory_space<vmem>>, vector<256x128xf32>,
    %c0_201 = arith.constant 0 : index
    %c2_202 = arith.constant 2 : index
    %c0_203 = arith.constant 0 : index
    %c0_204 = arith.constant 0 : index
    %136 = vector.load %arg10[%c0_201, %c2_202, %c0_203, %c0_204] : memref<1x18x18x128xbf16, #tpu.memory_space<vmem>>, vector<1x16x16x128xbf16>
    %137 = vector.shape_cast %136 : vector<1x16x16x128xbf16> to vector<256x128xbf16>
    %c6_205 = arith.constant 6 : index
    %c0_206 = arith.constant 0 : index
    %c0_207 = arith.constant 0 : index
    %138 = vector.load %arg4[%c6_205, %c0_206, %c0_207] : memref<9x128x128xbf16, #tpu.memory_space<vmem>>, vector<1x128x128xbf16>
    %139 = vector.shape_cast %138 : vector<1x128x128xbf16> to vector<128x128xbf16>
    %cst_208 = arith.constant dense<0.000000e+00> : vector<256x128xf32>
    %140 = tpu.matmul %137, %139, %cst_208 {dimension_numbers = #tpu.dot_dimension_numbers<[1], [0], [0], [1], [0, 0, 1, 1], [], []>} : vector<256x128xbf16>, vector<128x128xbf16>, vector<256x128xf32> -> vector<256x128xf32>
    %c0_209 = arith.constant 0 : index
    %c0_210 = arith.constant 0 : index
    %141 = vector.load %arg11[%c0_209, %c0_210] : memref<256x128xf32, #tpu.memory_space<vmem>>, vector<256x128xf32>
    %142 = arith.addf %141, %140 : vector<256x128xf32>
    %c0_211 = arith.constant 0 : index
    %c0_212 = arith.constant 0 : index
    %143 = vector.load %arg11[%c0_211, %c0_212] : memref<256x128xf32, #tpu.memory_space<vmem>>, vector<256x128xf32>
    tpu.vector_store %arg11[%c0_211, %c0_212], %142 {strides = array<i32>} : memref<256x128xf32, #tpu.memory_space<vmem>>, vector<256x128xf32>,
    %c0_213 = arith.constant 0 : index
    %c2_214 = arith.constant 2 : index
    %c1_215 = arith.constant 1 : index
    %c0_216 = arith.constant 0 : index
    %144 = vector.load %arg10[%c0_213, %c2_214, %c1_215, %c0_216] : memref<1x18x18x128xbf16, #tpu.memory_space<vmem>>, vector<1x16x16x128xbf16>
    %145 = vector.shape_cast %144 : vector<1x16x16x128xbf16> to vector<256x128xbf16>
    %c7_217 = arith.constant 7 : index
    %c0_218 = arith.constant 0 : index
    %c0_219 = arith.constant 0 : index
    %146 = vector.load %arg4[%c7_217, %c0_218, %c0_219] : memref<9x128x128xbf16, #tpu.memory_space<vmem>>, vector<1x128x128xbf16>
    %147 = vector.shape_cast %146 : vector<1x128x128xbf16> to vector<128x128xbf16>
    %cst_220 = arith.constant dense<0.000000e+00> : vector<256x128xf32>
    %148 = tpu.matmul %145, %147, %cst_220 {dimension_numbers = #tpu.dot_dimension_numbers<[1], [0], [0], [1], [0, 0, 1, 1], [], []>} : vector<256x128xbf16>, vector<128x128xbf16>, vector<256x128xf32> -> vector<256x128xf32>
    %c0_221 = arith.constant 0 : index
    %c0_222 = arith.constant 0 : index
    %149 = vector.load %arg11[%c0_221, %c0_222] : memref<256x128xf32, #tpu.memory_space<vmem>>, vector<256x128xf32>
    %150 = arith.addf %149, %148 : vector<256x128xf32>
    %c0_223 = arith.constant 0 : index
    %c0_224 = arith.constant 0 : index
    %151 = vector.load %arg11[%c0_223, %c0_224] : memref<256x128xf32, #tpu.memory_space<vmem>>, vector<256x128xf32>
    tpu.vector_store %arg11[%c0_223, %c0_224], %150 {strides = array<i32>} : memref<256x128xf32, #tpu.memory_space<vmem>>, vector<256x128xf32>,
    %c0_225 = arith.constant 0 : index
    %c2_226 = arith.constant 2 : index
    %c2_227 = arith.constant 2 : index
    %c0_228 = arith.constant 0 : index
    %152 = vector.load %arg10[%c0_225, %c2_226, %c2_227, %c0_228] : memref<1x18x18x128xbf16, #tpu.memory_space<vmem>>, vector<1x16x16x128xbf16>
    %153 = vector.shape_cast %152 : vector<1x16x16x128xbf16> to vector<256x128xbf16>
    %c8_229 = arith.constant 8 : index
    %c0_230 = arith.constant 0 : index
    %c0_231 = arith.constant 0 : index
    %154 = vector.load %arg4[%c8_229, %c0_230, %c0_231] : memref<9x128x128xbf16, #tpu.memory_space<vmem>>, vector<1x128x128xbf16>
    %155 = vector.shape_cast %154 : vector<1x128x128xbf16> to vector<128x128xbf16>
    %cst_232 = arith.constant dense<0.000000e+00> : vector<256x128xf32>
    %156 = tpu.matmul %153, %155, %cst_232 {dimension_numbers = #tpu.dot_dimension_numbers<[1], [0], [0], [1], [0, 0, 1, 1], [], []>} : vector<256x128xbf16>, vector<128x128xbf16>, vector<256x128xf32> -> vector<256x128xf32>
    %c0_233 = arith.constant 0 : index
    %c0_234 = arith.constant 0 : index
    %157 = vector.load %arg11[%c0_233, %c0_234] : memref<256x128xf32, #tpu.memory_space<vmem>>, vector<256x128xf32>
    %158 = arith.addf %157, %156 : vector<256x128xf32>
    %c0_235 = arith.constant 0 : index
    %c0_236 = arith.constant 0 : index
    %159 = vector.load %arg11[%c0_235, %c0_236] : memref<256x128xf32, #tpu.memory_space<vmem>>, vector<256x128xf32>
    tpu.vector_store %arg11[%c0_235, %c0_236], %158 {strides = array<i32>} : memref<256x128xf32, #tpu.memory_space<vmem>>, vector<256x128xf32>,
    %c0_237 = arith.constant 0 : index
    %c0_238 = arith.constant 0 : index
    %160 = vector.load %arg11[%c0_237, %c0_238] : memref<256x128xf32, #tpu.memory_space<vmem>>, vector<256x128xf32>
    %c0_239 = arith.constant 0 : index
    %c0_240 = arith.constant 0 : index
    %161 = vector.load %arg5[%c0_239, %c0_240] : memref<1x128xf32, #tpu.memory_space<vmem>>, vector<1x128xf32>
    %162 = vector.broadcast %161 : vector<1x128xf32> to vector<256x128xf32>
    %163 = arith.addf %160, %162 : vector<256x128xf32>
    %164 = vector.shape_cast %163 : vector<256x128xf32> to vector<1x16x16x128xf32>
    %165 = vector.shape_cast %164 : vector<1x16x16x128xf32> to vector<1x8x2x16x128xf32>
    %cst_241 = arith.constant dense<0.000000e+00> : vector<1x8x16x128xf32>
    %166 = vector.multi_reduction <add>, %165, %cst_241 [2] : vector<1x8x2x16x128xf32> to vector<1x8x16x128xf32>
    %c0_242 = arith.constant 0 : index
    %c0_243 = arith.constant 0 : index
    %c0_244 = arith.constant 0 : index
    %c0_245 = arith.constant 0 : index
    %167 = vector.load %arg12[%c0_242, %c0_243, %c0_244, %c0_245] : memref<1x8x16x128xf32, #tpu.memory_space<vmem>>, vector<1x8x16x128xf32>
    tpu.vector_store %arg12[%c0_242, %c0_243, %c0_244, %c0_245], %166 {strides = array<i32>} : memref<1x8x16x128xf32, #tpu.memory_space<vmem>>, vector<1x8x16x128xf32>,
    %c0_246 = arith.constant 0 : index
    %c0_247 = arith.constant 0 : index
    %c0_248 = arith.constant 0 : index
    %c0_249 = arith.constant 0 : index
    %168 = tpu.strided_load %arg12[%c0_246, %c0_247, %c0_248, %c0_249] {strides = array<i32: 1, 1, 2, 1>} : memref<1x8x16x128xf32, #tpu.memory_space<vmem>>, vector<1x8x8x128xf32>
    %c0_250 = arith.constant 0 : index
    %c0_251 = arith.constant 0 : index
    %c1_252 = arith.constant 1 : index
    %c0_253 = arith.constant 0 : index
    %169 = tpu.strided_load %arg12[%c0_250, %c0_251, %c1_252, %c0_253] {strides = array<i32: 1, 1, 2, 1>} : memref<1x8x16x128xf32, #tpu.memory_space<vmem>>, vector<1x8x8x128xf32>
    %170 = arith.addf %168, %169 : vector<1x8x8x128xf32>
    %c0_254 = arith.constant 0 : index
    %c1_255 = arith.constant 1 : index
    %c1_256 = arith.constant 1 : index
    %c0_257 = arith.constant 0 : index
    %171 = vector.load %arg1[%c0_254, %c1_255, %c1_256, %c0_257] : memref<1x18x18x128xf32, #tpu.memory_space<vmem>>, vector<1x16x16x128xf32>
    %172 = vector.shape_cast %171 : vector<1x16x16x128xf32> to vector<1x8x2x16x128xf32>
    %cst_258 = arith.constant dense<0.000000e+00> : vector<1x8x16x128xf32>
    %173 = vector.multi_reduction <add>, %172, %cst_258 [2] : vector<1x8x2x16x128xf32> to vector<1x8x16x128xf32>
    %c0_259 = arith.constant 0 : index
    %c0_260 = arith.constant 0 : index
    %c0_261 = arith.constant 0 : index
    %c0_262 = arith.constant 0 : index
    %174 = vector.load %arg13[%c0_259, %c0_260, %c0_261, %c0_262] : memref<1x8x16x128xf32, #tpu.memory_space<vmem>>, vector<1x8x16x128xf32>
    tpu.vector_store %arg13[%c0_259, %c0_260, %c0_261, %c0_262], %173 {strides = array<i32>} : memref<1x8x16x128xf32, #tpu.memory_space<vmem>>, vector<1x8x16x128xf32>,
    %c0_263 = arith.constant 0 : index
    %c0_264 = arith.constant 0 : index
    %c0_265 = arith.constant 0 : index
    %c0_266 = arith.constant 0 : index
    %175 = tpu.strided_load %arg13[%c0_263, %c0_264, %c0_265, %c0_266] {strides = array<i32: 1, 1, 2, 1>} : memref<1x8x16x128xf32, #tpu.memory_space<vmem>>, vector<1x8x8x128xf32>
    %c0_267 = arith.constant 0 : index
    %c0_268 = arith.constant 0 : index
    %c1_269 = arith.constant 1 : index
    %c0_270 = arith.constant 0 : index
    %176 = tpu.strided_load %arg13[%c0_267, %c0_268, %c1_269, %c0_270] {strides = array<i32: 1, 1, 2, 1>} : memref<1x8x16x128xf32, #tpu.memory_space<vmem>>, vector<1x8x8x128xf32>
    %177 = arith.addf %175, %176 : vector<1x8x8x128xf32>
    %178 = vector.shape_cast %177 : vector<1x8x8x128xf32> to vector<64x128xf32>
    %179 = arith.truncf %178 : vector<64x128xf32> to vector<64x128xbf16>
    %c0_271 = arith.constant 0 : index
    %c0_272 = arith.constant 0 : index
    %180 = vector.load %arg6[%c0_271, %c0_272] : memref<128x128xbf16, #tpu.memory_space<vmem>>, vector<128x128xbf16>
    %cst_273 = arith.constant dense<0.000000e+00> : vector<64x128xf32>
    %181 = tpu.matmul %179, %180, %cst_273 {dimension_numbers = #tpu.dot_dimension_numbers<[1], [0], [0], [1], [0, 0, 1, 1], [], []>} : vector<64x128xbf16>, vector<128x128xbf16>, vector<64x128xf32> -> vector<64x128xf32>
    %c0_274 = arith.constant 0 : index
    %c0_275 = arith.constant 0 : index
    %182 = vector.load %arg7[%c0_274, %c0_275] : memref<1x128xf32, #tpu.memory_space<vmem>>, vector<1x128xf32>
    %183 = vector.broadcast %182 : vector<1x128xf32> to vector<64x128xf32>
    %184 = arith.addf %181, %183 : vector<64x128xf32>
    %185 = vector.shape_cast %184 : vector<64x128xf32> to vector<1x8x8x128xf32>
    %186 = arith.addf %170, %185 : vector<1x8x8x128xf32>
    %c0_276 = arith.constant 0 : index
    %c0_277 = arith.constant 0 : index
    %c0_278 = arith.constant 0 : index
    %c0_279 = arith.constant 0 : index
    %187 = vector.load %arg8[%c0_276, %c0_277, %c0_278, %c0_279] : memref<1x8x8x128xf32, #tpu.memory_space<vmem>>, vector<1x8x8x128xf32>
    tpu.vector_store %arg8[%c0_276, %c0_277, %c0_278, %c0_279], %186 {strides = array<i32>} : memref<1x8x8x128xf32, #tpu.memory_space<vmem>>, vector<1x8x8x128xf32>,
    return
  }
  func.func @transform_0(%arg0: i32) -> (i32, i32, i32, i32) {
    %c0_i32 = arith.constant 0 : i32
    %c0_i32_0 = arith.constant 0 : i32
    %c0_i32_1 = arith.constant 0 : i32
    %c0_i32_2 = arith.constant 0 : i32
    return %arg0, %c0_i32, %c0_i32_0, %c0_i32_1 : i32, i32, i32, i32
  }
  func.func @transform_1(%arg0: i32) -> (i32, i32, i32) {
    %c0_i32 = arith.constant 0 : i32
    %c0_i32_0 = arith.constant 0 : i32
    %c0_i32_1 = arith.constant 0 : i32
    %c0_i32_2 = arith.constant 0 : i32
    return %c0_i32, %c0_i32_0, %c0_i32_1 : i32, i32, i32
  }
  func.func @transform_2(%arg0: i32) -> (i32, i32) {
    %c0_i32 = arith.constant 0 : i32
    %c0_i32_0 = arith.constant 0 : i32
    %c0_i32_1 = arith.constant 0 : i32
    return %c0_i32, %c0_i32_0 : i32, i32
  }
  func.func @transform_3(%arg0: i32) -> (i32, i32, i32) {
    %c0_i32 = arith.constant 0 : i32
    %c0_i32_0 = arith.constant 0 : i32
    %c0_i32_1 = arith.constant 0 : i32
    %c0_i32_2 = arith.constant 0 : i32
    return %c0_i32, %c0_i32_0, %c0_i32_1 : i32, i32, i32
  }
  func.func @transform_4(%arg0: i32) -> (i32, i32) {
    %c0_i32 = arith.constant 0 : i32
    %c0_i32_0 = arith.constant 0 : i32
    %c0_i32_1 = arith.constant 0 : i32
    return %c0_i32, %c0_i32_0 : i32, i32
  }
  func.func @transform_5(%arg0: i32) -> (i32, i32) {
    %c0_i32 = arith.constant 0 : i32
    %c0_i32_0 = arith.constant 0 : i32
    %c0_i32_1 = arith.constant 0 : i32
    return %c0_i32, %c0_i32_0 : i32, i32
  }
  func.func @transform_6(%arg0: i32) -> (i32, i32) {
    %c0_i32 = arith.constant 0 : i32
    %c0_i32_0 = arith.constant 0 : i32
    %c0_i32_1 = arith.constant 0 : i32
    return %c0_i32, %c0_i32_0 : i32, i32
  }
  func.func @transform_7(%arg0: i32) -> (i32, i32, i32, i32) {
    %c0_i32 = arith.constant 0 : i32
    %c0_i32_0 = arith.constant 0 : i32
    %c0_i32_1 = arith.constant 0 : i32
    %c0_i32_2 = arith.constant 0 : i32
    return %arg0, %c0_i32, %c0_i32_0, %c0_i32_1 : i32, i32, i32, i32
  }
}

</mosaic_0001>

<bundles_post_ra>
// kernel: resblock_forward_pallas.1
= control target key start
LH: loop header
LB: loop body
LE: loop exit
PB: predicated region body
PF: predicated region fallthrough
CT: control target
= control target key end

     0   :  { %s13131_s24 = smov 0   ;;  %s16481_s0 = inlined_call_operand.vmem [shape: f32[2,18,18,128], index: 0, kind: input, shape index: {}]   ;;  %s16482_s1 = inlined_call_operand.vmem [shape: bf16[9,128,128], index: 1, kind: input, shape index: {}]   ;;  %s16483_s2 = inlined_call_operand.vmem [shape: f32[1,128], index: 2, kind: input, shape index: {}]   ;;  %s16484_s3 = inlined_call_operand.vmem [shape: bf16[9,128,128], index: 3, kind: input, shape index: {}]   ;;  %s16485_s4 = inlined_call_operand.vmem [shape: f32[1,128], index: 4, kind: input, shape index: {}]   ;;  %s16486_s5 = inlined_call_operand.vmem [shape: bf16[128,128], index: 5, kind: input, shape index: {}]   ;;  %s16487_s6 = inlined_call_operand.vmem [shape: f32[1,128], index: 6, kind: input, shape index: {}]   ;;  %s16488_s7 = inlined_call_operand.vmem [shape: f32[2,8,8,128], index: 7, kind: output, shape index: {}]  }
   0x1 LB: > { %s11355_s25 = sadd.s32 4294967295, %s13088_s24   ;;  %p11359_p0 = scmp.ge.s32.totalorder %s13088_s24, 1  ;;  %s13088_s24 = sphi %s13131_s24, %s17_s24  }
   0x2   : > { %p237_p1 = scmp.lt.s32.totalorder %s13088_s24, 3 }
   0x4   : > { %p238_p2 = pnand %p11359_p0, %p237_p1 }
   0x6   : > { %241 = sbr.rel (%p238_p2) target bundleno = 1497 (0x5d9), region = 48 }
   0xb   : > { %v12765_v0 = vld [vmem:[%s16482_s1 + $0x38] sm:$0xff]  ;;  %p269_p3 = scmp.lt.s32.totalorder %s11355_s25, 1  ;;  %v12764_v2 = vld [vmem:[%s16482_s1 + $0x30] sm:$0xff]  ;;  %v12763_v4 = vld [vmem:[%s16482_s1 + $0x28] sm:$0xff]  ;;  %vm857_vm0 = vsmask.f32 3328 }
   0xc   : > { %v13145_v1 = vld [vmem:[%s16482_s1 + $0x78] sm:$0xff]  ;;  %688 = vmatpush.bf16.msra.mxu0 %v12765_v0  ;;  %13043 = vmatpush.bf16.msra.mxu3 %v12765_v0  ;;  %v13157_v3 = vld [vmem:[%s16482_s1 + $0x70] sm:$0xff]  ;;  %v13166_v5 = vld [vmem:[%s16482_s1 + $0x68] sm:$0xff]  ;;  %vm858_vm1 = vsmask.f32 7440  ;;  %vm1654_vm3 = vcmask 1042432  }
   0xd   : > { %s16632_s25 = smov (!%p269_p3, %s11355_s25), 1  ;;  %1373 = vmatpush.bf16.msra.mxu1 %v13145_v1  ;;  %13051 = vmatpush.bf16.msra.mxu2 %v13145_v1  ;;  %v12762_v9 = vld [vmem:[%s16482_s1 + $0x20] sm:$0xff]  ;;  %v12761_v39 = vld [vmem:[%s16482_s1 + $0x18] sm:$0xff]  ;;  %v12760_v54 = vld [vmem:[%s16482_s1 + $0x10] sm:$0xff]  ;;  %vm1655_vm4 = vcmask 1046532   ;;  %vm5452_vm6 = vcmask 1040384  }
   0xe   : > { %s13067_s11 = smul.u32 432, %s16632_s25  ;;  %v13186_v15 = vld [vmem:[%s16482_s1 + $0x60] sm:$0xff]  ;;  %v13207_v40 = vld [vmem:[%s16482_s1 + $0x58] sm:$0xff]  ;;  %v13221_v57 = vld [vmem:[%s16482_s1 + $0x50] sm:$0xff]  ;;  %vm5453_vm7 = vsmask.f32 256 }
   0xf   : > { %vm13246_vm2 = vmor %vm857_vm0, %vm858_vm1  ;;  %vm5509_vm9 = vsmask.f32 7938  ;;  %vm5952_vm11 = vcmask 1043456   ;;  %vm5629_vm13 = vsmask.f32 4368  ;;  %s12741_s21 = sshll.u32 %s16632_s25, 6 }
  0x10   : > { %689 = vmatpush.bf16.msra.mxu0 %v12764_v2  ;;  %13044 = vmatpush.bf16.msra.mxu3 %v12764_v2  ;;  %s13171_s18 = scalar_lea.vmem %s16481_s0, %s13067_s11  ;;  %vm13399_vm5 = vmor %vm1654_vm3, %vm1655_vm4  ;;  %s16347_s26 = scalar_lea.vmem %s16488_s7, %s12741_s21 }
  0x11   : > { %1374 = vmatpush.bf16.msra.mxu1 %v13157_v3  ;;  %13053 = vmatpush.bf16.msra.mxu2 %v13157_v3  ;;  %v280_v6 = vld [vmem:[%s13171_s18] sm:$0xff]  ;;  %v281_v7 = vld [vmem:[%s13171_s18 + $0x8] sm:$0xff]  ;;  %v307_v8 = vld [vmem:[%s13171_s18 + $0xd8] sm:$0xff] }
  0x12   : > { %v334_v10 = vmax.f32 %v280_v6, 0.0  ;;  %v335_v11 = vmax.f32 %v281_v7, 0.0  ;;  %v308_v12 = vld [vmem:[%s13171_s18 + $0xe0] sm:$0xff]  ;;  %v361_v13 = vmax.f32 %v307_v8, 0.0  ;;  %v282_v14 = vld [vmem:[%s13171_s18 + $0x10] sm:$0x3]  ;;  %vm14170_vm8 = vmand %vm5452_vm6, %vm5453_vm7 }
  0x13   : > { %v362_v16 = vmax.f32 %v308_v12, 0.0  ;;  %v336_v17 = vmax.f32 %v282_v14, 0.0  ;;  %v309_v18 = vld [vmem:[%s13171_s18 + $0xe8] sm:$0x3]  ;;  %v283_v19 = vld [vmem:[%s13171_s18 + $0x18] sm:$0xff]  ;;  %v284_v20 = vld [vmem:[%s13171_s18 + $0x20] sm:$0xff] }
  0x14   : > { %690 = vmatpush.bf16.msra.mxu0 %v12763_v4  ;;  %13045 = vmatpush.bf16.msra.mxu3 %v12763_v4  ;;  %v12993_v21 = vpack.c.bf16 %v335_v11, %v334_v10  ;;  %v415_v22 = vpack.c.bf16 %v361_v13, %v361_v13  ;;  %v363_v23 = vmax.f32 %v309_v18, 0.0  ;;  %v337_v24 = vmax.f32 %v283_v19, 0.0  ;;  %v310_v25 = vld [vmem:[%s13171_s18 + $0xf0] sm:$0xff]  ;;  %v311_v26 = vld [vmem:[%s13171_s18 + $0xf8] sm:$0xff]  ;;  %v285_v27 = vld [vmem:[%s13171_s18 + $0x28] sm:$0x3] }
  0x15   : > { %1375 = vmatpush.bf16.msra.mxu1 %v13166_v5  ;;  %13055 = vmatpush.bf16.msra.mxu2 %v13166_v5  ;;  %v416_v28 = vpack.c.bf16 %v362_v16, %v362_v16  ;;  %v390_v29 = vpack.c.bf16 %v336_v17, %v336_v17  ;;  %v338_v30 = vmax.f32 %v284_v20, 0.0  ;;  %v364_v31 = vmax.f32 %v310_v25, 0.0  ;;  %v312_v32 = vld [vmem:[%s13171_s18 + $0x100] sm:$0x3]  ;;  %v286_v33 = vld [vmem:[%s13171_s18 + $0x30] sm:$0xff]  ;;  %v287_v34 = vld [vmem:[%s13171_s18 + $0x38] sm:$0xff] }
  0x16   : > { %12994 = vst [vmem:[#allocation2] sm:$0xff] %v12993_v21   ;;  %v417_v35 = vpack.c.bf16 %v363_v23, %v363_v23  ;;  %v365_v36 = vmax.f32 %v311_v26, 0.0  ;;  %v313_v37 = vld [vmem:[%s13171_s18 + $0x108] sm:$0xff]  ;;  %v314_v38 = vld [vmem:[%s13171_s18 + $0x110] sm:$0xff]  ;;  %v391_v41 = vpack.c.bf16 %v337_v24, %v337_v24  ;;  %v339_v43 = vmax.f32 %v285_v27, 0.0  ;;  %vm14197_vm10 = vmand %vm5452_vm6, %vm5509_vm9 }
  0x17   : > { %469 = vst [vmem:[#allocation2 + $0x6c] sm:$0xf] %v415_v22  ;;  %v392_v42 = vpack.c.bf16 %v338_v30, %v338_v30  ;;  %v366_v44 = vmax.f32 %v312_v32, 0.0  ;;  %v340_v45 = vmax.f32 %v286_v33, 0.0  ;;  %v341_v46 = vmax.f32 %v287_v34, 0.0  ;;  %v12759_v7 = vld [vmem:[%s16482_s1 + $0x8] sm:$0xff]  ;;  %vm14283_vm12 = vmand %vm5952_vm11, %vm5509_vm9 }
  0x18   : > { %691 = vmatpush.bf16.msra.mxu0 %v12762_v9  ;;  %13046 = vmatpush.bf16.msra.mxu3 %v12762_v9  ;;  %470 = vst [vmem:[#allocation2 + $0x70] sm:$0xf] %v416_v28  ;;  %v367_v47 = vmax.f32 %v313_v37, 0.0  ;;  %v368_v48 = vmax.f32 %v314_v38, 0.0  ;;  %v13018_v49 = vpack.c.bf16 %v365_v36, %v364_v31  ;;  %v288_v50 = vld [vmem:[%s13171_s18 + $0x40] sm:$0x3]  ;;  %v393_v55 = vpack.c.bf16 %v339_v43, %v339_v43  ;;  %vm14321_vm14 = vmor %vm5453_vm7, %vm5629_vm13 }
  0x19   : > { %1376 = vmatpush.bf16.msra.mxu1 %v13186_v15  ;;  %13057 = vmatpush.bf16.msra.mxu2 %v13186_v15  ;;  %444 = vst [vmem:[#allocation2 + $0x8] sm:$0x1] %v390_v29  ;;  %v315_v51 = vld [vmem:[%s13171_s18 + $0x118] sm:$0x3]  ;;  %v342_v52 = vmax.f32 %v288_v50, 0.0  ;;  %v420_v56 = vpack.c.bf16 %v366_v44, %v366_v44  ;;  %v12998_v60 = vpack.c.bf16 %v341_v46, %v340_v45  ;;  %v13233_v8 = vld [vmem:[%s16482_s1 + $0x48] sm:$0xff] }
  0x1a   : > { %471 = vst [vmem:[#allocation2 + $0x74] sm:$0x1] %v417_v35  ;;  %v369_v53 = vmax.f32 %v315_v51, 0.0  ;;  %v13223_v61 = vpack.c.bf16 %v367_v47, %v367_v47  ;;  %v13225_v62 = vpack.c.bf16 %v368_v48, %v368_v48  ;;  %v12758_v30 = vld [vmem:[%s16482_s1] sm:$0xff]  ;;  %v12813_v51 = vld [vmem:[%s16482_s1 + $0x138] sm:$0xff] }
  0x1b   : > { %445 = vst [vmem:[#allocation2 + $0xc] sm:$0xf] %v391_v41  ;;  %v13235_v12 = vpack.c.bf16 %v342_v52, %v342_v52  ;;  %v13253_v37 = vld [vmem:[%s16482_s1 + $0x40] sm:$0xff] }
  0x1c   : > { %692 = vmatpush.bf16.msra.mxu0 %v12761_v39  ;;  %13047 = vmatpush.bf16.msra.mxu3 %v12761_v39  ;;  %446 = vst [vmem:[#allocation2 + $0x10] sm:$0xf] %v392_v42  ;;  %v13237_v13 = vpack.c.bf16 %v369_v53, %v369_v53 }
  0x1d   : > { %1377 = vmatpush.bf16.msra.mxu1 %v13207_v40  ;;  %13059 = vmatpush.bf16.msra.mxu2 %v13207_v40  ;;  %v809_v58 = vld [vmem:[#allocation2] sm:$0xf]  ;;  %v810_v59 = vld [vmem:[#allocation2 + $0x4] sm:$0xf]  ;;  %13039 = vst [vmem:[#allocation2 + $0x78] sm:$0xff] %v13018_v49  }
  0x1e   : > { %v861_v63 = vshrl.u32 %v809_v58, 16  ;;  %v864_v0 = vshll.u32 %v809_v58, 16  ;;  %v870_v2 = vshll.u32 %v810_v59, 16  ;;  %v874_v4 = vshrl.u32 %v810_v59, 16  ;;  %v836_v6 = vld [vmem:[#allocation2 + $0x6c] sm:$0xf] }
  0x1f   : > { %v837_v9 = vld [vmem:[#allocation2 + $0x70] sm:$0xf]  ;;  %v1077_v10 = vshrl.u32 %v836_v6, 16  ;;  %v1080_v11 = vshll.u32 %v836_v6, 16  ;;  %447 = vst [vmem:[#allocation2 + $0x14] sm:$0x1] %v393_v55 }
  0x20   : > { %693 = vmatpush.bf16.msra.mxu0 %v12760_v54  ;;  %13048 = vmatpush.bf16.msra.mxu3 %v12760_v54  ;;  %v811_v14 = vld [vmem:[#allocation2 + $0x8] sm:$0x1]  ;;  %v863_v16 = vrot.slane %v861_v63, 4  ;;  %v866_v17 = vrot.slane %v864_v0, 5  ;;  %v872_v18 = vrot.slane %v870_v2, 5  ;;  %v876_v19 = vrot.slane %v874_v4, 4 }
  0x21   : > { %1378 = vmatpush.bf16.msra.mxu1 %v13221_v57  ;;  %13061 = vmatpush.bf16.msra.mxu2 %v13221_v57  ;;  %v880_v20 = vshll.u32 %v811_v14, 16  ;;  %v838_v21 = vld [vmem:[#allocation2 + $0x74] sm:$0x1]  ;;  %v1079_v22 = vrot.slane %v1077_v10, 4  ;;  %v1082_v23 = vrot.slane %v1080_v11, 5  ;;  %v1086_v24 = vshll.u32 %v837_v9, 16 }
  0x22   : > { %v867_v25 = vor.u32 %v866_v17, %v863_v16  ;;  %v877_v26 = vor.u32 %v876_v19, %v872_v18  ;;  %v1090_v27 = vshrl.u32 %v837_v9, 16  ;;  %v1096_v28 = vshll.u32 %v838_v21, 16  ;;  %v812_v29 = vld [vmem:[#allocation2 + $0xc] sm:$0xf]  ;;  %13035 = vst [vmem:[#allocation2 + $0x18] sm:$0xff] %v12998_v60   ;;  %v12742_v47 = vld [vmem:[#allocation2] sm:$0xff] }
  0x23   : > { %v882_v32 = vrot.slane %v880_v20, 5  ;;  %v1083_v33 = vor.u32 %v1082_v23, %v1079_v22  ;;  %v1088_v34 = vrot.slane %v1086_v24, 5  ;;  %v813_v35 = vld [vmem:[#allocation2 + $0x10] sm:$0xf]  ;;  %v885_v36 = vshrl.u32 %v812_v29, 16 }
  0x24   : > { %694 = vmatpush.bf16.msra.mxu0 %v12759_v7  ;;  %13049 = vmatpush.bf16.msra.mxu3 %v12759_v7  ;;  %v868_v38 = vrot.slane %v867_v25, 4  ;;  %v878_v39 = vrot.slane %v877_v26, 4  ;;  %v1092_v41 = vrot.slane %v1090_v27, 4  ;;  %v1098_v42 = vrot.slane %v1096_v28, 5  ;;  %474 = vst [vmem:[#allocation2 + $0x80] sm:$0x1] %v420_v56 }
  0x25   : > { %1379 = vmatpush.bf16.msra.mxu1 %v13233_v8  ;;  %13063 = vmatpush.bf16.msra.mxu2 %v13233_v8  ;;  %v1084_v43 = vrot.slane %v1083_v33, 4  ;;  %v887_v44 = vrot.slane %v885_v36, 4  ;;  %v888_v45 = vshll.u32 %v812_v29, 16  ;;  %v894_v46 = vshll.u32 %v813_v35, 16  ;;  %v839_v53 = vld [vmem:[#allocation2 + $0x78] sm:$0xf] }
  0x26   : > { %v873_v48 = vsel %vm13246_vm2, %v868_v38, %v872_v18  ;;  %v883_v49 = vsel %vm13246_vm2, %v878_v39, %v882_v32  ;;  %v1093_v50 = vor.u32 %v1092_v41, %v1088_v34  ;;  %v898_v52 = vshrl.u32 %v813_v35, 16  ;;  %v12751_v54 = vld [vmem:[#allocation2 + $0x6c] sm:$0xff]  ;;  %v840_v60 = vld [vmem:[#allocation2 + $0x7c] sm:$0xf]  ;;  %475 = vst [vmem:[#allocation2 + $0x84] sm:$0xf] %v13223_v61 }
  0x27   : > { %v1261_v55 = vunpack.c.l.b16 %v873_v48  ;;  %v1262_v58 = vunpack.c.l.b16 %v883_v49  ;;  %v1089_v56 = vsel %vm13246_vm2, %v1084_v43, %v1088_v34  ;;  %v890_v59 = vrot.slane %v888_v45, 5  ;;  %476 = vst [vmem:[#allocation2 + $0x88] sm:$0xf] %v13225_v62  ;;  %v814_v7 = vld [vmem:[#allocation2 + $0x14] sm:$0x1] }
  0x28   : > { %695 = vmatpush.bf16.msra.mxu0 %v12758_v30  ;;  %13050 = vmatpush.bf16.msra.mxu3 %v12758_v30  ;;  %v1094_v63 = vrot.slane %v1093_v50, 4  ;;  %v1279_v0 = vunpack.c.l.b16 %v1089_v56  ;;  %v896_v2 = vrot.slane %v894_v46, 5  ;;  %v900_v4 = vrot.slane %v898_v52, 4  ;;  %450 = vst [vmem:[#allocation2 + $0x20] sm:$0x1] %v13235_v12  ;;  %v12812_v17 = vld [vmem:[%s16482_s1 + $0x130] sm:$0xff] }
  0x29   : > { %1380 = vmatpush.bf16.msra.mxu1 %v13253_v37  ;;  %13065 = vmatpush.bf16.msra.mxu2 %v13253_v37  ;;  %v1293_v6 = vpack.c.b16 %v1262_v58, %v1261_v55  ;;  %v891_v9 = vor.u32 %v890_v59, %v887_v44  ;;  %v1101_v10 = vshrl.u32 %v839_v53, 16  ;;  %v1104_v11 = vshll.u32 %v839_v53, 16  ;;  %477 = vst [vmem:[#allocation2 + $0x8c] sm:$0x1] %v13237_v13  ;;  %v816_v29 = vld [vmem:[#allocation2 + $0x1c] sm:$0xf] }
  0x2a   : > { %v1099_v61 = vsel %vm13246_vm2, %v1094_v63, %v1098_v42  ;;  %v901_v14 = vor.u32 %v900_v4, %v896_v2  ;;  %v904_v16 = vshll.u32 %v814_v7, 16  ;;  %v1110_v62 = vshll.u32 %v840_v60, 16  ;;  %v12743_v63 = vld [vmem:[#allocation2 + $0xc] sm:$0xff] }
  0x2b   : > { %696 = vmatmul.bf16.vlgmr.msra.gmra.mxu0 %v12742_v47  ;;  %741 = vmatmul.bf16.vlgmr.msra.gmra.mxu3 %v12751_v54  ;;  %v1280_v18 = vunpack.c.l.b16 %v1099_v61  ;;  %v892_v19 = vrot.slane %v891_v9, 4  ;;  %v1103_v12 = vrot.slane %v1101_v10, 4  ;;  %v1106_v20 = vrot.slane %v1104_v11, 5  ;;  %v841_v23 = vld [vmem:[#allocation2 + $0x80] sm:$0x1]  ;;  %v290_v10 = vld [vmem:[%s13171_s18 + $0x50] sm:$0xff] }
  0x2c   : > { %13052 = vmatpush.bf16.msrb.mxu3 %v13145_v1  ;;  %3023 = vmatpush.bf16.msrb.mxu0 %v12813_v51  ;;  %v815_v1 = vld [vmem:[#allocation2 + $0x18] sm:$0xf]  ;;  %v902_v21 = vrot.slane %v901_v14, 4  ;;  %v906_v22 = vrot.slane %v904_v16, 5  ;;  %v1112_v24 = vrot.slane %v1110_v62, 5  ;;  %v1114_v25 = vshrl.u32 %v840_v60, 16 }
  0x2d   : > { %1381 = vmatmul.bf16.vlgmr.msra.gmra.mxu1 %v1293_v6  ;;  %v1302_v26 = vpack.c.b16 %v1280_v18, %v1279_v0  ;;  %v1107_v27 = vor.u32 %v1106_v20, %v1103_v12  ;;  %v1120_v28 = vshll.u32 %v841_v23, 16  ;;  %v897_v13 = vsel %vm13246_vm2, %v892_v19, %v896_v2  ;;  %v842_v43 = vld [vmem:[#allocation2 + $0x84] sm:$0xf]  ;;  %v289_v60 = vld [vmem:[%s13171_s18 + $0x48] sm:$0xff]  ;;  %v291_v18 = vld [vmem:[%s13171_s18 + $0x58] sm:$0x3] }
  0x2e   : > { %v1116_v30 = vrot.slane %v1114_v25, 4  ;;  %v909_v32 = vshrl.u32 %v815_v1, 16  ;;  %v907_v33 = vsel %vm13246_vm2, %v902_v21, %v906_v22  ;;  %v912_v36 = vshll.u32 %v815_v1, 16  ;;  %v843_v45 = vld [vmem:[#allocation2 + $0x88] sm:$0xf]  ;;  %v316_v62 = vld [vmem:[%s13171_s18 + $0x120] sm:$0xff] }
  0x2f   : > { %1426 = vmatmul.bf16.vlgmr.msra.gmra.mxu2 %v1302_v26  ;;  %v1108_v34 = vrot.slane %v1107_v27, 4  ;;  %v1122_v35 = vrot.slane %v1120_v28, 5  ;;  %v918_v41 = vshll.u32 %v816_v29, 16  ;;  %v922_v42 = vshrl.u32 %v816_v29, 16  ;;  %v817_v50 = vld [vmem:[#allocation2 + $0x20] sm:$0x1] }
  0x30   : > { %13054 = vmatpush.bf16.msrb.mxu3 %v13157_v3  ;;  %3024 = vmatpush.bf16.msrb.mxu0 %v12812_v17  ;;  %v1117_v38 = vor.u32 %v1116_v30, %v1112_v24  ;;  %v911_v39 = vrot.slane %v909_v32, 4  ;;  %v12811_v3 = vld [vmem:[%s16482_s1 + $0x128] sm:$0xff]  ;;  %v914_v44 = vrot.slane %v912_v36, 5  ;;  %v1263_v46 = vunpack.c.l.b16 %v897_v13  ;;  %v318_v23 = vld [vmem:[%s13171_s18 + $0x130] sm:$0x3]  ;;  %v292_v27 = vld [vmem:[%s13171_s18 + $0x60] sm:$0xff] }
  0x31   : > { %v1264_v47 = vunpack.c.l.b16 %v907_v33  ;;  %v1113_v48 = vsel %vm13246_vm2, %v1108_v34, %v1112_v24  ;;  %v13289_v51 = vrot.slane %v918_v41, 5  ;;  %v924_v52 = vrot.slane %v922_v42, 4  ;;  %v844_v6 = vld [vmem:[#allocation2 + $0x8c] sm:$0x1]  ;;  %v319_v33 = vld [vmem:[%s13171_s18 + $0x138] sm:$0xff]  ;;  %v320_v34 = vld [vmem:[%s13171_s18 + $0x140] sm:$0xff] }
  0x32   : > { %v1118_v49 = vrot.slane %v1117_v38, 4  ;;  %v1125_v53 = vshrl.u32 %v842_v43, 16  ;;  %v1128_v54 = vshll.u32 %v842_v43, 16  ;;  %v915_v58 = vor.u32 %v914_v44, %v911_v39  ;;  %v317_v17 = vld [vmem:[%s13171_s18 + $0x128] sm:$0xff] }
  0x33   : > { %v1134_v56 = vshll.u32 %v843_v45, 16  ;;  %v1138_v59 = vshrl.u32 %v843_v45, 16  ;;  %v928_v4 = vshll.u32 %v817_v50, 16  ;;  %v1281_v11 = vunpack.c.l.b16 %v1113_v48  ;;  %v293_v28 = vld [vmem:[%s13171_s18 + $0x68] sm:$0xff]  ;;  %v12781_v45 = vld [vmem:[%s16482_s1 + $0xb8] sm:$0xff] }
  0x34   : > { %13056 = vmatpush.bf16.msrb.mxu3 %v13166_v5  ;;  %3025 = vmatpush.bf16.msrb.mxu0 %v12811_v3  ;;  %v1123_v55 = vsel %vm13246_vm2, %v1118_v49, %v1122_v35  ;;  %v12752_v5 = vld [vmem:[#allocation2 + $0x78] sm:$0xff]  ;;  %v1127_v0 = vrot.slane %v1125_v53, 4  ;;  %v1130_v2 = vrot.slane %v1128_v54, 5  ;;  %v925_v14 = vor.u32 %v924_v52, %v13289_v51  ;;  %v12780_v52 = vld [vmem:[%s16482_s1 + $0xb0] sm:$0xff]  ;;  %v12810_v53 = vld [vmem:[%s16482_s1 + $0x120] sm:$0xff] }
  0x35   : > { %v13294_v7 = vrot.slane %v1134_v56, 5  ;;  %v1140_v9 = vrot.slane %v1138_v59, 4  ;;  %v1282_v61 = vunpack.c.l.b16 %v1123_v55  ;;  %v343_v16 = vmax.f32 %v289_v60, 0.0  ;;  %1898 = vmatpush.bf16.msrb.mxu2 %v12781_v45 }
  0x36   : > { %v1294_v19 = vpack.c.b16 %v1264_v47, %v1263_v46  ;;  %v916_v12 = vrot.slane %v915_v58, 4  ;;  %v1131_v20 = vor.u32 %v1130_v2, %v1127_v0  ;;  %v1144_v1 = vshll.u32 %v844_v6, 16 }
  0x37   : > { %v344_v21 = vmax.f32 %v290_v10, 0.0  ;;  %v397_v22 = vpack.c.bf16 %v343_v16, %v343_v16  ;;  %v370_v24 = vmax.f32 %v316_v62, 0.0  ;;  %v371_v25 = vmax.f32 %v317_v17, 0.0 }
  0x38   : > { %13058 = vmatpush.bf16.msrb.mxu3 %v13186_v15  ;;  %v1141_v15 = vor.u32 %v1140_v9, %v13294_v7  ;;  %v345_v26 = vmax.f32 %v291_v18, 0.0  ;;  %v1303_v29 = vpack.c.b16 %v1282_v61, %v1281_v11  ;;  %v926_v13 = vrot.slane %v925_v14, 4  ;;  %3026 = vmatpush.bf16.msrb.mxu0 %v12810_v53  ;;  %v12779_v9 = vld [vmem:[%s16482_s1 + $0xa8] sm:$0xff] }
  0x39   : > { %v930_v30 = vrot.slane %v928_v4, 5  ;;  %v398_v32 = vpack.c.bf16 %v344_v21, %v344_v21  ;;  %451 = vst [vmem:[#allocation2 + $0x24] sm:$0xf] %v397_v22  ;;  %v921_v35 = vsel %vm13246_vm2, %v916_v12, %v13289_v51  ;;  %v13023_v36 = vpack.c.bf16 %v371_v25, %v370_v24  ;;  %1899 = vmatpush.bf16.msrb.mxu2 %v12780_v52  ;;  %v12753_v12 = vld [vmem:[#allocation2 + $0x84] sm:$0xff] }
  0x3a   : > { %v399_v38 = vpack.c.bf16 %v345_v26, %v345_v26  ;;  %v1146_v39 = vrot.slane %v1144_v1, 5  ;;  %v372_v41 = vmax.f32 %v318_v23, 0.0  ;;  %v346_v42 = vmax.f32 %v292_v27, 0.0  ;;  %v12778_v22 = vld [vmem:[%s16482_s1 + $0xa0] sm:$0xff] }
  0x3b   : > { %701 = vmatmul.bf16.gmra.mxu0 %v12743_v63  ;;  %746 = vmatmul.bf16.gmra.mxu3 %v12752_v5  ;;  %452 = vst [vmem:[#allocation2 + $0x28] sm:$0xf] %v398_v32  ;;  %v347_v43 = vmax.f32 %v293_v28, 0.0  ;;  %v1132_v3 = vrot.slane %v1131_v20, 4  ;;  %v1142_v44 = vrot.slane %v1141_v15, 4  ;;  %v373_v46 = vmax.f32 %v319_v33, 0.0 }
  0x3c   : > { %13060 = vmatpush.bf16.msrb.mxu3 %v13207_v40  ;;  %v294_v40 = vld [vmem:[%s13171_s18 + $0x70] sm:$0x3]  ;;  %13040 = vst [vmem:[#allocation2 + $0x90] sm:$0xff] %v13023_v36   ;;  %v374_v47 = vmax.f32 %v320_v34, 0.0  ;;  %v931_v48 = vsel %vm13246_vm2, %v926_v13, %v930_v30  ;;  %v426_v49 = vpack.c.bf16 %v372_v41, %v372_v41  ;;  %v1265_v58 = vunpack.c.l.b16 %v921_v35 }
  0x3d   : > { %1386 = vmatmul.bf16.gmra.mxu1 %v1294_v19  ;;  %453 = vst [vmem:[#allocation2 + $0x2c] sm:$0x1] %v399_v38  ;;  %v13003_v50 = vpack.c.bf16 %v347_v43, %v346_v42  ;;  %v348_v51 = vmax.f32 %v294_v40, 0.0  ;;  %v427_v54 = vpack.c.bf16 %v373_v46, %v373_v46  ;;  %v1266_v56 = vunpack.c.l.b16 %v931_v48  ;;  %1900 = vmatpush.bf16.msrb.mxu2 %v12779_v9 }
  0x3e   : > { %v428_v55 = vpack.c.bf16 %v374_v47, %v374_v47  ;;  %480 = vst [vmem:[#allocation2 + $0x98] sm:$0x1] %v426_v49  ;;  %v1137_v59 = vsel %vm13246_vm2, %v1132_v3, %v13294_v7  ;;  %v1147_v60 = vsel %vm13246_vm2, %v1142_v44, %v1146_v39  ;;  %v12744_v7 = vld [vmem:[#allocation2 + $0x18] sm:$0xff] }
  0x3f   : > { %1431 = vmatmul.bf16.gmra.mxu2 %v1303_v29  ;;  %13036 = vst [vmem:[#allocation2 + $0x30] sm:$0xff] %v13003_v50   ;;  %v402_v2 = vpack.c.bf16 %v348_v51, %v348_v51  ;;  %v1295_v16 = vpack.c.b16 %v1266_v56, %v1265_v58  ;;  %v1283_v62 = vunpack.c.l.b16 %v1137_v59  ;;  %v12777_v44 = vld [vmem:[%s16482_s1 + $0x98] sm:$0xff]  ;;  %v12776_v50 = vld [vmem:[%s16482_s1 + $0x90] sm:$0xff] }
  0x40   : > { %13062 = vmatpush.bf16.msrb.mxu3 %v13221_v57  ;;  %v321_v57 = vld [vmem:[%s13171_s18 + $0x148] sm:$0x3]  ;;  %v818_v63 = vld [vmem:[#allocation2 + $0x24] sm:$0xf]  ;;  %481 = vst [vmem:[#allocation2 + $0x9c] sm:$0xf] %v427_v54 }
  0x41   : > { %v933_v5 = vshrl.u32 %v818_v63, 16  ;;  %v936_v0 = vshll.u32 %v818_v63, 16  ;;  %v375_v4 = vmax.f32 %v321_v57, 0.0  ;;  %482 = vst [vmem:[#allocation2 + $0xa0] sm:$0xf] %v428_v55  ;;  %1901 = vmatpush.bf16.msrb.mxu2 %v12778_v22  ;;  %v295_v55 = vld [vmem:[%s13171_s18 + $0x78] sm:$0xff] }
  0x42   : > { %v819_v6 = vld [vmem:[#allocation2 + $0x28] sm:$0xf]  ;;  %456 = vst [vmem:[#allocation2 + $0x38] sm:$0x1] %v402_v2  ;;  %v296_v2 = vld [vmem:[%s13171_s18 + $0x80] sm:$0xff] }
  0x43   : > { %v935_v10 = vrot.slane %v933_v5, 4  ;;  %v938_v11 = vrot.slane %v936_v0, 5  ;;  %v942_v61 = vshll.u32 %v819_v6, 16  ;;  %v946_v14 = vshrl.u32 %v819_v6, 16  ;;  %v845_v18 = vld [vmem:[#allocation2 + $0x90] sm:$0xf] }
  0x44   : > { %13064 = vmatpush.bf16.msrb.mxu3 %v13233_v8  ;;  %v1284_v8 = vunpack.c.l.b16 %v1147_v60  ;;  %v820_v17 = vld [vmem:[#allocation2 + $0x2c] sm:$0x1]  ;;  %v846_v19 = vld [vmem:[#allocation2 + $0x94] sm:$0xf]  ;;  %v429_v23 = vpack.c.bf16 %v375_v4, %v375_v4  ;;  %v1149_v24 = vshrl.u32 %v845_v18, 16  ;;  %v1152_v25 = vshll.u32 %v845_v18, 16 }
  0x45   : > { %v939_v20 = vor.u32 %v938_v11, %v935_v10  ;;  %v944_v1 = vrot.slane %v942_v61, 5  ;;  %v948_v21 = vrot.slane %v946_v14, 4  ;;  %v847_v15 = vld [vmem:[#allocation2 + $0x98] sm:$0x1]  ;;  %v1158_v26 = vshll.u32 %v846_v19, 16  ;;  %1902 = vmatpush.bf16.msrb.mxu2 %v12777_v44  ;;  %v12775_v10 = vld [vmem:[%s16482_s1 + $0x88] sm:$0xff] }
  0x46   : > { %v1162_v27 = vshrl.u32 %v846_v19, 16  ;;  %v952_v13 = vshll.u32 %v820_v17, 16  ;;  %v1154_v30 = vrot.slane %v1152_v25, 5  ;;  %v1304_v34 = vpack.c.b16 %v1284_v8, %v1283_v62  ;;  %483 = vst [vmem:[#allocation2 + $0xa4] sm:$0x1] %v429_v23  ;;  %v322_v61 = vld [vmem:[%s13171_s18 + $0x150] sm:$0xff] }
  0x47   : > { %v940_v28 = vrot.slane %v939_v20, 4  ;;  %v949_v29 = vor.u32 %v948_v21, %v944_v1  ;;  %v1160_v32 = vrot.slane %v1158_v26, 5  ;;  %v1168_v35 = vshll.u32 %v847_v15, 16  ;;  %v821_v40 = vld [vmem:[#allocation2 + $0x30] sm:$0xf]  ;;  %v323_v14 = vld [vmem:[%s13171_s18 + $0x158] sm:$0xff] }
  0x48   : > { %13066 = vmatpush.bf16.msrb.mxu3 %v13253_v37  ;;  %v1151_v37 = vrot.slane %v1149_v24, 4  ;;  %v1164_v33 = vrot.slane %v1162_v27, 4  ;;  %v954_v41 = vrot.slane %v952_v13, 5  ;;  %v822_v3 = vld [vmem:[#allocation2 + $0x34] sm:$0xf]  ;;  %v957_v47 = vshrl.u32 %v821_v40, 16 }
  0x49   : > { %v950_v39 = vrot.slane %v949_v29, 4  ;;  %v945_v42 = vsel %vm13246_vm2, %v940_v28, %v944_v1  ;;  %v1170_v46 = vrot.slane %v1168_v35, 5  ;;  %v960_v48 = vshll.u32 %v821_v40, 16  ;;  %v848_v49 = vld [vmem:[#allocation2 + $0x9c] sm:$0xf]  ;;  %1903 = vmatpush.bf16.msrb.mxu2 %v12776_v50  ;;  %v12745_v18 = vld [vmem:[#allocation2 + $0x24] sm:$0xff] }
  0x4a   : > { %v1155_v36 = vor.u32 %v1154_v30, %v1151_v37  ;;  %v1165_v38 = vor.u32 %v1164_v33, %v1160_v32  ;;  %v966_v52 = vshll.u32 %v822_v3, 16  ;;  %v970_v53 = vshrl.u32 %v822_v3, 16  ;;  %v849_v54 = vld [vmem:[#allocation2 + $0xa0] sm:$0xf]  ;;  %v823_v56 = vld [vmem:[#allocation2 + $0x38] sm:$0x1] }
  0x4b   : > { %706 = vmatmul.bf16.gmra.mxu0 %v12744_v7  ;;  %751 = vmatmul.bf16.gmra.mxu3 %v12753_v12  ;;  %v955_v51 = vsel %vm13246_vm2, %v950_v39, %v954_v41  ;;  %v1267_v57 = vunpack.c.l.b16 %v945_v42  ;;  %v1173_v59 = vshrl.u32 %v848_v49, 16  ;;  %v959_v63 = vrot.slane %v957_v47, 4  ;;  %v297_v4 = vld [vmem:[%s13171_s18 + $0x88] sm:$0x3]  ;;  %v12754_v19 = vld [vmem:[#allocation2 + $0x90] sm:$0xff]  ;;  %v12774_v1 = vld [vmem:[%s16482_s1 + $0x80] sm:$0xff] }
  0x4c   : > { %v1156_v43 = vrot.slane %v1155_v36, 4  ;;  %v1166_v45 = vrot.slane %v1165_v38, 4  ;;  %v962_v5 = vrot.slane %v960_v48, 5  ;;  %v1176_v0 = vshll.u32 %v848_v49, 16  ;;  %v298_v37 = vld [vmem:[%s13171_s18 + $0x90] sm:$0xff]  ;;  %v299_v30 = vld [vmem:[%s13171_s18 + $0x98] sm:$0xff] }
  0x4d   : > { %1391 = vmatmul.bf16.gmra.mxu1 %v1295_v16  ;;  %v1268_v6 = vunpack.c.l.b16 %v955_v51  ;;  %v1182_v9 = vshll.u32 %v849_v54, 16  ;;  %v1186_v7 = vshrl.u32 %v849_v54, 16  ;;  %v349_v11 = vmax.f32 %v295_v55, 0.0  ;;  %v850_v23 = vld [vmem:[#allocation2 + $0xa4] sm:$0x1]  ;;  %1904 = vmatpush.bf16.msrb.mxu2 %v12775_v10  ;;  %v12809_v51 = vld [vmem:[%s16482_s1 + $0x118] sm:$0xff] }
  0x4e   : > { %v1161_v58 = vsel %vm13246_vm2, %v1156_v43, %v1160_v32  ;;  %v1171_v60 = vsel %vm13246_vm2, %v1166_v45, %v1170_v46  ;;  %v13361_v62 = vrot.slane %v966_v52, 5  ;;  %v972_v8 = vrot.slane %v970_v53, 4  ;;  %v300_v36 = vld [vmem:[%s13171_s18 + $0xa0] sm:$0x3]  ;;  %3027 = vmatpush.bf16.msrb.mxu0 %v12809_v51 }
  0x4f   : > { %1436 = vmatmul.bf16.gmra.mxu2 %v1304_v34  ;;  %v1285_v16 = vunpack.c.l.b16 %v1161_v58  ;;  %v976_v17 = vshll.u32 %v823_v56, 16  ;;  %v1286_v12 = vunpack.c.l.b16 %v1171_v60  ;;  %v1175_v20 = vrot.slane %v1173_v59, 4  ;;  %v325_v59 = vld [vmem:[%s13171_s18 + $0x168] sm:$0xff] }
  0x50   : > { %v350_v21 = vmax.f32 %v296_v2, 0.0  ;;  %v403_v22 = vpack.c.bf16 %v349_v11, %v349_v11  ;;  %v1178_v15 = vrot.slane %v1176_v0, 5  ;;  %v376_v24 = vmax.f32 %v322_v61, 0.0  ;;  %v326_v2 = vld [vmem:[%s13171_s18 + $0x170] sm:$0xff] }
  0x51   : > { %v377_v25 = vmax.f32 %v323_v14, 0.0  ;;  %v351_v26 = vmax.f32 %v297_v4, 0.0  ;;  %v1296_v27 = vpack.c.b16 %v1268_v6, %v1267_v57  ;;  %v13366_v28 = vrot.slane %v1182_v9, 5  ;;  %1905 = vmatpush.bf16.msrb.mxu2 %v12774_v1  ;;  %v1559_v1 = vld [vmem:[#allocation2 + $0x4] sm:$0xf] }
  0x52   : > { %v1188_v29 = vrot.slane %v1186_v7, 4  ;;  %v404_v13 = vpack.c.bf16 %v350_v21, %v350_v21  ;;  %457 = vst [vmem:[#allocation2 + $0x3c] sm:$0xf] %v403_v22  ;;  %v963_v32 = vor.u32 %v962_v5, %v959_v63  ;;  %v973_v33 = vor.u32 %v972_v8, %v13361_v62 }
  0x53   : > { %v13028_v34 = vpack.c.bf16 %v377_v25, %v376_v24  ;;  %v405_v35 = vpack.c.bf16 %v351_v26, %v351_v26  ;;  %v1305_v38 = vpack.c.b16 %v1286_v12, %v1285_v16  ;;  %v1192_v40 = vshll.u32 %v850_v23, 16  ;;  %v1560_v25 = vld [vmem:[#allocation2 + $0x8] sm:$0x1] }
  0x54   : > { %458 = vst [vmem:[#allocation2 + $0x40] sm:$0xf] %v404_v13  ;;  %v352_v39 = vmax.f32 %v298_v37, 0.0  ;;  %v353_v41 = vmax.f32 %v299_v30, 0.0  ;;  %v1179_v42 = vor.u32 %v1178_v15, %v1175_v20  ;;  %v1189_v43 = vor.u32 %v1188_v29, %v13366_v28  ;;  %v1558_v15 = vld [vmem:[#allocation2] sm:$0xe] }
  0x55   : > { %13041 = vst [vmem:[#allocation2 + $0xa8] sm:$0xff] %v13028_v34   ;;  %v354_v3 = vmax.f32 %v300_v36, 0.0  ;;  %v964_v44 = vrot.slane %v963_v32, 4  ;;  %v974_v45 = vrot.slane %v973_v33, 4  ;;  %v978_v46 = vrot.slane %v976_v17, 5  ;;  %v302_v29 = vld [vmem:[%s13171_s18 + $0xb0] sm:$0xff] }
  0x56   : > { %459 = vst [vmem:[#allocation2 + $0x44] sm:$0x1] %v405_v35  ;;  %v13008_v47 = vpack.c.bf16 %v353_v41, %v352_v39  ;;  %v1194_v49 = vrot.slane %v1192_v40, 5  ;;  %v1180_v52 = vrot.slane %v1179_v42, 4  ;;  %v1190_v53 = vrot.slane %v1189_v43, 4 }
  0x57   : > { %v408_v48 = vpack.c.bf16 %v354_v3, %v354_v3  ;;  %v969_v57 = vsel %vm13246_vm2, %v964_v44, %v13361_v62  ;;  %v979_v58 = vsel %vm13246_vm2, %v974_v45, %v978_v46  ;;  %v379_v4 = vmax.f32 %v325_v59, 0.0  ;;  %v303_v13 = vld [vmem:[%s13171_s18 + $0xb8] sm:$0x3]  ;;  %v324_v32 = vld [vmem:[%s13171_s18 + $0x160] sm:$0x3]  ;;  %v12808_v44 = vld [vmem:[%s16482_s1 + $0x110] sm:$0xff] }
  0x58   : > { %13037 = vst [vmem:[#allocation2 + $0x48] sm:$0xff] %v13008_v47   ;;  %v380_v6 = vmax.f32 %v326_v2, 0.0  ;;  %v1269_v9 = vunpack.c.l.b16 %v969_v57  ;;  %v1270_v7 = vunpack.c.l.b16 %v979_v58  ;;  %v1185_v10 = vsel %vm13246_vm2, %v1180_v52, %v13366_v28  ;;  %3028 = vmatpush.bf16.msrb.mxu0 %v12808_v44  ;;  %v305_v2 = vld [vmem:[%s13171_s18 + $0xc8] sm:$0xff] }
  0x59   : > { %v824_v50 = vld [vmem:[#allocation2 + $0x3c] sm:$0xf]  ;;  %462 = vst [vmem:[#allocation2 + $0x50] sm:$0x1] %v408_v48  ;;  %v1195_v11 = vsel %vm13246_vm2, %v1190_v53, %v1194_v49  ;;  %v433_v16 = vpack.c.bf16 %v379_v4, %v379_v4  ;;  %v1287_v12 = vunpack.c.l.b16 %v1185_v10  ;;  %v1659_v26 = vrot.slane %v1559_v1, 5 }
  0x5a   : > { %v981_v54 = vshrl.u32 %v824_v50, 16  ;;  %v984_v55 = vshll.u32 %v824_v50, 16  ;;  %v434_v62 = vpack.c.bf16 %v380_v6, %v380_v6  ;;  %v1288_v20 = vunpack.c.l.b16 %v1195_v11  ;;  %v13413_v4 = vld [vmem:[#allocation2 + $0x10] sm:$0xf] }
  0x5b   : > { %711 = vmatmul.bf16.gmra.mxu0 %v12745_v18  ;;  %756 = vmatmul.bf16.gmra.mxu3 %v12754_v19  ;;  %v825_v56 = vld [vmem:[#allocation2 + $0x40] sm:$0xf]  ;;  %v12746_v18 = vld [vmem:[#allocation2 + $0x30] sm:$0xff]  ;;  %487 = vst [vmem:[#allocation2 + $0xb4] sm:$0xf] %v433_v16  ;;  %v1297_v21 = vpack.c.b16 %v1270_v7, %v1269_v9  ;;  %v11507_v37 = vrot.slane %v1558_v15, 9 }
  0x5c   : > { %v983_v60 = vrot.slane %v981_v54, 4  ;;  %v986_v63 = vrot.slane %v984_v55, 5  ;;  %v990_v5 = vshll.u32 %v825_v56, 16  ;;  %v994_v0 = vshrl.u32 %v825_v56, 16  ;;  %v12755_v19 = vld [vmem:[#allocation2 + $0x9c] sm:$0xff]  ;;  %v12756_v10 = vld [vmem:[#allocation2 + $0xa8] sm:$0xff] }
  0x5d   : > { %1396 = vmatmul.bf16.gmra.mxu1 %v1296_v27  ;;  %v826_v8 = vld [vmem:[#allocation2 + $0x44] sm:$0x1]  ;;  %488 = vst [vmem:[#allocation2 + $0xb8] sm:$0xf] %v434_v62  ;;  %v301_v27 = vld [vmem:[%s13171_s18 + $0xa8] sm:$0xff]  ;;  %v1306_v28 = vpack.c.b16 %v1288_v20, %v1287_v12  ;;  %v1662_v35 = vrot.slane %v1560_v25, 5  ;;  %v1660_v55 = vsel %vm13399_vm5, %v11507_v37, %v1659_v26 }
  0x5e   : > { %v992_v61 = vrot.slane %v990_v5, 5  ;;  %v996_v14 = vrot.slane %v994_v0, 4  ;;  %v987_v17 = vor.u32 %v986_v63, %v983_v60  ;;  %v1000_v23 = vshll.u32 %v826_v8, 16  ;;  %v304_v0 = vld [vmem:[%s13171_s18 + $0xc0] sm:$0xff]  ;;  %v851_v12 = vld [vmem:[#allocation2 + $0xa8] sm:$0xf] }
  0x5f   : > { %1441 = vmatmul.bf16.gmra.mxu2 %v1305_v38  ;;  %v827_v30 = vld [vmem:[#allocation2 + $0x48] sm:$0xf]  ;;  %v828_v36 = vld [vmem:[#allocation2 + $0x4c] sm:$0xf]  ;;  %v355_v38 = vmax.f32 %v301_v27, 0.0  ;;  %v1661_v39 = vrot.slane %v1659_v26, 4  ;;  %v1786_v11 = vunpack.c.l.b16 %v1660_v55 }
  0x60   : > { %v997_v22 = vor.u32 %v996_v14, %v992_v61  ;;  %v988_v24 = vrot.slane %v987_v17, 4  ;;  %v1002_v34 = vrot.slane %v1000_v23, 5  ;;  %v356_v41 = vmax.f32 %v302_v29, 0.0  ;;  %v829_v58 = vld [vmem:[#allocation2 + $0x50] sm:$0x1]  ;;  %v12747_v7 = vld [vmem:[#allocation2 + $0x3c] sm:$0xff] }
  0x61   : > { %v357_v42 = vmax.f32 %v303_v13, 0.0  ;;  %v1005_v43 = vshrl.u32 %v827_v30, 16  ;;  %v1008_v3 = vshll.u32 %v827_v30, 16  ;;  %v409_v45 = vpack.c.bf16 %v355_v38, %v355_v38  ;;  %v852_v20 = vld [vmem:[#allocation2 + $0xac] sm:$0xf] }
  0x62   : > { %v998_v33 = vrot.slane %v997_v22, 4  ;;  %v993_v40 = vsel %vm13246_vm2, %v988_v24, %v992_v61  ;;  %v378_v46 = vmax.f32 %v324_v32, 0.0  ;;  %v1014_v48 = vshll.u32 %v828_v36, 16  ;;  %v306_v23 = vld [vmem:[%s13171_s18 + $0xd0] sm:$0x3] }
  0x63   : > { %v1018_v49 = vshrl.u32 %v828_v36, 16  ;;  %v410_v50 = vpack.c.bf16 %v356_v41, %v356_v41  ;;  %v411_v51 = vpack.c.bf16 %v357_v42, %v357_v42  ;;  %463 = vst [vmem:[#allocation2 + $0x54] sm:$0xf] %v409_v45  ;;  %v1271_v54 = vunpack.c.l.b16 %v993_v40  ;;  %v327_v26 = vld [vmem:[%s13171_s18 + $0x178] sm:$0x3] }
  0x64   : > { %v1003_v52 = vsel %vm13246_vm2, %v998_v33, %v1002_v34  ;;  %v432_v53 = vpack.c.bf16 %v378_v46, %v378_v46  ;;  %v1663_v57 = vsel %vm13399_vm5, %v1661_v39, %v1662_v35  ;;  %v1007_v56 = vrot.slane %v1005_v43, 4  ;;  %v1563_v27 = vld [vmem:[#allocation2 + $0x14] sm:$0x1]  ;;  %v12805_v33 = vld [vmem:[%s16482_s1 + $0xf8] sm:$0xff]  ;;  %v12807_v39 = vld [vmem:[%s16482_s1 + $0x108] sm:$0xff] }
  0x65   : > { %464 = vst [vmem:[#allocation2 + $0x58] sm:$0xf] %v410_v50  ;;  %v1272_v59 = vunpack.c.l.b16 %v1003_v52  ;;  %v1010_v60 = vrot.slane %v1008_v3, 5  ;;  %v13409_v63 = vrot.slane %v1014_v48, 5  ;;  %v1020_v5 = vrot.slane %v1018_v49, 4  ;;  %2277 = vmatpush.bf16.msra.mxu3 %v12805_v33  ;;  %v12804_v43 = vld [vmem:[%s16482_s1 + $0xf0] sm:$0xff]  ;;  %3029 = vmatpush.bf16.msrb.mxu0 %v12807_v39 }
  0x66   : > { %465 = vst [vmem:[#allocation2 + $0x5c] sm:$0x1] %v411_v51  ;;  %v358_v6 = vmax.f32 %v304_v0, 0.0  ;;  %v359_v9 = vmax.f32 %v305_v2, 0.0  ;;  %v1787_v61 = vunpack.c.l.b16 %v1663_v57  ;;  %v1024_v14 = vshll.u32 %v829_v58, 16  ;;  %v12821_v3 = vld [vmem:[%s16482_s1 + $0x178] sm:$0xff] }
  0x67   : > { %486 = vst [vmem:[#allocation2 + $0xb0] sm:$0x1] %v432_v53  ;;  %v1298_v16 = vpack.c.b16 %v1272_v59, %v1271_v54  ;;  %v1011_v62 = vor.u32 %v1010_v60, %v1007_v56  ;;  %v1021_v8 = vor.u32 %v1020_v5, %v13409_v63  ;;  %v1666_v17 = vrot.slane %v13413_v4, 5  ;;  %3545 = vmatpush.bf16.msrb.mxu1 %v12821_v3  ;;  %v12803_v0 = vld [vmem:[%s16482_s1 + $0xe8] sm:$0xff] }
  0x68   : > { %v1818_v1 = vpack.c.b16 %v1787_v61, %v1786_v11  ;;  %v1200_v29 = vshll.u32 %v851_v12, 16  ;;  %v1206_v13 = vshll.u32 %v852_v20, 16  ;;  %v1210_v37 = vshrl.u32 %v852_v20, 16  ;;  %v12757_v11 = vld [vmem:[#allocation2 + $0xb4] sm:$0xff]  ;;  %v12819_v3 = vld [vmem:[%s16482_s1 + $0x168] sm:$0xff] }
  0x69   : > { %v1012_v15 = vrot.slane %v1011_v62, 4  ;;  %v1022_v24 = vrot.slane %v1021_v8, 4  ;;  %v360_v34 = vmax.f32 %v306_v23, 0.0  ;;  %v381_v35 = vmax.f32 %v327_v26, 0.0  ;;  %2278 = vmatpush.bf16.msra.mxu3 %v12804_v43 }
  0x6a   : > { %v830_v22 = vld [vmem:[#allocation2 + $0x54] sm:$0xf]  ;;  %v1668_v41 = vrot.slane %v1666_v17, 4  ;;  %v1669_v42 = vrot.slane %v1563_v27, 5  ;;  %v1202_v50 = vrot.slane %v1200_v29, 5  ;;  %v13436_v53 = vrot.slane %v1206_v13, 5 }
  0x6b   : > { %716 = vmatmul.bf16.gmra.mxu0 %v12746_v18  ;;  %761 = vmatmul.bf16.gmra.mxu3 %v12755_v19  ;;  %v13013_v18 = vpack.c.bf16 %v359_v9, %v358_v6  ;;  %v1561_v19 = vld [vmem:[#allocation2 + $0xc] sm:$0xe]  ;;  %v1029_v30 = vshrl.u32 %v830_v22, 16  ;;  %v1032_v32 = vshll.u32 %v830_v22, 16  ;;  %v414_v44 = vpack.c.bf16 %v360_v34, %v360_v34  ;;  %v855_v29 = vld [vmem:[#allocation2 + $0xb8] sm:$0xf] }
  0x6c   : > { %v831_v25 = vld [vmem:[#allocation2 + $0x58] sm:$0xf]  ;;  %v11508_v36 = vrot.slane %v1561_v19, 9  ;;  %v435_v45 = vpack.c.bf16 %v381_v35, %v381_v35  ;;  %v1017_v46 = vsel %vm13246_vm2, %v1012_v15, %v13409_v63  ;;  %v1212_v54 = vrot.slane %v1210_v37, 4 }
  0x6d   : > { %1401 = vmatmul.bf16.gmra.mxu1 %v1297_v21  ;;  %v1026_v21 = vrot.slane %v1024_v14, 5  ;;  %13038 = vst [vmem:[#allocation2 + $0x60] sm:$0xff] %v13013_v18   ;;  %v1038_v38 = vshll.u32 %v831_v25, 16  ;;  %v1042_v40 = vshrl.u32 %v831_v25, 16  ;;  %v1031_v51 = vrot.slane %v1029_v30, 4  ;;  %2279 = vmatpush.bf16.msra.mxu3 %v12803_v0  ;;  %v12801_v34 = vld [vmem:[%s16482_s1 + $0xd8] sm:$0xff] }
  0x6e   : > { %v1034_v52 = vrot.slane %v1032_v32, 5  ;;  %468 = vst [vmem:[#allocation2 + $0x68] sm:$0x1] %v414_v44  ;;  %v1667_v55 = vsel %vm13399_vm5, %v11508_v36, %v1666_v17  ;;  %v853_v56 = vld [vmem:[#allocation2 + $0xb0] sm:$0x1]  ;;  %v1273_v59 = vunpack.c.l.b16 %v1017_v46  ;;  %v1670_v63 = vsel %vm13399_vm5, %v1668_v41, %v1669_v42  ;;  %v12802_v17 = vld [vmem:[%s16482_s1 + $0xe0] sm:$0xff] }
  0x6f   : > { %1446 = vmatmul.bf16.gmra.mxu2 %v1306_v28  ;;  %v1197_v28 = vshrl.u32 %v851_v12, 16  ;;  %v1027_v48 = vsel %vm13246_vm2, %v1022_v24, %v1026_v21  ;;  %v13440_v57 = vrot.slane %v1038_v38, 5  ;;  %v1044_v58 = vrot.slane %v1042_v40, 4  ;;  %489 = vst [vmem:[#allocation2 + $0xbc] sm:$0x1] %v435_v45  ;;  %v12820_v21 = vld [vmem:[%s16482_s1 + $0x170] sm:$0xff] }
  0x70   : > { %v1274_v60 = vunpack.c.l.b16 %v1027_v48  ;;  %v832_v5 = vld [vmem:[#allocation2 + $0x5c] sm:$0x1]  ;;  %v1788_v2 = vunpack.c.l.b16 %v1667_v55  ;;  %v1213_v6 = vor.u32 %v1212_v54, %v13436_v53  ;;  %v1216_v9 = vshll.u32 %v853_v56, 16  ;;  %v1566_v25 = vld [vmem:[#allocation2 + $0x20] sm:$0x1]  ;;  %3546 = vmatpush.bf16.msrb.mxu1 %v12820_v21 }
  0x71   : > { %v1199_v49 = vrot.slane %v1197_v28, 4  ;;  %v1789_v61 = vunpack.c.l.b16 %v1670_v63  ;;  %v1035_v14 = vor.u32 %v1034_v52, %v1031_v51  ;;  %v1048_v62 = vshll.u32 %v832_v5, 16  ;;  %2280 = vmatpush.bf16.msra.mxu3 %v12802_v17  ;;  %v854_v28 = vld [vmem:[#allocation2 + $0xb4] sm:$0xf]  ;;  %v12799_v5 = vld [vmem:[%s16482_s1 + $0xc8] sm:$0xff] }
  0x72   : > { %v1299_v8 = vpack.c.b16 %v1274_v60, %v1273_v59  ;;  %v1214_v12 = vrot.slane %v1213_v6, 4  ;;  %v1218_v20 = vrot.slane %v1216_v9, 5  ;;  %v1676_v32 = vrot.slane %v1566_v25, 5  ;;  %v12800_v51 = vld [vmem:[%s16482_s1 + $0xd0] sm:$0xff]  ;;  %v1568_v17 = vld [vmem:[#allocation2 + $0x28] sm:$0xf] }
  0x73   : > { %v1203_v4 = vor.u32 %v1202_v50, %v1199_v49  ;;  %v1819_v22 = vpack.c.b16 %v1789_v61, %v1788_v2  ;;  %v1036_v23 = vrot.slane %v1035_v14, 4  ;;  %v1050_v24 = vrot.slane %v1048_v62, 5  ;;  %v12749_v9 = vld [vmem:[#allocation2 + $0x54] sm:$0xff] }
  0x74   : > { %v833_v26 = vld [vmem:[#allocation2 + $0x60] sm:$0xf]  ;;  %v1219_v37 = vsel %vm13246_vm2, %v1214_v12, %v1218_v20  ;;  %v834_v33 = vld [vmem:[#allocation2 + $0x64] sm:$0xf]  ;;  %v1221_v39 = vshrl.u32 %v854_v28, 16  ;;  %v1224_v41 = vshll.u32 %v854_v28, 16  ;;  %3547 = vmatpush.bf16.msrb.mxu1 %v12819_v3 }
  0x75   : > { %v1204_v19 = vrot.slane %v1203_v4, 4  ;;  %v1041_v35 = vsel %vm13246_vm2, %v1036_v23, %v13440_v57  ;;  %v1053_v38 = vshrl.u32 %v833_v26, 16  ;;  %v1056_v40 = vshll.u32 %v833_v26, 16  ;;  %2281 = vmatpush.bf16.msra.mxu3 %v12801_v34  ;;  %v835_v6 = vld [vmem:[#allocation2 + $0x68] sm:$0x1]  ;;  %v12816_v25 = vld [vmem:[%s16482_s1 + $0x150] sm:$0xff] }
  0x76   : > { %v1230_v42 = vshll.u32 %v855_v29, 16  ;;  %v1234_v43 = vshrl.u32 %v855_v29, 16  ;;  %v1062_v44 = vshll.u32 %v834_v33, 16  ;;  %v1066_v45 = vshrl.u32 %v834_v33, 16  ;;  %v856_v4 = vld [vmem:[#allocation2 + $0xbc] sm:$0x1] }
  0x77   : > { %v1209_v13 = vsel %vm13246_vm2, %v1204_v19, %v13436_v53  ;;  %v1290_v48 = vunpack.c.l.b16 %v1219_v37  ;;  %v1275_v52 = vunpack.c.l.b16 %v1041_v35  ;;  %v1055_v54 = vrot.slane %v1053_v38, 4  ;;  %v1567_v20 = vld [vmem:[#allocation2 + $0x24] sm:$0xe]  ;;  %v1569_v23 = vld [vmem:[#allocation2 + $0x2c] sm:$0x1] }
  0x78   : > { %v1289_v46 = vunpack.c.l.b16 %v1209_v13  ;;  %v1058_v55 = vrot.slane %v1056_v40, 5  ;;  %v1223_v56 = vrot.slane %v1221_v39, 4  ;;  %v1226_v59 = vrot.slane %v1224_v41, 5  ;;  %v2462_v29 = vld [vmem:[#allocation2 + $0xc] sm:$0xf]  ;;  %v12853_v40 = vld [vmem:[%s16482_s1 + $0x1f8] sm:$0xff] }
  0x79   : > { %v13484_v60 = vrot.slane %v1230_v42, 5  ;;  %v1236_v63 = vrot.slane %v1234_v43, 4  ;;  %2282 = vmatpush.bf16.msra.mxu3 %v12800_v51  ;;  %v1064_v0 = vrot.slane %v1062_v44, 5  ;;  %v1068_v2 = vrot.slane %v1066_v45, 4  ;;  %v12815_v3 = vld [vmem:[%s16482_s1 + $0x148] sm:$0xff] }
  0x7a   : > { %v1059_v61 = vor.u32 %v1058_v55, %v1055_v54  ;;  %v1072_v12 = vshll.u32 %v835_v6, 16  ;;  %v1683_v33 = vrot.slane %v1569_v23, 5  ;;  %v2514_v38 = vshll.u32 %v2462_v29, 16 }
  0x7b   : > { %721 = vmatmul.bf16.gmra.mxu0 %v12747_v7  ;;  %766 = vmatmul.bf16.gmra.mxu3 %v12756_v10  ;;  %v1565_v7 = vld [vmem:[#allocation2 + $0x1c] sm:$0xf]  ;;  %v12748_v10 = vld [vmem:[#allocation2 + $0x48] sm:$0xff]  ;;  %v1237_v62 = vor.u32 %v1236_v63, %v13484_v60  ;;  %v1069_v19 = vor.u32 %v1068_v2, %v1064_v0  ;;  %v1571_v2 = vld [vmem:[#allocation2 + $0x34] sm:$0xf] }
  0x7c   : > { %v1673_v18 = vrot.slane %v1565_v7, 5  ;;  %v1307_v7 = vpack.c.b16 %v1290_v48, %v1289_v46  ;;  %v1074_v37 = vrot.slane %v1072_v12, 5  ;;  %v2516_v51 = vrot.slane %v2514_v38, 5 }
  0x7d   : > { %1406 = vmatmul.bf16.gmra.mxu1 %v1298_v16  ;;  %v1045_v16 = vor.u32 %v1044_v58, %v13440_v57  ;;  %v12806_v57 = vld [vmem:[%s16482_s1 + $0x100] sm:$0xff]  ;;  %2283 = vmatpush.bf16.msra.mxu3 %v12799_v5  ;;  %v1070_v13 = vrot.slane %v1069_v19, 4  ;;  %v1572_v19 = vld [vmem:[#allocation2 + $0x38] sm:$0x1] }
  0x7e   : > { %v1675_v30 = vrot.slane %v1673_v18, 4  ;;  %v12818_v58 = vld [vmem:[%s16482_s1 + $0x160] sm:$0xff]  ;;  %3030 = vmatpush.bf16.msrb.mxu0 %v12806_v57 }
  0x7f   : > { %1906 = vmatmul.bf16.vlgmr.msrb.gmra.mxu2 %v1818_v1  ;;  %v1564_v1 = vld [vmem:[#allocation2 + $0x18] sm:$0xe]  ;;  %v1046_v15 = vrot.slane %v1045_v16, 4  ;;  %3548 = vmatpush.bf16.msrb.mxu1 %v12818_v58  ;;  %v1227_v16 = vor.u32 %v1226_v59, %v1223_v56  ;;  %v1075_v44 = vsel %vm13246_vm2, %v1070_v13, %v1074_v37  ;;  %v2464_v56 = vld [vmem:[#allocation2 + $0x14] sm:$0x1] }
  0x80   : > { %v11509_v27 = vrot.slane %v1564_v1, 9  ;;  %v1677_v50 = vsel %vm13399_vm5, %v1675_v30, %v1676_v32  ;;  %v12798_v1 = vld [vmem:[%s16482_s1 + $0xc0] sm:$0xff]  ;;  %v2463_v30 = vld [vmem:[#allocation2 + $0x10] sm:$0xf]  ;;  %v11510_v32 = vrot.slane %v1567_v20, 9  ;;  %v1278_v54 = vunpack.c.l.b16 %v1075_v44 }
  0x81   : > { %v1051_v36 = vsel %vm13246_vm2, %v1046_v15, %v1050_v24  ;;  %v1680_v15 = vrot.slane %v1568_v17, 5  ;;  %v12845_v24 = vld [vmem:[%s16482_s1 + $0x1b8] sm:$0xff]  ;;  %v1228_v26 = vrot.slane %v1227_v16, 4  ;;  %2284 = vmatpush.bf16.msra.mxu3 %v12798_v1  ;;  %v2520_v42 = vshll.u32 %v2463_v30, 16  ;;  %v3209_v59 = vld [vmem:[#allocation2 + $0x10] sm:$0xf] }
  0x82   : > { %v1674_v49 = vsel %vm13399_vm5, %v11509_v27, %v1673_v18  ;;  %v1276_v53 = vunpack.c.l.b16 %v1051_v36  ;;  %v12817_v18 = vld [vmem:[%s16482_s1 + $0x158] sm:$0xff]  ;;  %v1238_v27 = vrot.slane %v1237_v62, 4  ;;  %3924 = vmatpush.bf16.msra.mxu2 %v12845_v24  ;;  %v2511_v36 = vshrl.u32 %v2462_v29, 16  ;;  %v3208_v62 = vld [vmem:[#allocation2 + $0xc] sm:$0xe] }
  0x83   : > { %3549 = vmatpush.bf16.msrb.mxu1 %v12817_v18  ;;  %v1682_v35 = vrot.slane %v1680_v15, 4  ;;  %v1233_v39 = vsel %vm13246_vm2, %v1228_v26, %v13484_v60  ;;  %v2524_v43 = vshrl.u32 %v2463_v30, 16  ;;  %v1681_v46 = vsel %vm13399_vm5, %v11510_v32, %v1680_v15  ;;  %v12750_v60 = vld [vmem:[#allocation2 + $0x60] sm:$0xff]  ;;  %v1570_v18 = vld [vmem:[#allocation2 + $0x30] sm:$0xe] }
  0x84   : > { %v1300_v14 = vpack.c.b16 %v1276_v53, %v1275_v52  ;;  %v1291_v48 = vunpack.c.l.b16 %v1233_v39  ;;  %v12814_v52 = vld [vmem:[%s16482_s1 + $0x140] sm:$0xff]  ;;  %v12861_v53 = vld [vmem:[%s16482_s1 + $0x238] sm:$0xff]  ;;  %v2522_v57 = vrot.slane %v2520_v42, 5  ;;  %v1792_v5 = vunpack.c.l.b16 %v1681_v46 }
  0x85   : > { %v1684_v55 = vsel %vm13399_vm5, %v1682_v35, %v1683_v33  ;;  %v2526_v58 = vrot.slane %v2524_v43, 4  ;;  %5192 = vmatpush.bf16.msra.mxu0 %v12861_v53  ;;  %v1687_v16 = vrot.slane %v1571_v2, 5  ;;  %v2466_v24 = vld [vmem:[#allocation2 + $0x1c] sm:$0xf]  ;;  %v11511_v26 = vrot.slane %v1570_v18, 9 }
  0x86   : > { %v2544_v33 = vshll.u32 %v2466_v24, 16 }
  0x87   : > { %3550 = vmatpush.bf16.msrb.mxu1 %v12816_v25 }
  0x8b   : > { %726 = vmatmul.bf16.gmra.mxu0 %v12748_v10  ;;  %771 = vmatmul.bf16.gmra.mxu3 %v12757_v11  ;;  %v1790_v10 = vunpack.c.l.b16 %v1674_v49  ;;  %v1791_v11 = vunpack.c.l.b16 %v1677_v50  ;;  %v2513_v50 = vrot.slane %v2511_v36, 4 }
  0x8c   : > { %3551 = vmatpush.bf16.msrb.mxu1 %v12815_v3 }
  0x8d   : > { %1411 = vmatmul.bf16.gmra.mxu1 %v1299_v8  ;;  %v1240_v8 = vshll.u32 %v856_v4, 16  ;;  %v1820_v21 = vpack.c.b16 %v1791_v11, %v1790_v10  ;;  %v2517_v4 = vor.u32 %v2516_v51, %v2513_v50  ;;  %v2530_v10 = vshll.u32 %v2464_v56, 16 }
  0x8e   : > { %v2546_v50 = vrot.slane %v2544_v33, 5 }
  0x8f   : > { %1911 = vmatmul.bf16.gmra.mxu2 %v1819_v22  ;;  %v1060_v22 = vrot.slane %v1059_v61, 4  ;;  %v1242_v28 = vrot.slane %v1240_v8, 5  ;;  %v3306_v61 = vrot.slane %v3209_v59, 5  ;;  %v3210_v8 = vld [vmem:[#allocation2 + $0x14] sm:$0x1]  ;;  %v2518_v12 = vrot.slane %v2517_v4, 4 }
  0x90   : > { %3552 = vmatpush.bf16.msrb.mxu1 %v12814_v52  ;;  %v2532_v1 = vrot.slane %v2530_v10, 5  ;;  %v3309_v15 = vrot.slane %v3210_v8, 5  ;;  %v2467_v52 = vld [vmem:[#allocation2 + $0x20] sm:$0x1]  ;;  %v1573_v8 = vld [vmem:[#allocation2 + $0x3c] sm:$0xe] }
  0x91   : > { %v1065_v34 = vsel %vm13246_vm2, %v1060_v22, %v1064_v0  ;;  %v1243_v41 = vsel %vm13246_vm2, %v1238_v27, %v1242_v28  ;;  %v1793_v0 = vunpack.c.l.b16 %v1684_v55  ;;  %v11731_v22 = vrot.slane %v3208_v62, 9  ;;  %v1574_v59 = vld [vmem:[#allocation2 + $0x40] sm:$0xf] }
  0x92   : > { %v1277_v45 = vunpack.c.l.b16 %v1065_v34  ;;  %v1292_v49 = vunpack.c.l.b16 %v1243_v41  ;;  %v3308_v23 = vrot.slane %v3306_v61, 4  ;;  %v1689_v27 = vrot.slane %v1687_v16, 4 }
  0x93   : > { %v1821_v17 = vpack.c.b16 %v1793_v0, %v1792_v5  ;;  %v1690_v28 = vrot.slane %v1572_v19, 5  ;;  %v2523_v29 = vsel %vm13246_vm2, %v2518_v12, %v2522_v57  ;;  %v2548_v34 = vshrl.u32 %v2466_v24, 16  ;;  %v12844_v19 = vld [vmem:[%s16482_s1 + $0x1b0] sm:$0xff] }
  0x94   : > { %v1308_v63 = vpack.c.b16 %v1292_v49, %v1291_v48  ;;  %v3307_v36 = vsel %vm13399_vm5, %v11731_v22, %v3306_v61  ;;  %v3310_v38 = vsel %vm13399_vm5, %v3308_v23, %v3309_v15  ;;  %v1688_v41 = vsel %vm13399_vm5, %v11511_v26, %v1687_v16  ;;  %v3213_v61 = vld [vmem:[#allocation2 + $0x20] sm:$0x1]  ;;  %3925 = vmatpush.bf16.msra.mxu2 %v12844_v19  ;;  %v2469_v15 = vld [vmem:[#allocation2 + $0x28] sm:$0xf] }
  0x95   : > { %v1691_v42 = vsel %vm13399_vm5, %v1689_v27, %v1690_v28  ;;  %v2911_v43 = vunpack.c.l.b16 %v2523_v29  ;;  %v3433_v48 = vunpack.c.l.b16 %v3307_v36  ;;  %v3434_v49 = vunpack.c.l.b16 %v3310_v38 }
  0x96   : > { %v2550_v51 = vrot.slane %v2548_v34, 4  ;;  %v1794_v55 = vunpack.c.l.b16 %v1688_v41  ;;  %v2554_v2 = vshll.u32 %v2467_v52, 16  ;;  %v1694_v10 = vrot.slane %v1574_v59, 5 }
  0x97   : > { %v3465_v5 = vpack.c.b16 %v3434_v49, %v3433_v48  ;;  %v3316_v23 = vrot.slane %v3213_v61, 5  ;;  %v2568_v33 = vshll.u32 %v2469_v15, 16  ;;  %v2572_v34 = vshrl.u32 %v2469_v15, 16  ;;  %v2471_v15 = vld [vmem:[#allocation2 + $0x30] sm:$0xf] }
  0x98   : > { %v2551_v0 = vor.u32 %v2550_v51, %v2546_v50  ;;  %v1696_v26 = vrot.slane %v1694_v10, 4 }
  0x9a   : > { %v2552_v12 = vrot.slane %v2551_v0, 4 }
  0x9b   : > { %731 = vmatmul.bf16.gmra.mxu0 %v12749_v9  ;;  %1451 = vmatmul.bf16.vlgmr.msrb.gmra.mxu3 %v1307_v7  ;;  %v1301_v9 = vpack.c.b16 %v1278_v54, %v1277_v45  ;;  %v2527_v7 = vor.u32 %v2526_v58, %v2522_v57  ;;  %v3212_v54 = vld [vmem:[#allocation2 + $0x1c] sm:$0xf]  ;;  %v1795_v57 = vunpack.c.l.b16 %v1691_v42  ;;  %v12782_v58 = vld [vmem:[#allocation2 + $0xc] sm:$0xff] }
  0x9c   : > { %4670 = vmatpush.bf16.msrb.mxu3 %v12853_v40 }
  0x9d   : > { %1416 = vmatmul.bf16.gmra.mxu1 %v1300_v14  ;;  %v2528_v20 = vrot.slane %v2527_v7, 4  ;;  %v1822_v62 = vpack.c.b16 %v1795_v57, %v1794_v55  ;;  %v2470_v55 = vld [vmem:[#allocation2 + $0x2c] sm:$0x1] }
  0x9f   : > { %1916 = vmatmul.bf16.gmra.mxu2 %v1820_v21  ;;  %v2465_v21 = vld [vmem:[#allocation2 + $0x18] sm:$0xf]  ;;  %v2533_v32 = vsel %vm13246_vm2, %v2528_v20, %v2532_v1  ;;  %v2556_v20 = vrot.slane %v2554_v2, 5  ;;  %v2468_v1 = vld [vmem:[#allocation2 + $0x24] sm:$0xf] }
  0xa0   : > { %v2535_v13 = vshrl.u32 %v2465_v21, 16  ;;  %v2538_v37 = vshll.u32 %v2465_v21, 16  ;;  %v2912_v44 = vunpack.c.l.b16 %v2533_v32  ;;  %v2559_v29 = vshrl.u32 %v2468_v1, 16 }
  0xa1   : > { %v2557_v32 = vsel %vm13246_vm2, %v2552_v12, %v2556_v20  ;;  %v1576_v20 = vld [vmem:[#allocation2 + $0x48] sm:$0xe] }
  0xa2   : > { %v2537_v45 = vrot.slane %v2535_v13, 4  ;;  %v2540_v46 = vrot.slane %v2538_v37, 5  ;;  %v2943_v56 = vpack.c.b16 %v2912_v44, %v2911_v43  ;;  %v2562_v13 = vshll.u32 %v2468_v1, 16  ;;  %v12852_v37 = vld [vmem:[%s16482_s1 + $0x1f0] sm:$0xff] }
  0xa3   : > { %4671 = vmatpush.bf16.msrb.mxu3 %v12852_v37  ;;  %v2561_v48 = vrot.slane %v2559_v29, 4  ;;  %v1578_v1 = vld [vmem:[#allocation2 + $0x50] sm:$0x1]  ;;  %v11513_v29 = vrot.slane %v1576_v20, 9 }
  0xa4   : > { %v2564_v49 = vrot.slane %v2562_v13, 5  ;;  %v1704_v37 = vrot.slane %v1578_v1, 5 }
  0xa6   : > { %v2565_v0 = vor.u32 %v2564_v49, %v2561_v48 }
  0xa8   : > { %v697_v6 = vpop.f32.mrf.mxu0 }
  0xaa   : > { %v1382_v11 = vpop.f32.mrf.mxu1 }
  0xab   : > { %v13527_v14 = vadd.f32 %v1382_v11, %v697_v6  ;;  %736 = vmatmul.bf16.gmra.mxu0 %v12750_v60  ;;  %1456 = vmatmul.bf16.gmra.mxu3 %v1308_v63  ;;  %v2541_v60 = vor.u32 %v2540_v46, %v2537_v45  ;;  %v3313_v6 = vrot.slane %v3212_v54, 5  ;;  %v3211_v11 = vld [vmem:[#allocation2 + $0x18] sm:$0xe]  ;;  %v2914_v46 = vunpack.c.l.b16 %v2557_v32 }
  0xac   : > { %v11732_v21 = vrot.slane %v3211_v11, 9  ;;  %v2574_v54 = vrot.slane %v2572_v34, 4  ;;  %v2583_v32 = vshrl.u32 %v2471_v15, 16 }
  0xad   : > { %1421 = vmatmul.bf16.gmra.mxu1 %v1301_v9  ;;  %v2542_v18 = vrot.slane %v2541_v60, 4  ;;  %v3315_v22 = vrot.slane %v3313_v6, 4  ;;  %v12783_v60 = vld [vmem:[#allocation2 + $0x18] sm:$0xff] }
  0xae   : > { %v742_v25 = vpop.f32.mrf.mxu3  ;;  %v3314_v36 = vsel %vm13399_vm5, %v11732_v21, %v3313_v6  ;;  %v2566_v21 = vrot.slane %v2565_v0, 4 }
  0xaf   : > { %1921 = vmatmul.bf16.gmra.mxu2 %v1821_v17  ;;  %v1575_v17 = vld [vmem:[#allocation2 + $0x44] sm:$0x1]  ;;  %v2547_v28 = vsel %vm13246_vm2, %v2542_v18, %v2546_v50  ;;  %v3317_v38 = vsel %vm13399_vm5, %v3315_v22, %v3316_v23  ;;  %v12860_v50 = vld [vmem:[%s16482_s1 + $0x230] sm:$0xff]  ;;  %v3435_v51 = vunpack.c.l.b16 %v3314_v36  ;;  %v3216_v18 = vld [vmem:[#allocation2 + $0x2c] sm:$0x1] }
  0xb0   : > { %v699_v30 = vpop.f32.mrf.mxu0  ;;  %v1697_v27 = vrot.slane %v1575_v17, 5  ;;  %v2913_v44 = vunpack.c.l.b16 %v2547_v28  ;;  %v3436_v52 = vunpack.c.l.b16 %v3317_v38  ;;  %5193 = vmatpush.bf16.msra.mxu0 %v12860_v50  ;;  %v3214_v17 = vld [vmem:[#allocation2 + $0x24] sm:$0xe] }
  0xb2   : > { %v1384_v35 = vpop.f32.mrf.mxu1  ;;  %v1427_v40 = vpop.f32.mrf.mxu2  ;;  %v1698_v43 = vsel %vm13399_vm5, %v1696_v26, %v1697_v27  ;;  %v3323_v26 = vrot.slane %v3216_v18, 5  ;;  %v2472_v27 = vld [vmem:[#allocation2 + $0x34] sm:$0xf] }
  0xb3   : > { %v13537_v39 = vadd.f32 %v1384_v35, %v699_v30  ;;  %v13543_v3 = vadd.f32 %v1427_v40, %v742_v25  ;;  %v11512_v25 = vrot.slane %v1573_v8, 9  ;;  %v1797_v59 = vunpack.c.l.b16 %v1698_v43 }
  0xb4   : > { %v2592_v36 = vshll.u32 %v2472_v27, 16  ;;  %v2596_v38 = vshrl.u32 %v2472_v27, 16  ;;  %v12843_v27 = vld [vmem:[%s16482_s1 + $0x1a8] sm:$0xff] }
  0xb5   : > { %v1695_v42 = vsel %vm13399_vm5, %v11512_v25, %v1694_v10  ;;  %3926 = vmatpush.bf16.msra.mxu2 %v12843_v27 }
  0xb6   : > { %v744_v53 = vpop.f32.mrf.mxu3 }
  0xb8   : > { %v702_v63 = vpop.f32.mrf.mxu0 }
  0xba   : > { %v1387_v4 = vpop.f32.mrf.mxu1  ;;  %v1429_v9 = vpop.f32.mrf.mxu2 }
  0xbb   : > { %v13545_v7 = vadd.f32 %v1387_v4, %v702_v63  ;;  %v13547_v16 = vadd.f32 %v1429_v9, %v744_v53  ;;  %2285 = vmatmul.bf16.vlgmr.msra.gmra.mxu3 %v12782_v58  ;;  %3031 = vmatmul.bf16.vlgmr.msrb.gmra.mxu0 %v2943_v56  ;;  %v2570_v53 = vrot.slane %v2568_v33, 5  ;;  %v3215_v58 = vld [vmem:[#allocation2 + $0x28] sm:$0xf]  ;;  %v1796_v56 = vunpack.c.l.b16 %v1695_v42 }
  0xbc   : > { %v2944_v63 = vpack.c.b16 %v2914_v46, %v2913_v44  ;;  %v3466_v4 = vpack.c.b16 %v3436_v52, %v3435_v51  ;;  %v2578_v9 = vshll.u32 %v2470_v55, 16  ;;  %v3320_v11 = vrot.slane %v3215_v58, 5 }
  0xbd   : > { %3553 = vmatmul.bf16.vlgmr.msrb.gmra.mxu1 %v3465_v5  ;;  %v1577_v5 = vld [vmem:[#allocation2 + $0x4c] sm:$0xf]  ;;  %v2575_v6 = vor.u32 %v2574_v54, %v2570_v53  ;;  %v1823_v12 = vpack.c.b16 %v1797_v59, %v1796_v56  ;;  %v2586_v33 = vshll.u32 %v2471_v15, 16  ;;  %v2594_v58 = vrot.slane %v2592_v36, 5  ;;  %v2473_v59 = vld [vmem:[#allocation2 + $0x38] sm:$0x1] }
  0xbe   : > { %v747_v24 = vpop.f32.mrf.mxu3  ;;  %v1701_v8 = vrot.slane %v1577_v5, 5  ;;  %v2580_v23 = vrot.slane %v2578_v9, 5  ;;  %v3322_v25 = vrot.slane %v3320_v11, 4  ;;  %v2598_v56 = vrot.slane %v2596_v38, 4 }
  0xbf   : > { %1926 = vmatmul.bf16.gmra.mxu2 %v1822_v62  ;;  %v2576_v22 = vrot.slane %v2575_v6, 4  ;;  %v2588_v54 = vrot.slane %v2586_v33, 5  ;;  %v1580_v6 = vld [vmem:[#allocation2 + $0x58] sm:$0xf]  ;;  %v2475_v33 = vld [vmem:[#allocation2 + $0x40] sm:$0xf] }
  0xc0   : > { %v704_v30 = vpop.f32.mrf.mxu0  ;;  %v1703_v13 = vrot.slane %v1701_v8, 4  ;;  %v3324_v43 = vsel %vm13399_vm5, %v3322_v25, %v3323_v26  ;;  %v1702_v48 = vsel %vm13399_vm5, %v11513_v29, %v1701_v8  ;;  %v2602_v8 = vshll.u32 %v2473_v59, 16  ;;  %v1581_v25 = vld [vmem:[#allocation2 + $0x5c] sm:$0x1] }
  0xc1   : > { %v1798_v5 = vunpack.c.l.b16 %v1702_v48  ;;  %v1708_v1 = vrot.slane %v1580_v6, 5  ;;  %v1711_v38 = vrot.slane %v1581_v25, 5 }
  0xc2   : > { %v1389_v35 = vpop.f32.mrf.mxu1  ;;  %v1432_v40 = vpop.f32.mrf.mxu2  ;;  %v1705_v49 = vsel %vm13399_vm5, %v1703_v13, %v1704_v37  ;;  %v2604_v29 = vrot.slane %v2602_v8, 5  ;;  %v2474_v13 = vld [vmem:[#allocation2 + $0x3c] sm:$0xf] }
  0xc3   : > { %v13563_v41 = vadd.f32 %v1389_v35, %v704_v30  ;;  %v13569_v45 = vadd.f32 %v1432_v40, %v747_v24  ;;  %v11733_v24 = vrot.slane %v3214_v17, 9  ;;  %v2571_v30 = vsel %vm13246_vm2, %v2566_v21, %v2570_v53  ;;  %v3217_v21 = vld [vmem:[#allocation2 + $0x30] sm:$0xe] }
  0xc4   : > { %v2581_v35 = vsel %vm13246_vm2, %v2576_v22, %v2580_v23  ;;  %v2915_v50 = vunpack.c.l.b16 %v2571_v30  ;;  %v2585_v53 = vrot.slane %v2583_v32, 4  ;;  %v1799_v0 = vunpack.c.l.b16 %v1705_v49  ;;  %v3219_v22 = vld [vmem:[#allocation2 + $0x38] sm:$0x1] }
  0xc5   : > { %v3321_v42 = vsel %vm13399_vm5, %v11733_v24, %v3320_v11  ;;  %v2916_v52 = vunpack.c.l.b16 %v2581_v35  ;;  %v1579_v24 = vld [vmem:[#allocation2 + $0x54] sm:$0xe]  ;;  %v11734_v37 = vrot.slane %v3217_v21, 9  ;;  %v3330_v32 = vrot.slane %v3219_v22, 5  ;;  %v1583_v22 = vld [vmem:[#allocation2 + $0x64] sm:$0xf] }
  0xc6   : > { %v749_v57 = vpop.f32.mrf.mxu3  ;;  %v3437_v55 = vunpack.c.l.b16 %v3321_v42  ;;  %v2589_v9 = vor.u32 %v2588_v54, %v2585_v53  ;;  %v1824_v15 = vpack.c.b16 %v1799_v0, %v1798_v5  ;;  %v11514_v35 = vrot.slane %v1579_v24, 9 }
  0xc7   : > { %v1710_v36 = vrot.slane %v1708_v1, 4  ;;  %v2607_v42 = vshrl.u32 %v2474_v13, 16 }
  0xc8   : > { %v707_v2 = vpop.f32.mrf.mxu0  ;;  %v2590_v26 = vrot.slane %v2589_v9, 4 }
  0xc9   : > { %v1712_v59 = vsel %vm13399_vm5, %v1710_v36, %v1711_v38  ;;  %v2609_v0 = vrot.slane %v2607_v42, 4  ;;  %v1582_v36 = vld [vmem:[#allocation2 + $0x60] sm:$0xe]  ;;  %v1584_v38 = vld [vmem:[#allocation2 + $0x68] sm:$0x1] }
  0xca   : > { %v1392_v10 = vpop.f32.mrf.mxu1  ;;  %v1434_v61 = vpop.f32.mrf.mxu2 }
  0xcb   : > { %v13574_v62 = vadd.f32 %v1392_v10, %v707_v2  ;;  %v13576_v19 = vadd.f32 %v1434_v61, %v749_v57  ;;  %2290 = vmatmul.bf16.gmra.mxu3 %v12783_v60  ;;  %3036 = vmatmul.bf16.gmra.mxu0 %v2944_v63  ;;  %v3438_v57 = vunpack.c.l.b16 %v3324_v43  ;;  %v3218_v63 = vld [vmem:[#allocation2 + $0x34] sm:$0xf]  ;;  %v12784_v2 = vld [vmem:[#allocation2 + $0x24] sm:$0xff]  ;;  %v2599_v61 = vor.u32 %v2598_v56, %v2594_v58 }
  0xcc   : > { %v3327_v18 = vrot.slane %v3218_v63, 5  ;;  %v2610_v43 = vshll.u32 %v2474_v13, 16  ;;  %v1709_v56 = vsel %vm13399_vm5, %v11514_v35, %v1708_v1  ;;  %v12785_v1 = vld [vmem:[#allocation2 + $0x30] sm:$0xff] }
  0xcd   : > { %3558 = vmatmul.bf16.gmra.mxu1 %v3466_v4  ;;  %v2945_v4 = vpack.c.b16 %v2916_v52, %v2915_v50  ;;  %v3467_v11 = vpack.c.b16 %v3438_v57, %v3437_v55  ;;  %v2616_v50 = vshll.u32 %v2475_v33, 16  ;;  %v2620_v52 = vshrl.u32 %v2475_v33, 16  ;;  %v3222_v33 = vld [vmem:[#allocation2 + $0x44] sm:$0x1] }
  0xce   : > { %v752_v28 = vpop.f32.mrf.mxu3  ;;  %v3329_v30 = vrot.slane %v3327_v18, 4  ;;  %v3328_v54 = vsel %vm13399_vm5, %v11734_v37, %v3327_v18  ;;  %v1800_v18 = vunpack.c.l.b16 %v1709_v56 }
  0xcf   : > { %1931 = vmatmul.bf16.gmra.mxu2 %v1823_v12  ;;  %v3439_v6 = vunpack.c.l.b16 %v3328_v54  ;;  %v11515_v54 = vrot.slane %v1582_v36, 9 }
  0xd0   : > { %v709_v34 = vpop.f32.mrf.mxu0  ;;  %v3331_v55 = vsel %vm13399_vm5, %v3329_v30, %v3330_v32  ;;  %v1715_v30 = vrot.slane %v1583_v22, 5  ;;  %v3220_v32 = vld [vmem:[#allocation2 + $0x3c] sm:$0xe] }
  0xd1   : > { %v3440_v9 = vunpack.c.l.b16 %v3331_v55 }
  0xd2   : > { %v1394_v40 = vpop.f32.mrf.mxu1  ;;  %v1437_v44 = vpop.f32.mrf.mxu2  ;;  %v1717_v55 = vrot.slane %v1715_v30, 4 }
  0xd3   : > { %v13586_v46 = vadd.f32 %v1394_v40, %v709_v34  ;;  %v13592_v51 = vadd.f32 %v1437_v44, %v752_v28  ;;  %v2600_v28 = vrot.slane %v2599_v61, 4  ;;  %v2595_v40 = vsel %vm13246_vm2, %v2590_v26, %v2594_v58  ;;  %v12851_v44 = vld [vmem:[%s16482_s1 + $0x1e8] sm:$0xff]  ;;  %v2476_v61 = vld [vmem:[#allocation2 + $0x44] sm:$0x1] }
  0xd4   : > { %4672 = vmatpush.bf16.msrb.mxu3 %v12851_v44  ;;  %v3468_v25 = vpack.c.b16 %v3440_v9, %v3439_v6  ;;  %v2626_v27 = vshll.u32 %v2476_v61, 16  ;;  %v2477_v44 = vld [vmem:[#allocation2 + $0x48] sm:$0xf] }
  0xd5   : > { %v2605_v49 = vsel %vm13246_vm2, %v2600_v28, %v2604_v29 }
  0xd6   : > { %v754_v60 = vpop.f32.mrf.mxu3  ;;  %v2918_v5 = vunpack.c.l.b16 %v2605_v49 }
  0xd8   : > { %v712_v10 = vpop.f32.mrf.mxu0 }
  0xda   : > { %v1397_v17 = vpop.f32.mrf.mxu1  ;;  %v1439_v12 = vpop.f32.mrf.mxu2 }
  0xdb   : > { %v13594_v20 = vadd.f32 %v1397_v17, %v712_v10  ;;  %v13596_v23 = vadd.f32 %v1439_v12, %v754_v60  ;;  %2295 = vmatmul.bf16.gmra.mxu3 %v12784_v2  ;;  %3041 = vmatmul.bf16.gmra.mxu0 %v2945_v4  ;;  %v2917_v60 = vunpack.c.l.b16 %v2595_v40  ;;  %v2612_v2 = vrot.slane %v2610_v43, 5  ;;  %v12859_v4 = vld [vmem:[%s16482_s1 + $0x228] sm:$0xff]  ;;  %v3221_v17 = vld [vmem:[#allocation2 + $0x40] sm:$0xf] }
  0xdc   : > { %v2618_v10 = vrot.slane %v2616_v50, 5  ;;  %5194 = vmatpush.bf16.msra.mxu0 %v12859_v4  ;;  %v1801_v12 = vunpack.c.l.b16 %v1712_v59  ;;  %v3334_v29 = vrot.slane %v3221_v17, 5  ;;  %v2628_v43 = vrot.slane %v2626_v27, 5  ;;  %v2479_v27 = vld [vmem:[#allocation2 + $0x50] sm:$0x1] }
  0xdd   : > { %3563 = vmatmul.bf16.gmra.mxu1 %v3467_v11  ;;  %v2622_v11 = vrot.slane %v2620_v52, 4  ;;  %v2946_v21 = vpack.c.b16 %v2918_v5, %v2917_v60  ;;  %v3337_v50 = vrot.slane %v3222_v33, 5  ;;  %v2478_v52 = vld [vmem:[#allocation2 + $0x4c] sm:$0xf]  ;;  %v2631_v59 = vshrl.u32 %v2477_v44, 16  ;;  %v12786_v33 = vld [vmem:[#allocation2 + $0x3c] sm:$0xff] }
  0xde   : > { %v757_v34 = vpop.f32.mrf.mxu3  ;;  %v1825_v35 = vpack.c.b16 %v1801_v12, %v1800_v18  ;;  %v3336_v49 = vrot.slane %v3334_v29, 4  ;;  %v2634_v60 = vshll.u32 %v2477_v44, 16  ;;  %v2644_v4 = vshrl.u32 %v2478_v52, 16 }
  0xdf   : > { %1936 = vmatmul.bf16.gmra.mxu2 %v1824_v15  ;;  %v2613_v15 = vor.u32 %v2612_v2, %v2609_v0  ;;  %v2623_v26 = vor.u32 %v2622_v11, %v2618_v10  ;;  %v2640_v2 = vshll.u32 %v2478_v52, 16 }
  0xe0   : > { %v714_v48 = vpop.f32.mrf.mxu0  ;;  %v3338_v11 = vsel %vm13399_vm5, %v3336_v49, %v3337_v50  ;;  %v2636_v22 = vrot.slane %v2634_v60, 5 }
  0xe1   : > { %v2614_v40 = vrot.slane %v2613_v15, 4  ;;  %v2624_v42 = vrot.slane %v2623_v26, 4  ;;  %v2646_v26 = vrot.slane %v2644_v4, 4  ;;  %v2480_v4 = vld [vmem:[#allocation2 + $0x54] sm:$0xf] }
  0xe2   : > { %v1399_v53 = vpop.f32.mrf.mxu1  ;;  %v1442_v57 = vpop.f32.mrf.mxu2 }
  0xe3   : > { %v13612_v58 = vadd.f32 %v1399_v53, %v714_v48  ;;  %v13618_v63 = vadd.f32 %v1442_v57, %v757_v34  ;;  %v11735_v48 = vrot.slane %v3220_v32, 9  ;;  %v1718_v57 = vrot.slane %v1584_v38, 5 }
  0xe4   : > { %v2619_v56 = vsel %vm13246_vm2, %v2614_v40, %v2618_v10  ;;  %v2629_v0 = vsel %vm13246_vm2, %v2624_v42, %v2628_v43  ;;  %v1716_v10 = vsel %vm13399_vm5, %v11515_v54, %v1715_v30  ;;  %v2650_v43 = vshll.u32 %v2479_v27, 16  ;;  %v3225_v54 = vld [vmem:[#allocation2 + $0x50] sm:$0x1] }
  0xe5   : > { %v3335_v9 = vsel %vm13399_vm5, %v11735_v48, %v3334_v29  ;;  %v1719_v17 = vsel %vm13399_vm5, %v1717_v55, %v1718_v57  ;;  %v2919_v18 = vunpack.c.l.b16 %v2619_v56  ;;  %v3224_v29 = vld [vmem:[#allocation2 + $0x4c] sm:$0xf] }
  0xe6   : > { %v759_v8 = vpop.f32.mrf.mxu3  ;;  %v3441_v15 = vunpack.c.l.b16 %v3335_v9  ;;  %v1803_v32 = vunpack.c.l.b16 %v1719_v17  ;;  %v3341_v48 = vrot.slane %v3224_v29, 5  ;;  %v1585_v56 = vld [vmem:[#allocation2 + $0x6c] sm:$0xe] }
  0xe7   : > { %v11516_v17 = vrot.slane %v1585_v56, 9  ;;  %v2482_v56 = vld [vmem:[#allocation2 + $0x5c] sm:$0x1] }
  0xe8   : > { %v717_v24 = vpop.f32.mrf.mxu0  ;;  %v3343_v9 = vrot.slane %v3341_v48, 4 }
  0xea   : > { %v1402_v28 = vpop.f32.mrf.mxu1  ;;  %v1444_v13 = vpop.f32.mrf.mxu2 }
  0xeb   : > { %v13623_v37 = vadd.f32 %v1402_v28, %v717_v24  ;;  %v13625_v34 = vadd.f32 %v1444_v13, %v759_v8  ;;  %2300 = vmatmul.bf16.gmra.mxu3 %v12785_v1  ;;  %3046 = vmatmul.bf16.gmra.mxu0 %v2946_v21  ;;  %v2920_v1 = vunpack.c.l.b16 %v2629_v0  ;;  %v2633_v21 = vrot.slane %v2631_v59, 4  ;;  %v1587_v59 = vld [vmem:[#allocation2 + $0x74] sm:$0x1] }
  0xec   : > { %v3442_v24 = vunpack.c.l.b16 %v3338_v11  ;;  %v1802_v13 = vunpack.c.l.b16 %v1716_v10  ;;  %v3344_v11 = vrot.slane %v3225_v54, 5 }
  0xed   : > { %3568 = vmatmul.bf16.gmra.mxu1 %v3468_v25  ;;  %v2642_v25 = vrot.slane %v2640_v2, 5  ;;  %v2947_v30 = vpack.c.b16 %v2920_v1, %v2919_v18  ;;  %v2637_v36 = vor.u32 %v2636_v22, %v2633_v21  ;;  %v2652_v2 = vrot.slane %v2650_v43, 5 }
  0xee   : > { %v762_v53 = vpop.f32.mrf.mxu3  ;;  %v3469_v40 = vpack.c.b16 %v3442_v24, %v3441_v15  ;;  %v1826_v57 = vpack.c.b16 %v1803_v32, %v1802_v13  ;;  %v1725_v1 = vrot.slane %v1587_v59, 5  ;;  %v2655_v22 = vshrl.u32 %v2480_v4, 16  ;;  %v12850_v24 = vld [vmem:[%s16482_s1 + $0x1e0] sm:$0xff]  ;;  %v3227_v59 = vld [vmem:[#allocation2 + $0x58] sm:$0xf] }
  0xef   : > { %1941 = vmatmul.bf16.gmra.mxu2 %v1825_v35  ;;  %v1586_v35 = vld [vmem:[#allocation2 + $0x70] sm:$0xf]  ;;  %v2647_v42 = vor.u32 %v2646_v26, %v2642_v25  ;;  %v2638_v60 = vrot.slane %v2637_v36, 4  ;;  %v2658_v15 = vshll.u32 %v2480_v4, 16  ;;  %4673 = vmatpush.bf16.msrb.mxu3 %v12850_v24  ;;  %v3228_v24 = vld [vmem:[#allocation2 + $0x5c] sm:$0x1] }
  0xf0   : > { %v719_v5 = vpop.f32.mrf.mxu0  ;;  %v1722_v52 = vrot.slane %v1586_v35, 5  ;;  %v2657_v43 = vrot.slane %v2655_v22, 4 }
  0xf1   : > { %v2648_v0 = vrot.slane %v2647_v42, 4  ;;  %v2643_v21 = vsel %vm13246_vm2, %v2638_v60, %v2642_v25 }
  0xf2   : > { %v1404_v6 = vpop.f32.mrf.mxu1  ;;  %v1447_v61 = vpop.f32.mrf.mxu2  ;;  %v1724_v18 = vrot.slane %v1722_v52, 4  ;;  %v1723_v35 = vsel %vm13399_vm5, %v11516_v17, %v1722_v52 }
  0xf3   : > { %v13635_v8 = vadd.f32 %v1404_v6, %v719_v5  ;;  %v13641_v12 = vadd.f32 %v1447_v61, %v762_v53  ;;  %v3223_v53 = vld [vmem:[#allocation2 + $0x48] sm:$0xe]  ;;  %v12842_v5 = vld [vmem:[%s16482_s1 + $0x1a0] sm:$0xff]  ;;  %v2481_v61 = vld [vmem:[#allocation2 + $0x58] sm:$0xf]  ;;  %v2653_v27 = vsel %vm13246_vm2, %v2648_v0, %v2652_v2  ;;  %v1804_v60 = vunpack.c.l.b16 %v1723_v35 }
  0xf4   : > { %v11736_v6 = vrot.slane %v3223_v53, 9  ;;  %3927 = vmatpush.bf16.msra.mxu2 %v12842_v5  ;;  %v2668_v29 = vshrl.u32 %v2481_v61, 16  ;;  %v1726_v36 = vsel %vm13399_vm5, %v1724_v18, %v1725_v1  ;;  %v2922_v42 = vunpack.c.l.b16 %v2653_v27  ;;  %v1589_v2 = vld [vmem:[#allocation2 + $0x7c] sm:$0xf] }
  0xf5   : > { %v1805_v5 = vunpack.c.l.b16 %v1726_v36  ;;  %v3348_v18 = vrot.slane %v3227_v59, 5  ;;  %v1729_v22 = vrot.slane %v1589_v2, 5 }
  0xf6   : > { %v764_v28 = vpop.f32.mrf.mxu3  ;;  %v3342_v32 = vsel %vm13399_vm5, %v11736_v6, %v3341_v48  ;;  %v12858_v48 = vld [vmem:[%s16482_s1 + $0x220] sm:$0xff] }
  0xf7   : > { %5195 = vmatpush.bf16.msra.mxu0 %v12858_v48  ;;  %v1827_v27 = vpack.c.b16 %v1805_v5, %v1804_v60  ;;  %v3350_v36 = vrot.slane %v3348_v18, 4  ;;  %v1731_v48 = vrot.slane %v1729_v22, 4 }
  0xf8   : > { %v722_v38 = vpop.f32.mrf.mxu0 }
  0xfa   : > { %v1407_v44 = vpop.f32.mrf.mxu1  ;;  %v1449_v49 = vpop.f32.mrf.mxu2 }
  0xfb   : > { %v13643_v50 = vadd.f32 %v1407_v44, %v722_v38  ;;  %v13645_v55 = vadd.f32 %v1449_v49, %v764_v28  ;;  %2305 = vmatmul.bf16.gmra.mxu3 %v12786_v33  ;;  %3051 = vmatmul.bf16.gmra.mxu0 %v2947_v30  ;;  %v2664_v28 = vshll.u32 %v2481_v61, 16  ;;  %v3345_v33 = vsel %vm13399_vm5, %v3343_v9, %v3344_v11 }
  0xfc   : > { %v2921_v38 = vunpack.c.l.b16 %v2643_v21  ;;  %v2660_v44 = vrot.slane %v2658_v15, 5  ;;  %v3443_v49 = vunpack.c.l.b16 %v3342_v32  ;;  %v3444_v53 = vunpack.c.l.b16 %v3345_v33  ;;  %v3226_v15 = vld [vmem:[#allocation2 + $0x54] sm:$0xe] }
  0xfd   : > { %3573 = vmatmul.bf16.gmra.mxu1 %v3469_v40  ;;  %v2666_v54 = vrot.slane %v2664_v28, 5  ;;  %v2674_v61 = vshll.u32 %v2482_v56, 16  ;;  %v1588_v28 = vld [vmem:[#allocation2 + $0x78] sm:$0xe]  ;;  %v11737_v35 = vrot.slane %v3226_v15, 9 }
  0xfe   : > { %v13650_v10 = vpop.f32.mrf.mxu3  ;;  %v2948_v0 = vpack.c.b16 %v2922_v42, %v2921_v38  ;;  %v2661_v4 = vor.u32 %v2660_v44, %v2657_v43  ;;  %v3470_v9 = vpack.c.b16 %v3444_v53, %v3443_v49  ;;  %v3351_v38 = vrot.slane %v3228_v24, 5  ;;  %v2484_v42 = vld [vmem:[#allocation2 + $0x64] sm:$0xf] }
  0xff   : > { %1946 = vmatmul.bf16.gmra.mxu2 %v1826_v57  ;;  %v2670_v57 = vrot.slane %v2668_v29, 4  ;;  %v1590_v29 = vld [vmem:[#allocation2 + $0x80] sm:$0x1]  ;;  %v2676_v33 = vrot.slane %v2674_v61, 5  ;;  %v11517_v44 = vrot.slane %v1588_v28, 9  ;;  %v2688_v60 = vshll.u32 %v2484_v42, 16 }
 0x100   : > { %v724_v26 = vpop.f32.mrf.mxu0  ;;  %v2692_v5 = vshrl.u32 %v2484_v42, 16  ;;  %v3352_v2 = vsel %vm13399_vm5, %v3350_v36, %v3351_v38  ;;  %v1592_v36 = vld [vmem:[#allocation2 + $0x88] sm:$0xf] }
 0x101   : > { %v2671_v11 = vor.u32 %v2670_v57, %v2666_v54  ;;  %v3446_v24 = vunpack.c.l.b16 %v3352_v2  ;;  %v1593_v2 = vld [vmem:[#allocation2 + $0x8c] sm:$0x1] }
 0x102   : > { %v1409_v13 = vpop.f32.mrf.mxu1  ;;  %v1907_v25 = vpop.f32.mrf.mxu2  ;;  %v2694_v28 = vrot.slane %v2692_v5, 4 }
 0x103   : > { %v13663_v30 = vadd.f32 %v1409_v13, %v724_v26  ;;  %v13670_v40 = vadd.f32 %v1907_v25, %v13527_v14  ;;  %v12787_v14 = vld [vmem:[#allocation2 + $0x48] sm:$0xff]  ;;  %v2662_v13 = vrot.slane %v2661_v4, 4  ;;  %v2672_v32 = vrot.slane %v2671_v11, 4  ;;  %v2483_v25 = vld [vmem:[#allocation2 + $0x60] sm:$0xf] }
 0x104   : > { %v2679_v53 = vshrl.u32 %v2483_v25, 16  ;;  %v2682_v57 = vshll.u32 %v2483_v25, 16  ;;  %v12788_v25 = vld [vmem:[#allocation2 + $0x54] sm:$0xff] }
 0x105   : > { %v2667_v49 = vsel %vm13246_vm2, %v2662_v13, %v2666_v54  ;;  %v2677_v59 = vsel %vm13246_vm2, %v2672_v32, %v2676_v33  ;;  %v1730_v54 = vsel %vm13399_vm5, %v11517_v44, %v1729_v22  ;;  %v3230_v32 = vld [vmem:[#allocation2 + $0x64] sm:$0xf] }
 0x106   : > { %v13675_v52 = vpop.f32.mrf.mxu3  ;;  %v2923_v11 = vunpack.c.l.b16 %v2667_v49  ;;  %v2684_v15 = vrot.slane %v2682_v57, 5  ;;  %v1806_v33 = vunpack.c.l.b16 %v1730_v54  ;;  %v3355_v49 = vrot.slane %v3230_v32, 5  ;;  %v12841_v54 = vld [vmem:[%s16482_s1 + $0x198] sm:$0xff] }
 0x107   : > { %3928 = vmatpush.bf16.msra.mxu2 %v12841_v54  ;;  %v1739_v32 = vrot.slane %v1593_v2, 5  ;;  %v12857_v54 = vld [vmem:[%s16482_s1 + $0x218] sm:$0xff] }
 0x108   : > { %v727_v6 = vpop.f32.mrf.mxu0  ;;  %5196 = vmatpush.bf16.msra.mxu0 %v12857_v54  ;;  %v3234_v54 = vld [vmem:[#allocation2 + $0x74] sm:$0x1] }
 0x10a   : > { %v1412_v17 = vpop.f32.mrf.mxu1  ;;  %v1909_v1 = vpop.f32.mrf.mxu2 }
 0x10b   : > { %v13677_v21 = vadd.f32 %v1412_v17, %v727_v6  ;;  %v13680_v26 = vadd.f32 %v1909_v1, %v13537_v39  ;;  %2310 = vmatmul.bf16.gmra.mxu3 %v12787_v14  ;;  %3056 = vmatmul.bf16.gmra.mxu0 %v2948_v0  ;;  %v1732_v39 = vrot.slane %v1590_v29, 5  ;;  %v3349_v0 = vsel %vm13399_vm5, %v11737_v35, %v3348_v18  ;;  %v2485_v29 = vld [vmem:[#allocation2 + $0x68] sm:$0x1] }
 0x10c   : > { %v2924_v17 = vunpack.c.l.b16 %v2677_v59  ;;  %v2681_v1 = vrot.slane %v2679_v53, 4  ;;  %v3445_v18 = vunpack.c.l.b16 %v3349_v0  ;;  %v3229_v59 = vld [vmem:[#allocation2 + $0x60] sm:$0xe]  ;;  %v1591_v0 = vld [vmem:[#allocation2 + $0x84] sm:$0xe] }
 0x10d   : > { %3578 = vmatmul.bf16.gmra.mxu1 %v3470_v9  ;;  %v1733_v9 = vsel %vm13399_vm5, %v1731_v48, %v1732_v39  ;;  %v2698_v48 = vshll.u32 %v2485_v29, 16 }
 0x10e   : > { %v13682_v43 = vpop.f32.mrf.mxu3  ;;  %v1807_v22 = vunpack.c.l.b16 %v1733_v9  ;;  %v2949_v35 = vpack.c.b16 %v2924_v17, %v2923_v11  ;;  %v2685_v38 = vor.u32 %v2684_v15, %v2681_v1  ;;  %v2486_v17 = vld [vmem:[#allocation2 + $0x6c] sm:$0xf]  ;;  %v11738_v1 = vrot.slane %v3229_v59, 9 }
 0x10f   : > { %1951 = vmatmul.bf16.gmra.mxu2 %v1827_v27  ;;  %v2690_v27 = vrot.slane %v2688_v60, 5  ;;  %v3231_v60 = vld [vmem:[#allocation2 + $0x68] sm:$0x1]  ;;  %v2700_v11 = vrot.slane %v2698_v48, 5  ;;  %v3357_v15 = vrot.slane %v3355_v49, 4 }
 0x110   : > { %v729_v56 = vpop.f32.mrf.mxu0 }
 0x111   : > { %v2695_v44 = vor.u32 %v2694_v28, %v2690_v27  ;;  %v11518_v28 = vrot.slane %v1591_v0, 9 }
 0x112   : > { %v1414_v14 = vpop.f32.mrf.mxu1  ;;  %v1912_v4 = vpop.f32.mrf.mxu2 }
 0x113   : > { %v13692_v6 = vadd.f32 %v1414_v14, %v729_v56  ;;  %v13699_v61 = vadd.f32 %v1912_v4, %v13545_v7  ;;  %v3471_v7 = vpack.c.b16 %v3446_v24, %v3445_v18  ;;  %v1736_v56 = vrot.slane %v1592_v36, 5  ;;  %v12849_v36 = vld [vmem:[%s16482_s1 + $0x1d8] sm:$0xff] }
 0x114   : > { %v1828_v14 = vpack.c.b16 %v1807_v22, %v1806_v33  ;;  %v2686_v4 = vrot.slane %v2685_v38, 4  ;;  %v2696_v9 = vrot.slane %v2695_v44, 4  ;;  %v3358_v18 = vrot.slane %v3231_v60, 5  ;;  %4674 = vmatpush.bf16.msrb.mxu3 %v12849_v36 }
 0x115   : > { %v1738_v29 = vrot.slane %v1736_v56, 4  ;;  %v1737_v59 = vsel %vm13399_vm5, %v11518_v28, %v1736_v56  ;;  %v2488_v56 = vld [vmem:[#allocation2 + $0x74] sm:$0x1] }
 0x116   : > { %v13701_v13 = vpop.f32.mrf.mxu3  ;;  %v2691_v22 = vsel %vm13246_vm2, %v2686_v4, %v2690_v27 }
 0x117   : > { %v1740_v60 = vsel %vm13399_vm5, %v1738_v29, %v1739_v32  ;;  %v12789_v29 = vld [vmem:[#allocation2 + $0x60] sm:$0xff] }
 0x118   : > { %v732_v42 = vpop.f32.mrf.mxu0  ;;  %v1809_v28 = vunpack.c.l.b16 %v1740_v60 }
 0x11a   : > { %v1417_v39 = vpop.f32.mrf.mxu1  ;;  %v1914_v53 = vpop.f32.mrf.mxu2 }
 0x11b   : > { %v13703_v57 = vadd.f32 %v1417_v39, %v732_v42  ;;  %v13706_v5 = vadd.f32 %v1914_v53, %v13563_v41  ;;  %2315 = vmatmul.bf16.gmra.mxu3 %v12788_v25  ;;  %3061 = vmatmul.bf16.gmra.mxu0 %v2949_v35  ;;  %v2487_v41 = vld [vmem:[#allocation2 + $0x70] sm:$0xf]  ;;  %v2703_v25 = vshrl.u32 %v2486_v17, 16  ;;  %v2706_v35 = vshll.u32 %v2486_v17, 16 }
 0x11c   : > { %v2701_v42 = vsel %vm13246_vm2, %v2696_v9, %v2700_v11  ;;  %v2716_v44 = vshrl.u32 %v2487_v41, 16  ;;  %v3359_v39 = vsel %vm13399_vm5, %v3357_v15, %v3358_v18  ;;  %v1595_v15 = vld [vmem:[#allocation2 + $0x94] sm:$0xf] }
 0x11d   : > { %3583 = vmatmul.bf16.gmra.mxu1 %v3471_v7  ;;  %v2712_v7 = vshll.u32 %v2487_v41, 16  ;;  %v2926_v2 = vunpack.c.l.b16 %v2701_v42  ;;  %v2705_v4 = vrot.slane %v2703_v25, 4  ;;  %v3448_v11 = vunpack.c.l.b16 %v3359_v39 }
 0x11e   : > { %v1452_v24 = vpop.f32.mrf.mxu3  ;;  %v1808_v41 = vunpack.c.l.b16 %v1737_v59  ;;  %v1743_v36 = vrot.slane %v1595_v15, 5  ;;  %v2722_v42 = vshll.u32 %v2488_v56, 16  ;;  %v3232_v59 = vld [vmem:[#allocation2 + $0x6c] sm:$0xe] }
 0x11f   : > { %1956 = vmatmul.bf16.gmra.mxu2 %v1828_v14  ;;  %v13712_v33 = vadd.f32 %v1452_v24, %v13650_v10  ;;  %v3356_v10 = vsel %vm13399_vm5, %v11738_v1, %v3355_v49  ;;  %v2925_v14 = vunpack.c.l.b16 %v2691_v22  ;;  %v2708_v49 = vrot.slane %v2706_v35, 5  ;;  %v3233_v24 = vld [vmem:[#allocation2 + $0x70] sm:$0xf] }
 0x120   : > { %v734_v38 = vpop.f32.mrf.mxu0  ;;  %v3447_v9 = vunpack.c.l.b16 %v3356_v10  ;;  %v2714_v17 = vrot.slane %v2712_v7, 5  ;;  %v2718_v1 = vrot.slane %v2716_v44, 4  ;;  %v1594_v44 = vld [vmem:[#allocation2 + $0x90] sm:$0xe]  ;;  %v1829_v60 = vpack.c.b16 %v1809_v28, %v1808_v41 }
 0x121   : > { %v2950_v32 = vpack.c.b16 %v2926_v2, %v2925_v14  ;;  %v2709_v22 = vor.u32 %v2708_v49, %v2705_v4  ;;  %v2489_v2 = vld [vmem:[#allocation2 + $0x78] sm:$0xf]  ;;  %v11519_v4 = vrot.slane %v1594_v44, 9  ;;  %v1745_v49 = vrot.slane %v1743_v36, 4 }
 0x122   : > { %v1419_v48 = vpop.f32.mrf.mxu1  ;;  %v1917_v27 = vpop.f32.mrf.mxu2  ;;  %v3472_v35 = vpack.c.b16 %v3448_v11, %v3447_v9  ;;  %v2724_v11 = vrot.slane %v2722_v42, 5  ;;  %v11739_v56 = vrot.slane %v3232_v59, 9 }
 0x123   : > { %v13725_v53 = vadd.f32 %v1419_v48, %v734_v38  ;;  %v13732_v0 = vadd.f32 %v1917_v27, %v13574_v62  ;;  %v2719_v38 = vor.u32 %v2718_v1, %v2714_v17  ;;  %v3362_v48 = vrot.slane %v3233_v24, 5  ;;  %v1596_v27 = vld [vmem:[#allocation2 + $0x98] sm:$0x1]  ;;  %v2490_v1 = vld [vmem:[#allocation2 + $0x7c] sm:$0xf] }
 0x124   : > { %v2710_v14 = vrot.slane %v2709_v22, 4  ;;  %v1746_v15 = vrot.slane %v1596_v27, 5  ;;  %v3365_v24 = vrot.slane %v3234_v54, 5  ;;  %v2736_v28 = vshll.u32 %v2490_v1, 16 }
 0x125   : > { %v2720_v9 = vrot.slane %v2719_v38, 4  ;;  %v1744_v38 = vsel %vm13399_vm5, %v11519_v4, %v1743_v36 }
 0x126   : > { %v1454_v18 = vpop.f32.mrf.mxu3  ;;  %v2715_v41 = vsel %vm13246_vm2, %v2710_v14, %v2714_v17  ;;  %v1747_v42 = vsel %vm13399_vm5, %v1745_v49, %v1746_v15  ;;  %v13765_v36 = vrot.slane %v2736_v28, 5  ;;  %v1810_v15 = vunpack.c.l.b16 %v1744_v38 }
 0x127   : > { %v13738_v62 = vadd.f32 %v1454_v18, %v13675_v52  ;;  %v3364_v18 = vrot.slane %v3362_v48, 4  ;;  %v2725_v22 = vsel %vm13246_vm2, %v2720_v9, %v2724_v11  ;;  %v2927_v27 = vunpack.c.l.b16 %v2715_v41  ;;  %v2491_v9 = vld [vmem:[#allocation2 + $0x80] sm:$0x1] }
 0x128   : > { %v737_v25 = vpop.f32.mrf.mxu0  ;;  %v2928_v14 = vunpack.c.l.b16 %v2725_v22  ;;  %v1598_v11 = vld [vmem:[#allocation2 + $0xa0] sm:$0xf]  ;;  %v2746_v41 = vshll.u32 %v2491_v9, 16  ;;  %v2493_v9 = vld [vmem:[#allocation2 + $0x88] sm:$0xf] }
 0x129   : > { %16495 = vst [vmem:[#allocation7_spill] sm:$0xff] %v13738_v62  ;;  %v2730_v62 = vshll.u32 %v2489_v2, 16  ;;  %v3366_v44 = vsel %vm13399_vm5, %v3364_v18, %v3365_v24  ;;  %v3236_v18 = vld [vmem:[#allocation2 + $0x7c] sm:$0xf]  ;;  %v12790_v24 = vld [vmem:[#allocation2 + $0x6c] sm:$0xff] }
 0x12a   : > { %v1422_v7 = vpop.f32.mrf.mxu1  ;;  %v1919_v10 = vpop.f32.mrf.mxu2  ;;  %v3450_v49 = vunpack.c.l.b16 %v3366_v44  ;;  %v3369_v44 = vrot.slane %v3236_v18, 5 }
 0x12b   : > { %v13740_v39 = vadd.f32 %v1422_v7, %v737_v25  ;;  %v13743_v52 = vadd.f32 %v1919_v10, %v13586_v46  ;;  %2320 = vmatmul.bf16.gmra.mxu3 %v12789_v29  ;;  %3066 = vmatmul.bf16.gmra.mxu0 %v2950_v32  ;;  %v2727_v7 = vshrl.u32 %v2489_v2, 16  ;;  %v2740_v29 = vshrl.u32 %v2490_v1, 16 }
 0x12c   : > { %v2732_v54 = vrot.slane %v2730_v62, 5 }
 0x12d   : > { %3588 = vmatmul.bf16.gmra.mxu1 %v3472_v35  ;;  %v2729_v59 = vrot.slane %v2727_v7, 4  ;;  %v2742_v2 = vrot.slane %v2740_v29, 4 }
 0x12e   : > { %v1457_v25 = vpop.f32.mrf.mxu3 }
 0x12f   : > { %1961 = vmatmul.bf16.gmra.mxu2 %v1829_v60  ;;  %v13746_v46 = vadd.f32 %v1457_v25, %v13682_v43  ;;  %v3363_v43 = vsel %vm13399_vm5, %v11739_v56, %v3362_v48  ;;  %v12885_v48 = vld [vmem:[%s16484_s3 + $0x38] sm:$0xff]  ;;  %v1811_v56 = vunpack.c.l.b16 %v1747_v42  ;;  %v2733_v62 = vor.u32 %v2732_v54, %v2729_v59  ;;  %v3237_v59 = vld [vmem:[#allocation2 + $0x80] sm:$0x1] }
 0x130   : > { %v739_v32 = vpop.f32.mrf.mxu0  ;;  %v3449_v4 = vunpack.c.l.b16 %v3363_v43  ;;  %6258 = vmatpush.bf16.msra.mxu1 %v12885_v48  ;;  %v2951_v25 = vpack.c.b16 %v2928_v14, %v2927_v27  ;;  %v2743_v7 = vor.u32 %v2742_v2, %v13765_v36  ;;  %v1599_v43 = vld [vmem:[#allocation2 + $0xa4] sm:$0x1]  ;;  %v3235_v42 = vld [vmem:[#allocation2 + $0x78] sm:$0xe]  ;;  %v2748_v14 = vrot.slane %v2746_v41, 5  ;;  %v12840_v2 = vld [vmem:[%s16482_s1 + $0x190] sm:$0xff] }
 0x131   : > { %v2734_v38 = vrot.slane %v2733_v62, 4  ;;  %v2492_v48 = vld [vmem:[#allocation2 + $0x84] sm:$0xf]  ;;  %v3371_v62 = vrot.slane %v3369_v44, 4  ;;  %v3372_v18 = vrot.slane %v3237_v59, 5  ;;  %3929 = vmatpush.bf16.msra.mxu2 %v12840_v2  ;;  %v2760_v41 = vshll.u32 %v2493_v9, 16 }
 0x132   : > { %v1424_v35 = vpop.f32.mrf.mxu1  ;;  %v1922_v17 = vpop.f32.mrf.mxu2  ;;  %v3473_v29 = vpack.c.b16 %v3450_v49, %v3449_v4  ;;  %v2744_v27 = vrot.slane %v2743_v7, 4 }
 0x133   : > { %v13760_v10 = vadd.f32 %v1424_v35, %v739_v32  ;;  %v13763_v60 = vadd.f32 %v1922_v17, %v13594_v20  ;;  %v1750_v32 = vrot.slane %v1598_v11, 5  ;;  %v1597_v35 = vld [vmem:[#allocation2 + $0x9c] sm:$0xe]  ;;  %v1753_v11 = vrot.slane %v1599_v43, 5 }
 0x134   : > { %v11520_v4 = vrot.slane %v1597_v35, 9  ;;  %v2749_v7 = vsel %vm13246_vm2, %v2744_v27, %v2748_v14  ;;  %v12848_v35 = vld [vmem:[%s16482_s1 + $0x1d0] sm:$0xff]  ;;  %v3373_v59 = vsel %vm13399_vm5, %v3371_v62, %v3372_v18  ;;  %v1601_v62 = vld [vmem:[#allocation2 + $0xac] sm:$0xf] }
 0x135   : > { %v1752_v49 = vrot.slane %v1750_v32, 4  ;;  %4675 = vmatpush.bf16.msrb.mxu3 %v12848_v35  ;;  %v2930_v14 = vunpack.c.l.b16 %v2749_v7 }
 0x136   : > { %v1459_v1 = vpop.f32.mrf.mxu3 }
 0x137   : > { %v13771_v20 = vadd.f32 %v1459_v1, %v13701_v13  ;;  %v1830_v13 = vpack.c.b16 %v1811_v56, %v1810_v15  ;;  %v11740_v1 = vrot.slane %v3235_v42, 9  ;;  %v2739_v15 = vsel %vm13246_vm2, %v2734_v38, %v13765_v36 }
 0x138   : > { %v3032_v28 = vpop.f32.mrf.mxu0  ;;  %v2751_v56 = vshrl.u32 %v2492_v48, 16  ;;  %v1754_v38 = vsel %vm13399_vm5, %v1752_v49, %v1753_v11  ;;  %v2929_v27 = vunpack.c.l.b16 %v2739_v15  ;;  %v3452_v11 = vunpack.c.l.b16 %v3373_v59 }
 0x139   : > { %16496 = vst [vmem:[#allocation8_spill] sm:$0xff] %v13771_v20  ;;  %v1813_v15 = vunpack.c.l.b16 %v1754_v38 }
 0x13a   : > { %v3554_v22 = vpop.f32.mrf.mxu1  ;;  %v1924_v17 = vpop.f32.mrf.mxu2  ;;  %v2753_v2 = vrot.slane %v2751_v56, 4 }
 0x13b   : > { %v13775_v54 = vadd.f32 %v1924_v17, %v13612_v58  ;;  %2325 = vmatmul.bf16.gmra.mxu3 %v12790_v24  ;;  %3071 = vmatmul.bf16.gmra.mxu0 %v2951_v25  ;;  %v2754_v24 = vshll.u32 %v2492_v48, 16  ;;  %v1751_v17 = vsel %vm13399_vm5, %v11520_v4, %v1750_v32  ;;  %v13802_v32 = vrot.slane %v2760_v41, 5 }
 0x13d   : > { %3593 = vmatmul.bf16.gmra.mxu1 %v3473_v29  ;;  %v2764_v29 = vshrl.u32 %v2493_v9, 16  ;;  %v2756_v48 = vrot.slane %v2754_v24, 5  ;;  %v12791_v24 = vld [vmem:[#allocation2 + $0x78] sm:$0xff] }
 0x13e   : > { %v2286_v58 = vpop.f32.mrf.mxu3 }
 0x13f   : > { %1966 = vmatmul.bf16.gmra.mxu2 %v1830_v13  ;;  %v2398_v25 = vadd.f32 %v2286_v58, %v13670_v40  ;;  %v3370_v40 = vsel %vm13399_vm5, %v11740_v1, %v3369_v44  ;;  %v2766_v4 = vrot.slane %v2764_v29, 4  ;;  %v12856_v44 = vld [vmem:[%s16482_s1 + $0x210] sm:$0xff]  ;;  %v2494_v1 = vld [vmem:[#allocation2 + $0x8c] sm:$0x1]  ;;  %v1812_v58 = vunpack.c.l.b16 %v1751_v17 }
 0x140   : > { %v3034_v43 = vpop.f32.mrf.mxu0  ;;  %v3451_v49 = vunpack.c.l.b16 %v3370_v40  ;;  %5197 = vmatpush.bf16.msra.mxu0 %v12856_v44  ;;  %v2757_v56 = vor.u32 %v2756_v48, %v2753_v2  ;;  %v2770_v41 = vshll.u32 %v2494_v1, 16  ;;  %v3238_v2 = vld [vmem:[#allocation2 + $0x84] sm:$0xe]  ;;  %v3240_v48 = vld [vmem:[#allocation2 + $0x8c] sm:$0x1] }
 0x141   : > { %v3144_v42 = vadd.f32 %v3032_v28, %v2398_v25  ;;  %v2952_v25 = vpack.c.b16 %v2930_v14, %v2929_v27  ;;  %v2767_v7 = vor.u32 %v2766_v4, %v13802_v32  ;;  %v1831_v17 = vpack.c.b16 %v1813_v15, %v1812_v58  ;;  %v2496_v1 = vld [vmem:[#allocation2 + $0x94] sm:$0xf] }
 0x142   : > { %v3556_v36 = vpop.f32.mrf.mxu1  ;;  %v1927_v13 = vpop.f32.mrf.mxu2  ;;  %v3474_v35 = vpack.c.b16 %v3452_v11, %v3451_v49  ;;  %v2758_v38 = vrot.slane %v2757_v56, 4  ;;  %v2772_v4 = vrot.slane %v2770_v41, 5  ;;  %v2495_v49 = vld [vmem:[#allocation2 + $0x90] sm:$0xf]  ;;  %v3379_v15 = vrot.slane %v3240_v48, 5 }
 0x143   : > { %v13798_v9 = vadd.f32 %v1927_v13, %v13623_v37  ;;  %v13800_v28 = vadd.f32 %v3554_v22, %v3144_v42  ;;  %v3239_v37 = vld [vmem:[#allocation2 + $0x88] sm:$0xf]  ;;  %v1757_v42 = vrot.slane %v1601_v62, 5  ;;  %v2768_v14 = vrot.slane %v2767_v7, 4 }
 0x144   : > { %v1600_v13 = vld [vmem:[#allocation2 + $0xa8] sm:$0xe]  ;;  %v3376_v44 = vrot.slane %v3239_v37, 5 }
 0x145   : > { %16497 = vst [vmem:[#allocation9_spill] sm:$0xff] %v13800_v28  ;;  %v1602_v28 = vld [vmem:[#allocation2 + $0xb0] sm:$0x1]  ;;  %v1759_v11 = vrot.slane %v1757_v42, 4 }
 0x146   : > { %v2288_v18 = vpop.f32.mrf.mxu3  ;;  %v1760_v62 = vrot.slane %v1602_v28, 5  ;;  %v3378_v58 = vrot.slane %v3376_v44, 4 }
 0x147   : > { %v2399_v22 = vadd.f32 %v2288_v18, %v13680_v26  ;;  %v11741_v18 = vrot.slane %v3238_v2, 9 }
 0x148   : > { %v3037_v29 = vpop.f32.mrf.mxu0 }
 0x149   : > { %v3145_v40 = vadd.f32 %v3034_v43, %v2399_v22  ;;  %v11521_v43 = vrot.slane %v1600_v13, 9  ;;  %v2773_v22 = vsel %vm13246_vm2, %v2768_v14, %v2772_v4 }
 0x14a   : > { %v3559_v59 = vpop.f32.mrf.mxu1  ;;  %v1929_v20 = vpop.f32.mrf.mxu2 }
 0x14b   : > { %v13810_v26 = vadd.f32 %v1929_v20, %v13635_v8  ;;  %v13812_v27 = vadd.f32 %v3556_v36, %v3145_v40  ;;  %2330 = vmatmul.bf16.gmra.mxu3 %v12791_v24  ;;  %3076 = vmatmul.bf16.gmra.mxu0 %v2952_v25  ;;  %v2763_v8 = vsel %vm13246_vm2, %v2758_v38, %v13802_v32  ;;  %v2775_v20 = vshrl.u32 %v2495_v49, 16 }
 0x14c   : > { %v2778_v36 = vshll.u32 %v2495_v49, 16  ;;  %v2784_v24 = vshll.u32 %v2496_v1, 16  ;;  %v2788_v25 = vshrl.u32 %v2496_v1, 16  ;;  %v1758_v28 = vsel %vm13399_vm5, %v11521_v43, %v1757_v42  ;;  %v12839_v49 = vld [vmem:[%s16482_s1 + $0x188] sm:$0xff]  ;;  %v2497_v1 = vld [vmem:[#allocation2 + $0x98] sm:$0x1] }
 0x14d   : > { %3598 = vmatmul.bf16.gmra.mxu1 %v3474_v35  ;;  %v1761_v40 = vsel %vm13399_vm5, %v1759_v11, %v1760_v62  ;;  %v3377_v32 = vsel %vm13399_vm5, %v11741_v18, %v3376_v44  ;;  %v2932_v38 = vunpack.c.l.b16 %v2773_v22  ;;  %v2777_v2 = vrot.slane %v2775_v20, 4  ;;  %v12884_v44 = vld [vmem:[%s16484_s3 + $0x30] sm:$0xff]  ;;  %v1604_v62 = vld [vmem:[#allocation2 + $0xb8] sm:$0xf]  ;;  %3930 = vmatpush.bf16.msra.mxu2 %v12839_v49 }
 0x14e   : > { %v2291_v56 = vpop.f32.mrf.mxu3  ;;  %v2780_v48 = vrot.slane %v2778_v36, 5  ;;  %v2790_v4 = vrot.slane %v2788_v25, 4  ;;  %v3453_v43 = vunpack.c.l.b16 %v3377_v32  ;;  %6259 = vmatpush.bf16.msra.mxu1 %v12884_v44  ;;  %v1815_v18 = vunpack.c.l.b16 %v1761_v40 }
 0x14f   : > { %1971 = vmatmul.bf16.gmra.mxu2 %v1831_v17  ;;  %v2400_v37 = vadd.f32 %v2291_v56, %v13699_v61  ;;  %v3380_v61 = vsel %vm13399_vm5, %v3378_v58, %v3379_v15  ;;  %v2931_v17 = vunpack.c.l.b16 %v2763_v8  ;;  %v3242_v15 = vld [vmem:[#allocation2 + $0x94] sm:$0xf]  ;;  %v12792_v8 = vld [vmem:[#allocation2 + $0x84] sm:$0xff]  ;;  %v1764_v25 = vrot.slane %v1604_v62, 5  ;;  %v2499_v62 = vld [vmem:[#allocation2 + $0xa0] sm:$0xf] }
 0x150   : > { %v3039_v7 = vpop.f32.mrf.mxu0  ;;  %v3454_v11 = vunpack.c.l.b16 %v3380_v61  ;;  %v2781_v58 = vor.u32 %v2780_v48, %v2777_v2  ;;  %v1603_v61 = vld [vmem:[#allocation2 + $0xb4] sm:$0xe]  ;;  %v3383_v44 = vrot.slane %v3242_v15, 5  ;;  %v3241_v2 = vld [vmem:[#allocation2 + $0x90] sm:$0xe] }
 0x151   : > { %v3146_v41 = vadd.f32 %v3037_v29, %v2400_v37  ;;  %v13833_v29 = vrot.slane %v2784_v24, 5  ;;  %v2953_v20 = vpack.c.b16 %v2932_v38, %v2931_v17  ;;  %v2794_v37 = vshll.u32 %v2497_v1, 16  ;;  %v3243_v48 = vld [vmem:[#allocation2 + $0x98] sm:$0x1] }
 0x152   : > { %v3561_v35 = vpop.f32.mrf.mxu1  ;;  %v1932_v13 = vpop.f32.mrf.mxu2  ;;  %v3475_v24 = vpack.c.b16 %v3454_v11, %v3453_v43  ;;  %v2782_v40 = vrot.slane %v2781_v58, 4  ;;  %v2498_v43 = vld [vmem:[#allocation2 + $0x9c] sm:$0xf]  ;;  %v11522_v11 = vrot.slane %v1603_v61, 9  ;;  %v1766_v1 = vrot.slane %v1764_v25, 4 }
 0x153   : > { %v13829_v14 = vadd.f32 %v1932_v13, %v13643_v50  ;;  %v13831_v42 = vadd.f32 %v3559_v59, %v3146_v41  ;;  %v1814_v59 = vunpack.c.l.b16 %v1758_v28  ;;  %v2791_v36 = vor.u32 %v2790_v4, %v13833_v29  ;;  %v1605_v13 = vld [vmem:[#allocation2 + $0xbc] sm:$0x1] }
 0x154   : > { %v2796_v4 = vrot.slane %v2794_v37, 5  ;;  %v3386_v58 = vrot.slane %v3243_v48, 5  ;;  %v2812_v37 = vshrl.u32 %v2499_v62, 16  ;;  %v1765_v61 = vsel %vm13399_vm5, %v11522_v11, %v1764_v25 }
 0x155   : > { %v1832_v28 = vpack.c.b16 %v1815_v18, %v1814_v59  ;;  %v11742_v59 = vrot.slane %v3241_v2, 9  ;;  %v3385_v18 = vrot.slane %v3383_v44, 4 }
 0x156   : > { %v2293_v50 = vpop.f32.mrf.mxu3 }
 0x157   : > { %v2401_v56 = vadd.f32 %v2293_v50, %v13706_v5  ;;  %v12838_v5 = vld [vmem:[%s16482_s1 + $0x180] sm:$0xff]  ;;  %v1767_v50 = vrot.slane %v1605_v13, 5 }
 0x158   : > { %v3042_v22 = vpop.f32.mrf.mxu0  ;;  %3931 = vmatpush.bf16.msra.mxu2 %v12838_v5 }
 0x159   : > { %v3147_v41 = vadd.f32 %v3039_v7, %v2401_v56  ;;  %v2792_v7 = vrot.slane %v2791_v36, 4  ;;  %v2802_v56 = vshll.u32 %v2498_v43, 16  ;;  %v2808_v36 = vshll.u32 %v2499_v62, 16  ;;  %v2500_v62 = vld [vmem:[#allocation2 + $0xa4] sm:$0x1] }
 0x15a   : > { %v3564_v32 = vpop.f32.mrf.mxu1  ;;  %v1934_v49 = vpop.f32.mrf.mxu2 }
 0x15b   : > { %v13847_v17 = vadd.f32 %v1934_v49, %v13663_v30  ;;  %v13849_v38 = vadd.f32 %v3561_v35, %v3147_v41  ;;  %2335 = vmatmul.bf16.gmra.mxu3 %v12792_v8  ;;  %3081 = vmatmul.bf16.gmra.mxu0 %v2953_v20  ;;  %v2787_v30 = vsel %vm13246_vm2, %v2782_v40, %v13833_v29  ;;  %v2799_v35 = vshrl.u32 %v2498_v43, 16 }
 0x15c   : > { %v2797_v20 = vsel %vm13246_vm2, %v2792_v7, %v2796_v4  ;;  %v1768_v49 = vsel %vm13399_vm5, %v1766_v1, %v1767_v50  ;;  %v2933_v2 = vunpack.c.l.b16 %v2787_v30  ;;  %v2804_v7 = vrot.slane %v2802_v56, 5  ;;  %v12793_v30 = vld [vmem:[#allocation2 + $0x90] sm:$0xff] }
 0x15d   : > { %3603 = vmatmul.bf16.gmra.mxu1 %v3475_v24  ;;  %v12847_v24 = vld [vmem:[%s16482_s1 + $0x1c8] sm:$0xff]  ;;  %v2934_v48 = vunpack.c.l.b16 %v2797_v20  ;;  %v2801_v5 = vrot.slane %v2799_v35, 4  ;;  %v2810_v25 = vrot.slane %v2808_v36, 5  ;;  %v2814_v43 = vrot.slane %v2812_v37, 4 }
 0x15e   : > { %v2296_v15 = vpop.f32.mrf.mxu3  ;;  %4676 = vmatpush.bf16.msrb.mxu3 %v12847_v24  ;;  %v2818_v56 = vshll.u32 %v2500_v62, 16  ;;  %v3244_v24 = vld [vmem:[#allocation2 + $0x9c] sm:$0xe] }
 0x15f   : > { %1976 = vmatmul.bf16.gmra.mxu2 %v1832_v28  ;;  %v2402_v8 = vadd.f32 %v2296_v15, %v13732_v0  ;;  %v3384_v0 = vsel %vm13399_vm5, %v11742_v59, %v3383_v44  ;;  %v3387_v28 = vsel %vm13399_vm5, %v3385_v18, %v3386_v58  ;;  %v12855_v44 = vld [vmem:[%s16482_s1 + $0x208] sm:$0xff]  ;;  %v1816_v59 = vunpack.c.l.b16 %v1765_v61  ;;  %v3245_v15 = vld [vmem:[#allocation2 + $0xa0] sm:$0xf] }
 0x160   : > { %v3044_v41 = vpop.f32.mrf.mxu0  ;;  %v3455_v11 = vunpack.c.l.b16 %v3384_v0  ;;  %v3456_v1 = vunpack.c.l.b16 %v3387_v28  ;;  %5198 = vmatpush.bf16.msra.mxu0 %v12855_v44  ;;  %v1817_v18 = vunpack.c.l.b16 %v1768_v49  ;;  %v2805_v58 = vor.u32 %v2804_v7, %v2801_v5  ;;  %v3246_v44 = vld [vmem:[#allocation2 + $0xa4] sm:$0x1]  ;;  %v2501_v61 = vld [vmem:[#allocation2 + $0xa8] sm:$0xf] }
 0x161   : > { %v3148_v13 = vadd.f32 %v3042_v22, %v2402_v8  ;;  %v2815_v35 = vor.u32 %v2814_v43, %v2810_v25  ;;  %v3393_v43 = vrot.slane %v3246_v44, 5  ;;  %v2503_v44 = vld [vmem:[#allocation2 + $0xb0] sm:$0x1] }
 0x162   : > { %v3566_v29 = vpop.f32.mrf.mxu1  ;;  %v1937_v40 = vpop.f32.mrf.mxu2  ;;  %v3476_v20 = vpack.c.b16 %v3456_v1, %v3455_v11  ;;  %v1833_v28 = vpack.c.b16 %v1817_v18, %v1816_v59  ;;  %v2823_v11 = vshrl.u32 %v2501_v61, 16  ;;  %v2826_v1 = vshll.u32 %v2501_v61, 16 }
 0x163   : > { %v13869_v4 = vadd.f32 %v1937_v40, %v13677_v21  ;;  %v13871_v22 = vadd.f32 %v3564_v32, %v3148_v13  ;;  %v2954_v32 = vpack.c.b16 %v2934_v48, %v2933_v2  ;;  %v3390_v13 = vrot.slane %v3245_v15, 5 }
 0x164   : > { %v2806_v40 = vrot.slane %v2805_v58, 4  ;;  %v2820_v2 = vrot.slane %v2818_v56, 5  ;;  %v11743_v48 = vrot.slane %v3244_v24, 9 }
 0x165   : > { %v3392_v7 = vrot.slane %v3390_v13, 4 }
 0x166   : > { %v2298_v50 = vpop.f32.mrf.mxu3  ;;  %v3391_v15 = vsel %vm13399_vm5, %v11743_v48, %v3390_v13 }
 0x167   : > { %v2403_v21 = vadd.f32 %v2298_v50, %v13743_v52  ;;  %v2816_v52 = vrot.slane %v2815_v35, 4  ;;  %v2811_v50 = vsel %vm13246_vm2, %v2806_v40, %v2810_v25  ;;  %v2825_v35 = vrot.slane %v2823_v11, 4 }
 0x168   : > { %v3047_v8 = vpop.f32.mrf.mxu0  ;;  %v2828_v25 = vrot.slane %v2826_v1, 5 }
 0x169   : > { %v3149_v36 = vadd.f32 %v3044_v41, %v2403_v21  ;;  %v2502_v41 = vld [vmem:[#allocation2 + $0xac] sm:$0xf] }
 0x16a   : > { %v3569_v37 = vpop.f32.mrf.mxu1  ;;  %v1939_v0 = vpop.f32.mrf.mxu2  ;;  %v2832_v59 = vshll.u32 %v2502_v41, 16  ;;  %v2836_v18 = vshrl.u32 %v2502_v41, 16  ;;  %v2829_v61 = vor.u32 %v2828_v25, %v2825_v35  ;;  %v3247_v25 = vld [vmem:[#allocation2 + $0xa8] sm:$0xe] }
 0x16b   : > { %v13878_v49 = vadd.f32 %v1939_v0, %v13692_v6  ;;  %v13880_v5 = vadd.f32 %v3566_v29, %v3149_v36  ;;  %2340 = vmatmul.bf16.gmra.mxu3 %v12793_v30  ;;  %3086 = vmatmul.bf16.gmra.mxu0 %v2954_v32  ;;  %v2821_v29 = vsel %vm13246_vm2, %v2816_v52, %v2820_v2  ;;  %v328_v52 = vld [vmem:[%s13171_s18 + $0x180] sm:$0xff]  ;;  %v329_v2 = vld [vmem:[%s13171_s18 + $0x188] sm:$0xff] }
 0x16c   : > { %v3394_v32 = vsel %vm13399_vm5, %v3392_v7, %v3393_v43  ;;  %v13896_v0 = vrot.slane %v2832_v59, 5  ;;  %v2838_v13 = vrot.slane %v2836_v18, 4  ;;  %v382_v41 = vmax.f32 %v328_v52, 0.0  ;;  %v12794_v43 = vld [vmem:[#allocation2 + $0x9c] sm:$0xff] }
 0x16d   : > { %3608 = vmatmul.bf16.gmra.mxu1 %v3476_v20  ;;  %v2936_v20 = vunpack.c.l.b16 %v2821_v29  ;;  %v3458_v40 = vunpack.c.l.b16 %v3394_v32  ;;  %v330_v32 = vld [vmem:[%s13171_s18 + $0x190] sm:$0x3] }
 0x16e   : > { %v2301_v62 = vpop.f32.mrf.mxu3  ;;  %v2839_v1 = vor.u32 %v2838_v13, %v13896_v0 }
 0x16f   : > { %1981 = vmatmul.bf16.gmra.mxu2 %v1833_v28  ;;  %v2404_v6 = vadd.f32 %v2301_v62, %v13763_v60  ;;  %v2935_v60 = vunpack.c.l.b16 %v2811_v50  ;;  %v3457_v28 = vunpack.c.l.b16 %v3391_v15  ;;  %v2842_v62 = vshll.u32 %v2503_v44, 16 }
 0x170   : > { %v3049_v58 = vpop.f32.mrf.mxu0  ;;  %v2830_v15 = vrot.slane %v2829_v61, 4  ;;  %v2840_v13 = vrot.slane %v2839_v1, 4  ;;  %v11744_v61 = vrot.slane %v3247_v25, 9 }
 0x171   : > { %v3150_v21 = vadd.f32 %v3047_v8, %v2404_v6  ;;  %v12883_v8 = vld [vmem:[%s16484_s3 + $0x28] sm:$0xff]  ;;  %v2955_v11 = vpack.c.b16 %v2936_v20, %v2935_v60  ;;  %v3477_v6 = vpack.c.b16 %v3458_v40, %v3457_v28  ;;  %v12822_v20 = vld [vmem:[#allocation2 + $0x18] sm:$0xff]  ;;  %v2844_v28 = vrot.slane %v2842_v62, 5 }
 0x172   : > { %v3571_v30 = vpop.f32.mrf.mxu1  ;;  %v1942_v56 = vpop.f32.mrf.mxu2  ;;  %6260 = vmatpush.bf16.msra.mxu1 %v12883_v8  ;;  %v384_v8 = vmax.f32 %v330_v32, 0.0  ;;  %v2505_v40 = vld [vmem:[#allocation2 + $0xb8] sm:$0xf] }
 0x173   : > { %v13892_v36 = vadd.f32 %v1942_v56, %v13703_v57  ;;  %v13894_v24 = vadd.f32 %v3569_v37, %v3150_v21  ;;  %v3248_v57 = vld [vmem:[#allocation2 + $0xac] sm:$0xf]  ;;  %v383_v37 = vmax.f32 %v329_v2, 0.0  ;;  %v3249_v56 = vld [vmem:[#allocation2 + $0xb0] sm:$0x1] }
 0x174   : > { %v3397_v21 = vrot.slane %v3248_v57, 5  ;;  %v438_v44 = vpack.c.bf16 %v384_v8, %v384_v8  ;;  %v3400_v2 = vrot.slane %v3249_v56, 5 }
 0x175   : > { %v13033_v29 = vpack.c.bf16 %v383_v37, %v382_v41  ;;  %v2845_v37 = vsel %vm13246_vm2, %v2840_v13, %v2844_v28  ;;  %v2506_v28 = vld [vmem:[#allocation2 + $0xbc] sm:$0x1] }
 0x176   : > { %v2303_v48 = vpop.f32.mrf.mxu3  ;;  %v3399_v52 = vrot.slane %v3397_v21, 4  ;;  %492 = vst [vmem:[#allocation2 + $0xc8] sm:$0x1] %v438_v44  ;;  %v3251_v44 = vld [vmem:[#allocation2 + $0xb8] sm:$0xf] }
 0x177   : > { %v2405_v7 = vadd.f32 %v2303_v48, %v13775_v54  ;;  %13042 = vst [vmem:[#allocation2 + $0xc0] sm:$0xff] %v13033_v29  }
 0x178   : > { %v3052_v50 = vpop.f32.mrf.mxu0  ;;  %v3401_v29 = vsel %vm13399_vm5, %v3399_v52, %v3400_v2  ;;  %v12795_v52 = vld [vmem:[#allocation2 + $0xa8] sm:$0xff] }
 0x179   : > { %v3151_v59 = vadd.f32 %v3049_v58, %v2405_v7  ;;  %v2504_v58 = vld [vmem:[#allocation2 + $0xb4] sm:$0xf]  ;;  %v2856_v7 = vshll.u32 %v2505_v40, 16  ;;  %v3460_v13 = vunpack.c.l.b16 %v3401_v29 }
 0x17a   : > { %v3574_v18 = vpop.f32.mrf.mxu1  ;;  %v1944_v35 = vpop.f32.mrf.mxu2  ;;  %v2847_v57 = vshrl.u32 %v2504_v58, 16 }
 0x17b   : > { %v13907_v54 = vadd.f32 %v1944_v35, %v13725_v53  ;;  %v13909_v60 = vadd.f32 %v3571_v30, %v3151_v59  ;;  %2345 = vmatmul.bf16.gmra.mxu3 %v12794_v43  ;;  %3091 = vmatmul.bf16.gmra.mxu0 %v2955_v11  ;;  %v2835_v53 = vsel %vm13246_vm2, %v2830_v15, %v13896_v0  ;;  %v2850_v30 = vshll.u32 %v2504_v58, 16  ;;  %v12846_v11 = vld [vmem:[%s16482_s1 + $0x1c0] sm:$0xff] }
 0x17c   : > { %v2860_v43 = vshrl.u32 %v2505_v40, 16  ;;  %v3398_v0 = vsel %vm13399_vm5, %v11744_v61, %v3397_v21  ;;  %4677 = vmatpush.bf16.msrb.mxu3 %v12846_v11  ;;  %v2937_v59 = vunpack.c.l.b16 %v2835_v53  ;;  %v2938_v15 = vunpack.c.l.b16 %v2845_v37  ;;  %v12854_v21 = vld [vmem:[%s16482_s1 + $0x200] sm:$0xff]  ;;  %v3252_v11 = vld [vmem:[#allocation2 + $0xbc] sm:$0x1] }
 0x17d   : > { %3613 = vmatmul.bf16.gmra.mxu1 %v3477_v6  ;;  %v2849_v32 = vrot.slane %v2847_v57, 4  ;;  %v2852_v35 = vrot.slane %v2850_v30, 5  ;;  %5199 = vmatpush.bf16.msra.mxu0 %v12854_v21 }
 0x17e   : > { %v2306_v48 = vpop.f32.mrf.mxu3  ;;  %v2862_v8 = vrot.slane %v2860_v43, 4  ;;  %v3250_v43 = vld [vmem:[#allocation2 + $0xb4] sm:$0xe] }
 0x17f   : > { %3932 = vmatmul.bf16.vlgmr.msra.gmra.mxu2 %v12822_v20  ;;  %v2406_v41 = vadd.f32 %v2306_v48, %v13798_v9  ;;  %v3459_v20 = vunpack.c.l.b16 %v3398_v0  ;;  %v2853_v40 = vor.u32 %v2852_v35, %v2849_v32  ;;  %v3407_v32 = vrot.slane %v3252_v11, 5  ;;  %v12882_v11 = vld [vmem:[%s16484_s3 + $0x20] sm:$0xff] }
 0x180   : > { %v3054_v1 = vpop.f32.mrf.mxu0  ;;  %6261 = vmatpush.bf16.msra.mxu1 %v12882_v11 }
 0x181   : > { %v3152_v62 = vadd.f32 %v3052_v50, %v2406_v41  ;;  %v2858_v50 = vrot.slane %v2856_v7, 5  ;;  %v3478_v53 = vpack.c.b16 %v3460_v13, %v3459_v20  ;;  %v3404_v41 = vrot.slane %v3251_v44, 5 }
 0x182   : > { %v13920_v6 = vpop.f32.mrf.mxu1  ;;  %v1947_v9 = vpop.f32.mrf.mxu2  ;;  %v2854_v7 = vrot.slane %v2853_v40, 4 }
 0x183   : > { %v13927_v25 = vadd.f32 %v1947_v9, %v13740_v39  ;;  %v13929_v56 = vadd.f32 %v3574_v18, %v3152_v62  ;;  %v2956_v39 = vpack.c.b16 %v2938_v15, %v2937_v59  ;;  %v2863_v2 = vor.u32 %v2862_v8, %v2858_v50  ;;  %v2507_v9 = vld [vmem:[#allocation2 + $0xc0] sm:$0xf]  ;;  %v2508_v59 = vld [vmem:[#allocation2 + $0xc4] sm:$0xf] }
 0x184   : > { %v2866_v18 = vshll.u32 %v2506_v28, 16  ;;  %v11745_v15 = vrot.slane %v3250_v43, 9  ;;  %v2859_v8 = vsel %vm13246_vm2, %v2854_v7, %v2858_v50  ;;  %v2871_v21 = vshrl.u32 %v2507_v9, 16 }
 0x185   : > { %v2864_v0 = vrot.slane %v2863_v2, 4  ;;  %v2874_v20 = vshll.u32 %v2507_v9, 16  ;;  %v2880_v28 = vshll.u32 %v2508_v59, 16  ;;  %v2939_v2 = vunpack.c.l.b16 %v2859_v8 }
 0x186   : > { %v2308_v58 = vpop.f32.mrf.mxu3  ;;  %v2868_v29 = vrot.slane %v2866_v18, 5 }
 0x187   : > { %v2407_v61 = vadd.f32 %v2308_v58, %v13810_v26  ;;  %v12823_v26 = vld [vmem:[#allocation2 + $0x24] sm:$0xff]  ;;  %v2884_v58 = vshrl.u32 %v2508_v59, 16  ;;  %v2882_v43 = vrot.slane %v2880_v28, 5 }
 0x188   : > { %v3057_v48 = vpop.f32.mrf.mxu0  ;;  %v2869_v13 = vsel %vm13246_vm2, %v2864_v0, %v2868_v29  ;;  %v2509_v0 = vld [vmem:[#allocation2 + $0xc8] sm:$0x1]  ;;  %v3254_v59 = vld [vmem:[#allocation2 + $0xc4] sm:$0xf] }
 0x189   : > { %v13935_v57 = vadd.f32 %v3054_v1, %v2407_v61  ;;  %v3406_v1 = vrot.slane %v3404_v41, 4  ;;  %v2940_v18 = vunpack.c.l.b16 %v2869_v13 }
 0x18a   : > { %v3579_v30 = vpop.f32.mrf.mxu1  ;;  %v1949_v37 = vpop.f32.mrf.mxu2 }
 0x18b   : > { %v13938_v62 = vadd.f32 %v1949_v37, %v13760_v10  ;;  %2350 = vmatmul.bf16.gmra.mxu3 %v12795_v52  ;;  %3096 = vmatmul.bf16.gmra.mxu0 %v2956_v39  ;;  %v3405_v52 = vsel %vm13399_vm5, %v11745_v15, %v3404_v41  ;;  %v3408_v50 = vsel %vm13399_vm5, %v3406_v1, %v3407_v32  ;;  %v12796_v1 = vld [vmem:[#allocation2 + $0xb4] sm:$0xff] }
 0x18c   : > { %v3461_v41 = vunpack.c.l.b16 %v3405_v52 }
 0x18d   : > { %3618 = vmatmul.bf16.gmra.mxu1 %v3478_v53  ;;  %v2873_v53 = vrot.slane %v2871_v21, 4 }
 0x18e   : > { %v2311_v35 = vpop.f32.mrf.mxu3 }
 0x18f   : > { %3937 = vmatmul.bf16.gmra.mxu2 %v12823_v26  ;;  %v2408_v10 = vadd.f32 %v2311_v35, %v13829_v14  ;;  %v2876_v14 = vrot.slane %v2874_v20, 5  ;;  %v3462_v26 = vunpack.c.l.b16 %v3408_v50 }
 0x190   : > { %v3059_v40 = vpop.f32.mrf.mxu0 }
 0x191   : > { %v3154_v44 = vadd.f32 %v3057_v48, %v2408_v10  ;;  %v2886_v48 = vrot.slane %v2884_v58, 4  ;;  %v2877_v9 = vor.u32 %v2876_v14, %v2873_v53  ;;  %v3479_v8 = vpack.c.b16 %v3462_v26, %v3461_v41  ;;  %v3253_v58 = vld [vmem:[#allocation2 + $0xc0] sm:$0xe]  ;;  %v4110_v14 = vld [vmem:[#allocation2 + $0x1c] sm:$0xf] }
 0x192   : > { %v13945_v61 = vpop.f32.mrf.mxu1  ;;  %v1952_v39 = vpop.f32.mrf.mxu2  ;;  %v3411_v10 = vrot.slane %v3254_v59, 5  ;;  %v4171_v59 = vshrl.u32 %v4110_v14, 16 }
 0x193   : > { %v13952_v37 = vadd.f32 %v1952_v39, %v13543_v3  ;;  %v13954_v7 = vadd.f32 %v3579_v30, %v3154_v44  ;;  %v2957_v3 = vpack.c.b16 %v2940_v18, %v2939_v2  ;;  %v2887_v32 = vor.u32 %v2886_v48, %v2882_v43  ;;  %v3255_v44 = vld [vmem:[#allocation2 + $0xc8] sm:$0x1]  ;;  %v4109_v2 = vld [vmem:[#allocation2 + $0x18] sm:$0xf] }
 0x194   : > { %v2890_v30 = vshll.u32 %v2509_v0, 16  ;;  %v2878_v28 = vrot.slane %v2877_v9, 4  ;;  %v11746_v18 = vrot.slane %v3253_v58, 9  ;;  %v3413_v53 = vrot.slane %v3411_v10, 4 }
 0x195   : > { %v2888_v50 = vrot.slane %v2887_v32, 4  ;;  %v4158_v26 = vshrl.u32 %v4109_v2, 16  ;;  %v4161_v0 = vshll.u32 %v4109_v2, 16  ;;  %v4167_v9 = vshll.u32 %v4110_v14, 16  ;;  %v4856_v2 = vld [vmem:[#allocation2 + $0x1c] sm:$0xf] }
 0x196   : > { %v2313_v29 = vpop.f32.mrf.mxu3  ;;  %v2892_v39 = vrot.slane %v2890_v30, 5  ;;  %v2883_v11 = vsel %vm13246_vm2, %v2878_v28, %v2882_v43 }
 0x197   : > { %v2409_v15 = vadd.f32 %v2313_v29, %v13847_v17  ;;  %v12824_v17 = vld [vmem:[#allocation2 + $0x30] sm:$0xff]  ;;  %v2941_v30 = vunpack.c.l.b16 %v2883_v11  ;;  %v4160_v28 = vrot.slane %v4158_v26, 4  ;;  %v4163_v58 = vrot.slane %v4161_v0, 5 }
 0x198   : > { %v3062_v35 = vpop.f32.mrf.mxu0 }
 0x199   : > { %v13960_v21 = vadd.f32 %v3059_v40, %v2409_v15  ;;  %v3414_v40 = vrot.slane %v3255_v44, 5  ;;  %v4164_v14 = vor.u32 %v4163_v58, %v4160_v28 }
 0x19a   : > { %v3584_v20 = vpop.f32.mrf.mxu1  ;;  %v1954_v13 = vpop.f32.mrf.mxu2 }
 0x19b   : > { %v13963_v52 = vadd.f32 %v1954_v13, %v13547_v16  ;;  %2355 = vmatmul.bf16.gmra.mxu3 %v12796_v1  ;;  %3101 = vmatmul.bf16.gmra.mxu0 %v2957_v3  ;;  %v2893_v16 = vsel %vm13246_vm2, %v2888_v50, %v2892_v39  ;;  %v3412_v3 = vsel %vm13399_vm5, %v11746_v18, %v3411_v10  ;;  %v4173_v50 = vrot.slane %v4171_v59, 4  ;;  %v4111_v39 = vld [vmem:[#allocation2 + $0x20] sm:$0x1]  ;;  %v4112_v59 = vld [vmem:[#allocation2 + $0x24] sm:$0xf] }
 0x19c   : > { %v3415_v43 = vsel %vm13399_vm5, %v3413_v53, %v3414_v40  ;;  %v3463_v44 = vunpack.c.l.b16 %v3412_v3  ;;  %v12797_v53 = vld [vmem:[#allocation2 + $0xc0] sm:$0xff] }
 0x19d   : > { %3623 = vmatmul.bf16.gmra.mxu1 %v3479_v8 }
 0x19e   : > { %v2316_v48 = vpop.f32.mrf.mxu3 }
 0x19f   : > { %3942 = vmatmul.bf16.gmra.mxu2 %v12824_v17  ;;  %v2410_v41 = vadd.f32 %v2316_v48, %v13869_v4  ;;  %v2942_v4 = vunpack.c.l.b16 %v2893_v16  ;;  %v4169_v17 = vrot.slane %v4167_v9, 5  ;;  %v4953_v16 = vrot.slane %v4856_v2, 5 }
 0x1a0   : > { %v3064_v29 = vpop.f32.mrf.mxu0 }
 0x1a1   : > { %v3156_v15 = vadd.f32 %v3062_v35, %v2410_v41  ;;  %v3464_v35 = vunpack.c.l.b16 %v3415_v43  ;;  %v2958_v40 = vpack.c.b16 %v2942_v4, %v2941_v30  ;;  %v4177_v41 = vshll.u32 %v4111_v39, 16  ;;  %v4113_v30 = vld [vmem:[#allocation2 + $0x28] sm:$0xf] }
 0x1a2   : > { %v13970_v1 = vpop.f32.mrf.mxu1  ;;  %v1957_v32 = vpop.f32.mrf.mxu2  ;;  %v4165_v43 = vrot.slane %v4164_v14, 4  ;;  %v4955_v58 = vrot.slane %v4953_v16, 4  ;;  %v4191_v39 = vshll.u32 %v4113_v30, 16  ;;  %v4195_v2 = vshrl.u32 %v4113_v30, 16  ;;  %v4114_v30 = vld [vmem:[#allocation2 + $0x2c] sm:$0x1] }
 0x1a3   : > { %v13977_v8 = vadd.f32 %v1957_v32, %v13569_v45  ;;  %v13979_v13 = vadd.f32 %v3584_v20, %v3156_v15  ;;  %v3480_v11 = vpack.c.b16 %v3464_v35, %v3463_v44  ;;  %v4174_v45 = vor.u32 %v4173_v50, %v4169_v17  ;;  %v4855_v20 = vld [vmem:[#allocation2 + $0x18] sm:$0xe]  ;;  %v4857_v15 = vld [vmem:[#allocation2 + $0x20] sm:$0x1] }
 0x1a4   : > { %v11955_v32 = vrot.slane %v4855_v20, 9  ;;  %v4179_v28 = vrot.slane %v4177_v41, 5  ;;  %v4956_v44 = vrot.slane %v4857_v15, 5  ;;  %v4185_v35 = vshll.u32 %v4112_v59, 16 }
 0x1a5   : > { %v4175_v4 = vrot.slane %v4174_v45, 4 }
 0x1a6   : > { %v2318_v10 = vpop.f32.mrf.mxu3  ;;  %v4957_v14 = vsel %vm13399_vm5, %v4955_v58, %v4956_v44  ;;  %v4187_v20 = vrot.slane %v4185_v35, 5 }
 0x1a7   : > { %v2411_v18 = vadd.f32 %v2318_v10, %v13878_v49  ;;  %v12825_v49 = vld [vmem:[#allocation2 + $0x3c] sm:$0xff]  ;;  %v4170_v10 = vsel %vm13246_vm2, %v4165_v43, %v4169_v17  ;;  %v4197_v17 = vrot.slane %v4195_v2, 4 }
 0x1a8   : > { %v3067_v48 = vpop.f32.mrf.mxu0 }
 0x1a9   : > { %v13982_v26 = vadd.f32 %v3064_v29, %v2411_v18  ;;  %v4182_v29 = vshrl.u32 %v4112_v59, 16  ;;  %v4954_v18 = vsel %vm13399_vm5, %v11955_v32, %v4953_v16  ;;  %v4193_v59 = vrot.slane %v4191_v39, 5  ;;  %v4858_v39 = vld [vmem:[#allocation2 + $0x24] sm:$0xe] }
 0x1aa   : > { %v3589_v0 = vpop.f32.mrf.mxu1  ;;  %v1959_v9 = vpop.f32.mrf.mxu2  ;;  %v5081_v32 = vunpack.c.l.b16 %v4957_v14 }
 0x1ab   : > { %v13985_v3 = vadd.f32 %v1959_v9, %v13576_v19  ;;  %2360 = vmatmul.bf16.gmra.mxu3 %v12797_v53  ;;  %3106 = vmatmul.bf16.gmra.mxu0 %v2958_v40  ;;  %v4180_v40 = vsel %vm13246_vm2, %v4175_v4, %v4179_v28  ;;  %v4184_v41 = vrot.slane %v4182_v29, 4  ;;  %v5080_v9 = vunpack.c.l.b16 %v4954_v18  ;;  %v4859_v4 = vld [vmem:[#allocation2 + $0x28] sm:$0xf] }
 0x1ac   : > { %v4559_v43 = vunpack.c.l.b16 %v4180_v40  ;;  %v4198_v44 = vor.u32 %v4197_v17, %v4193_v59  ;;  %v4201_v29 = vshll.u32 %v4114_v30, 16  ;;  %v12826_v17 = vld [vmem:[#allocation2 + $0x48] sm:$0xff] }
 0x1ad   : > { %3628 = vmatmul.bf16.gmra.mxu1 %v3480_v11  ;;  %v4188_v28 = vor.u32 %v4187_v20, %v4184_v41  ;;  %v11956_v41 = vrot.slane %v4858_v39, 9 }
 0x1ae   : > { %v2321_v50 = vpop.f32.mrf.mxu3 }
 0x1af   : > { %3947 = vmatmul.bf16.gmra.mxu2 %v12825_v49  ;;  %v2412_v19 = vadd.f32 %v2321_v50, %v13892_v36  ;;  %v4558_v36 = vunpack.c.l.b16 %v4170_v10  ;;  %v4189_v40 = vrot.slane %v4188_v28, 4 }
 0x1b0   : > { %v3069_v53 = vpop.f32.mrf.mxu0 }
 0x1b1   : > { %v3158_v11 = vadd.f32 %v3067_v48, %v2412_v19  ;;  %v12881_v48 = vld [vmem:[%s16484_s3 + $0x18] sm:$0xff]  ;;  %v4590_v50 = vpack.c.b16 %v4559_v43, %v4558_v36  ;;  %v4860_v19 = vld [vmem:[#allocation2 + $0x2c] sm:$0x1]  ;;  %v4116_v43 = vld [vmem:[#allocation2 + $0x34] sm:$0xf] }
 0x1b2   : > { %v13996_v45 = vpop.f32.mrf.mxu1  ;;  %v1962_v15 = vpop.f32.mrf.mxu2  ;;  %6262 = vmatpush.bf16.msra.mxu1 %v12881_v48  ;;  %v4963_v36 = vrot.slane %v4860_v19, 5 }
 0x1b3   : > { %v13999_v49 = vadd.f32 %v1962_v15, %v13592_v51  ;;  %v14001_v16 = vadd.f32 %v3589_v0, %v3158_v11  ;;  %v5112_v51 = vpack.c.b16 %v5081_v32, %v5080_v9  ;;  %v4960_v0 = vrot.slane %v4859_v4, 5  ;;  %v4115_v9 = vld [vmem:[#allocation2 + $0x30] sm:$0xf] }
 0x1b4   : > { %v4199_v11 = vrot.slane %v4198_v44, 4  ;;  %v4203_v15 = vrot.slane %v4201_v29, 5  ;;  %v4206_v4 = vshrl.u32 %v4115_v9, 16  ;;  %v4215_v44 = vshll.u32 %v4116_v43, 16 }
 0x1b5   : > { %16498 = vst [vmem:[#allocation10_spill] sm:$0xff] %v14001_v16  ;;  %v4961_v48 = vsel %vm13399_vm5, %v11956_v41, %v4960_v0  ;;  %v4219_v29 = vshrl.u32 %v4116_v43, 16 }
 0x1b6   : > { %v2323_v58 = vpop.f32.mrf.mxu3  ;;  %v4204_v30 = vsel %vm13246_vm2, %v4199_v11, %v4203_v15  ;;  %v4217_v41 = vrot.slane %v4215_v44, 5 }
 0x1b7   : > { %v2413_v35 = vadd.f32 %v2323_v58, %v13907_v54  ;;  %v4962_v54 = vrot.slane %v4960_v0, 4  ;;  %v4561_v39 = vunpack.c.l.b16 %v4204_v30  ;;  %v4208_v0 = vrot.slane %v4206_v4, 4 }
 0x1b8   : > { %v3072_v2 = vpop.f32.mrf.mxu0 }
 0x1b9   : > { %v14007_v10 = vadd.f32 %v3069_v53, %v2413_v35  ;;  %v4194_v53 = vsel %vm13246_vm2, %v4189_v40, %v4193_v59  ;;  %v4964_v58 = vsel %vm13399_vm5, %v4962_v54, %v4963_v36  ;;  %v5082_v40 = vunpack.c.l.b16 %v4961_v48  ;;  %v4117_v54 = vld [vmem:[#allocation2 + $0x38] sm:$0x1]  ;;  %v4862_v36 = vld [vmem:[#allocation2 + $0x34] sm:$0xf] }
 0x1ba   : > { %v3594_v18 = vpop.f32.mrf.mxu1  ;;  %v1964_v14 = vpop.f32.mrf.mxu2  ;;  %v4225_v48 = vshll.u32 %v4117_v54, 16  ;;  %v4967_v4 = vrot.slane %v4862_v36, 5 }
 0x1bb   : > { %v14010_v20 = vadd.f32 %v1964_v14, %v13596_v23  ;;  %4678 = vmatmul.bf16.vlgmr.msrb.gmra.mxu3 %v4590_v50  ;;  %5200 = vmatmul.bf16.vlgmr.msra.gmra.mxu0 %v5112_v51  ;;  %v4209_v23 = vshll.u32 %v4115_v9, 16  ;;  %v4560_v51 = vunpack.c.l.b16 %v4194_v53  ;;  %v5083_v14 = vunpack.c.l.b16 %v4964_v58  ;;  %v4861_v58 = vld [vmem:[#allocation2 + $0x30] sm:$0xe] }
 0x1bd   : > { %v4211_v11 = vrot.slane %v4209_v23, 5  ;;  %v5113_v43 = vpack.c.b16 %v5083_v14, %v5082_v40  ;;  %v4227_v40 = vrot.slane %v4225_v48, 5  ;;  %v11957_v14 = vrot.slane %v4861_v58, 9 }
 0x1be   : > { %v2326_v32 = vpop.f32.mrf.mxu3 }
 0x1bf   : > { %3952 = vmatmul.bf16.gmra.mxu2 %v12826_v17  ;;  %v2414_v28 = vadd.f32 %v2326_v32, %v13927_v25  ;;  %v4221_v17 = vrot.slane %v4219_v29, 4  ;;  %v4212_v32 = vor.u32 %v4211_v11, %v4208_v0  ;;  %v4119_v29 = vld [vmem:[#allocation2 + $0x40] sm:$0xf]  ;;  %v4969_v0 = vrot.slane %v4967_v4, 4 }
 0x1c0   : > { %v3074_v35 = vpop.f32.mrf.mxu0  ;;  %v4239_v54 = vshll.u32 %v4119_v29, 16  ;;  %v4243_v36 = vshrl.u32 %v4119_v29, 16 }
 0x1c1   : > { %v3160_v50 = vadd.f32 %v3072_v2, %v2414_v28  ;;  %v4591_v2 = vpack.c.b16 %v4561_v39, %v4560_v51  ;;  %v4222_v30 = vor.u32 %v4221_v17, %v4217_v41  ;;  %v12827_v51 = vld [vmem:[#allocation2 + $0x54] sm:$0xff] }
 0x1c2   : > { %v14021_v59 = vpop.f32.mrf.mxu1  ;;  %v1967_v19 = vpop.f32.mrf.mxu2 }
 0x1c3   : > { %16499 = vst [vmem:[#allocation11_spill] sm:$0xff] %v14021_v59  ;;  %v14024_v15 = vadd.f32 %v1967_v19, %v13618_v63  ;;  %v14026_v25 = vadd.f32 %v3594_v18, %v3160_v50  ;;  %v4863_v18 = vld [vmem:[#allocation2 + $0x38] sm:$0x1]  ;;  %v4118_v50 = vld [vmem:[#allocation2 + $0x3c] sm:$0xf]  ;;  %v4223_v39 = vrot.slane %v4222_v30, 4 }
 0x1c4   : > { %v4970_v11 = vrot.slane %v4863_v18, 5  ;;  %v4233_v17 = vshll.u32 %v4118_v50, 16  ;;  %v4887_v59 = vld [vmem:[#allocation2 + $0x98] sm:$0x1] }
 0x1c5   : > { %16500 = vst [vmem:[#allocation12_spill] sm:$0xff] %v14026_v25  ;;  %v5026_v25 = vrot.slane %v4887_v59, 5 }
 0x1c6   : > { %v2328_v9 = vpop.f32.mrf.mxu3  ;;  %v4971_v30 = vsel %vm13399_vm5, %v4969_v0, %v4970_v11 }
 0x1c7   : > { %v2415_v53 = vadd.f32 %v2328_v9, %v13938_v62  ;;  %v4213_v62 = vrot.slane %v4212_v32, 4  ;;  %v4968_v32 = vsel %vm13399_vm5, %v11957_v14, %v4967_v4  ;;  %v5085_v14 = vunpack.c.l.b16 %v4971_v30 }
 0x1c8   : > { %v3077_v28 = vpop.f32.mrf.mxu0  ;;  %v5084_v4 = vunpack.c.l.b16 %v4968_v32 }
 0x1c9   : > { %v14029_v23 = vadd.f32 %v3074_v35, %v2415_v53  ;;  %v4230_v35 = vshrl.u32 %v4118_v50, 16  ;;  %v4235_v50 = vrot.slane %v4233_v17, 5  ;;  %v4865_v17 = vld [vmem:[#allocation2 + $0x40] sm:$0xf] }
 0x1ca   : > { %v3599_v63 = vpop.f32.mrf.mxu1  ;;  %v1969_v44 = vpop.f32.mrf.mxu2 }
 0x1cb   : > { %16501 = vst [vmem:[#allocation13_spill] sm:$0xff] %v14029_v23  ;;  %v14032_v19 = vadd.f32 %v1969_v44, %v13625_v34  ;;  %4683 = vmatmul.bf16.gmra.mxu3 %v4591_v2  ;;  %5205 = vmatmul.bf16.gmra.mxu0 %v5113_v43  ;;  %v4218_v34 = vsel %vm13246_vm2, %v4213_v62, %v4217_v41  ;;  %v4232_v48 = vrot.slane %v4230_v35, 4  ;;  %v4241_v44 = vrot.slane %v4239_v54, 5  ;;  %v4120_v62 = vld [vmem:[#allocation2 + $0x44] sm:$0x1] }
 0x1cc   : > { %v4228_v2 = vsel %vm13246_vm2, %v4223_v39, %v4227_v40  ;;  %v4249_v35 = vshll.u32 %v4120_v62, 16 }
 0x1cd   : > { %v4563_v41 = vunpack.c.l.b16 %v4228_v2  ;;  %v4236_v0 = vor.u32 %v4235_v50, %v4232_v48 }
 0x1ce   : > { %v2331_v9 = vpop.f32.mrf.mxu3 }
 0x1cf   : > { %3957 = vmatmul.bf16.gmra.mxu2 %v12827_v51  ;;  %v2416_v53 = vadd.f32 %v2331_v9, %v13952_v37  ;;  %v4245_v37 = vrot.slane %v4243_v36, 4  ;;  %v4562_v51 = vunpack.c.l.b16 %v4218_v34  ;;  %v4864_v34 = vld [vmem:[#allocation2 + $0x3c] sm:$0xe]  ;;  %v4237_v30 = vrot.slane %v4236_v0, 4 }
 0x1d0   : > { %v3079_v43 = vpop.f32.mrf.mxu0 }
 0x1d1   : > { %v3162_v58 = vadd.f32 %v3077_v28, %v2416_v53  ;;  %v12880_v28 = vld [vmem:[%s16484_s3 + $0x10] sm:$0xff]  ;;  %v4246_v11 = vor.u32 %v4245_v37, %v4241_v44  ;;  %v4592_v9 = vpack.c.b16 %v4563_v41, %v4562_v51  ;;  %v5114_v53 = vpack.c.b16 %v5085_v14, %v5084_v4  ;;  %v12828_v37 = vld [vmem:[#allocation2 + $0x60] sm:$0xff]  ;;  %v4122_v51 = vld [vmem:[#allocation2 + $0x4c] sm:$0xf] }
 0x1d2   : > { %v14043_v18 = vpop.f32.mrf.mxu1  ;;  %v1972_v29 = vpop.f32.mrf.mxu2  ;;  %6263 = vmatpush.bf16.msra.mxu1 %v12880_v28  ;;  %v11958_v41 = vrot.slane %v4864_v34, 9 }
 0x1d3   : > { %16502 = vst [vmem:[#allocation14_spill] sm:$0xff] %v14043_v18  ;;  %v14046_v39 = vadd.f32 %v1972_v29, %v13641_v12  ;;  %v14048_v40 = vadd.f32 %v3599_v63, %v3162_v58  ;;  %v4974_v63 = vrot.slane %v4865_v17, 5  ;;  %v4247_v58 = vrot.slane %v4246_v11, 4  ;;  %v4866_v18 = vld [vmem:[#allocation2 + $0x44] sm:$0x1] }
 0x1d4   : > { %v4251_v29 = vrot.slane %v4249_v35, 5  ;;  %v4977_v4 = vrot.slane %v4866_v18, 5  ;;  %v4263_v35 = vshll.u32 %v4122_v51, 16 }
 0x1d5   : > { %16503 = vst [vmem:[#allocation15_spill] sm:$0xff] %v14048_v40  ;;  %v4976_v62 = vrot.slane %v4974_v63, 4 }
 0x1d6   : > { %v2333_v54 = vpop.f32.mrf.mxu3  ;;  %v4252_v14 = vsel %vm13246_vm2, %v4247_v58, %v4251_v29 }
 0x1d7   : > { %v2417_v36 = vadd.f32 %v2333_v54, %v13963_v52  ;;  %v4121_v52 = vld [vmem:[#allocation2 + $0x48] sm:$0xf]  ;;  %v4978_v18 = vsel %vm13399_vm5, %v4976_v62, %v4977_v4  ;;  %v4565_v34 = vunpack.c.l.b16 %v4252_v14 }
 0x1d8   : > { %v3082_v12 = vpop.f32.mrf.mxu0  ;;  %v4254_v0 = vshrl.u32 %v4121_v52, 16  ;;  %v4257_v11 = vshll.u32 %v4121_v52, 16 }
 0x1d9   : > { %v14054_v2 = vadd.f32 %v3079_v43, %v2417_v36  ;;  %v4242_v43 = vsel %vm13246_vm2, %v4237_v30, %v4241_v44  ;;  %v4975_v36 = vsel %vm13399_vm5, %v11958_v41, %v4974_v63  ;;  %v5087_v63 = vunpack.c.l.b16 %v4978_v18  ;;  %v4123_v41 = vld [vmem:[#allocation2 + $0x50] sm:$0x1] }
 0x1da   : > { %v3604_v32 = vpop.f32.mrf.mxu1  ;;  %v1974_v48 = vpop.f32.mrf.mxu2  ;;  %v4256_v58 = vrot.slane %v4254_v0, 4  ;;  %v4259_v29 = vrot.slane %v4257_v11, 5  ;;  %v4867_v11 = vld [vmem:[#allocation2 + $0x48] sm:$0xe] }
 0x1db   : > { %16504 = vst [vmem:[#allocation16_spill] sm:$0xff] %v14054_v2  ;;  %v14057_v50 = vadd.f32 %v1974_v48, %v13645_v55  ;;  %4688 = vmatmul.bf16.gmra.mxu3 %v4592_v9  ;;  %5210 = vmatmul.bf16.gmra.mxu0 %v5114_v53  ;;  %v4267_v55 = vshrl.u32 %v4122_v51, 16  ;;  %v4564_v53 = vunpack.c.l.b16 %v4242_v43  ;;  %v4265_v48 = vrot.slane %v4263_v35, 5  ;;  %v4124_v2 = vld [vmem:[#allocation2 + $0x54] sm:$0xf] }
 0x1dc   : > { %v5086_v51 = vunpack.c.l.b16 %v4975_v36 }
 0x1dd   : > { %v4269_v52 = vrot.slane %v4267_v55, 4  ;;  %v4593_v14 = vpack.c.b16 %v4565_v34, %v4564_v53  ;;  %v4125_v34 = vld [vmem:[#allocation2 + $0x58] sm:$0xf] }
 0x1de   : > { %v2336_v28 = vpop.f32.mrf.mxu3  ;;  %v5115_v0 = vpack.c.b16 %v5087_v63, %v5086_v51  ;;  %v4278_v51 = vshrl.u32 %v4124_v2, 16  ;;  %v4281_v63 = vshll.u32 %v4124_v2, 16 }
 0x1df   : > { %3962 = vmatmul.bf16.gmra.mxu2 %v12828_v37  ;;  %v2418_v17 = vadd.f32 %v2336_v28, %v13977_v8  ;;  %v4868_v28 = vld [vmem:[#allocation2 + $0x4c] sm:$0xf]  ;;  %v4270_v4 = vor.u32 %v4269_v52, %v4265_v48 }
 0x1e0   : > { %v3084_v54 = vpop.f32.mrf.mxu0  ;;  %v4981_v35 = vrot.slane %v4868_v28, 5  ;;  %v12829_v52 = vld [vmem:[#allocation2 + $0x6c] sm:$0xff] }
 0x1e1   : > { %v3164_v9 = vadd.f32 %v3082_v12, %v2418_v17  ;;  %v4260_v12 = vor.u32 %v4259_v29, %v4256_v58  ;;  %v4273_v17 = vshll.u32 %v4123_v41, 16  ;;  %v4271_v18 = vrot.slane %v4270_v4, 4  ;;  %v16508_v58 = vld [vmem:[#allocation7_spill] sm:$0xff] }
 0x1e2   : > { %v14068_v44 = vpop.f32.mrf.mxu1  ;;  %v1977_v30 = vpop.f32.mrf.mxu2 }
 0x1e3   : > { %16505 = vst [vmem:[#allocation17_spill] sm:$0xff] %v14068_v44  ;;  %v14071_v37 = vadd.f32 %v1977_v30, %v13712_v33  ;;  %v14073_v8 = vadd.f32 %v3604_v32, %v3164_v9  ;;  %v4869_v44 = vld [vmem:[#allocation2 + $0x50] sm:$0x1]  ;;  %v4261_v36 = vrot.slane %v4260_v12, 4  ;;  %v4275_v30 = vrot.slane %v4273_v17, 5 }
 0x1e4   : > { %v4984_v53 = vrot.slane %v4869_v44, 5  ;;  %v4287_v44 = vshll.u32 %v4125_v34, 16  ;;  %v4291_v17 = vshrl.u32 %v4125_v34, 16 }
 0x1e5   : > { %16506 = vst [vmem:[#allocation18_spill] sm:$0xff] %v14073_v8  ;;  %v11959_v8 = vrot.slane %v4867_v11, 9  ;;  %v4266_v41 = vsel %vm13246_vm2, %v4261_v36, %v4265_v48  ;;  %v4276_v28 = vsel %vm13246_vm2, %v4271_v18, %v4275_v30  ;;  %v4283_v48 = vrot.slane %v4281_v63, 5 }
 0x1e6   : > { %v2338_v62 = vpop.f32.mrf.mxu3  ;;  %v4567_v36 = vunpack.c.l.b16 %v4276_v28 }
 0x1e7   : > { %v2419_v43 = vadd.f32 %v2338_v62, %v13985_v3  ;;  %v4983_v3 = vrot.slane %v4981_v35, 4  ;;  %v4982_v62 = vsel %vm13399_vm5, %v11959_v8, %v4981_v35  ;;  %v4289_v35 = vrot.slane %v4287_v44, 5  ;;  %v4870_v44 = vld [vmem:[#allocation2 + $0x54] sm:$0xe] }
 0x1e8   : > { %v3087_v55 = vpop.f32.mrf.mxu0  ;;  %v5088_v18 = vunpack.c.l.b16 %v4982_v62 }
 0x1e9   : > { %v14076_v33 = vadd.f32 %v3084_v54, %v2419_v43  ;;  %v4985_v4 = vsel %vm13399_vm5, %v4983_v3, %v4984_v53  ;;  %v4871_v53 = vld [vmem:[#allocation2 + $0x58] sm:$0xf] }
 0x1ea   : > { %v3609_v32 = vpop.f32.mrf.mxu1  ;;  %v1979_v9 = vpop.f32.mrf.mxu2  ;;  %v5089_v30 = vunpack.c.l.b16 %v4985_v4 }
 0x1eb   : > { %16507 = vst [vmem:[#allocation19_spill] sm:$0xff] %v14076_v33  ;;  %v14079_v29 = vadd.f32 %v1979_v9, %v16508_v58  ;;  %4693 = vmatmul.bf16.gmra.mxu3 %v4593_v14  ;;  %5215 = vmatmul.bf16.gmra.mxu0 %v5115_v0  ;;  %v4280_v0 = vrot.slane %v4278_v51, 4  ;;  %v4566_v9 = vunpack.c.l.b16 %v4266_v41  ;;  %v4293_v58 = vrot.slane %v4291_v17, 4  ;;  %v4872_v17 = vld [vmem:[#allocation2 + $0x5c] sm:$0x1] }
 0x1ed   : > { %v4284_v3 = vor.u32 %v4283_v48, %v4280_v0  ;;  %v4594_v63 = vpack.c.b16 %v4567_v36, %v4566_v9  ;;  %v4294_v41 = vor.u32 %v4293_v58, %v4289_v35  ;;  %v16512_v0 = vld [vmem:[#allocation8_spill] sm:$0xff]  ;;  %v4127_v36 = vld [vmem:[#allocation2 + $0x60] sm:$0xf] }
 0x1ee   : > { %v2341_v54 = vpop.f32.mrf.mxu3  ;;  %v12893_v9 = vld [vmem:[%s16484_s3 + $0x78] sm:$0xff] }
 0x1ef   : > { %3967 = vmatmul.bf16.gmra.mxu2 %v12829_v52  ;;  %v2420_v12 = vadd.f32 %v2341_v54, %v13999_v49  ;;  %v4126_v52 = vld [vmem:[#allocation2 + $0x5c] sm:$0x1]  ;;  %v5116_v54 = vpack.c.b16 %v5089_v30, %v5088_v18  ;;  %v4285_v4 = vrot.slane %v4284_v3, 4  ;;  %v4128_v18 = vld [vmem:[#allocation2 + $0x64] sm:$0xf]  ;;  %v11960_v30 = vrot.slane %v4870_v44, 9 }
 0x1f0   : > { %v3089_v43 = vpop.f32.mrf.mxu0  ;;  %v4297_v28 = vshll.u32 %v4126_v52, 16  ;;  %6940 = vmatpush.bf16.msrb.mxu2 %v12893_v9 }
 0x1f1   : > { %v3166_v2 = vadd.f32 %v3087_v55, %v2420_v12  ;;  %v12879_v55 = vld [vmem:[%s16484_s3 + $0x8] sm:$0xff]  ;;  %v4290_v52 = vsel %vm13246_vm2, %v4285_v4, %v4289_v35 }
 0x1f2   : > { %v14090_v14 = vpop.f32.mrf.mxu1  ;;  %v1982_v11 = vpop.f32.mrf.mxu2  ;;  %6264 = vmatpush.bf16.msra.mxu1 %v12879_v55  ;;  %v4991_v55 = vrot.slane %v4872_v17, 5  ;;  %v4568_v17 = vunpack.c.l.b16 %v4290_v52 }
 0x1f3   : > { %16509 = vst [vmem:[#allocation7_spill] sm:$0xff] %v14090_v14  ;;  %v14093_v8 = vadd.f32 %v1982_v11, %v13746_v46  ;;  %v14095_v49 = vadd.f32 %v3609_v32, %v3166_v2  ;;  %v4988_v32 = vrot.slane %v4871_v53, 5  ;;  %v12830_v11 = vld [vmem:[#allocation2 + $0x78] sm:$0xff]  ;;  %v4302_v53 = vshrl.u32 %v4127_v36, 16  ;;  %v4129_v14 = vld [vmem:[#allocation2 + $0x68] sm:$0x1] }
 0x1f5   : > { %16510 = vst [vmem:[#allocation20_spill] sm:$0xff] %v14095_v49  ;;  %v4990_v58 = vrot.slane %v4988_v32, 4  ;;  %v4304_v9 = vrot.slane %v4302_v53, 4  ;;  %v4873_v53 = vld [vmem:[#allocation2 + $0x60] sm:$0xe] }
 0x1f6   : > { %v2343_v34 = vpop.f32.mrf.mxu3 }
 0x1f7   : > { %v2421_v51 = vadd.f32 %v2343_v34, %v14010_v20  ;;  %v4295_v20 = vrot.slane %v4294_v41, 4  ;;  %v4305_v34 = vshll.u32 %v4127_v36, 16  ;;  %v4992_v44 = vsel %vm13399_vm5, %v4990_v58, %v4991_v55 }
 0x1f8   : > { %v3092_v46 = vpop.f32.mrf.mxu0 }
 0x1f9   : > { %v14101_v62 = vadd.f32 %v3089_v43, %v2421_v51  ;;  %v4299_v43 = vrot.slane %v4297_v28, 5  ;;  %v4311_v51 = vshll.u32 %v4128_v18, 16  ;;  %v4989_v28 = vsel %vm13399_vm5, %v11960_v30, %v4988_v32  ;;  %v4874_v32 = vld [vmem:[#allocation2 + $0x64] sm:$0xf] }
 0x1fa   : > { %v3614_v12 = vpop.f32.mrf.mxu1  ;;  %v1984_v2 = vpop.f32.mrf.mxu2 }
 0x1fb   : > { %16511 = vst [vmem:[#allocation21_spill] sm:$0xff] %v14101_v62  ;;  %v14104_v48 = vadd.f32 %v1984_v2, %v16512_v0  ;;  %4698 = vmatmul.bf16.gmra.mxu3 %v4594_v63  ;;  %5220 = vmatmul.bf16.gmra.mxu0 %v5116_v54  ;;  %v4315_v63 = vshrl.u32 %v4128_v18, 16  ;;  %v4300_v2 = vsel %vm13246_vm2, %v4295_v20, %v4299_v43  ;;  %v4313_v36 = vrot.slane %v4311_v51, 5 }
 0x1fc   : > { %v5090_v20 = vunpack.c.l.b16 %v4989_v28  ;;  %v5091_v43 = vunpack.c.l.b16 %v4992_v44 }
 0x1fe   : > { %v2346_v3 = vpop.f32.mrf.mxu3 }
 0x1ff   : > { %3972 = vmatmul.bf16.gmra.mxu2 %v12830_v11  ;;  %v2422_v54 = vadd.f32 %v2346_v3, %v14024_v15  ;;  %v4307_v11 = vrot.slane %v4305_v34, 5  ;;  %v4317_v15 = vrot.slane %v4315_v63, 4  ;;  %v4569_v3 = vunpack.c.l.b16 %v4300_v2  ;;  %v4875_v63 = vld [vmem:[#allocation2 + $0x68] sm:$0x1] }
 0x200   : > { %v3094_v41 = vpop.f32.mrf.mxu0  ;;  %v4995_v34 = vrot.slane %v4874_v32, 5 }
 0x201   : > { %v3168_v35 = vadd.f32 %v3092_v46, %v2422_v54  ;;  %v4308_v62 = vor.u32 %v4307_v11, %v4304_v9  ;;  %v4318_v58 = vor.u32 %v4317_v15, %v4313_v36  ;;  %v4321_v46 = vshll.u32 %v4129_v14, 16  ;;  %v12831_v9 = vld [vmem:[#allocation2 + $0x84] sm:$0xff]  ;;  %v4131_v11 = vld [vmem:[#allocation2 + $0x70] sm:$0xf] }
 0x202   : > { %v14118_v4 = vpop.f32.mrf.mxu1  ;;  %v14120_v0 = vpop.f32.mrf.mxu2  ;;  %v4595_v52 = vpack.c.b16 %v4569_v3, %v4568_v17  ;;  %v5117_v54 = vpack.c.b16 %v5091_v43, %v5090_v20  ;;  %v11961_v14 = vrot.slane %v4873_v53, 9  ;;  %v4998_v17 = vrot.slane %v4875_v63, 5 }
 0x203   : > { %16513 = vst [vmem:[#allocation8_spill] sm:$0xff] %v14118_v4  ;;  %v14122_v18 = vadd.f32 %v3614_v12, %v3168_v35  ;;  %v4309_v28 = vrot.slane %v4308_v62, 4  ;;  %v4319_v44 = vrot.slane %v4318_v58, 4  ;;  %v4323_v35 = vrot.slane %v4321_v46, 5 }
 0x204   : > { %v4996_v32 = vsel %vm13399_vm5, %v11961_v14, %v4995_v34  ;;  %v4339_v58 = vshrl.u32 %v4131_v11, 16  ;;  %v12878_v14 = vld [vmem:[%s16484_s3] sm:$0xff] }
 0x205   : > { %16514 = vst [vmem:[#allocation22_spill] sm:$0xff] %v14122_v18  ;;  %v4130_v18 = vld [vmem:[#allocation2 + $0x6c] sm:$0xf]  ;;  %v4324_v43 = vsel %vm13246_vm2, %v4319_v44, %v4323_v35  ;;  %v5092_v44 = vunpack.c.l.b16 %v4996_v32  ;;  %6265 = vmatpush.bf16.msra.mxu1 %v12878_v14 }
 0x206   : > { %v2348_v30 = vpop.f32.mrf.mxu3  ;;  %v4326_v15 = vshrl.u32 %v4130_v18, 16  ;;  %v4329_v3 = vshll.u32 %v4130_v18, 16 }
 0x207   : > { %v2423_v55 = vadd.f32 %v2348_v30, %v14032_v19  ;;  %v4997_v19 = vrot.slane %v4995_v34, 4  ;;  %v4335_v30 = vshll.u32 %v4131_v11, 16 }
 0x208   : > { %v3097_v4 = vpop.f32.mrf.mxu0 }
 0x209   : > { %v14125_v51 = vadd.f32 %v3094_v41, %v2423_v55  ;;  %v4314_v41 = vsel %vm13246_vm2, %v4309_v28, %v4313_v36  ;;  %v4999_v55 = vsel %vm13399_vm5, %v4997_v19, %v4998_v17  ;;  %v4571_v28 = vunpack.c.l.b16 %v4324_v43  ;;  %v4132_v19 = vld [vmem:[#allocation2 + $0x74] sm:$0x1]  ;;  %v4877_v17 = vld [vmem:[#allocation2 + $0x70] sm:$0xf] }
 0x20a   : > { %v3619_v12 = vpop.f32.mrf.mxu1  ;;  %v14127_v2 = vpop.f32.mrf.mxu2  ;;  %v4570_v63 = vunpack.c.l.b16 %v4314_v41  ;;  %v5093_v35 = vunpack.c.l.b16 %v4999_v55  ;;  %v4337_v34 = vrot.slane %v4335_v30, 5  ;;  %v4878_v55 = vld [vmem:[#allocation2 + $0x74] sm:$0x1] }
 0x20b   : > { %16515 = vst [vmem:[#allocation23_spill] sm:$0xff] %v14125_v51  ;;  %4703 = vmatmul.bf16.gmra.mxu3 %v4595_v52  ;;  %5225 = vmatmul.bf16.gmra.mxu0 %v5117_v54  ;;  %v4328_v52 = vrot.slane %v4326_v15, 4  ;;  %v4331_v54 = vrot.slane %v4329_v3, 5  ;;  %v5005_v14 = vrot.slane %v4878_v55, 5 }
 0x20c   : > { %v4596_v3 = vpack.c.b16 %v4571_v28, %v4570_v63  ;;  %v4134_v63 = vld [vmem:[#allocation2 + $0x7c] sm:$0xf]  ;;  %v13090_v28 = vmov 0  }
 0x20d   : > { %5445 = vst [vmem:[#allocation3] sm:$0xf] %v13090_v28 }
 0x20e   : > { %v2351_v20 = vpop.f32.mrf.mxu3  ;;  %5446 = vst [vmem:[#allocation3 + $0x4] sm:$0xf] %v13090_v28 }
 0x20f   : > { %3977 = vmatmul.bf16.gmra.mxu2 %v12831_v9  ;;  %v2424_v62 = vadd.f32 %v2351_v20, %v14046_v39  ;;  %v4341_v9 = vrot.slane %v4339_v58, 4  ;;  %v5118_v20 = vpack.c.b16 %v5093_v35, %v5092_v44  ;;  %v4876_v58 = vld [vmem:[#allocation2 + $0x6c] sm:$0xe]  ;;  %5447 = vst [vmem:[#allocation3 + $0x8] sm:$0x1] %v13090_v28 }
 0x210   : > { %v3099_v46 = vpop.f32.mrf.mxu0  ;;  %v11962_v35 = vrot.slane %v4876_v58, 9  ;;  %5449 = vst [vmem:[#allocation3 + $0xcc] sm:$0xf] %v13090_v28 }
 0x211   : > { %v3170_v18 = vadd.f32 %v3097_v4, %v2424_v62  ;;  %v4332_v4 = vor.u32 %v4331_v54, %v4328_v52  ;;  %v4342_v41 = vor.u32 %v4341_v9, %v4337_v34  ;;  %v5002_v62 = vrot.slane %v4877_v17, 5  ;;  %v4133_v52 = vld [vmem:[#allocation2 + $0x78] sm:$0xf]  ;;  %5450 = vst [vmem:[#allocation3 + $0xd0] sm:$0xf] %v13090_v28 }
 0x212   : > { %v14138_v53 = vpop.f32.mrf.mxu2  ;;  %v14140_v36 = vpop.f32.mrf.mxu1  ;;  %v4350_v17 = vshrl.u32 %v4133_v52, 16  ;;  %5451 = vst [vmem:[#allocation3 + $0xd4] sm:$0x1] %v13090_v28 }
 0x213   : > { %16516 = vst [vmem:[#allocation24_spill] sm:$0xff] %v14140_v36  ;;  %v14142_v39 = vadd.f32 %v3619_v12, %v3170_v18  ;;  %v4345_v12 = vshll.u32 %v4132_v19, 16  ;;  %v4333_v30 = vrot.slane %v4332_v4, 4  ;;  %v12832_v36 = vld [vmem:[#allocation2 + $0x90] sm:$0xff]  ;;  %v4343_v54 = vrot.slane %v4342_v41, 4 }
 0x214   : > { %v5004_v9 = vrot.slane %v5002_v62, 4  ;;  %v5003_v58 = vsel %vm13399_vm5, %v11962_v35, %v5002_v62  ;;  %v5455_v62 = vld [vmem:[#allocation3] sm:$0x1] }
 0x215   : > { %16517 = vst [vmem:[#allocation25_spill] sm:$0xff] %v14142_v39  ;;  %v4338_v19 = vsel %vm13246_vm2, %v4333_v30, %v4337_v34  ;;  %v5094_v28 = vunpack.c.l.b16 %v5003_v58 }
 0x216   : > { %v2353_v11 = vpop.f32.mrf.mxu3  ;;  %v5006_v34 = vsel %vm13399_vm5, %v5004_v9, %v5005_v14  ;;  %v4572_v55 = vunpack.c.l.b16 %v4338_v19  ;;  %v4135_v9 = vld [vmem:[#allocation2 + $0x80] sm:$0x1]  ;;  %v5458_v14 = vld [vmem:[#allocation3 + $0xc] sm:$0x1]  ;;  %v4880_v19 = vld [vmem:[#allocation2 + $0x7c] sm:$0xf] }
 0x217   : > { %v2425_v15 = vadd.f32 %v2353_v11, %v14057_v50  ;;  %v12892_v50 = vld [vmem:[%s16484_s3 + $0x70] sm:$0xff]  ;;  %v4353_v11 = vshll.u32 %v4133_v52, 16  ;;  %v5095_v35 = vunpack.c.l.b16 %v5006_v34 }
 0x218   : > { %v3102_v43 = vpop.f32.mrf.mxu0  ;;  %6941 = vmatpush.bf16.msrb.mxu2 %v12892_v50 }
 0x219   : > { %v14148_v32 = vadd.f32 %v3099_v46, %v2425_v15  ;;  %v4347_v46 = vrot.slane %v4345_v12, 5  ;;  %v4359_v15 = vshll.u32 %v4134_v63, 16  ;;  %v5119_v34 = vpack.c.b16 %v5095_v35, %v5094_v28 }
 0x21a   : > { %v14150_v18 = vpop.f32.mrf.mxu2  ;;  %v3624_v44 = vpop.f32.mrf.mxu1 }
 0x21b   : > { %16518 = vst [vmem:[#allocation26_spill] sm:$0xff] %v14148_v32  ;;  %4708 = vmatmul.bf16.gmra.mxu3 %v4596_v3  ;;  %5230 = vmatmul.bf16.gmra.mxu0 %v5118_v20  ;;  %v4363_v3 = vshrl.u32 %v4134_v63, 16  ;;  %v4348_v12 = vsel %vm13246_vm2, %v4343_v54, %v4347_v46  ;;  %v14166_v50 = vrot.slane %v4359_v15, 5  ;;  %v16519_v54 = vmov 0 }
 0x21c   : > { %v16520_v54 = vsel %vm14170_vm8, 4294967295, %v16519_v54 }
 0x21d   : > { %v4365_v63 = vrot.slane %v4363_v3, 4  ;;  %16521 = vst [vmem:[#allocation27_spill] sm:$0xff] %v16520_v54 }
 0x21e   : > { %v2356_v4 = vpop.f32.mrf.mxu3 }
 0x21f   : > { %3982 = vmatmul.bf16.gmra.mxu2 %v12832_v36  ;;  %v2426_v20 = vadd.f32 %v2356_v4, %v14071_v37  ;;  %v4352_v36 = vrot.slane %v4350_v17, 4  ;;  %v4355_v37 = vrot.slane %v4353_v11, 5  ;;  %v5459_v4 = vsel %vm14170_vm8, 0, %v5458_v14  ;;  %v4881_v14 = vld [vmem:[#allocation2 + $0x80] sm:$0x1] }
 0x220   : > { %v3104_v41 = vpop.f32.mrf.mxu0  ;;  %v5456_v17 = vsel %vm14170_vm8, 0, %v5455_v62  ;;  %5460 = vst [vmem:[#allocation3 + $0xc] sm:$0x1] %v5459_v4 }
 0x221   : > { %v3172_v30 = vadd.f32 %v3102_v43, %v2426_v20  ;;  %v4573_v43 = vunpack.c.l.b16 %v4348_v12  ;;  %v4356_v3 = vor.u32 %v4355_v37, %v4352_v36  ;;  %v4369_v20 = vshll.u32 %v4135_v9, 16  ;;  %5457 = vst [vmem:[#allocation3] sm:$0x1] %v5456_v17  ;;  %v4136_v37 = vld [vmem:[#allocation2 + $0x84] sm:$0xf] }
 0x222   : > { %v14164_v52 = vpop.f32.mrf.mxu2  ;;  %v14180_v15 = vpop.f32.mrf.mxu1  ;;  %v4374_v28 = vshrl.u32 %v4136_v37, 16  ;;  %v4377_v35 = vshll.u32 %v4136_v37, 16 }
 0x223   : > { %v14174_v46 = vadd.f32 %v3624_v44, %v3172_v30  ;;  %16523 = vst [vmem:[#allocation29_spill] sm:$0xff] %v14180_v15  ;;  %v4366_v44 = vor.u32 %v4365_v63, %v14166_v50  ;;  %v4597_v58 = vpack.c.b16 %v4573_v43, %v4572_v55  ;;  %v4879_v30 = vld [vmem:[#allocation2 + $0x78] sm:$0xe]  ;;  %v4357_v4 = vrot.slane %v4356_v3, 4  ;;  %v12833_v63 = vld [vmem:[#allocation2 + $0x9c] sm:$0xff] }
 0x224   : > { %v4371_v15 = vrot.slane %v4369_v20, 5  ;;  %v11963_v36 = vrot.slane %v4879_v30, 9  ;;  %v4137_v55 = vld [vmem:[#allocation2 + $0x88] sm:$0xf]  ;;  %v16525_v3 = vmov 0  ;;  %v4376_v30 = vrot.slane %v4374_v28, 4 }
 0x225   : > { %16522 = vst [vmem:[#allocation28_spill] sm:$0xff] %v14174_v46  ;;  %v5009_v46 = vrot.slane %v4880_v19, 5  ;;  %v4367_v51 = vrot.slane %v4366_v44, 4  ;;  %v16526_v3 = vsel %vm14197_vm10, 4294967295, %v16525_v3 }
 0x226   : > { %v2358_v11 = vpop.f32.mrf.mxu3  ;;  %16527 = vst [vmem:[#allocation31_spill] sm:$0xff] %v16526_v3  ;;  %v12959_v3 = vld [vmem:[%s16484_s3 + $0x188] sm:$0xff] }
 0x227   : > { %v2427_v12 = vadd.f32 %v2358_v11, %v14079_v29  ;;  %v5011_v9 = vrot.slane %v5009_v46, 4  ;;  %v5012_v29 = vrot.slane %v4881_v14, 5  ;;  %v4372_v17 = vsel %vm13246_vm2, %v4367_v51, %v4371_v15  ;;  %v5514_v15 = vld [vmem:[#allocation3 + $0x14] sm:$0x1] }
 0x228   : > { %v3107_v32 = vpop.f32.mrf.mxu0  ;;  %v12862_v43 = vld [vmem:[#allocation3] sm:$0xff]  ;;  %v5010_v11 = vsel %vm13399_vm5, %v11963_v36, %v5009_v46  ;;  %v5515_v46 = vsel %vm14197_vm10, 0, %v5514_v15  ;;  %v4379_v14 = vrot.slane %v4377_v35, 5  ;;  %v4575_v37 = vunpack.c.l.b16 %v4372_v17 }
 0x229   : > { %v14184_v39 = vadd.f32 %v3104_v41, %v2427_v12  ;;  %v4362_v41 = vsel %vm13246_vm2, %v4357_v4, %v14166_v50  ;;  %v5013_v20 = vsel %vm13399_vm5, %v5011_v9, %v5012_v29  ;;  %6266 = vmatmul.bf16.vlgmr.msra.gmra.mxu1 %v12862_v43  ;;  %v4383_v50 = vshll.u32 %v4137_v55, 16  ;;  %5516 = vst [vmem:[#allocation3 + $0x14] sm:$0x1] %v5515_v46  ;;  %v4138_v29 = vld [vmem:[#allocation2 + $0x8c] sm:$0x1] }
 0x22a   : > { %v14186_v62 = vpop.f32.mrf.mxu2  ;;  %v4387_v12 = vshrl.u32 %v4137_v55, 16  ;;  %v3629_v51 = vpop.f32.mrf.mxu1  ;;  %v4574_v36 = vunpack.c.l.b16 %v4362_v41  ;;  %v4393_v49 = vshll.u32 %v4138_v29, 16 }
 0x22b   : > { %16524 = vst [vmem:[#allocation30_spill] sm:$0xff] %v14184_v39  ;;  %4713 = vmatmul.bf16.gmra.mxu3 %v4597_v58  ;;  %5235 = vmatmul.bf16.gmra.mxu0 %v5119_v34  ;;  %v14210_v55 = vrot.slane %v4383_v50, 5  ;;  %v4140_v39 = vld [vmem:[#allocation2 + $0x94] sm:$0xf] }
 0x22c   : > { %v4389_v43 = vrot.slane %v4387_v12, 4  ;;  %v4598_v28 = vpack.c.b16 %v4575_v37, %v4574_v36  ;;  %v4407_v46 = vshll.u32 %v4140_v39, 16  ;;  %v4411_v12 = vshrl.u32 %v4140_v39, 16  ;;  %v5461_v36 = vld [vmem:[#allocation3 + $0x18] sm:$0x1] }
 0x22e   : > { %v2361_v19 = vpop.f32.mrf.mxu3  ;;  %v4390_v17 = vor.u32 %v4389_v43, %v14210_v55  ;;  %v5462_v43 = vsel %vm14170_vm8, 0, %v5461_v36 }
 0x22f   : > { %3987 = vmatmul.bf16.gmra.mxu2 %v12833_v63  ;;  %v2428_v44 = vadd.f32 %v2361_v19, %v14093_v8  ;;  %v5096_v8 = vunpack.c.l.b16 %v5010_v11  ;;  %v5097_v63 = vunpack.c.l.b16 %v5013_v20  ;;  %v4883_v19 = vld [vmem:[#allocation2 + $0x88] sm:$0xf]  ;;  %v4882_v11 = vld [vmem:[#allocation2 + $0x84] sm:$0xe]  ;;  %v4884_v20 = vld [vmem:[#allocation2 + $0x8c] sm:$0x1] }
 0x230   : > { %v3109_v58 = vpop.f32.mrf.mxu0  ;;  %v5016_v33 = vrot.slane %v4883_v19, 5  ;;  %v5019_v29 = vrot.slane %v4884_v20, 5  ;;  %v4391_v39 = vrot.slane %v4390_v17, 4  ;;  %5463 = vst [vmem:[#allocation3 + $0x18] sm:$0x1] %v5462_v43 }
 0x231   : > { %v3174_v34 = vadd.f32 %v3107_v32, %v2428_v44  ;;  %v4139_v32 = vld [vmem:[#allocation2 + $0x90] sm:$0xf]  ;;  %v4380_v44 = vor.u32 %v4379_v14, %v4376_v30  ;;  %v5120_v35 = vpack.c.b16 %v5097_v63, %v5096_v8  ;;  %v12901_v30 = vld [vmem:[%s16484_s3 + $0xb8] sm:$0xff]  ;;  %v11964_v8 = vrot.slane %v4882_v11, 9 }
 0x232   : > { %v14206_v4 = vpop.f32.mrf.mxu2  ;;  %v5018_v63 = vrot.slane %v5016_v33, 4  ;;  %7462 = vmatpush.bf16.msra.mxu3 %v12901_v30  ;;  %v4141_v11 = vld [vmem:[#allocation2 + $0x98] sm:$0x1] }
 0x233   : > { %v14208_v9 = vadd.f32 %v3629_v51, %v3174_v34  ;;  %v4398_v51 = vshrl.u32 %v4139_v32, 16  ;;  %v4401_v34 = vshll.u32 %v4139_v32, 16  ;;  %v4381_v14 = vrot.slane %v4380_v44, 4 }
 0x234   : > { %v4413_v44 = vrot.slane %v4411_v12, 4  ;;  %v5017_v20 = vsel %vm13399_vm5, %v11964_v8, %v5016_v33  ;;  %v4417_v30 = vshll.u32 %v4141_v11, 16  ;;  %v4885_v8 = vld [vmem:[#allocation2 + $0x90] sm:$0xe] }
 0x235   : > { %16528 = vst [vmem:[#allocation32_spill] sm:$0xff] %v14208_v9  ;;  %v4400_v19 = vrot.slane %v4398_v51, 4  ;;  %v4403_v32 = vrot.slane %v4401_v34, 5  ;;  %v4886_v51 = vld [vmem:[#allocation2 + $0x94] sm:$0xf] }
 0x236   : > { %v2363_v15 = vpop.f32.mrf.mxu3 }
 0x237   : > { %v2429_v41 = vadd.f32 %v2363_v15, %v14104_v48  ;;  %v12834_v48 = vld [vmem:[#allocation2 + $0xa8] sm:$0xff]  ;;  %v14223_v15 = vrot.slane %v4407_v46, 5  ;;  %v4404_v33 = vor.u32 %v4403_v32, %v4400_v19  ;;  %v5517_v46 = vld [vmem:[#allocation3 + $0x20] sm:$0x1] }
 0x238   : > { %v5201_v50 = vpop.f32.mrf.mxu0 }
 0x239   : > { %v14214_v9 = vadd.f32 %v3109_v58, %v2429_v41  ;;  %v4395_v58 = vrot.slane %v4393_v49, 5  ;;  %v16530_v41 = vld [vmem:[#allocation9_spill] sm:$0xff]  ;;  %v4414_v12 = vor.u32 %v4413_v44, %v14223_v15  ;;  %v4142_v44 = vld [vmem:[#allocation2 + $0x9c] sm:$0xf]  ;;  %v4405_v11 = vrot.slane %v4404_v33, 4 }
 0x23a   : > { %v14219_v37 = vpop.f32.mrf.mxu2 }
 0x23b   : > { %16529 = vst [vmem:[#allocation33_spill] sm:$0xff] %v14214_v9  ;;  %4718 = vmatmul.bf16.gmra.mxu3 %v4598_v28  ;;  %5240 = vmatmul.bf16.gmra.mxu0 %v5120_v35  ;;  %v4045_v9 = vadd.f32 %v14120_v0, %v16530_v41  ;;  %v5020_v28 = vsel %vm13399_vm5, %v5018_v63, %v5019_v29  ;;  %v14234_v35 = vld [vmem:[%s16483_s2] ss:$0 sm:$0xff]  ;;  %v331_v63 = vld [vmem:[%s13171_s18 + $0x198] sm:$0xff] }
 0x23c   : > { %v4386_v0 = vsel %vm13246_vm2, %v4381_v14, %v14210_v55  ;;  %v4396_v17 = vsel %vm13246_vm2, %v4391_v39, %v4395_v58  ;;  %v5098_v14 = vunpack.c.l.b16 %v5017_v20  ;;  %v5099_v36 = vunpack.c.l.b16 %v5020_v28  ;;  %v332_v29 = vld [vmem:[%s13171_s18 + $0x1a0] sm:$0xff] }
 0x23d   : > { %v4576_v39 = vunpack.c.l.b16 %v4386_v0  ;;  %v4577_v58 = vunpack.c.l.b16 %v4396_v17  ;;  %v385_v19 = vmax.f32 %v331_v63, 0.0  ;;  %v386_v32 = vmax.f32 %v332_v29, 0.0  ;;  %v4143_v28 = vld [vmem:[#allocation2 + $0xa0] sm:$0xf] }
 0x23e   : > { %v4679_v40 = vpop.f32.mrf.mxu3  ;;  %v5023_v20 = vrot.slane %v4886_v51, 5  ;;  %v4431_v33 = vshll.u32 %v4143_v28, 16  ;;  %v4435_v51 = vshrl.u32 %v4143_v28, 16 }
 0x23f   : > { %3992 = vmatmul.bf16.gmra.mxu2 %v12834_v48  ;;  %v4791_v49 = vadd.f32 %v4679_v40, %v4045_v9  ;;  %v12925_v40 = vld [vmem:[%s16484_s3 + $0xf8] sm:$0xff]  ;;  %v5518_v48 = vsel %vm14197_vm10, 0, %v5517_v46  ;;  %v4419_v46 = vrot.slane %v4417_v30, 5  ;;  %v439_v23 = vpack.c.bf16 %v385_v19, %v385_v19 }
 0x240   : > { %v5203_v34 = vpop.f32.mrf.mxu0  ;;  %v12933_v9 = vld [vmem:[%s16484_s3 + $0x138] sm:$0xff]  ;;  %7840 = vmatpush.bf16.msrb.mxu0 %v12925_v40  ;;  %5519 = vst [vmem:[#allocation3 + $0x20] sm:$0x1] %v5518_v48  ;;  %v440_v0 = vpack.c.bf16 %v386_v32, %v386_v32  ;;  %v5121_v40 = vpack.c.b16 %v5099_v36, %v5098_v14  ;;  %v4422_v48 = vshrl.u32 %v4142_v44, 16  ;;  %v4599_v29 = vpack.c.b16 %v4577_v58, %v4576_v39  ;;  %v4144_v32 = vld [vmem:[#allocation2 + $0xa4] sm:$0x1] }
 0x241   : > { %v5313_v55 = vadd.f32 %v5201_v50, %v4791_v49  ;;  %8586 = vmatpush.bf16.msrb.mxu1 %v12933_v9  ;;  %v4046_v50 = vadd.f32 %v14127_v2, %v13812_v27  ;;  %v4415_v49 = vrot.slane %v4414_v12, 4  ;;  %v11965_v9 = vrot.slane %v4885_v8, 9  ;;  %v12891_v27 = vld [vmem:[%s16484_s3 + $0x68] sm:$0xff]  ;;  %493 = vst [vmem:[#allocation2 + $0xcc] sm:$0xf] %v439_v23 }
 0x242   : > { %v14252_v43 = vpop.f32.mrf.mxu2  ;;  %v4425_v2 = vshll.u32 %v4142_v44, 16  ;;  %v5025_v30 = vrot.slane %v5023_v20, 4  ;;  %494 = vst [vmem:[#allocation2 + $0xd0] sm:$0xf] %v440_v0  ;;  %6942 = vmatpush.bf16.msrb.mxu2 %v12891_v27  ;;  %v4410_v14 = vsel %vm13246_vm2, %v4405_v11, %v14223_v15  ;;  %v5464_v58 = vld [vmem:[#allocation3 + $0x24] sm:$0x1] }
 0x243   : > { %v5413_v41 = vadd.f32 %v14234_v35, %v5313_v55  ;;  %v4420_v36 = vsel %vm13246_vm2, %v4415_v49, %v4419_v46  ;;  %v5024_v39 = vsel %vm13399_vm5, %v11965_v9, %v5023_v20  ;;  %v4424_v44 = vrot.slane %v4422_v48, 4  ;;  %v12890_v15 = vld [vmem:[%s16484_s3 + $0x60] sm:$0xff]  ;;  %v12835_v46 = vld [vmem:[#allocation2 + $0xb4] sm:$0xff] }
 0x244   : > { %v14274_v11 = vrot.slane %v4431_v33, 5  ;;  %v4437_v28 = vrot.slane %v4435_v51, 4  ;;  %v5027_v0 = vsel %vm13399_vm5, %v5025_v30, %v5026_v25  ;;  %v5954_v9 = vld [vmem:[#allocation3 + $0xc] sm:$0xf]  ;;  %v14287_v48 = vunpack.c.l.b16 %v4410_v14  ;;  %v14294_v51 = vld [vmem:[#allocation2 + $0xa0] sm:$0xf] }
 0x245   : > { %v5565_v17 = vmax.f32 %v5413_v41, 0.0  ;;  %v4427_v41 = vrot.slane %v4425_v2, 5  ;;  %v4441_v27 = vshll.u32 %v4144_v32, 16  ;;  %v5511_v2 = vld [vmem:[#allocation3 + $0x8] sm:$0x1]  ;;  %v5100_v33 = vunpack.c.l.b16 %v5024_v39 }
 0x246   : > { %v4681_v63 = vpop.f32.mrf.mxu3  ;;  %6943 = vmatpush.bf16.msrb.mxu2 %v12890_v15  ;;  %v4438_v14 = vor.u32 %v4437_v28, %v14274_v11  ;;  %v4048_v32 = vadd.f32 %v14150_v18, %v13849_v38  ;;  %v5520_v15 = vld [vmem:[#allocation3 + $0x2c] sm:$0x1]  ;;  %v5030_v28 = vrot.slane %v14294_v51, 5 }
 0x247   : > { %v5597_v55 = vpack.c.bf16 %v5565_v17, %v5565_v17  ;;  %v4792_v12 = vadd.f32 %v4681_v63, %v4046_v50  ;;  %v5465_v50 = vsel %vm14170_vm8, 0, %v5464_v58  ;;  %v14289_v63 = vunpack.c.l.b16 %v4420_v36  ;;  %v12889_v36 = vld [vmem:[%s16484_s3 + $0x58] sm:$0xff]  ;;  %v4890_v58 = vld [vmem:[#allocation2 + $0xa4] sm:$0x1] }
 0x248   : > { %v5206_v19 = vpop.f32.mrf.mxu0  ;;  %5466 = vst [vmem:[#allocation3 + $0x24] sm:$0x1] %v5465_v50  ;;  %v4428_v30 = vor.u32 %v4427_v41, %v4424_v44  ;;  %v14308_v41 = vrot.slane %v4441_v27, 5  ;;  %v12888_v27 = vld [vmem:[%s16484_s3 + $0x50] sm:$0xff] }
 0x249   : > { %v5632_v8 = vshrl.u32 %v5597_v55, 16  ;;  %v5314_v23 = vadd.f32 %v5203_v34, %v4792_v12  ;;  %v5635_v49 = vshll.u32 %v5597_v55, 16  ;;  %v5101_v12 = vunpack.c.l.b16 %v5027_v0 }
 0x24a   : > { %v14267_v59 = vpop.f32.mrf.mxu2  ;;  %6944 = vmatpush.bf16.msrb.mxu2 %v12889_v36  ;;  %v4429_v18 = vrot.slane %v4428_v30, 4  ;;  %v5033_v30 = vrot.slane %v4890_v58, 5 }
 0x24b   : > { %v14276_v34 = vrot.slane %v5632_v8, 7  ;;  %v5414_v20 = vadd.f32 %v14234_v35, %v5314_v23  ;;  %4723 = vmatmul.bf16.gmra.mxu3 %v4599_v29  ;;  %5245 = vmatmul.bf16.gmra.mxu0 %v5121_v40  ;;  %v4047_v40 = vadd.f32 %v14138_v53, %v13831_v42  ;;  %v4888_v8 = vld [vmem:[#allocation2 + $0x9c] sm:$0xe]  ;;  %v5512_v23 = vsel %vm14197_vm10, 0, %v5511_v2 }
 0x24c   : > { %5513 = vst [vmem:[#allocation3 + $0x8] sm:$0x1] %v5512_v23  ;;  %v11966_v0 = vrot.slane %v4888_v8, 9  ;;  %v5122_v38 = vpack.c.b16 %v5101_v12, %v5100_v33  ;;  %v5958_v33 = vld [vmem:[#allocation3 + $0x14] sm:$0x1]  ;;  %v5032_v12 = vrot.slane %v5030_v28, 4 }
 0x24d   : > { %v5637_v25 = vor.u32 %v5635_v49, %v14276_v34  ;;  %v5566_v29 = vmax.f32 %v5414_v20, 0.0 }
 0x24e   : > { %v4684_v55 = vpop.f32.mrf.mxu3  ;;  %6945 = vmatpush.bf16.msrb.mxu2 %v12888_v27 }
 0x24f   : > { %v5955_v42 = vsel %vm14283_vm12, %v5637_v25, %v5954_v9  ;;  %v5598_v53 = vpack.c.bf16 %v5566_v29, %v5566_v29  ;;  %3997 = vmatmul.bf16.gmra.mxu2 %v12835_v46  ;;  %v4793_v39 = vadd.f32 %v4684_v55, %v4047_v40  ;;  %v5521_v46 = vsel %vm14197_vm10, 0, %v5520_v15  ;;  %v4145_v9 = vld [vmem:[#allocation2 + $0xa8] sm:$0xf]  ;;  %v4146_v55 = vld [vmem:[#allocation2 + $0xac] sm:$0xf] }
 0x250   : > { %5956 = vst [vmem:[#allocation3 + $0xc] sm:$0xf] %v5955_v42  ;;  %v5208_v44 = vpop.f32.mrf.mxu0  ;;  %v4439_v40 = vrot.slane %v4438_v14, 4  ;;  %v4446_v25 = vshrl.u32 %v4145_v9, 16  ;;  %v4449_v36 = vshll.u32 %v4145_v9, 16  ;;  %v4455_v14 = vshll.u32 %v4146_v55, 16 }
 0x251   : > { %v5640_v49 = vshrl.u32 %v5598_v53, 16  ;;  %v5315_v20 = vadd.f32 %v5206_v19, %v4793_v39  ;;  %5522 = vst [vmem:[#allocation3 + $0x2c] sm:$0x1] %v5521_v46  ;;  %v5643_v51 = vshll.u32 %v5598_v53, 16  ;;  %v4459_v23 = vshrl.u32 %v4146_v55, 16 }
 0x252   : > { %v14313_v2 = vpop.f32.mrf.mxu2  ;;  %v5638_v42 = vrot.slane %v14276_v34, 4  ;;  %v4448_v46 = vrot.slane %v4446_v25, 4  ;;  %v4451_v9 = vrot.slane %v4449_v36, 5  ;;  %v14329_v50 = vrot.slane %v4455_v14, 5 }
 0x253   : > { %v5642_v29 = vrot.slane %v5640_v49, 7  ;;  %v5415_v19 = vadd.f32 %v14234_v35, %v5315_v20  ;;  %v12887_v20 = vld [vmem:[%s16484_s3 + $0x48] sm:$0xff]  ;;  %v4461_v16 = vrot.slane %v4459_v23, 4  ;;  %v4434_v55 = vsel %vm13246_vm2, %v4429_v18, %v14274_v11  ;;  %v14345_v23 = vld [vmem:[#allocation3] sm:$0xf] }
 0x254   : > { %v5031_v25 = vsel %vm13399_vm5, %v11966_v0, %v5030_v28  ;;  %6946 = vmatpush.bf16.msrb.mxu2 %v12887_v20  ;;  %v12900_v28 = vld [vmem:[%s16484_s3 + $0xb0] sm:$0xff]  ;;  %v4452_v0 = vor.u32 %v4451_v9, %v4448_v46 }
 0x255   : > { %v5645_v39 = vor.u32 %v5643_v51, %v5642_v29  ;;  %v5647_v53 = vrot.slane %v5642_v29, 4  ;;  %v5567_v15 = vmax.f32 %v5415_v19, 0.0  ;;  %v4147_v29 = vld [vmem:[#allocation2 + $0xb0] sm:$0x1]  ;;  %v4462_v18 = vor.u32 %v4461_v16, %v14329_v50  ;;  %7463 = vmatpush.bf16.msra.mxu3 %v12900_v28  ;;  %v6380_v28 = vld [vmem:[#allocation3 + $0x4] sm:$0xf] }
 0x256   : > { %v4686_v49 = vpop.f32.mrf.mxu3  ;;  %v14370_v16 = vunpack.c.l.b16 %v4434_v55  ;;  %v5102_v46 = vunpack.c.l.b16 %v5031_v25  ;;  %v14386_v25 = vld [vmem:[#allocation2 + $0xb0] sm:$0x1] }
 0x257   : > { %v5646_v58 = vsel %vm14321_vm14, %v5638_v42, %v5645_v39  ;;  %v5959_v27 = vsel %vm14170_vm8, %v5647_v53, %v5958_v33  ;;  %v5599_v34 = vpack.c.bf16 %v5567_v15, %v5567_v15  ;;  %v4794_v51 = vadd.f32 %v4686_v49, %v4048_v32  ;;  %v14368_v15 = vld [vmem:[#allocation2 + $0xa8] sm:$0xe]  ;;  %v5961_v49 = vld [vmem:[#allocation3 + $0x18] sm:$0xf] }
 0x258   : > { %5957 = vst [vmem:[#allocation3 + $0x10] sm:$0xf] %v5646_v58  ;;  %v5211_v19 = vpop.f32.mrf.mxu0  ;;  %v4444_v33 = vsel %vm13246_vm2, %v4439_v40, %v14308_v41  ;;  %v5034_v32 = vsel %vm13399_vm5, %v5032_v12, %v5033_v30  ;;  %v14349_v42 = vadd.f32 %v13920_v6, %v13935_v57  ;;  %v12886_v41 = vld [vmem:[%s16484_s3 + $0x40] sm:$0xff]  ;;  %v4465_v40 = vshll.u32 %v4147_v29, 16  ;;  %v14374_v58 = vld [vmem:[#allocation2 + $0xac] sm:$0xf] }
 0x259   : > { %5960 = vst [vmem:[#allocation3 + $0x14] sm:$0x1] %v5959_v27  ;;  %v5649_v36 = vshrl.u32 %v5599_v34, 16  ;;  %v5316_v14 = vadd.f32 %v5208_v44, %v4794_v51  ;;  %v5467_v44 = vld [vmem:[#allocation3 + $0x30] sm:$0x1]  ;;  %v5652_v30 = vshll.u32 %v5599_v34, 16  ;;  %v16535_v39 = vpack.c.b16 %v14289_v63, %v14287_v48  ;;  %6947 = vmatpush.bf16.msrb.mxu2 %v12886_v41 }
 0x25a   : > { %v14351_v11 = vpop.f32.mrf.mxu2  ;;  %v12836_v57 = vld [vmem:[#allocation2 + $0xc0] sm:$0xff]  ;;  %v5468_v53 = vsel %vm14170_vm8, 0, %v5467_v44  ;;  %v14372_v20 = vunpack.c.l.b16 %v4444_v33  ;;  %v5103_v9 = vunpack.c.l.b16 %v5034_v32  ;;  %v4049_v48 = vadd.f32 %v14164_v52, %v13871_v22 }
 0x25b   : > { %v14360_v12 = vrot.slane %v5649_v36, 7  ;;  %v5416_v6 = vadd.f32 %v14234_v35, %v5316_v14  ;;  %4728 = vmatmul.bf16.gmra.mxu3 %v16535_v39  ;;  %5250 = vmatmul.bf16.gmra.mxu0 %v5122_v38  ;;  %5469 = vst [vmem:[#allocation3 + $0x30] sm:$0x1] %v5468_v53  ;;  %v6428_v27 = vshrl.u32 %v14345_v23, 16  ;;  %v14380_v51 = vrot.slane %v4452_v0, 4 }
 0x25c   : > { %v14382_v29 = vrot.slane %v4462_v18, 4  ;;  %v14384_v55 = vrot.slane %v4465_v40, 5  ;;  %v11967_v36 = vrot.slane %v14368_v15, 9  ;;  %v5037_v32 = vrot.slane %v14374_v58, 5  ;;  %v6381_v39 = vld [vmem:[#allocation3 + $0x8] sm:$0x1] }
 0x25d   : > { %v5654_v63 = vor.u32 %v5652_v30, %v14360_v12  ;;  %v5568_v38 = vmax.f32 %v5416_v6, 0.0  ;;  %v14394_v44 = vadd.f32 %v13945_v61, %v13960_v21  ;;  %v4050_v41 = vadd.f32 %v14186_v62, %v13880_v5  ;;  %v12924_v30 = vld [vmem:[%s16484_s3 + $0xf0] sm:$0xff] }
 0x25e   : > { %v4689_v34 = vpop.f32.mrf.mxu3  ;;  %v14400_v40 = vpack.c.b16 %v5103_v9, %v5102_v46  ;;  %v12932_v6 = vld [vmem:[%s16484_s3 + $0x130] sm:$0xff]  ;;  %v5040_v62 = vrot.slane %v14386_v25, 5  ;;  %7841 = vmatpush.bf16.msrb.mxu0 %v12924_v30  ;;  %v6431_v46 = vshll.u32 %v14345_v23, 16  ;;  %v6437_v9 = vshll.u32 %v6380_v28, 16 }
 0x25f   : > { %v5962_v14 = vsel %vm14283_vm12, %v5654_v63, %v5961_v49  ;;  %v5600_v22 = vpack.c.bf16 %v5568_v38, %v5568_v38  ;;  %4002 = vmatmul.bf16.gmra.mxu2 %v12836_v57  ;;  %v4795_v52 = vadd.f32 %v4689_v34, %v4049_v48  ;;  %v12863_v33 = vld [vmem:[#allocation3 + $0xc] sm:$0xff]  ;;  %v5523_v61 = vld [vmem:[#allocation3 + $0x38] sm:$0x1]  ;;  %8587 = vmatpush.bf16.msrb.mxu1 %v12932_v6  ;;  %v6430_v49 = vrot.slane %v6428_v27, 4  ;;  %v4148_v34 = vld [vmem:[#allocation2 + $0xb4] sm:$0xf] }
 0x260   : > { %5963 = vst [vmem:[#allocation3 + $0x18] sm:$0xf] %v5962_v14  ;;  %v5213_v0 = vpop.f32.mrf.mxu0  ;;  %6271 = vmatmul.bf16.gmra.mxu1 %v12863_v33  ;;  %v5524_v5 = vsel %vm14197_vm10, 0, %v5523_v61  ;;  %v6441_v58 = vshrl.u32 %v6380_v28, 16  ;;  %v5655_v48 = vrot.slane %v14360_v12, 4  ;;  %v5039_v25 = vrot.slane %v5037_v32, 4 }
 0x261   : > { %v5657_v21 = vshrl.u32 %v5600_v22, 16  ;;  %v5317_v57 = vadd.f32 %v5211_v19, %v4795_v52  ;;  %5525 = vst [vmem:[#allocation3 + $0x38] sm:$0x1] %v5524_v5  ;;  %v5660_v63 = vshll.u32 %v5600_v22, 16  ;;  %v5965_v14 = vld [vmem:[#allocation3 + $0x20] sm:$0x1] }
 0x262   : > { %v14411_v53 = vpop.f32.mrf.mxu2  ;;  %v6433_v52 = vrot.slane %v6431_v46, 5  ;;  %v14416_v33 = vrot.slane %v6437_v9, 5  ;;  %v6443_v30 = vrot.slane %v6441_v58, 4  ;;  %v6447_v5 = vshll.u32 %v6381_v39, 16  ;;  %v12837_v15 = vld [vmem:[#allocation2 + $0xcc] sm:$0xff] }
 0x263   : > { %v5659_v19 = vrot.slane %v5657_v21, 7  ;;  %v5417_v38 = vadd.f32 %v14234_v35, %v5317_v57  ;;  %v4470_v12 = vshrl.u32 %v4148_v34, 16  ;;  %v4473_v21 = vshll.u32 %v4148_v34, 16 }
 0x264   : > { %v6434_v18 = vor.u32 %v6433_v52, %v6430_v49  ;;  %v6444_v28 = vor.u32 %v6443_v30, %v14416_v33  ;;  %v14425_v58 = vadd.f32 %v13970_v1, %v13982_v26  ;;  %v4051_v39 = vadd.f32 %v14206_v4, %v13894_v24  ;;  %v4149_v26 = vld [vmem:[#allocation2 + $0xb8] sm:$0xf] }
 0x265   : > { %v5662_v6 = vor.u32 %v5660_v63, %v5659_v19  ;;  %v5664_v61 = vrot.slane %v5659_v19, 4  ;;  %v5569_v27 = vmax.f32 %v5417_v38, 0.0  ;;  %v4458_v19 = vsel %vm13246_vm2, %v14380_v51, %v14329_v50  ;;  %v5470_v38 = vld [vmem:[#allocation3 + $0x3c] sm:$0x1] }
 0x266   : > { %v4691_v23 = vpop.f32.mrf.mxu3  ;;  %v5038_v24 = vsel %vm13399_vm5, %v11967_v36, %v5037_v32  ;;  %v5041_v1 = vsel %vm13399_vm5, %v5039_v25, %v5040_v62  ;;  %v6435_v50 = vrot.slane %v6434_v18, 4  ;;  %v6449_v51 = vrot.slane %v6447_v5, 5  ;;  %v5968_v62 = vld [vmem:[#allocation3 + $0x24] sm:$0xf] }
 0x267   : > { %v5663_v22 = vsel %vm14321_vm14, %v5655_v48, %v5662_v6  ;;  %v5966_v57 = vsel %vm14170_vm8, %v5664_v61, %v5965_v14  ;;  %v5601_v46 = vpack.c.bf16 %v5569_v27, %v5569_v27  ;;  %v4796_v9 = vadd.f32 %v4691_v23, %v4050_v41 }
 0x268   : > { %5964 = vst [vmem:[#allocation3 + $0x1c] sm:$0xf] %v5663_v22  ;;  %v5216_v49 = vpop.f32.mrf.mxu0  ;;  %v4468_v48 = vsel %vm13246_vm2, %v14382_v29, %v14384_v55  ;;  %v4472_v34 = vrot.slane %v4470_v12, 4  ;;  %v4475_v14 = vrot.slane %v4473_v21, 5  ;;  %v16536_v36 = vpack.c.b16 %v14372_v20, %v14370_v16 }
 0x269   : > { %5967 = vst [vmem:[#allocation3 + $0x20] sm:$0x1] %v5966_v57  ;;  %v5666_v41 = vshrl.u32 %v5601_v46, 16  ;;  %v5318_v63 = vadd.f32 %v5213_v0, %v4796_v9  ;;  %v5669_v55 = vshll.u32 %v5601_v46, 16  ;;  %v6445_v32 = vrot.slane %v6444_v28, 4 }
 0x26a   : > { %v14443_v4 = vpop.f32.mrf.mxu2  ;;  %v14454_v18 = vadd.f32 %v14219_v37, %v13909_v60  ;;  %v14456_v25 = vunpack.c.l.b16 %v4458_v19  ;;  %v5471_v52 = vsel %vm14170_vm8, 0, %v5470_v38  ;;  %v4479_v30 = vshll.u32 %v4149_v26, 16  ;;  %v6382_v57 = vld [vmem:[#allocation3 + $0xc] sm:$0xf]  ;;  %v5526_v19 = vld [vmem:[#allocation3 + $0x44] sm:$0x1] }
 0x26b   : > { %v14445_v29 = vrot.slane %v5666_v41, 7  ;;  %v5418_v0 = vadd.f32 %v14234_v35, %v5318_v63  ;;  %4733 = vmatmul.bf16.gmra.mxu3 %v16536_v36  ;;  %5255 = vmatmul.bf16.gmra.mxu0 %v14400_v40  ;;  %v14461_v27 = vunpack.c.l.b16 %v4468_v48  ;;  %5472 = vst [vmem:[#allocation3 + $0x3c] sm:$0x1] %v5471_v52  ;;  %v4483_v16 = vshrl.u32 %v4149_v26, 16  ;;  %v6383_v38 = vld [vmem:[#allocation3 + $0x10] sm:$0xf] }
 0x26c   : > { %v5104_v40 = vunpack.c.l.b16 %v5038_v24  ;;  %v5105_v5 = vunpack.c.l.b16 %v5041_v1  ;;  %v6440_v60 = vsel %vm13246_vm2, %v6435_v50, %v14416_v33  ;;  %v4476_v37 = vor.u32 %v4475_v14, %v4472_v34 }
 0x26d   : > { %v5671_v6 = vor.u32 %v5669_v55, %v14445_v29  ;;  %v5570_v61 = vmax.f32 %v5418_v0, 0.0  ;;  %v6450_v22 = vsel %vm13246_vm2, %v6445_v32, %v6449_v51  ;;  %v14472_v46 = vadd.f32 %v14252_v43, %v13929_v56  ;;  %v4150_v56 = vld [vmem:[#allocation2 + $0xbc] sm:$0x1]  ;;  %v4895_v43 = vld [vmem:[#allocation2 + $0xb8] sm:$0xf] }
 0x26e   : > { %v4694_v20 = vpop.f32.mrf.mxu3  ;;  %v14476_v9 = vadd.f32 %v14267_v59, %v14349_v42  ;;  %v4481_v48 = vrot.slane %v4479_v30, 5  ;;  %v4485_v41 = vrot.slane %v4483_v16, 4  ;;  %v4602_v24 = vpack.c.b16 %v14461_v27, %v14456_v25  ;;  %v4894_v0 = vld [vmem:[#allocation2 + $0xb4] sm:$0xe] }
 0x26f   : > { %v5969_v23 = vsel %vm14283_vm12, %v5671_v6, %v5968_v62  ;;  %v5602_v28 = vpack.c.bf16 %v5570_v61, %v5570_v61  ;;  %4007 = vmatmul.bf16.gmra.mxu2 %v12837_v15  ;;  %v4797_v12 = vadd.f32 %v4694_v20, %v4051_v39  ;;  %v12864_v21 = vld [vmem:[#allocation3 + $0x18] sm:$0xff]  ;;  %v5527_v1 = vsel %vm14197_vm10, 0, %v5526_v19  ;;  %v5972_v15 = vld [vmem:[#allocation3 + $0x2c] sm:$0x1]  ;;  %v4896_v61 = vld [vmem:[#allocation2 + $0xbc] sm:$0x1] }
 0x270   : > { %5970 = vst [vmem:[#allocation3 + $0x24] sm:$0xf] %v5969_v23  ;;  %v5218_v33 = vpop.f32.mrf.mxu0  ;;  %6276 = vmatmul.bf16.gmra.mxu1 %v12864_v21  ;;  %v5124_v59 = vpack.c.b16 %v5105_v5, %v5104_v40  ;;  %v14484_v42 = vunpack.c.l.b16 %v6440_v60  ;;  %v14486_v50 = vunpack.c.l.b16 %v6450_v22  ;;  %v4477_v51 = vrot.slane %v4476_v37, 4 }
 0x271   : > { %v5674_v63 = vshrl.u32 %v5602_v28, 16  ;;  %v5319_v39 = vadd.f32 %v5216_v49, %v4797_v12  ;;  %5528 = vst [vmem:[#allocation3 + $0x44] sm:$0x1] %v5527_v1  ;;  %v5672_v49 = vrot.slane %v14445_v29, 4  ;;  %v5677_v14 = vshll.u32 %v5602_v28, 16 }
 0x272   : > { %v14482_v26 = vpop.f32.mrf.mxu2  ;;  %v4486_v36 = vor.u32 %v4485_v41, %v4481_v48  ;;  %v4489_v32 = vshll.u32 %v4150_v56, 16  ;;  %v5044_v62 = vrot.slane %v4895_v43, 5  ;;  %v6452_v25 = vshrl.u32 %v6382_v57, 16  ;;  %v6385_v12 = vld [vmem:[#allocation3 + $0x18] sm:$0xf] }
 0x273   : > { %v5676_v34 = vrot.slane %v5674_v63, 7  ;;  %v5419_v55 = vadd.f32 %v14234_v35, %v5319_v39  ;;  %v6455_v27 = vshll.u32 %v6382_v57, 16  ;;  %v6860_v20 = vpack.c.b16 %v14486_v50, %v14484_v42  ;;  %v6384_v63 = vld [vmem:[#allocation3 + $0x14] sm:$0x1] }
 0x274   : > { %v4482_v29 = vsel %vm13246_vm2, %v4477_v51, %v4481_v48  ;;  %v11968_v40 = vrot.slane %v4894_v0, 9  ;;  %v6461_v5 = vshll.u32 %v6383_v38, 16  ;;  %v4487_v22 = vrot.slane %v4486_v36, 4  ;;  %v12899_v42 = vld [vmem:[%s16484_s3 + $0xa8] sm:$0xff] }
 0x275   : > { %v5679_v52 = vor.u32 %v5677_v14, %v5676_v34  ;;  %v5681_v30 = vrot.slane %v5676_v34, 4  ;;  %v5571_v6 = vmax.f32 %v5419_v55, 0.0  ;;  %v4491_v57 = vrot.slane %v4489_v32, 5  ;;  %v5473_v34 = vld [vmem:[#allocation3 + $0x48] sm:$0x1]  ;;  %7464 = vmatpush.bf16.msra.mxu3 %v12899_v42 }
 0x276   : > { %v4696_v16 = vpop.f32.mrf.mxu3  ;;  %v5046_v19 = vrot.slane %v5044_v62, 4  ;;  %v5047_v41 = vrot.slane %v4896_v61, 5  ;;  %v6454_v1 = vrot.slane %v6452_v25, 4  ;;  %v6457_v56 = vrot.slane %v6455_v27, 5  ;;  %v5975_v36 = vld [vmem:[#allocation3 + $0x30] sm:$0xf] }
 0x277   : > { %v5680_v60 = vsel %vm14321_vm14, %v5672_v49, %v5679_v52  ;;  %v5973_v37 = vsel %vm14170_vm8, %v5681_v30, %v5972_v15  ;;  %v5603_v23 = vpack.c.bf16 %v5571_v6, %v5571_v6  ;;  %v4798_v28 = vadd.f32 %v4696_v16, %v14454_v18  ;;  %v6386_v15 = vld [vmem:[#allocation3 + $0x1c] sm:$0xf] }
 0x278   : > { %5971 = vst [vmem:[#allocation3 + $0x28] sm:$0xf] %v5680_v60  ;;  %v5221_v21 = vpop.f32.mrf.mxu0  ;;  %v14504_v18 = vunpack.c.l.b16 %v4482_v29  ;;  %v14508_v50 = vsel %vm13399_vm5, %v11968_v40, %v5044_v62  ;;  %v14510_v51 = vrot.slane %v6461_v5, 5  ;;  %v6465_v49 = vshrl.u32 %v6383_v38, 16 }
 0x279   : > { %5974 = vst [vmem:[#allocation3 + $0x2c] sm:$0x1] %v5973_v37  ;;  %v5683_v48 = vshrl.u32 %v5603_v23, 16  ;;  %v5320_v39 = vadd.f32 %v5218_v33, %v4798_v28  ;;  %v5686_v33 = vshll.u32 %v5603_v23, 16  ;;  %v5474_v0 = vsel %vm14170_vm8, 0, %v5473_v34 }
 0x27a   : > { %v14499_v43 = vpop.f32.mrf.mxu2  ;;  %v4492_v32 = vsel %vm13246_vm2, %v4487_v22, %v4491_v57  ;;  %v5048_v38 = vsel %vm13399_vm5, %v5046_v19, %v5047_v41  ;;  %v6467_v62 = vrot.slane %v6465_v49, 4  ;;  %5475 = vst [vmem:[#allocation3 + $0x48] sm:$0x1] %v5474_v0  ;;  %v6476_v25 = vshrl.u32 %v6385_v12, 16  ;;  %v12931_v41 = vld [vmem:[%s16484_s3 + $0x128] sm:$0xff] }
 0x27b   : > { %v14512_v14 = vrot.slane %v5683_v48, 7  ;;  %v5420_v55 = vadd.f32 %v14234_v35, %v5320_v39  ;;  %4738 = vmatmul.bf16.gmra.mxu3 %v4602_v24  ;;  %5260 = vmatmul.bf16.gmra.mxu0 %v5124_v59  ;;  %v6458_v24 = vor.u32 %v6457_v56, %v6454_v1  ;;  %v6471_v59 = vshll.u32 %v6384_v63, 16  ;;  %v5529_v39 = vld [vmem:[#allocation3 + $0x50] sm:$0x1]  ;;  %v6387_v34 = vld [vmem:[#allocation3 + $0x20] sm:$0x1] }
 0x27c   : > { %v6468_v61 = vor.u32 %v6467_v62, %v14510_v51  ;;  %v6478_v27 = vrot.slane %v6476_v25, 4  ;;  %v6479_v16 = vshll.u32 %v6385_v12, 16  ;;  %v6485_v29 = vshll.u32 %v6386_v15, 16  ;;  %v12923_v12 = vld [vmem:[%s16484_s3 + $0xe8] sm:$0xff]  ;;  %8588 = vmatpush.bf16.msrb.mxu1 %v12931_v41 }
 0x27d   : > { %v5688_v52 = vor.u32 %v5686_v33, %v14512_v14  ;;  %v5572_v30 = vmax.f32 %v5420_v55, 0.0  ;;  %v6489_v23 = vshrl.u32 %v6386_v15, 16  ;;  %v5106_v22 = vunpack.c.l.b16 %v14508_v50  ;;  %7842 = vmatpush.bf16.msrb.mxu0 %v12923_v12 }
 0x27e   : > { %v4699_v6 = vpop.f32.mrf.mxu3  ;;  %v5107_v57 = vunpack.c.l.b16 %v5048_v38  ;;  %v6469_v19 = vrot.slane %v6468_v61, 4  ;;  %v6481_v63 = vrot.slane %v6479_v16, 5  ;;  %v14533_v1 = vrot.slane %v6485_v29, 5  ;;  %v5979_v38 = vld [vmem:[#allocation3 + $0x38] sm:$0x1] }
 0x27f   : > { %v5976_v40 = vsel %vm14283_vm12, %v5688_v52, %v5975_v36  ;;  %v5604_v5 = vpack.c.bf16 %v5572_v30, %v5572_v30  ;;  %6948 = vmatmul.bf16.vlgmr.msrb.gmra.mxu2 %v6860_v20  ;;  %v4799_v60 = vadd.f32 %v4699_v6, %v14472_v46  ;;  %v12865_v37 = vld [vmem:[#allocation3 + $0x24] sm:$0xff]  ;;  %v6473_v46 = vrot.slane %v6471_v59, 5 }
 0x280   : > { %5977 = vst [vmem:[#allocation3 + $0x30] sm:$0xf] %v5976_v40  ;;  %v5223_v28 = vpop.f32.mrf.mxu0  ;;  %6281 = vmatmul.bf16.gmra.mxu1 %v12865_v37  ;;  %v4585_v42 = vunpack.c.l.b16 %v4492_v32  ;;  %v6459_v50 = vrot.slane %v6458_v24, 4  ;;  %v5530_v49 = vsel %vm14197_vm10, 0, %v5529_v39  ;;  %v6491_v33 = vrot.slane %v6489_v23, 4 }
 0x281   : > { %v5691_v20 = vshrl.u32 %v5604_v5, 16  ;;  %v5321_v48 = vadd.f32 %v5221_v21, %v4799_v60  ;;  %v5694_v0 = vshll.u32 %v5604_v5, 16  ;;  %v6474_v15 = vsel %vm13246_vm2, %v6469_v19, %v6473_v46  ;;  %5531 = vst [vmem:[#allocation3 + $0x50] sm:$0x1] %v5530_v49  ;;  %v14542_v36 = vld [vmem:[#allocation3 + $0x24] sm:$0xf] }
 0x282   : > { %v14535_v56 = vpop.f32.mrf.mxu2  ;;  %v5689_v32 = vrot.slane %v14512_v14, 4  ;;  %v6464_v62 = vsel %vm13246_vm2, %v6459_v50, %v14510_v51  ;;  %v6482_v25 = vor.u32 %v6481_v63, %v6478_v27  ;;  %v6492_v52 = vor.u32 %v6491_v33, %v14533_v1  ;;  %v4151_v63 = vld [vmem:[#allocation2 + $0xc0] sm:$0xf]  ;;  %v4152_v46 = vld [vmem:[#allocation2 + $0xc4] sm:$0xf] }
 0x283   : > { %v5693_v55 = vrot.slane %v5691_v20, 7  ;;  %v5421_v21 = vadd.f32 %v14234_v35, %v5321_v48  ;;  %v6495_v6 = vshll.u32 %v6387_v34, 16  ;;  %v4603_v16 = vpack.c.b16 %v4585_v42, %v14504_v18 }
 0x284   : > { %v5125_v29 = vpack.c.b16 %v5107_v57, %v5106_v22  ;;  %v6831_v40 = vunpack.c.l.b16 %v6474_v15  ;;  %v6500_v5 = vshrl.u32 %v14542_v36, 16  ;;  %v4055_v37 = vadd.f32 %v14313_v2, %v13954_v7  ;;  %v4153_v7 = vld [vmem:[#allocation2 + $0xc8] sm:$0x1] }
 0x285   : > { %v5696_v30 = vor.u32 %v5694_v0, %v5693_v55  ;;  %v5698_v24 = vrot.slane %v5693_v55, 4  ;;  %v5573_v59 = vmax.f32 %v5421_v21, 0.0  ;;  %v6830_v19 = vunpack.c.l.b16 %v6464_v62  ;;  %v4897_v21 = vld [vmem:[#allocation2 + $0xc0] sm:$0xe]  ;;  %v4898_v62 = vld [vmem:[#allocation2 + $0xc4] sm:$0xf] }
 0x286   : > { %v4701_v61 = vpop.f32.mrf.mxu3  ;;  %v14558_v18 = vrot.slane %v6482_v25, 4  ;;  %v6493_v22 = vrot.slane %v6492_v52, 4  ;;  %v14562_v57 = vadd.f32 %v14351_v11, %v14394_v44  ;;  %v6497_v20 = vrot.slane %v6495_v6, 5  ;;  %v4899_v25 = vld [vmem:[#allocation2 + $0xc8] sm:$0x1] }
 0x287   : > { %v5697_v14 = vsel %vm14321_vm14, %v5689_v32, %v5696_v30  ;;  %v5980_v51 = vsel %vm14170_vm8, %v5698_v24, %v5979_v38  ;;  %v5605_v27 = vpack.c.bf16 %v5573_v59, %v5573_v59  ;;  %v4800_v60 = vadd.f32 %v4701_v61, %v14476_v9 }
 0x288   : > { %5978 = vst [vmem:[#allocation3 + $0x34] sm:$0xf] %v5697_v14  ;;  %v5226_v23 = vpop.f32.mrf.mxu0  ;;  %v6861_v9 = vpack.c.b16 %v6831_v40, %v6830_v19  ;;  %v6488_v2 = vsel %vm13246_vm2, %v14558_v18, %v14533_v1  ;;  %v14570_v39 = vrot.slane %v6500_v5, 4  ;;  %v6503_v11 = vshll.u32 %v14542_v36, 16  ;;  %v4154_v18 = vld [vmem:[#allocation2 + $0xcc] sm:$0xf] }
 0x289   : > { %5981 = vst [vmem:[#allocation3 + $0x38] sm:$0x1] %v5980_v51  ;;  %v5700_v12 = vshrl.u32 %v5605_v27, 16  ;;  %v5322_v41 = vadd.f32 %v5223_v28, %v4800_v60  ;;  %v5703_v42 = vshll.u32 %v5605_v27, 16  ;;  %v5982_v28 = vld [vmem:[#allocation3 + $0x3c] sm:$0xf]  ;;  %v6498_v52 = vsel %vm13246_vm2, %v6493_v22, %v6497_v20 }
 0x28a   : > { %v14564_v48 = vpop.f32.mrf.mxu2  ;;  %v4494_v49 = vshrl.u32 %v4151_v63, 16  ;;  %v4497_v34 = vshll.u32 %v4151_v63, 16  ;;  %v4503_v33 = vshll.u32 %v4152_v46, 16  ;;  %v4507_v55 = vshrl.u32 %v4152_v46, 16  ;;  %v5476_v46 = vld [vmem:[#allocation3 + $0x54] sm:$0x1] }
 0x28b   : > { %v14573_v44 = vrot.slane %v5700_v12, 7  ;;  %v5422_v50 = vadd.f32 %v14234_v35, %v5322_v41  ;;  %4743 = vmatmul.bf16.gmra.mxu3 %v4603_v16  ;;  %5265 = vmatmul.bf16.gmra.mxu0 %v5125_v29  ;;  %v4513_v0 = vshll.u32 %v4153_v7, 16  ;;  %v11969_v14 = vrot.slane %v4897_v21, 9 }
 0x28c   : > { %v4496_v38 = vrot.slane %v4494_v49, 4  ;;  %v4499_v24 = vrot.slane %v4497_v34, 5  ;;  %v4505_v59 = vrot.slane %v4503_v33, 5  ;;  %v4509_v6 = vrot.slane %v4507_v55, 4  ;;  %v5532_v33 = vld [vmem:[#allocation3 + $0x5c] sm:$0x1] }
 0x28d   : > { %v5705_v15 = vor.u32 %v5703_v42, %v14573_v44  ;;  %v5574_v32 = vmax.f32 %v5422_v50, 0.0  ;;  %v4515_v61 = vrot.slane %v4513_v0, 5  ;;  %v5051_v19 = vrot.slane %v4898_v62, 5  ;;  %v333_v55 = vld [vmem:[%s13171_s18 + $0x1a8] sm:$0x3] }
 0x28e   : > { %v4704_v30 = vpop.f32.mrf.mxu3  ;;  %v4500_v27 = vor.u32 %v4499_v24, %v4496_v38  ;;  %v4510_v60 = vor.u32 %v4509_v6, %v4505_v59  ;;  %v5054_v12 = vrot.slane %v4899_v25, 5  ;;  %v5706_v22 = vrot.slane %v14573_v44, 4 }
 0x28f   : > { %v5983_v16 = vsel %vm14283_vm12, %v5705_v15, %v5982_v28  ;;  %v5606_v29 = vpack.c.bf16 %v5574_v32, %v5574_v32  ;;  %6953 = vmatmul.bf16.gmra.mxu2 %v6861_v9  ;;  %v4801_v40 = vadd.f32 %v4704_v30, %v4055_v37  ;;  %v12866_v5 = vld [vmem:[#allocation3 + $0x30] sm:$0xff]  ;;  %v14582_v20 = vunpack.c.l.b16 %v6498_v52  ;;  %v14598_v52 = vld [vmem:[#allocation3 + $0x28] sm:$0xf] }
 0x290   : > { %5984 = vst [vmem:[#allocation3 + $0x3c] sm:$0xf] %v5983_v16  ;;  %v5228_v51 = vpop.f32.mrf.mxu0  ;;  %6286 = vmatmul.bf16.gmra.mxu1 %v12866_v5  ;;  %v4501_v37 = vrot.slane %v4500_v27, 4  ;;  %v4511_v9 = vrot.slane %v4510_v60, 4  ;;  %v5052_v42 = vsel %vm13399_vm5, %v11969_v14, %v5051_v19  ;;  %v5053_v28 = vrot.slane %v5051_v19, 4 }
 0x291   : > { %v5708_v41 = vshrl.u32 %v5606_v29, 16  ;;  %v5323_v63 = vadd.f32 %v5226_v23, %v4801_v40  ;;  %v5711_v49 = vshll.u32 %v5606_v29, 16  ;;  %v5108_v44 = vunpack.c.l.b16 %v5052_v42  ;;  %v5986_v23 = vld [vmem:[#allocation3 + $0x44] sm:$0x1] }
 0x292   : > { %v14584_v7 = vpop.f32.mrf.mxu2  ;;  %v4506_v0 = vsel %vm13246_vm2, %v4501_v37, %v4505_v59  ;;  %v4516_v21 = vsel %vm13246_vm2, %v4511_v9, %v4515_v61  ;;  %v5055_v15 = vsel %vm13399_vm5, %v5053_v28, %v5054_v12  ;;  %v5477_v32 = vsel %vm14170_vm8, 0, %v5476_v46  ;;  %v12922_v37 = vld [vmem:[%s16484_s3 + $0xe0] sm:$0xff] }
 0x293   : > { %v5710_v50 = vrot.slane %v5708_v41, 7  ;;  %v5423_v34 = vadd.f32 %v14234_v35, %v5323_v63  ;;  %v4586_v35 = vunpack.c.l.b16 %v4506_v0  ;;  %5478 = vst [vmem:[#allocation3 + $0x54] sm:$0x1] %v5477_v32  ;;  %v4587_v24 = vunpack.c.l.b16 %v4516_v21  ;;  %7843 = vmatpush.bf16.msrb.mxu0 %v12922_v37 }
 0x294   : > { %v5109_v6 = vunpack.c.l.b16 %v5055_v15  ;;  %v5533_v59 = vsel %vm14197_vm10, 0, %v5532_v33  ;;  %v387_v61 = vmax.f32 %v333_v55, 0.0  ;;  %v6509_v12 = vshll.u32 %v14598_v52, 16  ;;  %v12921_v15 = vld [vmem:[%s16484_s3 + $0xd8] sm:$0xff] }
 0x295   : > { %v5713_v38 = vor.u32 %v5711_v49, %v5710_v50  ;;  %v5715_v62 = vrot.slane %v5710_v50, 4  ;;  %v5575_v25 = vmax.f32 %v5423_v34, 0.0  ;;  %5534 = vst [vmem:[#allocation3 + $0x5c] sm:$0x1] %v5533_v59  ;;  %v4604_v27 = vpack.c.b16 %v4587_v24, %v4586_v35  ;;  %v14638_v50 = vld [vmem:[%s16483_s2] ss:$0 sm:$0xff] }
 0x296   : > { %v4706_v30 = vpop.f32.mrf.mxu3  ;;  %v5126_v60 = vpack.c.b16 %v5109_v6, %v5108_v44  ;;  %v441_v19 = vpack.c.bf16 %v387_v61, %v387_v61  ;;  %v14623_v9 = vadd.f32 %v13996_v45, %v14007_v10  ;;  %v14629_v42 = vadd.f32 %v14443_v4, %v14425_v58  ;;  %v4901_v58 = vld [vmem:[#allocation2 + $0xd0] sm:$0xf]  ;;  %v5989_v4 = vld [vmem:[#allocation3 + $0x48] sm:$0xf] }
 0x297   : > { %v5714_v16 = vsel %vm14321_vm14, %v5706_v22, %v5713_v38  ;;  %v5987_v29 = vsel %vm14170_vm8, %v5715_v62, %v5986_v23  ;;  %v5607_v40 = vpack.c.bf16 %v5575_v25, %v5575_v25  ;;  %v4802_v5 = vadd.f32 %v4706_v30, %v14562_v57  ;;  %v12898_v57 = vld [vmem:[%s16484_s3 + $0xa0] sm:$0xff]  ;;  %7844 = vmatpush.bf16.msrb.mxu0 %v12921_v15 }
 0x298   : > { %5985 = vst [vmem:[#allocation3 + $0x40] sm:$0xf] %v5714_v16  ;;  %v14607_v14 = vpop.f32.mrf.mxu0  ;;  %v6832_v22 = vunpack.c.l.b16 %v6488_v2  ;;  %v4155_v2 = vld [vmem:[#allocation2 + $0xd0] sm:$0xf]  ;;  %v4518_v10 = vshrl.u32 %v4154_v18, 16  ;;  %7465 = vmatpush.bf16.msra.mxu3 %v12898_v57  ;;  %v4521_v49 = vshll.u32 %v4154_v18, 16 }
 0x299   : > { %5988 = vst [vmem:[#allocation3 + $0x44] sm:$0x1] %v5987_v29  ;;  %v5717_v41 = vshrl.u32 %v5607_v40, 16  ;;  %v5720_v63 = vshll.u32 %v5607_v40, 16  ;;  %v5324_v46 = vadd.f32 %v5228_v51, %v4802_v5  ;;  %v4057_v51 = vadd.f32 %v14411_v53, %v13979_v13  ;;  %v4900_v53 = vld [vmem:[#allocation2 + $0xcc] sm:$0xe] }
 0x29a   : > { %v14631_v1 = vpop.f32.mrf.mxu2  ;;  %495 = vst [vmem:[#allocation2 + $0xd4] sm:$0x1] %v441_v19  ;;  %v6862_v13 = vpack.c.b16 %v14582_v20, %v6832_v22  ;;  %v4527_v34 = vshll.u32 %v4155_v2, 16  ;;  %v4531_v44 = vshrl.u32 %v4155_v2, 16  ;;  %v11970_v33 = vrot.slane %v4900_v53, 9  ;;  %v12897_v20 = vld [vmem:[%s16484_s3 + $0x98] sm:$0xff] }
 0x29b   : > { %v14633_v28 = vrot.slane %v5717_v41, 7  ;;  %v5424_v45 = vadd.f32 %v14638_v50, %v5324_v46  ;;  %4748 = vmatmul.bf16.gmra.mxu3 %v4604_v27  ;;  %5270 = vmatmul.bf16.gmra.mxu0 %v5126_v60  ;;  %v4520_v0 = vrot.slane %v4518_v10, 4  ;;  %v6505_v21 = vrot.slane %v6503_v11, 5  ;;  %v12896_v5 = vld [vmem:[%s16484_s3 + $0x90] sm:$0xff]  ;;  %v12930_v60 = vld [vmem:[%s16484_s3 + $0x120] sm:$0xff] }
 0x29c   : > { %v4523_v38 = vrot.slane %v4521_v49, 5  ;;  %v4529_v62 = vrot.slane %v4527_v34, 5  ;;  %v4533_v25 = vrot.slane %v4531_v44, 4  ;;  %v5058_v35 = vrot.slane %v4901_v58, 5  ;;  %7466 = vmatpush.bf16.msra.mxu3 %v12897_v20  ;;  %v12920_v27 = vld [vmem:[%s16484_s3 + $0xd0] sm:$0xff]  ;;  %8589 = vmatpush.bf16.msrb.mxu1 %v12930_v60  ;;  %v12895_v34 = vld [vmem:[%s16484_s3 + $0x88] sm:$0xff] }
 0x29d   : > { %v5722_v55 = vor.u32 %v5720_v63, %v14633_v28  ;;  %v5576_v23 = vmax.f32 %v5424_v45, 0.0  ;;  %v5723_v30 = vrot.slane %v14633_v28, 4  ;;  %v6506_v57 = vor.u32 %v6505_v21, %v14570_v39  ;;  %v5993_v53 = vld [vmem:[#allocation3 + $0x50] sm:$0x1]  ;;  %7845 = vmatpush.bf16.msrb.mxu0 %v12920_v27 }
 0x29e   : > { %v4709_v32 = vpop.f32.mrf.mxu3  ;;  %v4524_v61 = vor.u32 %v4523_v38, %v4520_v0  ;;  %v4534_v16 = vor.u32 %v4533_v25, %v4529_v62  ;;  %v5059_v29 = vsel %vm13399_vm5, %v11970_v33, %v5058_v35  ;;  %v5060_v40 = vrot.slane %v5058_v35, 4  ;;  %v12919_v0 = vld [vmem:[%s16484_s3 + $0xc8] sm:$0xff] }
 0x29f   : > { %v5990_v24 = vsel %vm14283_vm12, %v5722_v55, %v5989_v4  ;;  %v5608_v36 = vpack.c.bf16 %v5576_v23, %v5576_v23  ;;  %6958 = vmatmul.bf16.gmra.mxu2 %v6862_v13  ;;  %v4803_v11 = vadd.f32 %v4709_v32, %v4057_v51  ;;  %v12867_v6 = vld [vmem:[#allocation3 + $0x3c] sm:$0xff]  ;;  %v5110_v10 = vunpack.c.l.b16 %v5059_v29  ;;  %v16537_v27 = vld [vmem:[#allocation10_spill] sm:$0xff] }
 0x2a0   : > { %5991 = vst [vmem:[#allocation3 + $0x48] sm:$0xf] %v5990_v24  ;;  %v14654_v59 = vpop.f32.mrf.mxu0  ;;  %6291 = vmatmul.bf16.gmra.mxu1 %v12867_v6  ;;  %v4525_v51 = vrot.slane %v4524_v61, 4  ;;  %v4535_v18 = vrot.slane %v4534_v16, 4  ;;  %v6513_v49 = vshrl.u32 %v14598_v52, 16  ;;  %7467 = vmatpush.bf16.msra.mxu3 %v12896_v5  ;;  %v6507_v23 = vrot.slane %v6506_v57, 4 }
 0x2a1   : > { %v5725_v19 = vshrl.u32 %v5608_v36, 16  ;;  %v5728_v41 = vshll.u32 %v5608_v36, 16  ;;  %v5325_v63 = vadd.f32 %v14607_v14, %v4803_v11  ;;  %v4156_v46 = vld [vmem:[#allocation2 + $0xd4] sm:$0x1]  ;;  %v14674_v14 = vrot.slane %v6509_v12, 5  ;;  %7846 = vmatpush.bf16.msrb.mxu0 %v12919_v0 }
 0x2a2   : > { %v4902_v22 = vld [vmem:[#allocation2 + $0xd4] sm:$0x1]  ;;  %v14669_v37 = vpop.f32.mrf.mxu2  ;;  %v4537_v2 = vshll.u32 %v4156_v46, 16  ;;  %v4530_v39 = vsel %vm13246_vm2, %v4525_v51, %v4529_v62  ;;  %v6390_v12 = vld [vmem:[#allocation3 + $0x2c] sm:$0x1]  ;;  %v6515_v32 = vrot.slane %v6513_v49, 4 }
 0x2a3   : > { %v5061_v28 = vrot.slane %v4902_v22, 5  ;;  %v5727_v45 = vrot.slane %v5725_v19, 7  ;;  %v5425_v13 = vadd.f32 %v14638_v50, %v5325_v63  ;;  %v4588_v52 = vunpack.c.l.b16 %v4530_v39  ;;  %v5479_v24 = vld [vmem:[#allocation3 + $0x60] sm:$0x1]  ;;  %v6391_v36 = vld [vmem:[#allocation3 + $0x30] sm:$0xf] }
 0x2a4   : > { %v4539_v58 = vrot.slane %v4537_v2, 5  ;;  %v6392_v11 = vld [vmem:[#allocation3 + $0x34] sm:$0xf]  ;;  %v6516_v29 = vor.u32 %v6515_v32, %v14674_v14  ;;  %7468 = vmatpush.bf16.msra.mxu3 %v12895_v34  ;;  %v5535_v5 = vld [vmem:[#allocation3 + $0x68] sm:$0x1] }
 0x2a5   : > { %v5062_v4 = vsel %vm13399_vm5, %v5060_v40, %v5061_v28  ;;  %v5730_v44 = vor.u32 %v5728_v41, %v5727_v45  ;;  %v5732_v33 = vrot.slane %v5727_v45, 4  ;;  %v5577_v55 = vmax.f32 %v5425_v13, 0.0  ;;  %v12894_v41 = vld [vmem:[%s16484_s3 + $0x80] sm:$0xff]  ;;  %v5996_v46 = vld [vmem:[#allocation3 + $0x54] sm:$0xf] }
 0x2a6   : > { %v4711_v21 = vpop.f32.mrf.mxu3  ;;  %v4540_v20 = vsel %vm13246_vm2, %v4535_v18, %v4539_v58  ;;  %v5111_v15 = vunpack.c.l.b16 %v5062_v4  ;;  %v6519_v40 = vshll.u32 %v6390_v12, 16  ;;  %v12918_v63 = vld [vmem:[%s16484_s3 + $0xc0] sm:$0xff]  ;;  %v6517_v57 = vrot.slane %v6516_v29, 4  ;;  %v6393_v34 = vld [vmem:[#allocation3 + $0x38] sm:$0x1] }
 0x2a7   : > { %v5731_v38 = vsel %vm14321_vm14, %v5723_v30, %v5730_v44  ;;  %v5994_v62 = vsel %vm14170_vm8, %v5732_v33, %v5993_v53  ;;  %v5609_v25 = vpack.c.bf16 %v5577_v55, %v5577_v55  ;;  %v4804_v35 = vadd.f32 %v4711_v21, %v14629_v42  ;;  %7847 = vmatpush.bf16.msrb.mxu0 %v12918_v63  ;;  %v7125_v44 = vld [vmem:[#allocation3] sm:$0xe]  ;;  %v7126_v21 = vld [vmem:[#allocation3 + $0x4] sm:$0xf] }
 0x2a8   : > { %5992 = vst [vmem:[#allocation3 + $0x4c] sm:$0xf] %v5731_v38  ;;  %v5236_v6 = vpop.f32.mrf.mxu0  ;;  %v4589_v61 = vunpack.c.l.b16 %v4540_v20  ;;  %v5127_v16 = vpack.c.b16 %v5111_v15, %v5110_v10  ;;  %v4059_v30 = vadd.f32 %v14482_v26, %v16537_v27  ;;  %v6512_v42 = vsel %vm13246_vm2, %v6507_v23, %v14674_v14  ;;  %7469 = vmatpush.bf16.msra.mxu3 %v12894_v41 }
 0x2a9   : > { %5995 = vst [vmem:[#allocation3 + $0x50] sm:$0x1] %v5994_v62  ;;  %v5734_v60 = vshrl.u32 %v5609_v25, 16  ;;  %v5326_v19 = vadd.f32 %v14654_v59, %v4804_v35  ;;  %v6521_v51 = vrot.slane %v6519_v40, 5  ;;  %v5480_v59 = vsel %vm14170_vm8, 0, %v5479_v24 }
 0x2aa   : > { %v14707_v22 = vpop.f32.mrf.mxu2  ;;  %v4605_v26 = vpack.c.b16 %v4589_v61, %v4588_v52  ;;  %v5737_v2 = vshll.u32 %v5609_v25, 16  ;;  %5481 = vst [vmem:[#allocation3 + $0x60] sm:$0x1] %v5480_v59  ;;  %v5536_v45 = vsel %vm14197_vm10, 0, %v5535_v5  ;;  %v6524_v10 = vshrl.u32 %v6391_v36, 16 }
 0x2ab   : > { %v14711_v18 = vrot.slane %v5734_v60, 7  ;;  %v5426_v28 = vadd.f32 %v14638_v50, %v5326_v19  ;;  %5275 = vmatmul.bf16.gmra.mxu0 %v5127_v16  ;;  %v6522_v13 = vsel %vm13246_vm2, %v6517_v57, %v6521_v51  ;;  %5537 = vst [vmem:[#allocation3 + $0x68] sm:$0x1] %v5536_v45  ;;  %v6527_v14 = vshll.u32 %v6391_v36, 16  ;;  %v7127_v62 = vld [vmem:[#allocation3 + $0x8] sm:$0x1] }
 0x2ac   : > { %4753 = vmatmul.bf16.gmra.mxu3 %v4605_v26  ;;  %v6533_v53 = vshll.u32 %v6392_v11, 16  ;;  %v6834_v4 = vunpack.c.l.b16 %v6512_v42  ;;  %v6835_v49 = vunpack.c.l.b16 %v6522_v13  ;;  %v6526_v55 = vrot.slane %v6524_v10, 4  ;;  %v6000_v26 = vld [vmem:[#allocation3 + $0x5c] sm:$0x1] }
 0x2ad   : > { %v5739_v39 = vor.u32 %v5737_v2, %v14711_v18  ;;  %v5578_v58 = vmax.f32 %v5426_v28, 0.0  ;;  %v6529_v12 = vrot.slane %v6527_v14, 5  ;;  %v6537_v0 = vshrl.u32 %v6392_v11, 16 }
 0x2ae   : > { %v4714_v33 = vpop.f32.mrf.mxu3  ;;  %v14719_v23 = vrot.slane %v6533_v53, 5  ;;  %v6863_v15 = vpack.c.b16 %v6835_v49, %v6834_v4  ;;  %v6543_v36 = vshll.u32 %v6393_v34, 16  ;;  %v12163_v61 = vrot.slane %v7125_v44, 9  ;;  %v6394_v44 = vld [vmem:[#allocation3 + $0x3c] sm:$0xf] }
 0x2af   : > { %v5997_v20 = vsel %vm14283_vm12, %v5739_v39, %v5996_v46  ;;  %v5610_v52 = vpack.c.bf16 %v5578_v58, %v5578_v58  ;;  %v4805_v32 = vadd.f32 %v4714_v33, %v4059_v30  ;;  %v12868_v38 = vld [vmem:[#allocation3 + $0x48] sm:$0xff]  ;;  %v6530_v35 = vor.u32 %v6529_v12, %v6526_v55  ;;  %v5538_v46 = vld [vmem:[#allocation3 + $0x74] sm:$0x1]  ;;  %v6395_v39 = vld [vmem:[#allocation3 + $0x40] sm:$0xf] }
 0x2b0   : > { %5998 = vst [vmem:[#allocation3 + $0x54] sm:$0xf] %v5997_v20  ;;  %v5238_v25 = vpop.f32.mrf.mxu0  ;;  %v6539_v24 = vrot.slane %v6537_v0, 4  ;;  %6963 = vmatmul.bf16.gmra.mxu2 %v6863_v15  ;;  %6296 = vmatmul.bf16.gmra.mxu1 %v12868_v38  ;;  %v7223_v11 = vrot.slane %v7126_v21, 5  ;;  %v4060_v40 = vadd.f32 %v14499_v43, %v14623_v9  ;;  %v5740_v5 = vrot.slane %v14711_v18, 4  ;;  %v12902_v20 = vld [vmem:[#allocation3 + $0xc] sm:$0xff] }
 0x2b1   : > { %v5742_v16 = vshrl.u32 %v5610_v52, 16  ;;  %v5327_v29 = vadd.f32 %v5236_v6, %v4805_v32  ;;  %v7226_v60 = vrot.slane %v7127_v62, 5  ;;  %v5745_v42 = vshll.u32 %v5610_v52, 16  ;;  %v5482_v6 = vld [vmem:[#allocation3 + $0x6c] sm:$0x1] }
 0x2b2   : > { %v14726_v27 = vpop.f32.mrf.mxu2  ;;  %v6540_v30 = vor.u32 %v6539_v24, %v14719_v23  ;;  %v7224_v63 = vsel %vm13399_vm5, %v12163_v61, %v7223_v11  ;;  %v6531_v57 = vrot.slane %v6530_v35, 4  ;;  %v6545_v43 = vrot.slane %v6543_v36, 5  ;;  %v14749_v24 = vld [vmem:[#allocation3 + $0x10] sm:$0xf] }
 0x2b3   : > { %v5744_v19 = vrot.slane %v5742_v16, 7  ;;  %v5427_v41 = vadd.f32 %v14638_v50, %v5327_v29  ;;  %v7225_v9 = vrot.slane %v7223_v11, 4  ;;  %v7350_v28 = vunpack.c.l.b16 %v7224_v63  ;;  %v6003_v16 = vld [vmem:[#allocation3 + $0x60] sm:$0xf] }
 0x2b4   : > { %v6541_v51 = vrot.slane %v6540_v30, 4  ;;  %v5483_v14 = vsel %vm14170_vm8, 0, %v5482_v6  ;;  %v5539_v53 = vsel %vm14197_vm10, 0, %v5538_v46  ;;  %v6536_v21 = vsel %vm13246_vm2, %v6531_v57, %v14719_v23  ;;  %v6396_v23 = vld [vmem:[#allocation3 + $0x44] sm:$0x1] }
 0x2b5   : > { %v5747_v59 = vor.u32 %v5745_v42, %v5744_v19  ;;  %v5749_v18 = vrot.slane %v5744_v19, 4  ;;  %v5579_v2 = vmax.f32 %v5427_v41, 0.0  ;;  %v7227_v10 = vsel %vm13399_vm5, %v7225_v9, %v7226_v60  ;;  %5484 = vst [vmem:[#allocation3 + $0x6c] sm:$0x1] %v5483_v14  ;;  %v7130_v57 = vld [vmem:[#allocation3 + $0x14] sm:$0x1] }
 0x2b6   : > { %v4716_v45 = vpop.f32.mrf.mxu3  ;;  %v6546_v13 = vsel %vm13246_vm2, %v6541_v51, %v6545_v43  ;;  %v7351_v55 = vunpack.c.l.b16 %v7227_v10  ;;  %v6557_v52 = vshll.u32 %v6395_v39, 16  ;;  %5540 = vst [vmem:[#allocation3 + $0x74] sm:$0x1] %v5539_v53  ;;  %v6548_v62 = vshrl.u32 %v6394_v44, 16  ;;  %v12929_v10 = vld [vmem:[%s16484_s3 + $0x118] sm:$0xff]  ;;  %v16539_v53 = vld [vmem:[#allocation13_spill] sm:$0xff] }
 0x2b7   : > { %v5748_v58 = vsel %vm14321_vm14, %v5740_v5, %v5747_v59  ;;  %v6001_v4 = vsel %vm14170_vm8, %v5749_v18, %v6000_v26  ;;  %v5611_v49 = vpack.c.bf16 %v5579_v2, %v5579_v2  ;;  %v4806_v34 = vadd.f32 %v4716_v45, %v4060_v40  ;;  %v16538_v5 = vld [vmem:[#allocation12_spill] sm:$0xff]  ;;  %v7128_v2 = vld [vmem:[#allocation3 + $0xc] sm:$0xe]  ;;  %8590 = vmatpush.bf16.msrb.mxu1 %v12929_v10 }
 0x2b8   : > { %5999 = vst [vmem:[#allocation3 + $0x58] sm:$0xf] %v5748_v58  ;;  %v5241_v33 = vpop.f32.mrf.mxu0  ;;  %v6837_v32 = vunpack.c.l.b16 %v6546_v13  ;;  %v7382_v38 = vpack.c.b16 %v7351_v55, %v7350_v28  ;;  %v6551_v35 = vshll.u32 %v6394_v44, 16  ;;  %v6836_v29 = vunpack.c.l.b16 %v6536_v21  ;;  %v5541_v14 = vld [vmem:[#allocation3 + $0x80] sm:$0x1] }
 0x2b9   : > { %6002 = vst [vmem:[#allocation3 + $0x5c] sm:$0x1] %v6001_v4  ;;  %v5751_v12 = vshrl.u32 %v5611_v49, 16  ;;  %v5328_v0 = vadd.f32 %v5238_v25, %v4806_v34  ;;  %v5754_v61 = vshll.u32 %v5611_v49, 16  ;;  %v14754_v11 = vrot.slane %v6557_v52, 5 }
 0x2ba   : > { %v14747_v15 = vpop.f32.mrf.mxu2  ;;  %v6561_v40 = vshrl.u32 %v6395_v39, 16  ;;  %v4061_v30 = vadd.f32 %v14535_v56, %v16538_v5  ;;  %v7230_v42 = vrot.slane %v14749_v24, 5  ;;  %v6864_v41 = vpack.c.b16 %v6837_v32, %v6836_v29  ;;  %v5485_v56 = vld [vmem:[#allocation3 + $0x78] sm:$0x1]  ;;  %v6007_v24 = vld [vmem:[#allocation3 + $0x68] sm:$0x1] }
 0x2bb   : > { %v14751_v36 = vrot.slane %v5751_v12, 7  ;;  %v5428_v25 = vadd.f32 %v14638_v50, %v5328_v0  ;;  %7848 = vmatmul.bf16.vlgmr.msrb.gmra.mxu0 %v12902_v20  ;;  %v6550_v6 = vrot.slane %v6548_v62, 4  ;;  %v6553_v46 = vrot.slane %v6551_v35, 5  ;;  %v16540_v39 = vld [vmem:[#allocation11_spill] sm:$0xff] }
 0x2bc   : > { %7470 = vmatmul.bf16.vlgmr.msra.gmra.mxu3 %v7382_v38  ;;  %v6563_v26 = vrot.slane %v6561_v40, 4  ;;  %v6567_v18 = vshll.u32 %v6396_v23, 16  ;;  %v7232_v13 = vrot.slane %v7230_v42, 4  ;;  %v3683_v58 = vadd.f32 %v16540_v39, %v16539_v53  ;;  %v14777_v38 = vpop.f32.mrf.mxu1  ;;  %v16541_v53 = vld [vmem:[#allocation15_spill] sm:$0xff] }
 0x2bd   : > { %v5756_v60 = vor.u32 %v5754_v61, %v14751_v36  ;;  %v5580_v19 = vmax.f32 %v5428_v25, 0.0  ;;  %v7233_v34 = vrot.slane %v7130_v57, 5  ;;  %v12164_v12 = vrot.slane %v7128_v2, 9 }
 0x2be   : > { %v4719_v63 = vpop.f32.mrf.mxu3  ;;  %v6564_v45 = vor.u32 %v6563_v26, %v14754_v11  ;;  %v5486_v0 = vsel %vm14170_vm8, 0, %v5485_v56  ;;  %v5542_v21 = vsel %vm14197_vm10, 0, %v5541_v14  ;;  %v4062_v62 = vadd.f32 %v14564_v48, %v3683_v58  ;;  %v6398_v56 = vld [vmem:[#allocation3 + $0x4c] sm:$0xf] }
 0x2bf   : > { %v6004_v51 = vsel %vm14283_vm12, %v5756_v60, %v6003_v16  ;;  %v5612_v43 = vpack.c.bf16 %v5580_v19, %v5580_v19  ;;  %v4807_v9 = vadd.f32 %v4719_v63, %v4061_v30  ;;  %v12869_v59 = vld [vmem:[#allocation3 + $0x54] sm:$0xff]  ;;  %5487 = vst [vmem:[#allocation3 + $0x78] sm:$0x1] %v5486_v0  ;;  %v5757_v35 = vrot.slane %v14751_v36, 4  ;;  %v14789_v63 = vld [vmem:[#allocation3 + $0x1c] sm:$0xf] }
 0x2c0   : > { %6005 = vst [vmem:[#allocation3 + $0x60] sm:$0xf] %v6004_v51  ;;  %v5243_v28 = vpop.f32.mrf.mxu0  ;;  %6968 = vmatmul.bf16.gmra.mxu2 %v6864_v41  ;;  %6301 = vmatmul.bf16.gmra.mxu1 %v12869_v59  ;;  %v6565_v55 = vrot.slane %v6564_v45, 4  ;;  %v6554_v61 = vor.u32 %v6553_v46, %v6550_v6  ;;  %v6569_v25 = vrot.slane %v6567_v18, 5  ;;  %v7231_v40 = vsel %vm13399_vm5, %v12164_v12, %v7230_v42  ;;  %v12903_v51 = vld [vmem:[#allocation3 + $0x18] sm:$0xff] }
 0x2c1   : > { %v5759_v4 = vshrl.u32 %v5612_v43, 16  ;;  %v5329_v49 = vadd.f32 %v5241_v33, %v4807_v9  ;;  %v5762_v52 = vshll.u32 %v5612_v43, 16  ;;  %v7234_v33 = vsel %vm13399_vm5, %v7232_v13, %v7233_v34  ;;  %5543 = vst [vmem:[#allocation3 + $0x80] sm:$0x1] %v5542_v21  ;;  %v6397_v43 = vld [vmem:[#allocation3 + $0x48] sm:$0xf] }
 0x2c2   : > { %v14768_v44 = vpop.f32.mrf.mxu2  ;;  %v6570_v30 = vsel %vm13246_vm2, %v6565_v55, %v6569_v25  ;;  %v7353_v60 = vunpack.c.l.b16 %v7234_v33  ;;  %v6555_v46 = vrot.slane %v6554_v61, 4  ;;  %v7352_v26 = vunpack.c.l.b16 %v7231_v40  ;;  %v6010_v58 = vld [vmem:[#allocation3 + $0x6c] sm:$0xf]  ;;  %v6399_v21 = vld [vmem:[#allocation3 + $0x50] sm:$0x1] }
 0x2c3   : > { %v5761_v20 = vrot.slane %v5759_v4, 7  ;;  %v5429_v32 = vadd.f32 %v14638_v50, %v5329_v49  ;;  %v6839_v18 = vunpack.c.l.b16 %v6570_v30  ;;  %v7237_v45 = vrot.slane %v14789_v63, 5  ;;  %v7131_v40 = vld [vmem:[#allocation3 + $0x18] sm:$0xe] }
 0x2c4   : > { %v6560_v59 = vsel %vm13246_vm2, %v6555_v46, %v14754_v11  ;;  %v7383_v2 = vpack.c.b16 %v7353_v60, %v7352_v26  ;;  %v4063_v39 = vadd.f32 %v14584_v7, %v16541_v53  ;;  %v14802_v4 = vpop.f32.mrf.mxu1  ;;  %v6575_v11 = vshll.u32 %v6397_v43, 16 }
 0x2c5   : > { %v5764_v16 = vor.u32 %v5762_v52, %v5761_v20  ;;  %v5766_v29 = vrot.slane %v5761_v20, 4  ;;  %v5581_v23 = vmax.f32 %v5429_v32, 0.0  ;;  %v6581_v49 = vshll.u32 %v6398_v56, 16  ;;  %v5488_v52 = vld [vmem:[#allocation3 + $0x84] sm:$0x1] }
 0x2c6   : > { %v4721_v5 = vpop.f32.mrf.mxu3  ;;  %v6585_v34 = vshrl.u32 %v6398_v56, 16  ;;  %v6838_v0 = vunpack.c.l.b16 %v6560_v59  ;;  %v6577_v33 = vrot.slane %v6575_v11, 5  ;;  %v7239_v7 = vrot.slane %v7237_v45, 4 }
 0x2c7   : > { %v5765_v48 = vsel %vm14321_vm14, %v5757_v35, %v5764_v16  ;;  %v6008_v36 = vsel %vm14170_vm8, %v5766_v29, %v6007_v24  ;;  %v5613_v19 = vpack.c.bf16 %v5581_v23, %v5581_v23  ;;  %v4808_v41 = vadd.f32 %v4721_v5, %v4062_v62  ;;  %v7133_v24 = vld [vmem:[#allocation3 + $0x20] sm:$0x1] }
 0x2c8   : > { %6006 = vst [vmem:[#allocation3 + $0x64] sm:$0xf] %v5765_v48  ;;  %v5246_v6 = vpop.f32.mrf.mxu0  ;;  %v6583_v62 = vrot.slane %v6581_v49, 5  ;;  %v6587_v35 = vrot.slane %v6585_v34, 4  ;;  %v6865_v16 = vpack.c.b16 %v6839_v18, %v6838_v0  ;;  %v6591_v48 = vshll.u32 %v6399_v21, 16 }
 0x2c9   : > { %6009 = vst [vmem:[#allocation3 + $0x68] sm:$0x1] %v6008_v36  ;;  %v5768_v42 = vshrl.u32 %v5613_v19, 16  ;;  %v5330_v57 = vadd.f32 %v5243_v28, %v4808_v41  ;;  %v5771_v10 = vshll.u32 %v5613_v19, 16  ;;  %v6572_v28 = vshrl.u32 %v6397_v43, 16 }
 0x2ca   : > { %v14791_v9 = vpop.f32.mrf.mxu2  ;;  %v6588_v60 = vor.u32 %v6587_v35, %v6583_v62  ;;  %v5489_v36 = vsel %vm14170_vm8, 0, %v5488_v52  ;;  %v5544_v19 = vld [vmem:[#allocation3 + $0x8c] sm:$0x1]  ;;  %v7240_v46 = vrot.slane %v7133_v24, 5  ;;  %v12165_v18 = vrot.slane %v7131_v40, 9 }
 0x2cb   : > { %v14797_v13 = vrot.slane %v5768_v42, 7  ;;  %v5430_v14 = vadd.f32 %v14638_v50, %v5330_v57  ;;  %7853 = vmatmul.bf16.gmra.mxu0 %v12903_v51  ;;  %v6574_v20 = vrot.slane %v6572_v28, 4  ;;  %5490 = vst [vmem:[#allocation3 + $0x84] sm:$0x1] %v5489_v36  ;;  %v5545_v26 = vsel %vm14197_vm10, 0, %v5544_v19  ;;  %v16542_v42 = vld [vmem:[#allocation16_spill] sm:$0xff] }
 0x2cc   : > { %7475 = vmatmul.bf16.gmra.mxu3 %v7383_v2  ;;  %v16543_v57 = vld [vmem:[#allocation14_spill] sm:$0xff]  ;;  %v6589_v59 = vrot.slane %v6588_v60, 4  ;;  %5546 = vst [vmem:[#allocation3 + $0x8c] sm:$0x1] %v5545_v26  ;;  %v14828_v52 = vld [vmem:[#allocation3 + $0x28] sm:$0xf] }
 0x2cd   : > { %v5773_v55 = vor.u32 %v5771_v10, %v14797_v13  ;;  %v5582_v12 = vmax.f32 %v5430_v14, 0.0  ;;  %v6578_v30 = vor.u32 %v6577_v33, %v6574_v20  ;;  %v3685_v51 = vadd.f32 %v16543_v57, %v16542_v42  ;;  %v6014_v28 = vld [vmem:[#allocation3 + $0x74] sm:$0x1]  ;;  %v6401_v60 = vld [vmem:[#allocation3 + $0x58] sm:$0xf] }
 0x2ce   : > { %v4724_v32 = vpop.f32.mrf.mxu3  ;;  %v5774_v11 = vrot.slane %v14797_v13, 4  ;;  %v6017_v19 = vld [vmem:[#allocation3 + $0x78] sm:$0xf]  ;;  %v6605_v42 = vshll.u32 %v6401_v60, 16  ;;  %v6609_v57 = vshrl.u32 %v6401_v60, 16 }
 0x2cf   : > { %v6011_v61 = vsel %vm14283_vm12, %v5773_v55, %v6010_v58  ;;  %v5614_v25 = vpack.c.bf16 %v5582_v12, %v5582_v12  ;;  %v4809_v29 = vadd.f32 %v4724_v32, %v4063_v39  ;;  %v12870_v23 = vld [vmem:[#allocation3 + $0x60] sm:$0xff]  ;;  %v4064_v14 = vadd.f32 %v14631_v1, %v3685_v51  ;;  %v14822_v12 = vpop.f32.mrf.mxu1  ;;  %v5491_v51 = vld [vmem:[#allocation3 + $0x90] sm:$0x1] }
 0x2d0   : > { %6012 = vst [vmem:[#allocation3 + $0x6c] sm:$0xf] %v6011_v61  ;;  %v5248_v5 = vpop.f32.mrf.mxu0  ;;  %6973 = vmatmul.bf16.gmra.mxu2 %v6865_v16  ;;  %6306 = vmatmul.bf16.gmra.mxu1 %v12870_v23  ;;  %v6579_v53 = vrot.slane %v6578_v30, 4  ;;  %v6593_v39 = vrot.slane %v6591_v48, 5  ;;  %v7238_v58 = vsel %vm13399_vm5, %v12165_v18, %v7237_v45  ;;  %v7244_v16 = vrot.slane %v14828_v52, 5 }
 0x2d1   : > { %v5776_v41 = vshrl.u32 %v5614_v25, 16  ;;  %v5331_v63 = vadd.f32 %v5246_v6, %v4809_v29  ;;  %v5779_v56 = vshll.u32 %v5614_v25, 16  ;;  %v7241_v6 = vsel %vm13399_vm5, %v7239_v7, %v7240_v46  ;;  %v12904_v25 = vld [vmem:[#allocation3 + $0x24] sm:$0xff]  ;;  %v6400_v30 = vld [vmem:[#allocation3 + $0x54] sm:$0xf] }
 0x2d2   : > { %v14813_v43 = vpop.f32.mrf.mxu2  ;;  %v6584_v21 = vsel %vm13246_vm2, %v6579_v53, %v6583_v62  ;;  %v6594_v1 = vsel %vm13246_vm2, %v6589_v59, %v6593_v39  ;;  %v7355_v20 = vunpack.c.l.b16 %v7241_v6  ;;  %v7354_v24 = vunpack.c.l.b16 %v7238_v58  ;;  %v16544_v46 = vld [vmem:[#allocation18_spill] sm:$0xff]  ;;  %v7136_v58 = vld [vmem:[#allocation3 + $0x2c] sm:$0x1] }
 0x2d3   : > { %v5778_v2 = vrot.slane %v5776_v41, 7  ;;  %v5431_v10 = vadd.f32 %v14638_v50, %v5331_v63  ;;  %v6841_v61 = vunpack.c.l.b16 %v6594_v1  ;;  %v6840_v23 = vunpack.c.l.b16 %v6584_v21 }
 0x2d4   : > { %v7384_v40 = vpack.c.b16 %v7355_v20, %v7354_v24  ;;  %v6596_v63 = vshrl.u32 %v6400_v30, 16  ;;  %v6599_v26 = vshll.u32 %v6400_v30, 16  ;;  %v14847_v39 = vrot.slane %v6605_v42, 5 }
 0x2d5   : > { %v5781_v49 = vor.u32 %v5779_v56, %v5778_v2  ;;  %v5783_v34 = vrot.slane %v5778_v2, 4  ;;  %v5583_v55 = vmax.f32 %v5431_v10, 0.0  ;;  %v6866_v2 = vpack.c.b16 %v6841_v61, %v6840_v23  ;;  %v6402_v56 = vld [vmem:[#allocation3 + $0x5c] sm:$0x1] }
 0x2d6   : > { %v4726_v0 = vpop.f32.mrf.mxu3  ;;  %v7246_v10 = vrot.slane %v7244_v16, 4  ;;  %v6601_v53 = vrot.slane %v6599_v26, 5  ;;  %v5492_v21 = vsel %vm14170_vm8, 0, %v5491_v51  ;;  %v16545_v61 = vld [vmem:[#allocation19_spill] sm:$0xff] }
 0x2d7   : > { %v5782_v45 = vsel %vm14321_vm14, %v5774_v11, %v5781_v49  ;;  %v6015_v13 = vsel %vm14170_vm8, %v5783_v34, %v6014_v28  ;;  %v5615_v32 = vpack.c.bf16 %v5583_v55, %v5583_v55  ;;  %v4810_v33 = vadd.f32 %v4726_v0, %v4064_v14  ;;  %v7134_v0 = vld [vmem:[#allocation3 + $0x24] sm:$0xe]  ;;  %5493 = vst [vmem:[#allocation3 + $0x90] sm:$0x1] %v5492_v21 }
 0x2d8   : > { %6013 = vst [vmem:[#allocation3 + $0x70] sm:$0xf] %v5782_v45  ;;  %v5251_v35 = vpop.f32.mrf.mxu0  ;;  %v6598_v28 = vrot.slane %v6596_v63, 4  ;;  %v6615_v45 = vshll.u32 %v6402_v56, 16  ;;  %v16547_v21 = vld [vmem:[#allocation20_spill] sm:$0xff] }
 0x2d9   : > { %6016 = vst [vmem:[#allocation3 + $0x74] sm:$0x1] %v6015_v13  ;;  %v5785_v7 = vshrl.u32 %v5615_v32, 16  ;;  %v5332_v62 = vadd.f32 %v5248_v5, %v4810_v33  ;;  %v5788_v36 = vshll.u32 %v5615_v32, 16  ;;  %v4065_v5 = vadd.f32 %v14669_v37, %v16544_v46  ;;  %v12928_v13 = vld [vmem:[%s16484_s3 + $0x110] sm:$0xff] }
 0x2da   : > { %v14835_v29 = vpop.f32.mrf.mxu2  ;;  %v6611_v37 = vrot.slane %v6609_v57, 4  ;;  %v5547_v32 = vld [vmem:[#allocation3 + $0x98] sm:$0x1]  ;;  %v6602_v30 = vor.u32 %v6601_v53, %v6598_v28  ;;  %8591 = vmatpush.bf16.msrb.mxu1 %v12928_v13  ;;  %v6617_v26 = vrot.slane %v6615_v45, 5  ;;  %v14876_v28 = vld [vmem:[#allocation3 + $0x34] sm:$0xf] }
 0x2db   : > { %v14837_v48 = vrot.slane %v5785_v7, 7  ;;  %v5432_v41 = vadd.f32 %v14638_v50, %v5332_v62  ;;  %7858 = vmatmul.bf16.gmra.mxu0 %v12904_v25  ;;  %v7247_v7 = vrot.slane %v7136_v58, 5  ;;  %v5548_v62 = vsel %vm14197_vm10, 0, %v5547_v32  ;;  %v16546_v25 = vld [vmem:[#allocation17_spill] sm:$0xff] }
 0x2dc   : > { %7480 = vmatmul.bf16.gmra.mxu3 %v7384_v40  ;;  %v6612_v20 = vor.u32 %v6611_v37, %v14847_v39  ;;  %v3687_v23 = vadd.f32 %v16546_v25, %v16545_v61  ;;  %5549 = vst [vmem:[#allocation3 + $0x98] sm:$0x1] %v5548_v62 }
 0x2dd   : > { %v5790_v59 = vor.u32 %v5788_v36, %v14837_v48  ;;  %v5584_v18 = vmax.f32 %v5432_v41, 0.0  ;;  %v14845_v14 = vpop.f32.mrf.mxu1  ;;  %v12166_v36 = vrot.slane %v7134_v0, 9  ;;  %v7248_v63 = vsel %vm13399_vm5, %v7246_v10, %v7247_v7 }
 0x2de   : > { %v4729_v6 = vpop.f32.mrf.mxu3  ;;  %v6613_v60 = vrot.slane %v6612_v20, 4  ;;  %v4066_v46 = vadd.f32 %v14707_v22, %v3687_v23  ;;  %v5791_v57 = vrot.slane %v14837_v48, 4  ;;  %v7357_v22 = vunpack.c.l.b16 %v7248_v63 }
 0x2df   : > { %v6018_v11 = vsel %vm14283_vm12, %v5790_v59, %v6017_v19  ;;  %v5616_v49 = vpack.c.bf16 %v5584_v18, %v5584_v18  ;;  %v4811_v34 = vadd.f32 %v4729_v6, %v4065_v5  ;;  %v12871_v55 = vld [vmem:[#allocation3 + $0x6c] sm:$0xff]  ;;  %v6021_v5 = vld [vmem:[#allocation3 + $0x80] sm:$0x1]  ;;  %v7245_v42 = vsel %vm13399_vm5, %v12166_v36, %v7244_v16 }
 0x2e0   : > { %6019 = vst [vmem:[#allocation3 + $0x78] sm:$0xf] %v6018_v11  ;;  %v5253_v1 = vpop.f32.mrf.mxu0  ;;  %6978 = vmatmul.bf16.gmra.mxu2 %v6866_v2  ;;  %6311 = vmatmul.bf16.gmra.mxu1 %v12871_v55  ;;  %v6603_v6 = vrot.slane %v6602_v30, 4  ;;  %v6618_v10 = vsel %vm13246_vm2, %v6613_v60, %v6617_v26  ;;  %v7356_v58 = vunpack.c.l.b16 %v7245_v42  ;;  %v12905_v55 = vld [vmem:[#allocation3 + $0x30] sm:$0xff]  ;;  %v7251_v0 = vrot.slane %v14876_v28, 5 }
 0x2e1   : > { %v5793_v33 = vshrl.u32 %v5616_v49, 16  ;;  %v5333_v24 = vadd.f32 %v5251_v35, %v4811_v34  ;;  %v5796_v41 = vshll.u32 %v5616_v49, 16  ;;  %v4067_v20 = vadd.f32 %v14726_v27, %v16547_v21  ;;  %v5494_v27 = vld [vmem:[#allocation3 + $0x9c] sm:$0x1]  ;;  %v10440_v31 = vld [vmem:[#allocation3 + $0x70] sm:$0xf] }
 0x2e2   : > { %v14861_v40 = vpop.f32.mrf.mxu2  ;;  %v6608_v34 = vsel %vm13246_vm2, %v6603_v6, %v14847_v39  ;;  %v6843_v13 = vunpack.c.l.b16 %v6618_v10  ;;  %v7385_v32 = vpack.c.b16 %v7357_v22, %v7356_v58  ;;  %v7253_v63 = vrot.slane %v7251_v0, 4  ;;  %v7137_v22 = vld [vmem:[#allocation3 + $0x30] sm:$0xe] }
 0x2e3   : > { %v5795_v19 = vrot.slane %v5793_v33, 7  ;;  %v5433_v35 = vadd.f32 %v14638_v50, %v5333_v24  ;;  %v6403_v33 = vld [vmem:[#allocation3 + $0x60] sm:$0xf]  ;;  %v6404_v24 = vld [vmem:[#allocation3 + $0x64] sm:$0xf]  ;;  %v6842_v25 = vunpack.c.l.b16 %v6608_v34 }
 0x2e4   : > { %v6620_v39 = vshrl.u32 %v6403_v33, 16  ;;  %v6623_v23 = vshll.u32 %v6403_v33, 16  ;;  %v6629_v30 = vshll.u32 %v6404_v24, 16  ;;  %v6633_v60 = vshrl.u32 %v6404_v24, 16 }
 0x2e5   : > { %v5798_v51 = vor.u32 %v5796_v41, %v5795_v19  ;;  %v5800_v59 = vrot.slane %v5795_v19, 4  ;;  %v5585_v18 = vmax.f32 %v5433_v35, 0.0  ;;  %v14872_v56 = vpop.f32.mrf.mxu1  ;;  %v6405_v41 = vld [vmem:[#allocation3 + $0x68] sm:$0x1] }
 0x2e6   : > { %v4731_v2 = vpop.f32.mrf.mxu3  ;;  %v6622_v35 = vrot.slane %v6620_v39, 4  ;;  %v6625_v42 = vrot.slane %v6623_v23, 5  ;;  %v6639_v58 = vshll.u32 %v6405_v41, 16  ;;  %v6028_v23 = vld [vmem:[#allocation3 + $0x8c] sm:$0x1] }
 0x2e7   : > { %v5799_v52 = vsel %vm14321_vm14, %v5791_v57, %v5798_v51  ;;  %v6022_v16 = vsel %vm14170_vm8, %v5800_v59, %v6021_v5  ;;  %v5617_v48 = vpack.c.bf16 %v5585_v18, %v5585_v18  ;;  %v4812_v53 = vadd.f32 %v4731_v2, %v4066_v46  ;;  %v7139_v59 = vld [vmem:[#allocation3 + $0x38] sm:$0x1] }
 0x2e8   : > { %6020 = vst [vmem:[#allocation3 + $0x7c] sm:$0xf] %v5799_v52  ;;  %v5256_v37 = vpop.f32.mrf.mxu0  ;;  %v6867_v46 = vpack.c.b16 %v6843_v13, %v6842_v25  ;;  %v6631_v57 = vrot.slane %v6629_v30, 5  ;;  %v6635_v51 = vrot.slane %v6633_v60, 4  ;;  %v5495_v52 = vsel %vm14170_vm8, 0, %v5494_v27  ;;  %v16549_v13 = vld [vmem:[#allocation7_spill] sm:$0xff] }
 0x2e9   : > { %6023 = vst [vmem:[#allocation3 + $0x80] sm:$0x1] %v6022_v16  ;;  %v5802_v11 = vshrl.u32 %v5617_v48, 16  ;;  %v5334_v49 = vadd.f32 %v5253_v1, %v4812_v53  ;;  %v5805_v62 = vshll.u32 %v5617_v48, 16  ;;  %v6024_v1 = vld [vmem:[#allocation3 + $0x84] sm:$0xf]  ;;  %v6626_v48 = vor.u32 %v6625_v42, %v6622_v35 }
 0x2ea   : > { %v14888_v45 = vpop.f32.mrf.mxu2  ;;  %v6636_v53 = vor.u32 %v6635_v51, %v6631_v57  ;;  %5496 = vst [vmem:[#allocation3 + $0x9c] sm:$0x1] %v5495_v52  ;;  %v6641_v60 = vrot.slane %v6639_v58, 5  ;;  %v14923_v42 = vld [vmem:[#allocation3 + $0x40] sm:$0xf] }
 0x2eb   : > { %v14890_v7 = vrot.slane %v5802_v11, 7  ;;  %v5434_v61 = vadd.f32 %v14638_v50, %v5334_v49  ;;  %7863 = vmatmul.bf16.gmra.mxu0 %v12905_v55  ;;  %v5550_v11 = vld [vmem:[#allocation3 + $0xa4] sm:$0x1]  ;;  %v7254_v55 = vrot.slane %v7139_v59, 5  ;;  %v6627_v30 = vrot.slane %v6626_v48, 4 }
 0x2ec   : > { %7485 = vmatmul.bf16.gmra.mxu3 %v7385_v32  ;;  %v5551_v21 = vsel %vm14197_vm10, 0, %v5550_v11  ;;  %v6637_v24 = vrot.slane %v6636_v53, 4  ;;  %v6406_v58 = vld [vmem:[#allocation3 + $0x6c] sm:$0xf]  ;;  %v6407_v11 = vld [vmem:[#allocation3 + $0x70] sm:$0xf] }
 0x2ed   : > { %v5807_v36 = vor.u32 %v5805_v62, %v14890_v7  ;;  %v5586_v19 = vmax.f32 %v5434_v61, 0.0  ;;  %v14896_v26 = vpop.f32.mrf.mxu1  ;;  %v12167_v62 = vrot.slane %v7137_v22, 9  ;;  %5552 = vst [vmem:[#allocation3 + $0xa4] sm:$0x1] %v5551_v21  ;;  %v7258_v22 = vrot.slane %v14923_v42, 5 }
 0x2ee   : > { %v4734_v5 = vpop.f32.mrf.mxu3  ;;  %v14937_v21 = vld [vmem:[%s16483_s2] ss:$0 sm:$0xff] }
 0x2ef   : > { %v6025_v18 = vsel %vm14283_vm12, %v5807_v36, %v6024_v1  ;;  %v5618_v2 = vpack.c.bf16 %v5586_v19, %v5586_v19  ;;  %v4813_v6 = vadd.f32 %v4734_v5, %v4067_v20  ;;  %v12872_v10 = vld [vmem:[#allocation3 + $0x78] sm:$0xff]  ;;  %v16548_v20 = vld [vmem:[#allocation21_spill] sm:$0xff]  ;;  %v7252_v27 = vsel %vm13399_vm5, %v12167_v62, %v7251_v0 }
 0x2f0   : > { %6026 = vst [vmem:[#allocation3 + $0x84] sm:$0xf] %v6025_v18  ;;  %v5258_v16 = vpop.f32.mrf.mxu0  ;;  %6983 = vmatmul.bf16.gmra.mxu2 %v6867_v46  ;;  %6316 = vmatmul.bf16.gmra.mxu1 %v12872_v10  ;;  %v3689_v32 = vadd.f32 %v16549_v13, %v16548_v20  ;;  %v5808_v36 = vrot.slane %v14890_v7, 4  ;;  %v7358_v18 = vunpack.c.l.b16 %v7252_v27  ;;  %v12906_v10 = vld [vmem:[#allocation3 + $0x3c] sm:$0xff]  ;;  %v6644_v20 = vshrl.u32 %v6406_v58, 16  ;;  %v16550_v13 = vld [vmem:[#allocation22_spill] sm:$0xff] }
 0x2f1   : > { %v5810_v49 = vshrl.u32 %v5618_v2, 16  ;;  %v5335_v34 = vadd.f32 %v5256_v37, %v4813_v6  ;;  %v5813_v61 = vshll.u32 %v5618_v2, 16  ;;  %v7255_v37 = vsel %vm13399_vm5, %v7253_v63, %v7254_v55  ;;  %v6031_v55 = vld [vmem:[#allocation3 + $0x90] sm:$0xf] }
 0x2f2   : > { %v14906_v33 = vpop.f32.mrf.mxu2  ;;  %v4068_v25 = vadd.f32 %v14747_v15, %v3689_v32  ;;  %v6632_v63 = vsel %vm13246_vm2, %v6627_v30, %v6631_v57  ;;  %v6642_v15 = vsel %vm13246_vm2, %v6637_v24, %v6641_v60  ;;  %v7359_v5 = vunpack.c.l.b16 %v7255_v37 }
 0x2f3   : > { %v5812_v1 = vrot.slane %v5810_v49, 7  ;;  %v5435_v39 = vadd.f32 %v14638_v50, %v5335_v34  ;;  %v6845_v6 = vunpack.c.l.b16 %v6642_v15  ;;  %v6844_v48 = vunpack.c.l.b16 %v6632_v63 }
 0x2f4   : > { %v7386_v53 = vpack.c.b16 %v7359_v5, %v7358_v18  ;;  %v4069_v32 = vadd.f32 %v14768_v44, %v16550_v13  ;;  %v6647_v24 = vshll.u32 %v6406_v58, 16  ;;  %v6653_v62 = vshll.u32 %v6407_v11, 16  ;;  %v16551_v58 = vld [vmem:[#allocation23_spill] sm:$0xff] }
 0x2f5   : > { %v5815_v19 = vor.u32 %v5813_v61, %v5812_v1  ;;  %v5817_v41 = vrot.slane %v5812_v1, 4  ;;  %v5587_v35 = vmax.f32 %v5435_v39, 0.0  ;;  %v14917_v50 = vpop.f32.mrf.mxu1  ;;  %v6657_v1 = vshrl.u32 %v6407_v11, 16  ;;  %v5497_v61 = vld [vmem:[#allocation3 + $0xa8] sm:$0x1]  ;;  %v16552_v11 = vld [vmem:[#allocation8_spill] sm:$0xff] }
 0x2f6   : > { %v4736_v46 = vpop.f32.mrf.mxu3  ;;  %v7260_v30 = vrot.slane %v7258_v22, 4 }
 0x2f7   : > { %v5816_v28 = vsel %vm14321_vm14, %v5808_v36, %v5815_v19  ;;  %v6029_v0 = vsel %vm14170_vm8, %v5817_v41, %v6028_v23  ;;  %v5619_v7 = vpack.c.bf16 %v5587_v35, %v5587_v35  ;;  %v4814_v51 = vadd.f32 %v4736_v46, %v4068_v25  ;;  %v6408_v23 = vld [vmem:[#allocation3 + $0x74] sm:$0x1]  ;;  %v7142_v35 = vld [vmem:[#allocation3 + $0x44] sm:$0x1] }
 0x2f8   : > { %6027 = vst [vmem:[#allocation3 + $0x88] sm:$0xf] %v5816_v28  ;;  %v5261_v59 = vpop.f32.mrf.mxu0  ;;  %v6868_v25 = vpack.c.b16 %v6845_v6, %v6844_v48  ;;  %v6646_v36 = vrot.slane %v6644_v20, 4  ;;  %v6649_v19 = vrot.slane %v6647_v24, 5  ;;  %v14947_v41 = vrot.slane %v6653_v62, 5 }
 0x2f9   : > { %6030 = vst [vmem:[#allocation3 + $0x8c] sm:$0x1] %v6029_v0  ;;  %v5819_v2 = vshrl.u32 %v5619_v7, 16  ;;  %v5336_v57 = vadd.f32 %v5258_v16, %v4814_v51  ;;  %v5822_v34 = vshll.u32 %v5619_v7, 16  ;;  %v6659_v44 = vrot.slane %v6657_v1, 4 }
 0x2fa   : > { %v14930_v52 = vpop.f32.mrf.mxu2  ;;  %v7140_v28 = vld [vmem:[#allocation3 + $0x3c] sm:$0xe]  ;;  %v5498_v0 = vsel %vm14170_vm8, 0, %v5497_v61  ;;  %v6663_v18 = vshll.u32 %v6408_v23, 16  ;;  %v7261_v48 = vrot.slane %v7142_v35, 5 }
 0x2fb   : > { %v14932_v49 = vrot.slane %v5819_v2, 7  ;;  %v5436_v16 = vadd.f32 %v14937_v21, %v5336_v57  ;;  %7868 = vmatmul.bf16.gmra.mxu0 %v12906_v10  ;;  %v6660_v51 = vor.u32 %v6659_v44, %v14947_v41  ;;  %v12927_v2 = vld [vmem:[%s16484_s3 + $0x108] sm:$0xff]  ;;  %5499 = vst [vmem:[#allocation3 + $0xa8] sm:$0x1] %v5498_v0  ;;  %v12168_v13 = vrot.slane %v7140_v28, 9 }
 0x2fc   : > { %7490 = vmatmul.bf16.gmra.mxu3 %v7386_v53  ;;  %v5553_v57 = vld [vmem:[#allocation3 + $0xb0] sm:$0x1]  ;;  %8592 = vmatpush.bf16.msrb.mxu1 %v12927_v2  ;;  %v7262_v62 = vsel %vm13399_vm5, %v7260_v30, %v7261_v48  ;;  %v6035_v61 = vld [vmem:[#allocation3 + $0x98] sm:$0x1] }
 0x2fd   : > { %v5824_v39 = vor.u32 %v5822_v34, %v14932_v49  ;;  %v5588_v37 = vmax.f32 %v5436_v16, 0.0  ;;  %v14945_v27 = vpop.f32.mrf.mxu1  ;;  %v5554_v53 = vsel %vm14197_vm10, 0, %v5553_v57  ;;  %v3691_v34 = vadd.f32 %v16552_v11, %v16551_v58  ;;  %v16553_v57 = vld [vmem:[#allocation25_spill] sm:$0xff]  ;;  %v12941_v11 = vld [vmem:[%s16484_s3 + $0x178] sm:$0xff] }
 0x2fe   : > { %v4739_v60 = vpop.f32.mrf.mxu3  ;;  %v6650_v16 = vor.u32 %v6649_v19, %v6646_v36  ;;  %v6661_v20 = vrot.slane %v6660_v51, 4  ;;  %5555 = vst [vmem:[#allocation3 + $0xb0] sm:$0x1] %v5554_v53  ;;  %9108 = vmatpush.bf16.msra.mxu2 %v12941_v11  ;;  %v16554_v11 = vld [vmem:[#allocation26_spill] sm:$0xff] }
 0x2ff   : > { %v6032_v46 = vsel %vm14283_vm12, %v5824_v39, %v6031_v55  ;;  %v5620_v63 = vpack.c.bf16 %v5588_v37, %v5588_v37  ;;  %v4815_v15 = vadd.f32 %v4739_v60, %v4069_v32  ;;  %v12873_v5 = vld [vmem:[#allocation3 + $0x84] sm:$0xff]  ;;  %v4070_v1 = vadd.f32 %v14791_v9, %v3691_v34  ;;  %v6409_v34 = vld [vmem:[#allocation3 + $0x78] sm:$0xf] }
 0x300   : > { %6033 = vst [vmem:[#allocation3 + $0x90] sm:$0xf] %v6032_v46  ;;  %v5263_v7 = vpop.f32.mrf.mxu0  ;;  %6988 = vmatmul.bf16.gmra.mxu2 %v6868_v25  ;;  %6321 = vmatmul.bf16.gmra.mxu1 %v12873_v5  ;;  %v6665_v39 = vrot.slane %v6663_v18, 5  ;;  %v7259_v37 = vsel %vm13399_vm5, %v12168_v13, %v7258_v22  ;;  %v5825_v25 = vrot.slane %v14932_v49, 4  ;;  %v6651_v35 = vrot.slane %v6650_v16, 4  ;;  %v12907_v18 = vld [vmem:[#allocation3 + $0x48] sm:$0xff] }
 0x301   : > { %v5827_v6 = vshrl.u32 %v5620_v63, 16  ;;  %v5337_v10 = vadd.f32 %v5261_v59, %v4815_v15  ;;  %v5830_v24 = vshll.u32 %v5620_v63, 16  ;;  %v7361_v9 = vunpack.c.l.b16 %v7262_v62  ;;  %v14976_v46 = vld [vmem:[#allocation3 + $0x4c] sm:$0xf] }
 0x302   : > { %v14961_v55 = vpop.f32.mrf.mxu2  ;;  %v6666_v30 = vsel %vm13246_vm2, %v6661_v20, %v6665_v39  ;;  %v7360_v5 = vunpack.c.l.b16 %v7259_v37  ;;  %v6656_v51 = vsel %vm13246_vm2, %v6651_v35, %v14947_v41  ;;  %v7265_v2 = vrot.slane %v14976_v46, 5  ;;  %v6038_v20 = vld [vmem:[#allocation3 + $0x9c] sm:$0xf] }
 0x303   : > { %v5829_v32 = vrot.slane %v5827_v6, 7  ;;  %v5437_v59 = vadd.f32 %v14937_v21, %v5337_v10  ;;  %v4071_v6 = vadd.f32 %v14813_v43, %v16553_v57  ;;  %v6847_v53 = vunpack.c.l.b16 %v6666_v30 }
 0x304   : > { %v7387_v58 = vpack.c.b16 %v7361_v9, %v7360_v5  ;;  %v6668_v43 = vshrl.u32 %v6409_v34, 16  ;;  %v7143_v5 = vld [vmem:[#allocation3 + $0x48] sm:$0xe] }
 0x305   : > { %v5832_v23 = vor.u32 %v5830_v24, %v5829_v32  ;;  %v5834_v60 = vrot.slane %v5829_v32, 4  ;;  %v5589_v36 = vmax.f32 %v5437_v59, 0.0  ;;  %v14972_v44 = vpop.f32.mrf.mxu1  ;;  %v7145_v32 = vld [vmem:[#allocation3 + $0x50] sm:$0x1]  ;;  %v6846_v24 = vunpack.c.l.b16 %v6656_v51 }
 0x306   : > { %v4741_v19 = vpop.f32.mrf.mxu3  ;;  %v6671_v59 = vshll.u32 %v6409_v34, 16  ;;  %v16555_v34 = vld [vmem:[#allocation24_spill] sm:$0xff] }
 0x307   : > { %v5833_v42 = vsel %vm14321_vm14, %v5825_v25, %v5832_v23  ;;  %v6036_v22 = vsel %vm14170_vm8, %v5834_v60, %v6035_v61  ;;  %v5621_v49 = vpack.c.bf16 %v5589_v36, %v5589_v36  ;;  %v4816_v63 = vadd.f32 %v4741_v19, %v4070_v1  ;;  %v5500_v61 = vld [vmem:[#allocation3 + $0xb4] sm:$0x1]  ;;  %v6411_v25 = vld [vmem:[#allocation3 + $0x80] sm:$0x1] }
 0x308   : > { %6034 = vst [vmem:[#allocation3 + $0x94] sm:$0xf] %v5833_v42  ;;  %v5266_v15 = vpop.f32.mrf.mxu0  ;;  %v6670_v23 = vrot.slane %v6668_v43, 4  ;;  %v7267_v60 = vrot.slane %v7265_v2, 4  ;;  %v6673_v35 = vrot.slane %v6671_v59, 5  ;;  %v6687_v57 = vshll.u32 %v6411_v25, 16 }
 0x309   : > { %6037 = vst [vmem:[#allocation3 + $0x98] sm:$0x1] %v6036_v22  ;;  %v5836_v28 = vshrl.u32 %v5621_v49, 16  ;;  %v5338_v0 = vadd.f32 %v5263_v7, %v4816_v63  ;;  %v5839_v10 = vshll.u32 %v5621_v49, 16  ;;  %v6410_v7 = vld [vmem:[#allocation3 + $0x7c] sm:$0xf] }
 0x30a   : > { %v6951_v48 = vpop.f32.mrf.mxu2  ;;  %v6677_v62 = vshll.u32 %v6410_v7, 16  ;;  %v6681_v1 = vshrl.u32 %v6410_v7, 16  ;;  %v6674_v51 = vor.u32 %v6673_v35, %v6670_v23  ;;  %v3693_v7 = vadd.f32 %v16555_v34, %v16554_v11  ;;  %v6413_v11 = vld [vmem:[#allocation3 + $0x88] sm:$0xf] }
 0x30b   : > { %v14991_v16 = vrot.slane %v5836_v28, 7  ;;  %v5438_v41 = vadd.f32 %v14937_v21, %v5338_v0  ;;  %v14995_v13 = vadd.f32 %v6951_v48, %v14822_v12  ;;  %7873 = vmatmul.bf16.gmra.mxu0 %v12907_v18  ;;  %v6869_v12 = vpack.c.b16 %v6847_v53, %v6846_v24  ;;  %v5556_v48 = vld [vmem:[#allocation3 + $0xbc] sm:$0x1] }
 0x30c   : > { %7495 = vmatmul.bf16.gmra.mxu3 %v7387_v58  ;;  %v6679_v30 = vrot.slane %v6677_v62, 5  ;;  %v6683_v9 = vrot.slane %v6681_v1, 4  ;;  %v5501_v28 = vsel %vm14170_vm8, 0, %v5500_v61  ;;  %v12169_v43 = vrot.slane %v7143_v5, 9  ;;  %v6042_v61 = vld [vmem:[#allocation3 + $0xa4] sm:$0x1] }
 0x30d   : > { %v5841_v39 = vor.u32 %v5839_v10, %v14991_v16  ;;  %v5590_v37 = vmax.f32 %v5438_v41, 0.0  ;;  %v15000_v19 = vpop.f32.mrf.mxu1  ;;  %v7268_v10 = vrot.slane %v7145_v32, 5  ;;  %5502 = vst [vmem:[#allocation3 + $0xb4] sm:$0x1] %v5501_v28  ;;  %v4072_v1 = vadd.f32 %v14835_v29, %v3693_v7  ;;  %v6045_v7 = vld [vmem:[#allocation3 + $0xa8] sm:$0xf] }
 0x30e   : > { %v4744_v36 = vpop.f32.mrf.mxu3  ;;  %v6684_v18 = vor.u32 %v6683_v9, %v6679_v30  ;;  %v7266_v25 = vsel %vm13399_vm5, %v12169_v43, %v7265_v2  ;;  %v5842_v23 = vrot.slane %v14991_v16, 4  ;;  %v16556_v43 = vld [vmem:[#allocation28_spill] sm:$0xff] }
 0x30f   : > { %v6039_v42 = vsel %vm14283_vm12, %v5841_v39, %v6038_v20  ;;  %v5622_v22 = vpack.c.bf16 %v5590_v37, %v5590_v37  ;;  %v4817_v49 = vadd.f32 %v4744_v36, %v4071_v6  ;;  %v12874_v63 = vld [vmem:[#allocation3 + $0x90] sm:$0xff]  ;;  %v5557_v6 = vsel %vm14197_vm10, 0, %v5556_v48 }
 0x310   : > { %6040 = vst [vmem:[#allocation3 + $0x9c] sm:$0xf] %v6039_v42  ;;  %v5268_v0 = vpop.f32.mrf.mxu0  ;;  %6993 = vmatmul.bf16.gmra.mxu2 %v6869_v12  ;;  %6326 = vmatmul.bf16.gmra.mxu1 %v12874_v63  ;;  %v6685_v41 = vrot.slane %v6684_v18, 4  ;;  %v7269_v24 = vsel %vm13399_vm5, %v7267_v60, %v7268_v10  ;;  %v6675_v39 = vrot.slane %v6674_v51, 4  ;;  %v6689_v37 = vrot.slane %v6687_v57, 5  ;;  %v12908_v18 = vld [vmem:[#allocation3 + $0x54] sm:$0xff] }
 0x311   : > { %v5844_v53 = vshrl.u32 %v5622_v22, 16  ;;  %v5339_v58 = vadd.f32 %v5266_v15, %v4817_v49  ;;  %5558 = vst [vmem:[#allocation3 + $0xbc] sm:$0x1] %v5557_v6  ;;  %v5847_v59 = vshll.u32 %v5622_v22, 16  ;;  %v7363_v42 = vunpack.c.l.b16 %v7269_v24  ;;  %v15028_v22 = vld [vmem:[#allocation3 + $0x58] sm:$0xf] }
 0x312   : > { %v6954_v20 = vpop.f32.mrf.mxu2  ;;  %v6690_v29 = vsel %vm13246_vm2, %v6685_v41, %v6689_v37  ;;  %v7362_v5 = vunpack.c.l.b16 %v7266_v25  ;;  %v7272_v57 = vrot.slane %v15028_v22, 5  ;;  %v6412_v6 = vld [vmem:[#allocation3 + $0x84] sm:$0xf]  ;;  %v4073_v24 = vadd.f32 %v14861_v40, %v16556_v43  ;;  %v6414_v25 = vld [vmem:[#allocation3 + $0x8c] sm:$0x1] }
 0x313   : > { %v5846_v32 = vrot.slane %v5844_v53, 7  ;;  %v5439_v62 = vadd.f32 %v14937_v21, %v5339_v58  ;;  %v15014_v15 = vadd.f32 %v6954_v20, %v14845_v14  ;;  %v6680_v14 = vsel %vm13246_vm2, %v6675_v39, %v6679_v30 }
 0x314   : > { %v6849_v51 = vunpack.c.l.b16 %v6690_v29  ;;  %v6848_v53 = vunpack.c.l.b16 %v6680_v14  ;;  %v7388_v58 = vpack.c.b16 %v7363_v42, %v7362_v5  ;;  %v7146_v29 = vld [vmem:[#allocation3 + $0x54] sm:$0xe] }
 0x315   : > { %v5849_v60 = vor.u32 %v5847_v59, %v5846_v32  ;;  %v5851_v12 = vrot.slane %v5846_v32, 4  ;;  %v5591_v36 = vmax.f32 %v5439_v62, 0.0  ;;  %v15022_v9 = vpop.f32.mrf.mxu1  ;;  %v6695_v32 = vshll.u32 %v6412_v6, 16 }
 0x316   : > { %v4746_v35 = vpop.f32.mrf.mxu3  ;;  %v6701_v59 = vshll.u32 %v6413_v11, 16  ;;  %v6705_v62 = vshrl.u32 %v6413_v11, 16  ;;  %v6870_v37 = vpack.c.b16 %v6849_v51, %v6848_v53  ;;  %v12170_v11 = vrot.slane %v7146_v29, 9 }
 0x317   : > { %v5850_v46 = vsel %vm14321_vm14, %v5842_v23, %v5849_v60  ;;  %v6043_v2 = vsel %vm14170_vm8, %v5851_v12, %v6042_v61  ;;  %v5623_v16 = vpack.c.bf16 %v5591_v36, %v5591_v36  ;;  %v4818_v49 = vadd.f32 %v4746_v35, %v4072_v1  ;;  %v5503_v1 = vld [vmem:[#allocation3 + $0xc0] sm:$0x1]  ;;  %v7148_v23 = vld [vmem:[#allocation3 + $0x5c] sm:$0x1] }
 0x318   : > { %6041 = vst [vmem:[#allocation3 + $0xa0] sm:$0xf] %v5850_v46  ;;  %v5271_v63 = vpop.f32.mrf.mxu0  ;;  %v6697_v35 = vrot.slane %v6695_v32, 5  ;;  %v15048_v40 = vrot.slane %v6701_v59, 5  ;;  %v6707_v14 = vrot.slane %v6705_v62, 4  ;;  %v7275_v51 = vrot.slane %v7148_v23, 5 }
 0x319   : > { %6044 = vst [vmem:[#allocation3 + $0xa4] sm:$0x1] %v6043_v2  ;;  %v5853_v28 = vshrl.u32 %v5623_v16, 16  ;;  %v5340_v30 = vadd.f32 %v5268_v0, %v4818_v49  ;;  %v5856_v10 = vshll.u32 %v5623_v16, 16  ;;  %v6692_v0 = vshrl.u32 %v6412_v6, 16 }
 0x31a   : > { %v6956_v48 = vpop.f32.mrf.mxu2  ;;  %v5504_v49 = vsel %vm14170_vm8, 0, %v5503_v1  ;;  %v5559_v59 = vld [vmem:[#allocation3 + $0xc8] sm:$0x1]  ;;  %v7273_v23 = vsel %vm13399_vm5, %v12170_v11, %v7272_v57  ;;  %v12909_v11 = vld [vmem:[#allocation3 + $0x60] sm:$0xff] }
 0x31b   : > { %v15035_v34 = vrot.slane %v5853_v28, 7  ;;  %v5440_v20 = vadd.f32 %v14937_v21, %v5340_v30  ;;  %v15039_v41 = vadd.f32 %v6956_v48, %v14872_v56  ;;  %7878 = vmatmul.bf16.gmra.mxu0 %v12908_v18  ;;  %v7274_v56 = vrot.slane %v7272_v57, 4  ;;  %v15055_v18 = vld [vmem:[#allocation3 + $0x10] sm:$0xf]  ;;  %v16558_v48 = vld [vmem:[#allocation29_spill] sm:$0xff] }
 0x31c   : > { %7500 = vmatmul.bf16.gmra.mxu3 %v7388_v58  ;;  %v6694_v36 = vrot.slane %v6692_v0, 4  ;;  %v6708_v28 = vor.u32 %v6707_v14, %v15048_v40  ;;  %v6711_v30 = vshll.u32 %v6414_v25, 16  ;;  %5505 = vst [vmem:[#allocation3 + $0xc0] sm:$0x1] %v5504_v49  ;;  %v15077_v14 = vld [vmem:[#allocation3 + $0xc] sm:$0xf] }
 0x31d   : > { %v5858_v61 = vor.u32 %v5856_v10, %v15035_v34  ;;  %v5592_v39 = vmax.f32 %v5440_v20, 0.0  ;;  %v15046_v12 = vpop.f32.mrf.mxu1  ;;  %v16557_v10 = vld [vmem:[#allocation30_spill] sm:$0xff]  ;;  %v7276_v32 = vsel %vm13399_vm5, %v7274_v56, %v7275_v51  ;;  %v8083_v56 = vshll.u32 %v15055_v18, 16 }
 0x31e   : > { %v4749_v60 = vpop.f32.mrf.mxu3  ;;  %v3695_v53 = vadd.f32 %v16558_v48, %v16557_v10  ;;  %v6698_v43 = vor.u32 %v6697_v35, %v6694_v36  ;;  %v6713_v25 = vrot.slane %v6711_v30, 5  ;;  %v7364_v30 = vunpack.c.l.b16 %v7273_v23 }
 0x31f   : > { %v6046_v42 = vsel %vm14283_vm12, %v5858_v61, %v6045_v7  ;;  %v5624_v46 = vpack.c.bf16 %v5592_v39, %v5592_v39  ;;  %v4819_v2 = vadd.f32 %v4749_v60, %v4073_v24  ;;  %v12875_v16 = vld [vmem:[#allocation3 + $0x9c] sm:$0xff]  ;;  %v12926_v7 = vld [vmem:[%s16484_s3 + $0x100] sm:$0xff]  ;;  %v6709_v24 = vrot.slane %v6708_v28, 4 }
 0x320   : > { %6047 = vst [vmem:[#allocation3 + $0xa8] sm:$0xf] %v6046_v42  ;;  %v5273_v5 = vpop.f32.mrf.mxu0  ;;  %6998 = vmatmul.bf16.gmra.mxu2 %v6870_v37  ;;  %6331 = vmatmul.bf16.gmra.mxu1 %v12875_v16  ;;  %v5560_v61 = vsel %vm14197_vm10, 0, %v5559_v59  ;;  %v4074_v39 = vadd.f32 %v14888_v45, %v3695_v53  ;;  %v6049_v37 = vld [vmem:[#allocation3 + $0xb0] sm:$0x1]  ;;  %v5859_v60 = vrot.slane %v15035_v34, 4 }
 0x321   : > { %v5861_v58 = vshrl.u32 %v5624_v46, 16  ;;  %v5341_v6 = vadd.f32 %v5271_v63, %v4819_v2  ;;  %v5864_v20 = vshll.u32 %v5624_v46, 16  ;;  %8593 = vmatpush.bf16.msrb.mxu1 %v12926_v7  ;;  %5561 = vst [vmem:[#allocation3 + $0xc8] sm:$0x1] %v5560_v61  ;;  %v6699_v45 = vrot.slane %v6698_v43, 4 }
 0x322   : > { %v6959_v0 = vpop.f32.mrf.mxu2  ;;  %v6714_v22 = vsel %vm13246_vm2, %v6709_v24, %v6713_v25  ;;  %v7365_v46 = vunpack.c.l.b16 %v7276_v32  ;;  %v15083_v2 = vld [vmem:[#allocation3 + $0x64] sm:$0xf]  ;;  %v8074_v51 = vshrl.u32 %v15077_v14, 16  ;;  %v15092_v10 = vrot.slane %v8083_v56, 5 }
 0x323   : > { %v5863_v62 = vrot.slane %v5861_v58, 7  ;;  %v5441_v1 = vadd.f32 %v14937_v21, %v5341_v6  ;;  %v15066_v63 = vadd.f32 %v6959_v0, %v14896_v26  ;;  %v8087_v48 = vshrl.u32 %v15055_v18, 16  ;;  %v12940_v18 = vld [vmem:[%s16484_s3 + $0x170] sm:$0xff] }
 0x324   : > { %v6704_v6 = vsel %vm13246_vm2, %v6699_v45, %v15048_v40  ;;  %v7279_v7 = vrot.slane %v15083_v2, 5  ;;  %v6851_v32 = vunpack.c.l.b16 %v6714_v22  ;;  %v7389_v59 = vpack.c.b16 %v7365_v46, %v7364_v30  ;;  %9109 = vmatpush.bf16.msra.mxu2 %v12940_v18 }
 0x325   : > { %v5866_v26 = vor.u32 %v5864_v20, %v5863_v62  ;;  %v5868_v36 = vrot.slane %v5863_v62, 4  ;;  %v5593_v35 = vmax.f32 %v5441_v1, 0.0  ;;  %v15079_v42 = vpop.f32.mrf.mxu1  ;;  %v16559_v20 = vld [vmem:[#allocation32_spill] sm:$0xff]  ;;  %v6415_v62 = vld [vmem:[#allocation3 + $0x90] sm:$0xf]  ;;  %v6850_v25 = vunpack.c.l.b16 %v6704_v6 }
 0x326   : > { %v4751_v29 = vpop.f32.mrf.mxu3  ;;  %v4075_v0 = vadd.f32 %v14906_v33, %v16559_v20  ;;  %v7151_v33 = vld [vmem:[#allocation3 + $0x68] sm:$0x1]  ;;  %v6719_v23 = vshll.u32 %v6415_v62, 16 }
 0x327   : > { %v5867_v57 = vsel %vm14321_vm14, %v5859_v60, %v5866_v26  ;;  %v6050_v34 = vsel %vm14170_vm8, %v5868_v36, %v6049_v37  ;;  %v5625_v16 = vpack.c.bf16 %v5593_v35, %v5593_v35  ;;  %v4820_v49 = vadd.f32 %v4751_v29, %v4074_v39  ;;  %v6052_v37 = vld [vmem:[#allocation3 + $0xb4] sm:$0xf]  ;;  %v12965_v29 = vld [vmem:[%s16484_s3 + $0x1b8] sm:$0xff] }
 0x328   : > { %6048 = vst [vmem:[#allocation3 + $0xac] sm:$0xf] %v5867_v57  ;;  %v15089_v28 = vpop.f32.mrf.mxu0  ;;  %v6716_v39 = vshrl.u32 %v6415_v62, 16  ;;  %v7281_v35 = vrot.slane %v7279_v7, 4  ;;  %v6871_v45 = vpack.c.b16 %v6851_v32, %v6850_v25  ;;  %v7149_v57 = vld [vmem:[#allocation3 + $0x60] sm:$0xe]  ;;  %9487 = vmatpush.bf16.msrb.mxu3 %v12965_v29 }
 0x329   : > { %6051 = vst [vmem:[#allocation3 + $0xb0] sm:$0x1] %v6050_v34  ;;  %v5870_v53 = vshrl.u32 %v5625_v16, 16  ;;  %v5342_v58 = vadd.f32 %v5273_v5, %v4820_v49  ;;  %v5873_v43 = vshll.u32 %v5625_v16, 16  ;;  %v6416_v5 = vld [vmem:[#allocation3 + $0x94] sm:$0xf] }
 0x32a   : > { %v6961_v24 = vpop.f32.mrf.mxu2  ;;  %v6725_v56 = vshll.u32 %v6416_v5, 16  ;;  %v6729_v60 = vshrl.u32 %v6416_v5, 16  ;;  %v7282_v34 = vrot.slane %v7151_v33, 5  ;;  %v6718_v6 = vrot.slane %v6716_v39, 4  ;;  %v8027_v5 = vld [vmem:[#allocation3 + $0x14] sm:$0x1] }
 0x32b   : > { %v15104_v1 = vrot.slane %v5870_v53, 7  ;;  %v5442_v40 = vadd.f32 %v14937_v21, %v5342_v58  ;;  %v15108_v61 = vadd.f32 %v6961_v24, %v14917_v50  ;;  %7883 = vmatmul.bf16.gmra.mxu0 %v12909_v11  ;;  %v15114_v50 = vrot.slane %v8087_v48, 4  ;;  %v6417_v58 = vld [vmem:[#allocation3 + $0x98] sm:$0x1]  ;;  %v16560_v48 = vld [vmem:[#allocation33_spill] sm:$0xff] }
 0x32c   : > { %7505 = vmatmul.bf16.gmra.mxu3 %v7389_v59  ;;  %v15118_v46 = vrot.slane %v6725_v56, 5  ;;  %v6731_v2 = vrot.slane %v6729_v60, 4  ;;  %v6721_v11 = vrot.slane %v6719_v23, 5  ;;  %v3697_v20 = vadd.f32 %v14777_v38, %v16560_v48  ;;  %v6056_v60 = vld [vmem:[#allocation3 + $0xbc] sm:$0x1] }
 0x32d   : > { %v5875_v26 = vor.u32 %v5873_v43, %v15104_v1  ;;  %v5594_v36 = vmax.f32 %v5442_v40, 0.0  ;;  %v15116_v22 = vpop.f32.mrf.mxu1  ;;  %v12171_v18 = vrot.slane %v7149_v57, 9  ;;  %v7283_v62 = vsel %vm13399_vm5, %v7281_v35, %v7282_v34  ;;  %v6419_v29 = vld [vmem:[#allocation3 + $0xa0] sm:$0xf]  ;;  %v15153_v48 = vld [vmem:[#allocation3 + $0x70] sm:$0xf] }
 0x32e   : > { %v6732_v32 = vor.u32 %v6731_v2, %v15118_v46  ;;  %v15127_v40 = vrot.slane %v8074_v51, 4  ;;  %v6735_v33 = vshll.u32 %v6417_v58, 16  ;;  %v8077_v38 = vshll.u32 %v15077_v14, 16  ;;  %v12973_v57 = vld [vmem:[%s16484_s3 + $0x1f8] sm:$0xff] }
 0x32f   : > { %v6053_v16 = vsel %vm14283_vm12, %v5875_v26, %v6052_v37  ;;  %v5626_v49 = vpack.c.bf16 %v5594_v36, %v5594_v36  ;;  %v4754_v30 = vpop.f32.mrf.mxu3  ;;  %v12876_v53 = vld [vmem:[#allocation3 + $0xa8] sm:$0xff]  ;;  %v6722_v23 = vor.u32 %v6721_v11, %v6718_v6  ;;  %v7280_v56 = vsel %vm13399_vm5, %v12171_v18, %v7279_v7  ;;  %v12981_v7 = vld [vmem:[%s16484_s3 + $0x238] sm:$0xff]  ;;  %10233 = vmatpush.bf16.msra.mxu0 %v12973_v57 }
 0x330   : > { %6054 = vst [vmem:[#allocation3 + $0xb4] sm:$0xf] %v6053_v16  ;;  %v4821_v43 = vadd.f32 %v4754_v30, %v4075_v0  ;;  %v5278_v24 = vpop.f32.mrf.mxu0  ;;  %7003 = vmatmul.bf16.gmra.mxu2 %v6871_v45  ;;  %6336 = vmatmul.bf16.gmra.mxu1 %v12876_v53  ;;  %v8090_v0 = vor.u32 %v15114_v50, %v15092_v10  ;;  %v6733_v51 = vrot.slane %v6732_v32, 4  ;;  %v7367_v35 = vunpack.c.l.b16 %v7283_v62 }
 0x331   : > { %v5878_v59 = vshrl.u32 %v5626_v49, 16  ;;  %v5881_v25 = vshll.u32 %v5626_v49, 16  ;;  %v5876_v45 = vrot.slane %v15104_v1, 4  ;;  %v4076_v34 = vadd.f32 %v14930_v52, %v3697_v20  ;;  %10755 = vmatpush.bf16.msra.mxu1 %v12981_v7 }
 0x332   : > { %v5343_v39 = vadd.f32 %v15089_v28, %v4821_v43  ;;  %v8093_v28 = vshll.u32 %v8027_v5, 16  ;;  %v6737_v30 = vrot.slane %v6735_v33, 5  ;;  %v7366_v1 = vunpack.c.l.b16 %v7280_v56  ;;  %v12910_v5 = vld [vmem:[#allocation3 + $0x6c] sm:$0xff] }
 0x333   : > { %v5880_v37 = vrot.slane %v5878_v59, 7  ;;  %v6964_v36 = vpop.f32.mrf.mxu2  ;;  %v6723_v6 = vrot.slane %v6722_v23, 4  ;;  %v6749_v11 = vshll.u32 %v6419_v29, 16  ;;  %v6418_v59 = vld [vmem:[#allocation3 + $0x9c] sm:$0xf]  ;;  %v6753_v18 = vshrl.u32 %v6419_v29, 16 }
 0x334   : > { %v5443_v26 = vadd.f32 %v14937_v21, %v5343_v39  ;;  %v15138_v50 = vadd.f32 %v6964_v36, %v14945_v27  ;;  %v6738_v32 = vsel %vm13246_vm2, %v6733_v51, %v6737_v30  ;;  %v7390_v62 = vpack.c.b16 %v7367_v35, %v7366_v1  ;;  %v6420_v1 = vld [vmem:[#allocation3 + $0xa4] sm:$0x1] }
 0x335   : > { %v5883_v14 = vor.u32 %v5881_v25, %v5880_v37  ;;  %v5885_v2 = vrot.slane %v5880_v37, 4  ;;  %v15147_v49 = vpop.f32.mrf.mxu1  ;;  %v8079_v39 = vrot.slane %v8077_v38, 5  ;;  %v8091_v33 = vrot.slane %v8090_v0, 4 }
 0x336   : > { %v5595_v16 = vmax.f32 %v5443_v26, 0.0  ;;  %v8095_v37 = vrot.slane %v8093_v28, 5  ;;  %v6728_v56 = vsel %vm13246_vm2, %v6723_v6, %v15118_v46  ;;  %v6853_v26 = vunpack.c.l.b16 %v6738_v32  ;;  %v7154_v28 = vld [vmem:[#allocation3 + $0x74] sm:$0x1] }
 0x337   : > { %v5884_v53 = vsel %vm14321_vm14, %v5876_v45, %v5883_v14  ;;  %v6057_v27 = vsel %vm14170_vm8, %v5885_v2, %v6056_v60  ;;  %v4756_v58 = vpop.f32.mrf.mxu3  ;;  %v7286_v60 = vrot.slane %v15153_v48, 5  ;;  %v6740_v36 = vshrl.u32 %v6418_v59, 16  ;;  %v6059_v14 = vld [vmem:[#allocation3 + $0xc0] sm:$0xf] }
 0x338   : > { %6055 = vst [vmem:[#allocation3 + $0xb8] sm:$0xf] %v5884_v53  ;;  %v5627_v52 = vpack.c.bf16 %v5595_v16, %v5595_v16  ;;  %v4822_v20 = vadd.f32 %v4756_v58, %v4076_v34  ;;  %v15155_v43 = vpop.f32.mrf.mxu0  ;;  %v6743_v51 = vshll.u32 %v6418_v59, 16  ;;  %v15163_v45 = vrot.slane %v6749_v11, 5  ;;  %v12939_v34 = vld [vmem:[%s16484_s3 + $0x168] sm:$0xff] }
 0x339   : > { %6058 = vst [vmem:[#allocation3 + $0xbc] sm:$0x1] %v6057_v27  ;;  %v7061_v46 = vadd.f32 %v14961_v55, %v14802_v4  ;;  %v6852_v57 = vunpack.c.l.b16 %v6728_v56  ;;  %v8080_v7 = vor.u32 %v8079_v39, %v15127_v40  ;;  %v7288_v53 = vrot.slane %v7286_v60, 4  ;;  %v7152_v40 = vld [vmem:[#allocation3 + $0x6c] sm:$0xe]  ;;  %9110 = vmatpush.bf16.msra.mxu2 %v12939_v34 }
 0x33a   : > { %v5887_v25 = vshrl.u32 %v5627_v52, 16  ;;  %v5344_v23 = vadd.f32 %v5278_v24, %v4822_v20  ;;  %v5890_v35 = vshll.u32 %v5627_v52, 16  ;;  %v6755_v24 = vrot.slane %v6753_v18, 4 }
 0x33b   : > { %7888 = vmatmul.bf16.gmra.mxu0 %v12910_v5  ;;  %v6966_v0 = vpop.f32.mrf.mxu2  ;;  %v8096_v4 = vsel %vm13246_vm2, %v8091_v33, %v8095_v37  ;;  %v6872_v55 = vpack.c.b16 %v6853_v26, %v6852_v57  ;;  %v6742_v58 = vrot.slane %v6740_v36, 4  ;;  %v6745_v6 = vrot.slane %v6743_v51, 5  ;;  %v8029_v37 = vld [vmem:[#allocation3 + $0x1c] sm:$0xf] }
 0x33c   : > { %v15165_v29 = vrot.slane %v5887_v25, 7  ;;  %v5444_v38 = vadd.f32 %v14937_v21, %v5344_v23  ;;  %7510 = vmatmul.bf16.gmra.mxu3 %v7390_v62  ;;  %v15171_v2 = vadd.f32 %v6966_v0, %v14972_v44  ;;  %v7289_v11 = vrot.slane %v7154_v28, 5  ;;  %v6063_v0 = vld [vmem:[#allocation3 + $0xc8] sm:$0x1] }
 0x33d   : > { %v15178_v30 = vpop.f32.mrf.mxu1  ;;  %v6756_v59 = vor.u32 %v6755_v24, %v15163_v45  ;;  %v6759_v18 = vshll.u32 %v6420_v1, 16  ;;  %v8081_v62 = vrot.slane %v8080_v7, 4  ;;  %v12172_v39 = vrot.slane %v7152_v40, 9  ;;  %v15215_v40 = vld [vmem:[#allocation3 + $0x7c] sm:$0xf] }
 0x33e   : > { %v5892_v21 = vor.u32 %v5890_v35, %v15165_v29  ;;  %v5596_v16 = vmax.f32 %v5444_v38, 0.0  ;;  %v7290_v33 = vsel %vm13399_vm5, %v7288_v53, %v7289_v11  ;;  %v6746_v17 = vor.u32 %v6745_v6, %v6742_v58  ;;  %v6422_v38 = vld [vmem:[#allocation3 + $0xac] sm:$0xf] }
 0x33f   : > { %v7471_v44 = vpop.f32.mrf.mxu3  ;;  %v12877_v27 = vld [vmem:[#allocation3 + $0xb4] sm:$0xff]  ;;  %v8086_v25 = vsel %vm13246_vm2, %v8081_v62, %v15092_v10  ;;  %v15194_v23 = vunpack.c.l.b16 %v8096_v4  ;;  %v6757_v51 = vrot.slane %v6756_v59, 4  ;;  %v7287_v35 = vsel %vm13399_vm5, %v12172_v39, %v7286_v60  ;;  %v6421_v60 = vld [vmem:[#allocation3 + $0xa8] sm:$0xf] }
 0x340   : > { %v6060_v48 = vsel %vm14283_vm12, %v5892_v21, %v6059_v14  ;;  %v5628_v52 = vpack.c.bf16 %v5596_v16, %v5596_v16  ;;  %v15184_v20 = vadd.f32 %v7471_v44, %v7061_v46  ;;  %v15186_v32 = vpop.f32.mrf.mxu0  ;;  %7008 = vmatmul.bf16.gmra.mxu2 %v6872_v55  ;;  %6341 = vmatmul.bf16.gmra.mxu1 %v12877_v27  ;;  %v6761_v28 = vrot.slane %v6759_v18, 5  ;;  %v8028_v21 = vld [vmem:[#allocation3 + $0x18] sm:$0xf] }
 0x341   : > { %6061 = vst [vmem:[#allocation3 + $0xc0] sm:$0xf] %v6060_v48  ;;  %v7369_v46 = vunpack.c.l.b16 %v7290_v33  ;;  %v8107_v14 = vshll.u32 %v8029_v37, 16  ;;  %v5893_v57 = vrot.slane %v15165_v29, 4  ;;  %v8111_v16 = vshrl.u32 %v8029_v37, 16  ;;  %v12911_v48 = vld [vmem:[#allocation3 + $0x78] sm:$0xff] }
 0x342   : > { %v5895_v5 = vshrl.u32 %v5628_v52, 16  ;;  %v5898_v26 = vshll.u32 %v5628_v52, 16  ;;  %v6747_v53 = vrot.slane %v6746_v17, 4  ;;  %v7368_v4 = vunpack.c.l.b16 %v7287_v35  ;;  %v8030_v35 = vld [vmem:[#allocation3 + $0x20] sm:$0x1] }
 0x343   : > { %v6969_v36 = vpop.f32.mrf.mxu2  ;;  %v6773_v55 = vshll.u32 %v6422_v38, 16  ;;  %v6777_v44 = vshrl.u32 %v6422_v38, 16  ;;  %v6762_v6 = vsel %vm13246_vm2, %v6757_v51, %v6761_v28  ;;  %v8098_v52 = vshrl.u32 %v8028_v21, 16  ;;  %v12964_v28 = vld [vmem:[%s16484_s3 + $0x1b0] sm:$0xff] }
 0x344   : > { %v5897_v56 = vrot.slane %v5895_v5, 7  ;;  %v15199_v24 = vadd.f32 %v6969_v36, %v15000_v19  ;;  %v7391_v11 = vpack.c.b16 %v7369_v46, %v7368_v4  ;;  %v8101_v59 = vshll.u32 %v8028_v21, 16  ;;  %9488 = vmatpush.bf16.msrb.mxu3 %v12964_v28 }
 0x345   : > { %v15202_v34 = vpop.f32.mrf.mxu1  ;;  %v15217_v8 = vrot.slane %v8107_v14, 5  ;;  %v6764_v18 = vshrl.u32 %v6421_v60, 16  ;;  %v6767_v62 = vshll.u32 %v6421_v60, 16  ;;  %v8113_v5 = vrot.slane %v8111_v16, 4 }
 0x346   : > { %v5900_v10 = vor.u32 %v5898_v26, %v5897_v56  ;;  %v5902_v7 = vrot.slane %v5897_v56, 4  ;;  %v6855_v39 = vunpack.c.l.b16 %v6762_v6  ;;  %v15222_v33 = vrot.slane %v6773_v55, 5  ;;  %v7155_v55 = vld [vmem:[#allocation3 + $0x78] sm:$0xe] }
 0x347   : > { %v7473_v1 = vpop.f32.mrf.mxu3  ;;  %v6779_v37 = vrot.slane %v6777_v44, 4  ;;  %v7293_v17 = vrot.slane %v15215_v40, 5  ;;  %v8474_v26 = vunpack.c.l.b16 %v8086_v25  ;;  %v8100_v38 = vrot.slane %v8098_v52, 4  ;;  %v6423_v25 = vld [vmem:[#allocation3 + $0xb0] sm:$0x1]  ;;  %v12937_v40 = vld [vmem:[%s16484_s3 + $0x158] sm:$0xff] }
 0x348   : > { %v5901_v19 = vsel %vm14321_vm14, %v5893_v57, %v5900_v10  ;;  %v6064_v27 = vsel %vm14170_vm8, %v5902_v7, %v6063_v0  ;;  %v15209_v29 = vadd.f32 %v7473_v1, %v14995_v13  ;;  %v15211_v58 = vpop.f32.mrf.mxu0  ;;  %v6752_v13 = vsel %vm13246_vm2, %v6747_v53, %v15163_v45  ;;  %v12938_v0 = vld [vmem:[%s16484_s3 + $0x160] sm:$0xff]  ;;  %v7157_v10 = vld [vmem:[#allocation3 + $0x80] sm:$0x1] }
 0x349   : > { %6062 = vst [vmem:[#allocation3 + $0xc4] sm:$0xf] %v5901_v19  ;;  %v6854_v51 = vunpack.c.l.b16 %v6752_v13  ;;  %v8103_v45 = vrot.slane %v8101_v59, 5  ;;  %v8506_v14 = vpack.c.b16 %v15194_v23, %v8474_v26  ;;  %v6766_v57 = vrot.slane %v6764_v18, 4  ;;  %9111 = vmatpush.bf16.msra.mxu2 %v12938_v0  ;;  %v8032_v59 = vld [vmem:[#allocation3 + $0x28] sm:$0xf] }
 0x34a   : > { %6065 = vst [vmem:[#allocation3 + $0xc8] sm:$0x1] %v6064_v27  ;;  %v6780_v16 = vor.u32 %v6779_v37, %v15222_v33  ;;  %v7295_v1 = vrot.slane %v7293_v17, 4  ;;  %v8114_v53 = vor.u32 %v8113_v5, %v15217_v8  ;;  %v6783_v23 = vshll.u32 %v6423_v25, 16  ;;  %v6425_v18 = vld [vmem:[#allocation3 + $0xb8] sm:$0xf] }
 0x34b   : > { %7893 = vmatmul.bf16.gmra.mxu0 %v12911_v48  ;;  %v6971_v56 = vpop.f32.mrf.mxu2  ;;  %v6873_v7 = vpack.c.b16 %v6855_v39, %v6854_v51  ;;  %v7296_v44 = vrot.slane %v7157_v10, 5  ;;  %v8117_v19 = vshll.u32 %v8030_v35, 16  ;;  %v8104_v6 = vor.u32 %v8103_v45, %v8100_v38  ;;  %v12972_v26 = vld [vmem:[%s16484_s3 + $0x1f0] sm:$0xff]  ;;  %v8031_v45 = vld [vmem:[#allocation3 + $0x24] sm:$0xf] }
 0x34c   : > { %7515 = vmatmul.bf16.gmra.mxu3 %v7391_v11  ;;  %v15226_v36 = vadd.f32 %v6971_v56, %v15022_v9  ;;  %v6769_v9 = vrot.slane %v6767_v62, 5  ;;  %v6781_v11 = vrot.slane %v6780_v16, 4  ;;  %v12173_v48 = vrot.slane %v7155_v55, 9  ;;  %v12936_v56 = vld [vmem:[%s16484_s3 + $0x150] sm:$0xff]  ;;  %10234 = vmatpush.bf16.msra.mxu0 %v12972_v26  ;;  %v12935_v55 = vld [vmem:[%s16484_s3 + $0x148] sm:$0xff]  ;;  %v12934_v26 = vld [vmem:[%s16484_s3 + $0x140] sm:$0xff] }
 0x34d   : > { %v15234_v46 = vpop.f32.mrf.mxu1  ;;  %v8115_v52 = vrot.slane %v8114_v53, 4  ;;  %9112 = vmatpush.bf16.msra.mxu2 %v12937_v40  ;;  %v6785_v5 = vrot.slane %v6783_v23, 5  ;;  %v8119_v37 = vrot.slane %v8117_v19, 5  ;;  %v12980_v51 = vld [vmem:[%s16484_s3 + $0x230] sm:$0xff]  ;;  %v8105_v38 = vrot.slane %v8104_v6, 4 }
 0x34e   : > { %v6770_v27 = vor.u32 %v6769_v9, %v6766_v57  ;;  %v7294_v39 = vsel %vm13399_vm5, %v12173_v48, %v7293_v17  ;;  %v8131_v0 = vshll.u32 %v8032_v59, 16  ;;  %v6424_v57 = vld [vmem:[#allocation3 + $0xb4] sm:$0xf]  ;;  %v8135_v9 = vshrl.u32 %v8032_v59, 16  ;;  %10756 = vmatpush.bf16.msra.mxu1 %v12980_v51  ;;  %v7159_v53 = vld [vmem:[#allocation3 + $0x88] sm:$0xf] }
 0x34f   : > { %v7476_v21 = vpop.f32.mrf.mxu3  ;;  %v8120_v25 = vsel %vm13246_vm2, %v8115_v52, %v8119_v37  ;;  %v6797_v16 = vshll.u32 %v6425_v18, 16  ;;  %v8122_v19 = vshrl.u32 %v8031_v45, 16  ;;  %v6791_v52 = vshll.u32 %v6424_v57, 16 }
 0x350   : > { %v15240_v4 = vadd.f32 %v7476_v21, %v15014_v15  ;;  %v15242_v60 = vpop.f32.mrf.mxu0  ;;  %7013 = vmatmul.bf16.gmra.mxu2 %v6873_v7  ;;  %8594 = vmatmul.bf16.vlgmr.msrb.gmra.mxu1 %v8506_v14  ;;  %v7297_v15 = vsel %vm13399_vm5, %v7295_v1, %v7296_v44  ;;  %v6771_v28 = vrot.slane %v6770_v27, 4  ;;  %v6786_v14 = vsel %vm13246_vm2, %v6781_v11, %v6785_v5  ;;  %v12912_v44 = vld [vmem:[#allocation3 + $0x84] sm:$0xff] }
 0x351   : > { %v7370_v21 = vunpack.c.l.b16 %v7294_v39  ;;  %v6801_v1 = vshrl.u32 %v6425_v18, 16  ;;  %9113 = vmatpush.bf16.msra.mxu2 %v12936_v56  ;;  %v8125_v27 = vshll.u32 %v8031_v45, 16  ;;  %v6857_v6 = vunpack.c.l.b16 %v6786_v14  ;;  %v8033_v56 = vld [vmem:[#allocation3 + $0x2c] sm:$0x1]  ;;  %v6426_v45 = vld [vmem:[#allocation3 + $0xbc] sm:$0x1] }
 0x352   : > { %v6776_v23 = vsel %vm13246_vm2, %v6771_v28, %v15222_v33  ;;  %v8477_v11 = vunpack.c.l.b16 %v8120_v25  ;;  %v15283_v48 = vrot.slane %v8131_v0, 5  ;;  %v7300_v59 = vrot.slane %v7159_v53, 5  ;;  %v7160_v0 = vld [vmem:[#allocation3 + $0x8c] sm:$0x1] }
 0x353   : > { %v6974_v13 = vpop.f32.mrf.mxu2  ;;  %v6856_v5 = vunpack.c.l.b16 %v6776_v23  ;;  %v15285_v39 = vrot.slane %v6797_v16, 5  ;;  %v6803_v37 = vrot.slane %v6801_v1, 4  ;;  %v8127_v28 = vrot.slane %v8125_v27, 5 }
 0x354   : > { %v15250_v62 = vadd.f32 %v6974_v13, %v15046_v12  ;;  %v7371_v12 = vunpack.c.l.b16 %v7297_v15  ;;  %v6788_v15 = vshrl.u32 %v6424_v57, 16  ;;  %v8137_v13 = vrot.slane %v8135_v9, 4  ;;  %v7158_v9 = vld [vmem:[#allocation3 + $0x84] sm:$0xe] }
 0x355   : > { %v15263_v35 = vpop.f32.mrf.mxu1  ;;  %9114 = vmatpush.bf16.msra.mxu2 %v12935_v55  ;;  %v6874_v51 = vpack.c.b16 %v6857_v6, %v6856_v5  ;;  %v6793_v57 = vrot.slane %v6791_v52, 5  ;;  %v6804_v53 = vor.u32 %v6803_v37, %v15285_v39  ;;  %v7303_v55 = vrot.slane %v7160_v0, 5 }
 0x356   : > { %v7392_v40 = vpack.c.b16 %v7371_v12, %v7370_v21  ;;  %v6790_v25 = vrot.slane %v6788_v15, 4  ;;  %v7302_v21 = vrot.slane %v7300_v59, 4  ;;  %v8141_v23 = vshll.u32 %v8033_v56, 16 }
 0x357   : > { %v7478_v17 = vpop.f32.mrf.mxu3 }
 0x358   : > { %v15270_v10 = vadd.f32 %v7478_v17, %v15039_v41  ;;  %v15272_v7 = vpop.f32.mrf.mxu0  ;;  %v8110_v41 = vsel %vm13246_vm2, %v8105_v38, %v15217_v8  ;;  %v8124_v17 = vrot.slane %v8122_v19, 4  ;;  %v6794_v19 = vor.u32 %v6793_v57, %v6790_v25  ;;  %v12913_v57 = vld [vmem:[#allocation3 + $0x90] sm:$0xff] }
 0x359   : > { %v8476_v33 = vunpack.c.l.b16 %v8110_v41  ;;  %9115 = vmatpush.bf16.msra.mxu2 %v12934_v26  ;;  %v12174_v41 = vrot.slane %v7158_v9, 9  ;;  %v7304_v27 = vsel %vm13399_vm5, %v7302_v21, %v7303_v55 }
 0x35a   : > { %v8128_v6 = vor.u32 %v8127_v28, %v8124_v17  ;;  %v7373_v37 = vunpack.c.l.b16 %v7304_v27  ;;  %v6795_v26 = vrot.slane %v6794_v19, 4  ;;  %v7162_v17 = vld [vmem:[#allocation3 + $0x94] sm:$0xf]  ;;  %v8034_v28 = vld [vmem:[#allocation3 + $0x30] sm:$0xf] }
 0x35b   : > { %7898 = vmatmul.bf16.gmra.mxu0 %v12912_v44  ;;  %v6976_v18 = vpop.f32.mrf.mxu2  ;;  %v8507_v38 = vpack.c.b16 %v8477_v11, %v8476_v33  ;;  %v6807_v44 = vshll.u32 %v6426_v45, 16  ;;  %v7301_v15 = vsel %vm13399_vm5, %v12174_v41, %v7300_v59  ;;  %v7307_v55 = vrot.slane %v7162_v17, 5 }
 0x35c   : > { %7520 = vmatmul.bf16.gmra.mxu3 %v7392_v40  ;;  %v15288_v8 = vadd.f32 %v6976_v18, %v15079_v42  ;;  %v8138_v42 = vor.u32 %v8137_v13, %v15283_v48  ;;  %v8143_v13 = vrot.slane %v8141_v23, 5  ;;  %v8035_v18 = vld [vmem:[#allocation3 + $0x34] sm:$0xf]  ;;  %v6800_v21 = vsel %vm13246_vm2, %v6795_v26, %v15285_v39  ;;  %v15326_v23 = vld [vmem:[#allocation3 + $0x10] sm:$0xf] }
 0x35d   : > { %v15293_v12 = vpop.f32.mrf.mxu1  ;;  %v6809_v33 = vrot.slane %v6807_v44, 5  ;;  %v8159_v25 = vshrl.u32 %v8035_v18, 16  ;;  %v8146_v44 = vshrl.u32 %v8034_v28, 16  ;;  %v8149_v41 = vshll.u32 %v8034_v28, 16  ;;  %v12963_v39 = vld [vmem:[%s16484_s3 + $0x1a8] sm:$0xff] }
 0x35e   : > { %v8139_v40 = vrot.slane %v8138_v42, 4  ;;  %v7309_v26 = vrot.slane %v7307_v55, 4  ;;  %9489 = vmatpush.bf16.msrb.mxu3 %v12963_v39 }
 0x35f   : > { %v7481_v14 = vpop.f32.mrf.mxu3 }
 0x360   : > { %v15297_v16 = vadd.f32 %v7481_v14, %v15066_v63  ;;  %v15299_v1 = vpop.f32.mrf.mxu0  ;;  %7018 = vmatmul.bf16.gmra.mxu2 %v6874_v51  ;;  %8599 = vmatmul.bf16.gmra.mxu1 %v8507_v38  ;;  %v6805_v63 = vrot.slane %v6804_v53, 4  ;;  %v7372_v51 = vunpack.c.l.b16 %v7301_v15  ;;  %v8129_v38 = vrot.slane %v8128_v6, 4 }
 0x361   : > { %v8144_v45 = vsel %vm13246_vm2, %v8139_v40, %v8143_v13  ;;  %v8155_v14 = vshll.u32 %v8035_v18, 16  ;;  %v8161_v40 = vrot.slane %v8159_v25, 4  ;;  %v7161_v13 = vld [vmem:[#allocation3 + $0x90] sm:$0xe]  ;;  %v7163_v18 = vld [vmem:[#allocation3 + $0x98] sm:$0x1] }
 0x362   : > { %v8134_v9 = vsel %vm13246_vm2, %v8129_v38, %v15283_v48  ;;  %v8479_v42 = vunpack.c.l.b16 %v8144_v45  ;;  %v8148_v38 = vrot.slane %v8146_v44, 4  ;;  %v8151_v45 = vrot.slane %v8149_v41, 5  ;;  %v8773_v25 = vld [vmem:[#allocation3 + $0x14] sm:$0x1] }
 0x363   : > { %v6979_v11 = vpop.f32.mrf.mxu2  ;;  %v8478_v27 = vunpack.c.l.b16 %v8134_v9  ;;  %v15328_v6 = vrot.slane %v8155_v14, 5  ;;  %v7310_v28 = vrot.slane %v7163_v18, 5  ;;  %v12175_v14 = vrot.slane %v7161_v13, 9 }
 0x364   : > { %v15307_v52 = vadd.f32 %v6979_v11, %v15116_v22  ;;  %v6810_v22 = vsel %vm13246_vm2, %v6805_v63, %v6809_v33  ;;  %v6858_v11 = vunpack.c.l.b16 %v6800_v21  ;;  %v8869_v33 = vrot.slane %v15326_v23, 5 }
 0x365   : > { %v15309_v5 = vpop.f32.mrf.mxu1  ;;  %v6859_v53 = vunpack.c.l.b16 %v6810_v22  ;;  %v8508_v15 = vpack.c.b16 %v8479_v42, %v8478_v27  ;;  %v8162_v17 = vor.u32 %v8161_v40, %v15328_v6  ;;  %v7311_v9 = vsel %vm13399_vm5, %v7309_v26, %v7310_v28  ;;  %v8038_v27 = vld [vmem:[#allocation3 + $0x40] sm:$0xf]  ;;  %v12979_v40 = vld [vmem:[%s16484_s3 + $0x228] sm:$0xff] }
 0x366   : > { %v8871_v21 = vrot.slane %v8869_v33, 4  ;;  %v8872_v41 = vrot.slane %v8773_v25, 5  ;;  %v7375_v39 = vunpack.c.l.b16 %v7311_v9  ;;  %10757 = vmatpush.bf16.msra.mxu1 %v12979_v40  ;;  %v8183_v28 = vshrl.u32 %v8038_v27, 16 }
 0x367   : > { %v7483_v56 = vpop.f32.mrf.mxu3  ;;  %v8163_v23 = vrot.slane %v8162_v17, 4  ;;  %v8179_v17 = vshll.u32 %v8038_v27, 16 }
 0x368   : > { %v15314_v0 = vadd.f32 %v7483_v56, %v15108_v61  ;;  %v15316_v59 = vpop.f32.mrf.mxu0  ;;  %v7393_v61 = vpack.c.b16 %v7373_v37, %v7372_v51  ;;  %v6875_v37 = vpack.c.b16 %v6859_v53, %v6858_v11  ;;  %v8036_v51 = vld [vmem:[#allocation3 + $0x38] sm:$0x1]  ;;  %v8771_v53 = vld [vmem:[#allocation3 + $0xc] sm:$0xe]  ;;  %v8185_v27 = vrot.slane %v8183_v28, 4 }
 0x369   : > { %v12387_v18 = vrot.slane %v8771_v53, 9 }
 0x36b   : > { %7903 = vmatmul.bf16.gmra.mxu0 %v12913_v57  ;;  %v6981_v19 = vpop.f32.mrf.mxu2  ;;  %v8165_v57 = vshll.u32 %v8036_v51, 16  ;;  %v8870_v25 = vsel %vm13399_vm5, %v12387_v18, %v8869_v33 }
 0x36c   : > { %7525 = vmatmul.bf16.gmra.mxu3 %v7393_v61  ;;  %v15331_v48 = vadd.f32 %v6981_v19, %v15147_v49  ;;  %v8152_v61 = vor.u32 %v8151_v45, %v8148_v38  ;;  %v12971_v19 = vld [vmem:[%s16484_s3 + $0x1e8] sm:$0xff]  ;;  %v7165_v38 = vld [vmem:[#allocation3 + $0xa0] sm:$0xf]  ;;  %v8037_v45 = vld [vmem:[#allocation3 + $0x3c] sm:$0xf] }
 0x36d   : > { %v15336_v63 = vpop.f32.mrf.mxu1  ;;  %10235 = vmatpush.bf16.msra.mxu0 %v12971_v19  ;;  %v8173_v53 = vshll.u32 %v8037_v45, 16  ;;  %v15374_v19 = vrot.slane %v8179_v17, 5 }
 0x36f   : > { %v7486_v56 = vpop.f32.mrf.mxu3  ;;  %v8186_v28 = vor.u32 %v8185_v27, %v15374_v19 }
 0x370   : > { %v15340_v49 = vadd.f32 %v7486_v56, %v15138_v50  ;;  %v15342_v22 = vpop.f32.mrf.mxu0  ;;  %7023 = vmatmul.bf16.gmra.mxu2 %v6875_v37  ;;  %8604 = vmatmul.bf16.gmra.mxu1 %v8508_v15  ;;  %v7308_v50 = vsel %vm13399_vm5, %v12175_v14, %v7307_v55  ;;  %v8167_v15 = vrot.slane %v8165_v57, 5  ;;  %v8153_v37 = vrot.slane %v8152_v61, 4  ;;  %v12914_v14 = vld [vmem:[#allocation3 + $0x9c] sm:$0xff] }
 0x371   : > { %v7374_v13 = vunpack.c.l.b16 %v7308_v50  ;;  %v7314_v61 = vrot.slane %v7165_v38, 5  ;;  %v8170_v50 = vshrl.u32 %v8037_v45, 16  ;;  %v8175_v45 = vrot.slane %v8173_v53, 5  ;;  %v8774_v53 = vld [vmem:[#allocation3 + $0x18] sm:$0xe] }
 0x372   : > { %v8168_v51 = vsel %vm13246_vm2, %v8163_v23, %v8167_v15 }
 0x373   : > { %v6984_v42 = vpop.f32.mrf.mxu2  ;;  %v7394_v57 = vpack.c.b16 %v7375_v39, %v7374_v13  ;;  %v8172_v38 = vrot.slane %v8170_v50, 4 }
 0x374   : > { %v15350_v44 = vadd.f32 %v6984_v42, %v15178_v30  ;;  %v8873_v30 = vsel %vm13399_vm5, %v8871_v21, %v8872_v41  ;;  %v8481_v21 = vunpack.c.l.b16 %v8168_v51  ;;  %v8775_v42 = vld [vmem:[#allocation3 + $0x1c] sm:$0xf]  ;;  %v8996_v41 = vunpack.c.l.b16 %v8870_v25  ;;  %v8039_v51 = vld [vmem:[#allocation3 + $0x44] sm:$0x1] }
 0x375   : > { %v15358_v11 = vpop.f32.mrf.mxu1  ;;  %v8997_v9 = vunpack.c.l.b16 %v8873_v30  ;;  %v8876_v13 = vrot.slane %v8775_v42, 5  ;;  %v8176_v42 = vor.u32 %v8175_v45, %v8172_v38  ;;  %v7168_v45 = vld [vmem:[#allocation3 + $0xac] sm:$0xf] }
 0x377   : > { %v7488_v55 = vpop.f32.mrf.mxu3  ;;  %v9028_v39 = vpack.c.b16 %v8997_v9, %v8996_v41  ;;  %v8189_v9 = vshll.u32 %v8039_v51, 16  ;;  %v8177_v38 = vrot.slane %v8176_v42, 4 }
 0x378   : > { %v15363_v56 = vadd.f32 %v7488_v55, %v15171_v2  ;;  %v15365_v26 = vpop.f32.mrf.mxu0  ;;  %v8158_v2 = vsel %vm13246_vm2, %v8153_v37, %v15328_v6  ;;  %v7164_v6 = vld [vmem:[#allocation3 + $0x9c] sm:$0xe]  ;;  %v7166_v55 = vld [vmem:[#allocation3 + $0xa4] sm:$0x1]  ;;  %v7316_v37 = vrot.slane %v7314_v61, 4 }
 0x379   : > { %16561 = vst [vmem:[#allocation9_spill] sm:$0xff] %v15365_v26  ;;  %v8480_v40 = vunpack.c.l.b16 %v8158_v2  ;;  %v12176_v25 = vrot.slane %v7164_v6, 9  ;;  %v8784_v26 = vld [vmem:[#allocation3 + $0x40] sm:$0xf] }
 0x37b   : > { %7908 = vmatmul.bf16.gmra.mxu0 %v12914_v14  ;;  %v6986_v23 = vpop.f32.mrf.mxu2  ;;  %v8509_v30 = vpack.c.b16 %v8481_v21, %v8480_v40  ;;  %v7317_v14 = vrot.slane %v7166_v55, 5  ;;  %v8878_v21 = vrot.slane %v8876_v13, 4  ;;  %v8041_v40 = vld [vmem:[#allocation3 + $0x4c] sm:$0xf]  ;;  %v8191_v55 = vrot.slane %v8189_v9, 5 }
 0x37c   : > { %7530 = vmatmul.bf16.gmra.mxu3 %v7394_v57  ;;  %v15377_v33 = vadd.f32 %v6986_v23, %v15202_v34  ;;  %v8776_v57 = vld [vmem:[#allocation3 + $0x20] sm:$0x1]  ;;  %v8187_v23 = vrot.slane %v8186_v28, 4  ;;  %v8040_v28 = vld [vmem:[#allocation3 + $0x48] sm:$0xf] }
 0x37d   : > { %v15379_v15 = vpop.f32.mrf.mxu1  ;;  %v7318_v2 = vsel %vm13399_vm5, %v7316_v37, %v7317_v14  ;;  %v8879_v27 = vrot.slane %v8776_v57, 5  ;;  %v12388_v37 = vrot.slane %v8774_v53, 9  ;;  %v8203_v14 = vshll.u32 %v8041_v40, 16  ;;  %v12915_v57 = vld [vmem:[#allocation3 + $0xa8] sm:$0xff] }
 0x37e   : > { %v7377_v6 = vunpack.c.l.b16 %v7318_v2  ;;  %v15410_v53 = vld [vmem:[#allocation3 + $0x28] sm:$0xf] }
 0x37f   : > { %v7491_v18 = vpop.f32.mrf.mxu3  ;;  %v8880_v51 = vsel %vm13399_vm5, %v8878_v21, %v8879_v27  ;;  %v8877_v9 = vsel %vm13399_vm5, %v12388_v37, %v8876_v13  ;;  %v8182_v21 = vsel %vm13246_vm2, %v8177_v38, %v15374_v19  ;;  %v8197_v27 = vshll.u32 %v8040_v28, 16  ;;  %v12962_v19 = vld [vmem:[%s16484_s3 + $0x1a0] sm:$0xff] }
 0x380   : > { %v15382_v17 = vadd.f32 %v7491_v18, %v15199_v24  ;;  %9116 = vmatmul.bf16.vlgmr.msra.gmra.mxu2 %v9028_v39  ;;  %v15385_v34 = vpop.f32.mrf.mxu0  ;;  %8609 = vmatmul.bf16.gmra.mxu1 %v8509_v30  ;;  %v7315_v24 = vsel %vm13399_vm5, %v12176_v25, %v7314_v61  ;;  %v8207_v25 = vshrl.u32 %v8041_v40, 16  ;;  %v12970_v37 = vld [vmem:[%s16484_s3 + $0x1e0] sm:$0xff] }
 0x381   : > { %16562 = vst [vmem:[#allocation10_spill] sm:$0xff] %v15385_v34  ;;  %v7376_v30 = vunpack.c.l.b16 %v7315_v24  ;;  %v7321_v24 = vrot.slane %v7168_v45, 5  ;;  %v7169_v45 = vld [vmem:[#allocation3 + $0xb0] sm:$0x1]  ;;  %9490 = vmatpush.bf16.msrb.mxu3 %v12962_v19  ;;  %10236 = vmatpush.bf16.msra.mxu0 %v12970_v37  ;;  %v8782_v34 = vld [vmem:[#allocation3 + $0x38] sm:$0x1] }
 0x382   : > { %v8209_v13 = vrot.slane %v8207_v25, 4 }
 0x383   : > { %v6989_v50 = vpop.f32.mrf.mxu2  ;;  %v7395_v2 = vpack.c.b16 %v7377_v6, %v7376_v30  ;;  %v8482_v30 = vunpack.c.l.b16 %v8182_v21 }
 0x384   : > { %v15392_v41 = vadd.f32 %v6989_v50, %v15234_v46  ;;  %v8192_v46 = vsel %vm13246_vm2, %v8187_v23, %v8191_v55  ;;  %v8999_v50 = vunpack.c.l.b16 %v8880_v51  ;;  %v8194_v23 = vshrl.u32 %v8040_v28, 16 }
 0x385   : > { %v15394_v39 = vpop.f32.mrf.mxu1  ;;  %v8998_v55 = vunpack.c.l.b16 %v8877_v9  ;;  %v8883_v28 = vrot.slane %v15410_v53, 5  ;;  %v12961_v53 = vld [vmem:[%s16484_s3 + $0x198] sm:$0xff] }
 0x386   : > { %v8196_v9 = vrot.slane %v8194_v23, 4  ;;  %9491 = vmatpush.bf16.msrb.mxu3 %v12961_v53 }
 0x387   : > { %v7493_v18 = vpop.f32.mrf.mxu3  ;;  %v9029_v51 = vpack.c.b16 %v8999_v50, %v8998_v55  ;;  %v7324_v50 = vrot.slane %v7169_v45, 5 }
 0x388   : > { %v15399_v61 = vadd.f32 %v7493_v18, %v15226_v36  ;;  %v15408_v42 = vpop.f32.mrf.mxu0  ;;  %v8483_v36 = vunpack.c.l.b16 %v8192_v46  ;;  %v15412_v18 = vrot.slane %v8203_v14, 5  ;;  %v7167_v46 = vld [vmem:[#allocation3 + $0xa8] sm:$0xe] }
 0x389   : > { %16564 = vst [vmem:[#allocation13_spill] sm:$0xff] %v15408_v42  ;;  %v12177_v23 = vrot.slane %v7167_v46, 9 }
 0x38a   : > { %16563 = vst [vmem:[#allocation12_spill] sm:$0xff] %v15399_v61  ;;  %v8510_v25 = vpack.c.b16 %v8483_v36, %v8482_v30  ;;  %v12969_v36 = vld [vmem:[%s16484_s3 + $0x1d8] sm:$0xff]  ;;  %v8885_v30 = vrot.slane %v8883_v28, 4 }
 0x38b   : > { %7913 = vmatmul.bf16.gmra.mxu0 %v12915_v57  ;;  %v6991_v40 = vpop.f32.mrf.mxu2  ;;  %v8042_v57 = vld [vmem:[#allocation3 + $0x50] sm:$0x1]  ;;  %v7322_v37 = vsel %vm13399_vm5, %v12177_v23, %v7321_v24 }
 0x38c   : > { %7535 = vmatmul.bf16.gmra.mxu3 %v7395_v2  ;;  %v15415_v6 = vadd.f32 %v6991_v40, %v15263_v35  ;;  %v7323_v35 = vrot.slane %v7321_v24, 4  ;;  %v8199_v2 = vrot.slane %v8197_v27, 5  ;;  %v8210_v40 = vor.u32 %v8209_v13, %v15412_v18  ;;  %v8779_v27 = vld [vmem:[#allocation3 + $0x2c] sm:$0x1]  ;;  %10237 = vmatpush.bf16.msra.mxu0 %v12969_v36 }
 0x38d   : > { %v15423_v38 = vpop.f32.mrf.mxu1  ;;  %v8213_v55 = vshll.u32 %v8042_v57, 16  ;;  %v8886_v57 = vrot.slane %v8779_v27, 5  ;;  %v12978_v24 = vld [vmem:[%s16484_s3 + $0x220] sm:$0xff]  ;;  %v7378_v53 = vunpack.c.l.b16 %v7322_v37 }
 0x38e   : > { %v8200_v19 = vor.u32 %v8199_v2, %v8196_v9  ;;  %v8211_v45 = vrot.slane %v8210_v40, 4  ;;  %v12968_v9 = vld [vmem:[%s16484_s3 + $0x1d0] sm:$0xff]  ;;  %10758 = vmatpush.bf16.msra.mxu1 %v12978_v24 }
 0x38f   : > { %v7496_v14 = vpop.f32.mrf.mxu3  ;;  %v8887_v23 = vsel %vm13399_vm5, %v8885_v30, %v8886_v57  ;;  %v12967_v30 = vld [vmem:[%s16484_s3 + $0x1c8] sm:$0xff] }
 0x390   : > { %v15427_v21 = vadd.f32 %v7496_v14, %v15250_v62  ;;  %9121 = vmatmul.bf16.gmra.mxu2 %v9029_v51  ;;  %8614 = vmatmul.bf16.gmra.mxu1 %v8510_v25  ;;  %v7325_v62 = vsel %vm13399_vm5, %v7323_v35, %v7324_v50  ;;  %v8777_v51 = vld [vmem:[#allocation3 + $0x24] sm:$0xe]  ;;  %v8044_v14 = vld [vmem:[#allocation3 + $0x58] sm:$0xf]  ;;  %v15443_v46 = vpop.f32.mrf.mxu0  ;;  %v8201_v27 = vrot.slane %v8200_v19, 4 }
 0x391   : > { %16566 = vst [vmem:[#allocation15_spill] sm:$0xff] %v15443_v46  ;;  %v12960_v35 = vld [vmem:[%s16484_s3 + $0x190] sm:$0xff]  ;;  %v7379_v40 = vunpack.c.l.b16 %v7325_v62  ;;  %v12389_v36 = vrot.slane %v8777_v51, 9  ;;  %10238 = vmatpush.bf16.msra.mxu0 %v12968_v9  ;;  %v8227_v37 = vshll.u32 %v8044_v14, 16  ;;  %v8231_v51 = vshrl.u32 %v8044_v14, 16 }
 0x392   : > { %16565 = vst [vmem:[#allocation11_spill] sm:$0xff] %v15427_v21  ;;  %9492 = vmatpush.bf16.msrb.mxu3 %v12960_v35  ;;  %v7171_v62 = vld [vmem:[#allocation3 + $0xb8] sm:$0xf]  ;;  %v9001_v9 = vunpack.c.l.b16 %v8887_v23 }
 0x393   : > { %v6994_v13 = vpop.f32.mrf.mxu2  ;;  %v12916_v19 = vld [vmem:[#allocation3 + $0xb4] sm:$0xff]  ;;  %v8884_v57 = vsel %vm13399_vm5, %v12389_v36, %v8883_v28  ;;  %v7396_v35 = vpack.c.b16 %v7379_v40, %v7378_v53  ;;  %v15476_v42 = vrot.slane %v8227_v37, 5  ;;  %v8233_v28 = vrot.slane %v8231_v51, 4  ;;  %v12966_v36 = vld [vmem:[%s16484_s3 + $0x1c0] sm:$0xff] }
 0x394   : > { %v15441_v25 = vadd.f32 %v6994_v13, %v15293_v12  ;;  %v8215_v12 = vrot.slane %v8213_v55, 5  ;;  %v8043_v13 = vld [vmem:[#allocation3 + $0x54] sm:$0xf] }
 0x395   : > { %v15454_v2 = vpop.f32.mrf.mxu1  ;;  %v8218_v14 = vshrl.u32 %v8043_v13, 16  ;;  %v8221_v24 = vshll.u32 %v8043_v13, 16  ;;  %10239 = vmatpush.bf16.msra.mxu0 %v12967_v30  ;;  %v7170_v13 = vld [vmem:[#allocation3 + $0xb4] sm:$0xe]  ;;  %v8045_v30 = vld [vmem:[#allocation3 + $0x5c] sm:$0x1] }
 0x396   : > { %v8216_v55 = vsel %vm13246_vm2, %v8211_v45, %v8215_v12  ;;  %v7328_v12 = vrot.slane %v7171_v62, 5  ;;  %9493 = vmatpush.bf16.msrb.mxu3 %v12959_v3  ;;  %v9673_v3 = vld [vmem:[#allocation3 + $0x1c] sm:$0xf] }
 0x397   : > { %v7498_v50 = vpop.f32.mrf.mxu3  ;;  %v8485_v45 = vunpack.c.l.b16 %v8216_v55  ;;  %v7172_v55 = vld [vmem:[#allocation3 + $0xbc] sm:$0x1]  ;;  %v9734_v21 = vshrl.u32 %v9673_v3, 16 }
 0x398   : > { %v15462_v54 = vadd.f32 %v7498_v50, %v15288_v8  ;;  %v8206_v8 = vsel %vm13246_vm2, %v8201_v27, %v15412_v18  ;;  %v15474_v50 = vld [vmem:[#allocation3 + $0x34] sm:$0xf]  ;;  %v12958_v18 = vld [vmem:[%s16484_s3 + $0x180] sm:$0xff]  ;;  %v15490_v37 = vpop.f32.mrf.mxu0  ;;  %v7330_v51 = vrot.slane %v7328_v12, 4 }
 0x399   : > { %v8484_v53 = vunpack.c.l.b16 %v8206_v8  ;;  %v8890_v62 = vrot.slane %v15474_v50, 5  ;;  %16568 = vst [vmem:[#allocation14_spill] sm:$0xff] %v15490_v37  ;;  %10240 = vmatpush.bf16.msra.mxu0 %v12966_v36  ;;  %v9672_v8 = vld [vmem:[#allocation3 + $0x18] sm:$0xf]  ;;  %v9730_v50 = vshll.u32 %v9673_v3, 16  ;;  %v12178_v37 = vrot.slane %v7170_v13, 9 }
 0x39a   : > { %16567 = vst [vmem:[#allocation16_spill] sm:$0xff] %v15462_v54  ;;  %v9000_v54 = vunpack.c.l.b16 %v8884_v57  ;;  %v8223_v57 = vrot.slane %v8221_v24, 5  ;;  %9494 = vmatpush.bf16.msrb.mxu3 %v12958_v18  ;;  %v8893_v3 = vrot.slane %v8782_v34, 5 }
 0x39b   : > { %7918 = vmatmul.bf16.gmra.mxu0 %v12916_v19  ;;  %v6996_v46 = vpop.f32.mrf.mxu2  ;;  %v8220_v19 = vrot.slane %v8218_v14, 4  ;;  %v8892_v24 = vrot.slane %v8890_v62, 4  ;;  %v15503_v13 = vrot.slane %v9730_v50, 5 }
 0x39c   : > { %7540 = vmatmul.bf16.gmra.mxu3 %v7396_v35  ;;  %v15479_v40 = vadd.f32 %v6996_v46, %v15309_v5  ;;  %v9030_v23 = vpack.c.b16 %v9001_v9, %v9000_v54  ;;  %v8511_v46 = vpack.c.b16 %v8485_v45, %v8484_v53  ;;  %v8234_v54 = vor.u32 %v8233_v28, %v15476_v42  ;;  %v8780_v28 = vld [vmem:[#allocation3 + $0x30] sm:$0xe] }
 0x39d   : > { %v15487_v27 = vpop.f32.mrf.mxu1  ;;  %v7331_v9 = vrot.slane %v7172_v55, 5  ;;  %v8237_v45 = vshll.u32 %v8045_v30, 16  ;;  %v8224_v53 = vor.u32 %v8223_v57, %v8220_v19  ;;  %v8047_v30 = vld [vmem:[#allocation3 + $0x64] sm:$0xf]  ;;  %v12390_v61 = vrot.slane %v8780_v28, 9 }
 0x39e   : > { %v8235_v36 = vrot.slane %v8234_v54, 4  ;;  %v9674_v54 = vld [vmem:[#allocation3 + $0x20] sm:$0x1]  ;;  %v8255_v50 = vshrl.u32 %v8047_v30, 16 }
 0x39f   : > { %v7501_v5 = vpop.f32.mrf.mxu3  ;;  %v7332_v14 = vsel %vm13399_vm5, %v7330_v51, %v7331_v9  ;;  %v8239_v19 = vrot.slane %v8237_v45, 5  ;;  %v12917_v45 = vld [vmem:[#allocation3 + $0xc0] sm:$0xff] }
 0x3a0   : > { %v15493_v35 = vadd.f32 %v7501_v5, %v15307_v52  ;;  %9126 = vmatmul.bf16.gmra.mxu2 %v9030_v23  ;;  %8619 = vmatmul.bf16.gmra.mxu1 %v8511_v46  ;;  %v7329_v52 = vsel %vm13399_vm5, %v12178_v37, %v7328_v12  ;;  %v9721_v23 = vshrl.u32 %v9672_v8, 16  ;;  %v9724_v5 = vshll.u32 %v9672_v8, 16 }
 0x3a1   : > { %v9736_v46 = vrot.slane %v9734_v21, 4  ;;  %v7381_v51 = vunpack.c.l.b16 %v7332_v14  ;;  %v7380_v9 = vunpack.c.l.b16 %v7329_v52  ;;  %v8894_v12 = vsel %vm13399_vm5, %v8892_v24, %v8893_v3  ;;  %v8046_v21 = vld [vmem:[#allocation3 + $0x60] sm:$0xf] }
 0x3a2   : > { %16569 = vst [vmem:[#allocation18_spill] sm:$0xff] %v15493_v35  ;;  %v8225_v37 = vrot.slane %v8224_v53, 4  ;;  %v8240_v34 = vsel %vm13246_vm2, %v8235_v36, %v8239_v19  ;;  %v8251_v8 = vshll.u32 %v8047_v30, 16  ;;  %v8891_v14 = vsel %vm13399_vm5, %v12390_v61, %v8890_v62 }
 0x3a3   : > { %v6999_v18 = vpop.f32.mrf.mxu2  ;;  %v9723_v52 = vrot.slane %v9721_v23, 4  ;;  %v9726_v28 = vrot.slane %v9724_v5, 5  ;;  %v9737_v24 = vor.u32 %v9736_v46, %v15503_v13  ;;  %v7397_v53 = vpack.c.b16 %v7381_v51, %v7380_v9 }
 0x3a4   : > { %v15501_v55 = vadd.f32 %v6999_v18, %v15336_v63  ;;  %v15514_v18 = vpop.f32.mrf.mxu0  ;;  %v9003_v3 = vunpack.c.l.b16 %v8894_v12  ;;  %v9740_v36 = vshll.u32 %v9674_v54, 16  ;;  %v8487_v19 = vunpack.c.l.b16 %v8240_v34 }
 0x3a5   : > { %v15505_v35 = vpop.f32.mrf.mxu1  ;;  %16571 = vst [vmem:[#allocation17_spill] sm:$0xff] %v15514_v18  ;;  %v8242_v30 = vshrl.u32 %v8046_v21, 16  ;;  %v15522_v61 = vrot.slane %v8251_v8, 5  ;;  %v8257_v62 = vrot.slane %v8255_v50, 4  ;;  %v9727_v46 = vor.u32 %v9726_v28, %v9723_v52  ;;  %v9675_v50 = vld [vmem:[#allocation3 + $0x24] sm:$0xf] }
 0x3a6   : > { %v9738_v51 = vrot.slane %v9737_v24, 4  ;;  %v9742_v12 = vrot.slane %v9740_v36, 5  ;;  %v8785_v24 = vld [vmem:[#allocation3 + $0x44] sm:$0x1] }
 0x3a7   : > { %v7503_v57 = vpop.f32.mrf.mxu3 }
 0x3a8   : > { %v15510_v63 = vadd.f32 %v7503_v57, %v15331_v48  ;;  %v8230_v48 = vsel %vm13246_vm2, %v8225_v37, %v15476_v42  ;;  %v8245_v57 = vshll.u32 %v8046_v21, 16  ;;  %v9676_v37 = vld [vmem:[#allocation3 + $0x28] sm:$0xf]  ;;  %v8897_v21 = vrot.slane %v8784_v26, 5 }
 0x3a9   : > { %v8486_v5 = vunpack.c.l.b16 %v8230_v48  ;;  %v9754_v52 = vshll.u32 %v9676_v37, 16  ;;  %v9758_v28 = vshrl.u32 %v9676_v37, 16 }
 0x3aa   : > { %16570 = vst [vmem:[#allocation19_spill] sm:$0xff] %v15510_v63  ;;  %v9002_v63 = vunpack.c.l.b16 %v8891_v14  ;;  %v8244_v14 = vrot.slane %v8242_v30, 4  ;;  %v8899_v48 = vrot.slane %v8897_v21, 4 }
 0x3ab   : > { %7923 = vmatmul.bf16.gmra.mxu0 %v12917_v45  ;;  %v7001_v18 = vpop.f32.mrf.mxu2  ;;  %v8512_v34 = vpack.c.b16 %v8487_v19, %v8486_v5  ;;  %v8048_v45 = vld [vmem:[#allocation3 + $0x68] sm:$0x1]  ;;  %v9745_v19 = vshrl.u32 %v9675_v50, 16  ;;  %v9760_v37 = vrot.slane %v9758_v28, 4  ;;  %v8049_v28 = vld [vmem:[#allocation3 + $0x6c] sm:$0xf] }
 0x3ac   : > { %7545 = vmatmul.bf16.gmra.mxu3 %v7397_v53  ;;  %v15525_v23 = vadd.f32 %v7001_v18, %v15358_v11  ;;  %v9031_v9 = vpack.c.b16 %v9003_v3, %v9002_v63  ;;  %v8247_v53 = vrot.slane %v8245_v57, 5  ;;  %v8258_v11 = vor.u32 %v8257_v62, %v15522_v61  ;;  %v15535_v26 = vpop.f32.mrf.mxu0  ;;  %v8783_v57 = vld [vmem:[#allocation3 + $0x3c] sm:$0xe] }
 0x3ad   : > { %v15527_v42 = vpop.f32.mrf.mxu1  ;;  %v9728_v18 = vrot.slane %v9727_v46, 4  ;;  %v9743_v63 = vsel %vm13246_vm2, %v9738_v51, %v9742_v12  ;;  %v8261_v3 = vshll.u32 %v8048_v45, 16  ;;  %16573 = vst [vmem:[#allocation21_spill] sm:$0xff] %v15535_v26  ;;  %v9748_v46 = vshll.u32 %v9675_v50, 16  ;;  %v9677_v50 = vld [vmem:[#allocation3 + $0x2c] sm:$0x1] }
 0x3ae   : > { %v8248_v36 = vor.u32 %v8247_v53, %v8244_v14  ;;  %v10122_v62 = vunpack.c.l.b16 %v9743_v63  ;;  %v8259_v5 = vrot.slane %v8258_v11, 4  ;;  %v15543_v12 = vrot.slane %v9754_v52, 5 }
 0x3af   : > { %v7506_v54 = vpop.f32.mrf.mxu3  ;;  %v8263_v26 = vrot.slane %v8261_v3, 5  ;;  %v12391_v53 = vrot.slane %v8783_v57, 9  ;;  %v9750_v57 = vrot.slane %v9748_v46, 5 }
 0x3b0   : > { %v15530_v8 = vadd.f32 %v7506_v54, %v15350_v44  ;;  %9131 = vmatmul.bf16.gmra.mxu2 %v9031_v9  ;;  %8624 = vmatmul.bf16.gmra.mxu1 %v8512_v34  ;;  %v9733_v44 = vsel %vm13246_vm2, %v9728_v18, %v15503_v13  ;;  %v8900_v9 = vrot.slane %v8785_v24, 5  ;;  %v8050_v54 = vld [vmem:[#allocation3 + $0x70] sm:$0xf]  ;;  %v12977_v13 = vld [vmem:[%s16484_s3 + $0x218] sm:$0xff]  ;;  %v9747_v18 = vrot.slane %v9745_v19, 4 }
 0x3b1   : > { %v10121_v45 = vunpack.c.l.b16 %v9733_v44  ;;  %v8264_v52 = vsel %vm13246_vm2, %v8259_v5, %v8263_v26  ;;  %v8275_v24 = vshll.u32 %v8050_v54, 16  ;;  %v8279_v3 = vshrl.u32 %v8050_v54, 16  ;;  %10759 = vmatpush.bf16.msra.mxu1 %v12977_v13 }
 0x3b2   : > { %16572 = vst [vmem:[#allocation20_spill] sm:$0xff] %v15530_v8  ;;  %v8901_v11 = vsel %vm13399_vm5, %v8899_v48, %v8900_v9  ;;  %v8898_v44 = vsel %vm13399_vm5, %v12391_v53, %v8897_v21  ;;  %v9761_v48 = vor.u32 %v9760_v37, %v15543_v12  ;;  %v12942_v9 = vld [vmem:[#allocation3 + $0x18] sm:$0xff]  ;;  %v9764_v19 = vshll.u32 %v9677_v50, 16 }
 0x3b3   : > { %v7004_v30 = vpop.f32.mrf.mxu2  ;;  %v8489_v26 = vunpack.c.l.b16 %v8264_v52  ;;  %v8266_v5 = vshrl.u32 %v8049_v28, 16  ;;  %v9004_v13 = vunpack.c.l.b16 %v8898_v44  ;;  %v15563_v21 = vrot.slane %v8275_v24, 5  ;;  %v9678_v52 = vld [vmem:[#allocation3 + $0x30] sm:$0xf]  ;;  %v8051_v24 = vld [vmem:[#allocation3 + $0x74] sm:$0x1] }
 0x3b4   : > { %v15541_v51 = vadd.f32 %v7004_v30, %v15379_v15  ;;  %v8249_v15 = vrot.slane %v8248_v36, 4  ;;  %v10153_v30 = vpack.c.b16 %v10122_v62, %v10121_v45  ;;  %v9005_v36 = vunpack.c.l.b16 %v8901_v11  ;;  %v15565_v46 = vpop.f32.mrf.mxu0 }
 0x3b5   : > { %v15545_v34 = vpop.f32.mrf.mxu1  ;;  %v8281_v62 = vrot.slane %v8279_v3, 4  ;;  %16575 = vst [vmem:[#allocation22_spill] sm:$0xff] %v15565_v46  ;;  %v9751_v53 = vor.u32 %v9750_v57, %v9747_v18  ;;  %v9766_v50 = vrot.slane %v9764_v19, 5  ;;  %v8268_v8 = vrot.slane %v8266_v5, 4 }
 0x3b6   : > { %v9032_v11 = vpack.c.b16 %v9005_v36, %v9004_v13  ;;  %v8285_v19 = vshll.u32 %v8051_v24, 16  ;;  %v8786_v13 = vld [vmem:[#allocation3 + $0x48] sm:$0xe] }
 0x3b7   : > { %v7508_v14 = vpop.f32.mrf.mxu3  ;;  %v9752_v18 = vrot.slane %v9751_v53, 4 }
 0x3b8   : > { %v15553_v63 = vadd.f32 %v7508_v14, %v15377_v33  ;;  %v8254_v33 = vsel %vm13246_vm2, %v8249_v15, %v15522_v61  ;;  %v8269_v14 = vshll.u32 %v8049_v28, 16  ;;  %v9762_v61 = vrot.slane %v9761_v48, 4  ;;  %v9679_v28 = vld [vmem:[#allocation3 + $0x34] sm:$0xf] }
 0x3b9   : > { %v8488_v45 = vunpack.c.l.b16 %v8254_v33  ;;  %v9778_v48 = vshll.u32 %v9679_v28, 16  ;;  %v9782_v36 = vshrl.u32 %v9679_v28, 16  ;;  %v8788_v33 = vld [vmem:[#allocation3 + $0x50] sm:$0x1]  ;;  %v9757_v5 = vsel %vm13246_vm2, %v9752_v18, %v15543_v12  ;;  %v8053_v28 = vld [vmem:[#allocation3 + $0x7c] sm:$0xf] }
 0x3ba   : > { %16574 = vst [vmem:[#allocation7_spill] sm:$0xff] %v15553_v63  ;;  %v8787_v63 = vld [vmem:[#allocation3 + $0x4c] sm:$0xf]  ;;  %v8271_v3 = vrot.slane %v8269_v14, 5  ;;  %v9767_v57 = vsel %vm13246_vm2, %v9762_v61, %v9766_v50  ;;  %v9772_v14 = vshll.u32 %v9678_v52, 16  ;;  %v8907_v61 = vrot.slane %v8788_v33, 5 }
 0x3bb   : > { %10241 = vmatmul.bf16.vlgmr.msra.gmra.mxu0 %v10153_v30  ;;  %v7006_v54 = vpop.f32.mrf.mxu2  ;;  %v8513_v30 = vpack.c.b16 %v8489_v26, %v8488_v45  ;;  %v9769_v26 = vshrl.u32 %v9678_v52, 16  ;;  %v9784_v50 = vrot.slane %v9782_v36, 4  ;;  %v8287_v24 = vrot.slane %v8285_v19, 5  ;;  %v8052_v36 = vld [vmem:[#allocation3 + $0x78] sm:$0xf] }
 0x3bc   : > { %9495 = vmatmul.bf16.vlgmr.msrb.gmra.mxu3 %v12942_v9  ;;  %v15568_v37 = vadd.f32 %v7006_v54, %v15394_v39  ;;  %v8904_v9 = vrot.slane %v8787_v63, 5  ;;  %v8282_v39 = vor.u32 %v8281_v62, %v15563_v21  ;;  %v10124_v62 = vunpack.c.l.b16 %v9767_v57  ;;  %v15588_v12 = vpop.f32.mrf.mxu0 }
 0x3bd   : > { %v15570_v15 = vpop.f32.mrf.mxu1  ;;  %v12392_v52 = vrot.slane %v8786_v13, 9  ;;  %v9774_v18 = vrot.slane %v9772_v14, 5  ;;  %v8299_v33 = vshll.u32 %v8053_v28, 16  ;;  %v8303_v19 = vshrl.u32 %v8053_v28, 16 }
 0x3be   : > { %v8906_v63 = vrot.slane %v8904_v9, 4  ;;  %v8283_v45 = vrot.slane %v8282_v39, 4 }
 0x3bf   : > { %v7511_v44 = vpop.f32.mrf.mxu3 }
 0x3c0   : > { %v15573_v46 = vadd.f32 %v7511_v44, %v15392_v41  ;;  %9136 = vmatmul.bf16.gmra.mxu2 %v9032_v11  ;;  %8629 = vmatmul.bf16.gmra.mxu1 %v8513_v30  ;;  %v8272_v41 = vor.u32 %v8271_v3, %v8268_v8  ;;  %v15584_v11 = vrot.slane %v9778_v48, 5  ;;  %v10123_v30 = vunpack.c.l.b16 %v9757_v5 }
 0x3c1   : > { %v8908_v3 = vsel %vm13399_vm5, %v8906_v63, %v8907_v61  ;;  %v8288_v48 = vsel %vm13246_vm2, %v8283_v45, %v8287_v24  ;;  %v12943_v63 = vld [vmem:[#allocation3 + $0x24] sm:$0xff]  ;;  %v15603_v61 = vld [vmem:[#allocation3 + $0x58] sm:$0xf]  ;;  %v8290_v45 = vshrl.u32 %v8052_v36, 16  ;;  %v8293_v24 = vshll.u32 %v8052_v36, 16 }
 0x3c2   : > { %16576 = vst [vmem:[#allocation23_spill] sm:$0xff] %v15573_v46  ;;  %v9771_v46 = vrot.slane %v9769_v26, 4  ;;  %v8273_v39 = vrot.slane %v8272_v41, 4  ;;  %v8905_v26 = vsel %vm13399_vm5, %v12392_v52, %v8904_v9  ;;  %v10154_v5 = vpack.c.b16 %v10124_v62, %v10123_v30 }
 0x3c3   : > { %v7009_v54 = vpop.f32.mrf.mxu2  ;;  %v9007_v13 = vunpack.c.l.b16 %v8908_v3  ;;  %v8491_v14 = vunpack.c.l.b16 %v8288_v48  ;;  %v15605_v62 = vrot.slane %v8299_v33, 5  ;;  %v8911_v36 = vrot.slane %v15603_v61, 5 }
 0x3c4   : > { %v15582_v53 = vadd.f32 %v7009_v54, %v15423_v38  ;;  %v9680_v38 = vld [vmem:[#allocation3 + $0x38] sm:$0x1]  ;;  %v9785_v54 = vor.u32 %v9784_v50, %v15584_v11  ;;  %v8278_v41 = vsel %vm13246_vm2, %v8273_v39, %v15563_v21  ;;  %v9775_v9 = vor.u32 %v9774_v18, %v9771_v46  ;;  %v9682_v39 = vld [vmem:[#allocation3 + $0x40] sm:$0xf] }
 0x3c5   : > { %v15586_v44 = vpop.f32.mrf.mxu1  ;;  %v8305_v50 = vrot.slane %v8303_v19, 4  ;;  %v7961_v21 = vadd.f32 %v15155_v43, %v15184_v20  ;;  %v8490_v52 = vunpack.c.l.b16 %v8278_v41  ;;  %v8054_v18 = vld [vmem:[#allocation3 + $0x80] sm:$0x1]  ;;  %v8292_v33 = vrot.slane %v8290_v45, 4 }
 0x3c6   : > { %v9786_v3 = vrot.slane %v9785_v54, 4  ;;  %v8295_v19 = vrot.slane %v8293_v24, 5  ;;  %v9802_v20 = vshll.u32 %v9682_v39, 16  ;;  %v15619_v54 = vpop.f32.mrf.mxu0  ;;  %v8309_v61 = vshll.u32 %v8054_v18, 16 }
 0x3c7   : > { %v7513_v8 = vpop.f32.mrf.mxu3  ;;  %v8514_v46 = vpack.c.b16 %v8491_v14, %v8490_v52  ;;  %v8306_v43 = vor.u32 %v8305_v50, %v15605_v62  ;;  %v8791_v14 = vld [vmem:[#allocation3 + $0x5c] sm:$0x1]  ;;  %v8789_v52 = vld [vmem:[#allocation3 + $0x54] sm:$0xe] }
 0x3c8   : > { %v15593_v57 = vadd.f32 %v7513_v8, %v15415_v6  ;;  %v9788_v6 = vshll.u32 %v9680_v38, 16  ;;  %v9006_v8 = vunpack.c.l.b16 %v8905_v26  ;;  %v8296_v50 = vor.u32 %v8295_v19, %v8292_v33  ;;  %v12976_v19 = vld [vmem:[%s16484_s3 + $0x210] sm:$0xff] }
 0x3c9   : > { %10760 = vmatpush.bf16.msra.mxu1 %v12976_v19 }
 0x3ca   : > { %v9033_v38 = vpack.c.b16 %v9007_v13, %v9006_v8  ;;  %v9776_v13 = vrot.slane %v9775_v9, 4  ;;  %v8913_v8 = vrot.slane %v8911_v36, 4 }
 0x3cb   : > { %10246 = vmatmul.bf16.gmra.mxu0 %v10154_v5  ;;  %v7011_v28 = vpop.f32.mrf.mxu2  ;;  %v9790_v5 = vrot.slane %v9788_v6, 5  ;;  %v9806_v6 = vshrl.u32 %v9682_v39, 16  ;;  %v8914_v39 = vrot.slane %v8791_v14, 5  ;;  %v8055_v14 = vld [vmem:[#allocation3 + $0x84] sm:$0xf] }
 0x3cc   : > { %9500 = vmatmul.bf16.gmra.mxu3 %v12943_v63  ;;  %v15608_v30 = vadd.f32 %v7011_v28, %v15454_v2  ;;  %v9681_v2 = vld [vmem:[#allocation3 + $0x3c] sm:$0xf] }
 0x3cd   : > { %v8595_v48 = vpop.f32.mrf.mxu1  ;;  %v9791_v41 = vsel %vm13246_vm2, %v9786_v3, %v9790_v5  ;;  %v9793_v45 = vshrl.u32 %v9681_v2, 16  ;;  %v9796_v24 = vshll.u32 %v9681_v2, 16  ;;  %v7962_v3 = vadd.f32 %v15186_v32, %v15209_v29  ;;  %v9683_v29 = vld [vmem:[#allocation3 + $0x44] sm:$0x1] }
 0x3ce   : > { %v15613_v63 = vadd.f32 %v8595_v48, %v7961_v21  ;;  %v10126_v48 = vunpack.c.l.b16 %v9791_v41  ;;  %v9808_v5 = vrot.slane %v9806_v6, 4  ;;  %v8297_v32 = vrot.slane %v8296_v50, 4 }
 0x3cf   : > { %v7516_v26 = vpop.f32.mrf.mxu3  ;;  %v9798_v33 = vrot.slane %v9796_v24, 5  ;;  %v9812_v50 = vshll.u32 %v9683_v29, 16 }
 0x3d0   : > { %v15616_v28 = vadd.f32 %v7516_v26, %v15441_v25  ;;  %9141 = vmatmul.bf16.gmra.mxu2 %v9033_v38  ;;  %8634 = vmatmul.bf16.gmra.mxu1 %v8514_v46  ;;  %v9781_v25 = vsel %vm13246_vm2, %v9776_v13, %v15584_v11  ;;  %v8307_v38 = vrot.slane %v8306_v43, 4  ;;  %v15626_v26 = vrot.slane %v9802_v20, 5  ;;  %v8056_v46 = vld [vmem:[#allocation3 + $0x88] sm:$0xf] }
 0x3d1   : > { %v10125_v2 = vunpack.c.l.b16 %v9781_v25  ;;  %v9795_v11 = vrot.slane %v9793_v45, 4  ;;  %v8915_v13 = vsel %vm13399_vm5, %v8913_v8, %v8914_v39  ;;  %v8327_v45 = vshrl.u32 %v8056_v46, 16  ;;  %v12944_v8 = vld [vmem:[#allocation3 + $0x30] sm:$0xff] }
 0x3d2   : > { %16577 = vst [vmem:[#allocation8_spill] sm:$0xff] %v15616_v28  ;;  %v8311_v28 = vrot.slane %v8309_v61, 5  ;;  %v8323_v61 = vshll.u32 %v8056_v46, 16  ;;  %v8314_v39 = vshrl.u32 %v8055_v14, 16  ;;  %v8317_v46 = vshll.u32 %v8055_v14, 16 }
 0x3d3   : > { %v7014_v21 = vpop.f32.mrf.mxu2  ;;  %v10155_v25 = vpack.c.b16 %v10126_v48, %v10125_v2  ;;  %v9799_v48 = vor.u32 %v9798_v33, %v9795_v11  ;;  %v8329_v2 = vrot.slane %v8327_v45, 4  ;;  %v9814_v14 = vrot.slane %v9812_v50, 5  ;;  %v8057_v33 = vld [vmem:[#allocation3 + $0x8c] sm:$0x1]  ;;  %v8794_v50 = vld [vmem:[#allocation3 + $0x68] sm:$0x1] }
 0x3d4   : > { %v15629_v9 = vadd.f32 %v7014_v21, %v15487_v27  ;;  %v12393_v27 = vrot.slane %v8789_v52, 9  ;;  %v8312_v6 = vsel %vm13246_vm2, %v8307_v38, %v8311_v28  ;;  %v9809_v21 = vor.u32 %v9808_v5, %v15626_v26  ;;  %v15653_v38 = vld [vmem:[#allocation3 + $0x64] sm:$0xf] }
 0x3d5   : > { %v8597_v18 = vpop.f32.mrf.mxu1  ;;  %v9009_v52 = vunpack.c.l.b16 %v8915_v13  ;;  %v8493_v28 = vunpack.c.l.b16 %v8312_v6  ;;  %v15655_v5 = vrot.slane %v8323_v61, 5  ;;  %v9685_v13 = vld [vmem:[#allocation3 + $0x4c] sm:$0xf]  ;;  %v8918_v6 = vrot.slane %v15653_v38, 5 }
 0x3d6   : > { %v15636_v20 = vadd.f32 %v8597_v18, %v7962_v3  ;;  %v8912_v24 = vsel %vm13399_vm5, %v12393_v27, %v8911_v36  ;;  %v15651_v3 = vpop.f32.mrf.mxu0  ;;  %v9810_v27 = vrot.slane %v9809_v21, 4  ;;  %v8316_v61 = vrot.slane %v8314_v39, 4 }
 0x3d7   : > { %v7518_v43 = vpop.f32.mrf.mxu3  ;;  %v9008_v36 = vunpack.c.l.b16 %v8912_v24  ;;  %v8319_v45 = vrot.slane %v8317_v46, 5  ;;  %v9800_v21 = vrot.slane %v9799_v48, 4  ;;  %v8333_v38 = vshll.u32 %v8057_v33, 16 }
 0x3d8   : > { %v15641_v41 = vadd.f32 %v7518_v43, %v15479_v40  ;;  %v8302_v40 = vsel %vm13246_vm2, %v8297_v32, %v15605_v62  ;;  %v7963_v62 = vadd.f32 %v15211_v58, %v15240_v4  ;;  %v8330_v58 = vor.u32 %v8329_v2, %v15655_v5  ;;  %v8792_v2 = vld [vmem:[#allocation3 + $0x60] sm:$0xe] }
 0x3d9   : > { %v8492_v43 = vunpack.c.l.b16 %v8302_v40  ;;  %v9034_v32 = vpack.c.b16 %v9009_v52, %v9008_v36  ;;  %v9826_v4 = vshll.u32 %v9685_v13, 16  ;;  %v9815_v52 = vsel %vm13246_vm2, %v9810_v27, %v9814_v14 }
 0x3da   : > { %v9830_v40 = vshrl.u32 %v9685_v13, 16  ;;  %v8920_v39 = vrot.slane %v8918_v6, 4  ;;  %v8320_v46 = vor.u32 %v8319_v45, %v8316_v61  ;;  %v7964_v13 = vadd.f32 %v15242_v60, %v15270_v10  ;;  %v8058_v10 = vld [vmem:[#allocation3 + $0x90] sm:$0xf] }
 0x3db   : > { %10251 = vmatmul.bf16.gmra.mxu0 %v10155_v25  ;;  %v7016_v18 = vpop.f32.mrf.mxu2  ;;  %v8515_v11 = vpack.c.b16 %v8493_v28, %v8492_v43  ;;  %v8331_v43 = vrot.slane %v8330_v58, 4  ;;  %v8335_v33 = vrot.slane %v8333_v38, 5 }
 0x3dc   : > { %9505 = vmatmul.bf16.gmra.mxu3 %v12944_v8  ;;  %v15658_v19 = vadd.f32 %v7016_v18, %v15505_v35  ;;  %v9684_v35 = vld [vmem:[#allocation3 + $0x48] sm:$0xf]  ;;  %v9832_v14 = vrot.slane %v9830_v40, 4 }
 0x3dd   : > { %v8600_v29 = vpop.f32.mrf.mxu1  ;;  %v9817_v28 = vshrl.u32 %v9684_v35, 16  ;;  %v9820_v18 = vshll.u32 %v9684_v35, 16  ;;  %v8336_v60 = vsel %vm13246_vm2, %v8331_v43, %v8335_v33  ;;  %v8338_v43 = vshrl.u32 %v8058_v10, 16 }
 0x3de   : > { %v15663_v25 = vadd.f32 %v8600_v29, %v7963_v62  ;;  %v10128_v62 = vunpack.c.l.b16 %v9815_v52  ;;  %v15676_v48 = vpop.f32.mrf.mxu0  ;;  %v8921_v29 = vrot.slane %v8794_v50, 5  ;;  %v9686_v52 = vld [vmem:[#allocation3 + $0x50] sm:$0x1] }
 0x3df   : > { %v7521_v24 = vpop.f32.mrf.mxu3  ;;  %v9819_v61 = vrot.slane %v9817_v28, 4  ;;  %v9822_v45 = vrot.slane %v9820_v18, 5 }
 0x3e0   : > { %v15666_v8 = vadd.f32 %v7521_v24, %v15501_v55  ;;  %9146 = vmatmul.bf16.gmra.mxu2 %v9034_v32  ;;  %8639 = vmatmul.bf16.gmra.mxu1 %v8515_v11  ;;  %v9805_v55 = vsel %vm13246_vm2, %v9800_v21, %v15626_v26  ;;  %v15674_v32 = vrot.slane %v9826_v4, 5  ;;  %v8059_v24 = vld [vmem:[#allocation3 + $0x94] sm:$0xf]  ;;  %v12394_v4 = vrot.slane %v8792_v2, 9  ;;  %v12945_v2 = vld [vmem:[#allocation3 + $0x3c] sm:$0xff] }
 0x3e1   : > { %v10127_v26 = vunpack.c.l.b16 %v9805_v55  ;;  %v8922_v21 = vsel %vm13399_vm5, %v8920_v39, %v8921_v29  ;;  %v8347_v40 = vshll.u32 %v8059_v24, 16  ;;  %v8351_v50 = vshrl.u32 %v8059_v24, 16 }
 0x3e2   : > { %v8919_v38 = vsel %vm13399_vm5, %v12394_v4, %v8918_v6  ;;  %v9833_v18 = vor.u32 %v9832_v14, %v15674_v32  ;;  %v9011_v55 = vunpack.c.l.b16 %v8922_v21  ;;  %v8341_v29 = vshll.u32 %v8058_v10, 16  ;;  %v9688_v4 = vld [vmem:[#allocation3 + $0x58] sm:$0xf] }
 0x3e3   : > { %v7019_v36 = vpop.f32.mrf.mxu2  ;;  %v10156_v28 = vpack.c.b16 %v10128_v62, %v10127_v26  ;;  %v9823_v6 = vor.u32 %v9822_v45, %v9819_v61  ;;  %v15700_v62 = vrot.slane %v8347_v40, 5  ;;  %v8353_v14 = vrot.slane %v8351_v50, 4  ;;  %v8060_v50 = vld [vmem:[#allocation3 + $0x98] sm:$0x1] }
 0x3e4   : > { %v15679_v27 = vadd.f32 %v7019_v36, %v15527_v42  ;;  %v8321_v42 = vrot.slane %v8320_v46, 4  ;;  %v8495_v46 = vunpack.c.l.b16 %v8336_v60 }
 0x3e5   : > { %v8602_v11 = vpop.f32.mrf.mxu1 }
 0x3e6   : > { %v15683_v58 = vadd.f32 %v8602_v11, %v7964_v13  ;;  %v8326_v39 = vsel %vm13246_vm2, %v8321_v42, %v15655_v5  ;;  %v15698_v13 = vld [vmem:[#allocation3 + $0x70] sm:$0xf]  ;;  %v9010_v11 = vunpack.c.l.b16 %v8919_v38  ;;  %v7965_v5 = vadd.f32 %v15272_v7, %v15297_v16  ;;  %v15708_v10 = vpop.f32.mrf.mxu0 }
 0x3e7   : > { %v7523_v35 = vpop.f32.mrf.mxu3  ;;  %v8494_v33 = vunpack.c.l.b16 %v8326_v39  ;;  %v8343_v38 = vrot.slane %v8341_v29, 5  ;;  %v8354_v16 = vor.u32 %v8353_v14, %v15700_v62  ;;  %v9854_v39 = vshrl.u32 %v9688_v4, 16  ;;  %v8795_v14 = vld [vmem:[#allocation3 + $0x6c] sm:$0xe] }
 0x3e8   : > { %v15688_v36 = vadd.f32 %v7523_v35, %v15525_v23  ;;  %v9836_v23 = vshll.u32 %v9686_v52, 16  ;;  %v9834_v35 = vrot.slane %v9833_v18, 4  ;;  %v9035_v21 = vpack.c.b16 %v9011_v55, %v9010_v11 }
 0x3e9   : > { %v8925_v52 = vrot.slane %v15698_v13, 5  ;;  %v8516_v40 = vpack.c.b16 %v8495_v46, %v8494_v33  ;;  %v9850_v18 = vshll.u32 %v9688_v4, 16  ;;  %v9824_v55 = vrot.slane %v9823_v6, 4 }
 0x3ea   : > { %v9838_v60 = vrot.slane %v9836_v23, 5  ;;  %v8797_v23 = vld [vmem:[#allocation3 + $0x74] sm:$0x1]  ;;  %v8357_v13 = vshll.u32 %v8060_v50, 16  ;;  %v8355_v33 = vrot.slane %v8354_v16, 4 }
 0x3eb   : > { %10256 = vmatmul.bf16.gmra.mxu0 %v10156_v28  ;;  %v7021_v24 = vpop.f32.mrf.mxu2  ;;  %v9687_v28 = vld [vmem:[#allocation3 + $0x54] sm:$0xf]  ;;  %v8928_v4 = vrot.slane %v8797_v23, 5 }
 0x3ec   : > { %9510 = vmatmul.bf16.gmra.mxu3 %v12945_v2  ;;  %v15703_v26 = vadd.f32 %v7021_v24, %v15545_v34  ;;  %v8340_v34 = vrot.slane %v8338_v43, 4  ;;  %v9839_v2 = vsel %vm13246_vm2, %v9834_v35, %v9838_v60  ;;  %v9841_v46 = vshrl.u32 %v9687_v28, 16  ;;  %v8062_v60 = vld [vmem:[#allocation3 + $0xa0] sm:$0xf] }
 0x3ed   : > { %v8605_v42 = vpop.f32.mrf.mxu1  ;;  %v9844_v24 = vshll.u32 %v9687_v28, 16  ;;  %v8927_v43 = vrot.slane %v8925_v52, 4  ;;  %v7966_v35 = vadd.f32 %v15299_v1, %v15314_v0  ;;  %v8359_v50 = vrot.slane %v8357_v13, 5  ;;  %v9689_v0 = vld [vmem:[#allocation3 + $0x5c] sm:$0x1] }
 0x3ee   : > { %v15710_v45 = vadd.f32 %v8605_v42, %v7965_v5  ;;  %v8344_v29 = vor.u32 %v8343_v38, %v8340_v34  ;;  %v10130_v5 = vunpack.c.l.b16 %v9839_v2  ;;  %v9856_v42 = vrot.slane %v9854_v39, 4  ;;  %v12975_v38 = vld [vmem:[%s16484_s3 + $0x208] sm:$0xff]  ;;  %v8061_v39 = vld [vmem:[#allocation3 + $0x9c] sm:$0xf] }
 0x3ef   : > { %v7526_v61 = vpop.f32.mrf.mxu3  ;;  %v9846_v34 = vrot.slane %v9844_v24, 5  ;;  %v8360_v2 = vsel %vm13246_vm2, %v8355_v33, %v8359_v50  ;;  %v8371_v23 = vshll.u32 %v8062_v60, 16  ;;  %v8375_v13 = vshrl.u32 %v8062_v60, 16  ;;  %10761 = vmatpush.bf16.msra.mxu1 %v12975_v38 }
 0x3f0   : > { %v15713_v7 = vadd.f32 %v7526_v61, %v15541_v51  ;;  %9151 = vmatmul.bf16.gmra.mxu2 %v9035_v21  ;;  %8644 = vmatmul.bf16.gmra.mxu1 %v8516_v40  ;;  %v9829_v51 = vsel %vm13246_vm2, %v9824_v55, %v15674_v32  ;;  %v15721_v21 = vrot.slane %v9850_v18, 5  ;;  %v9843_v32 = vrot.slane %v9841_v46, 4  ;;  %v15740_v46 = vpop.f32.mrf.mxu0 }
 0x3f1   : > { %v10129_v40 = vunpack.c.l.b16 %v9829_v51  ;;  %v8929_v18 = vsel %vm13399_vm5, %v8927_v43, %v8928_v4  ;;  %v8345_v1 = vrot.slane %v8344_v29, 4  ;;  %v8497_v33 = vunpack.c.l.b16 %v8360_v2 }
 0x3f2   : > { %v9857_v43 = vor.u32 %v9856_v42, %v15721_v21  ;;  %v9013_v29 = vunpack.c.l.b16 %v8929_v18  ;;  %v8362_v4 = vshrl.u32 %v8061_v39, 16  ;;  %v8365_v60 = vshll.u32 %v8061_v39, 16  ;;  %v9691_v18 = vld [vmem:[#allocation3 + $0x64] sm:$0xf] }
 0x3f3   : > { %v7024_v11 = vpop.f32.mrf.mxu2  ;;  %v10157_v51 = vpack.c.b16 %v10130_v5, %v10129_v40  ;;  %v15750_v5 = vrot.slane %v8371_v23, 5  ;;  %v8377_v42 = vrot.slane %v8375_v13, 4  ;;  %v8063_v23 = vld [vmem:[#allocation3 + $0xa4] sm:$0x1] }
 0x3f4   : > { %v15724_v6 = vadd.f32 %v7024_v11, %v15570_v15  ;;  %v12395_v15 = vrot.slane %v8795_v14, 9  ;;  %v12946_v11 = vld [vmem:[#allocation3 + $0x48] sm:$0xff]  ;;  %v9860_v14 = vshll.u32 %v9689_v0, 16  ;;  %v8364_v13 = vrot.slane %v8362_v4, 4 }
 0x3f5   : > { %v8607_v61 = vpop.f32.mrf.mxu1 }
 0x3f6   : > { %v15731_v16 = vadd.f32 %v8607_v61, %v7966_v35  ;;  %v8926_v24 = vsel %vm13399_vm5, %v12395_v15, %v8925_v52  ;;  %v15748_v35 = vld [vmem:[#allocation3 + $0x7c] sm:$0xf]  ;;  %v9847_v52 = vor.u32 %v9846_v34, %v9843_v32  ;;  %v12989_v15 = vld [vmem:[%s16486_s5 + $0x38] sm:$0xff]  ;;  %v9862_v34 = vrot.slane %v9860_v14, 5 }
 0x3f7   : > { %v7528_v28 = vpop.f32.mrf.mxu3  ;;  %v9012_v50 = vunpack.c.l.b16 %v8926_v24  ;;  %v8932_v32 = vrot.slane %v15748_v35, 5  ;;  %v8367_v24 = vrot.slane %v8365_v60, 5  ;;  %11255 = vmatpush.bf16.msrb.mxu2 %v12989_v15  ;;  %v8800_v14 = vld [vmem:[#allocation3 + $0x80] sm:$0x1] }
 0x3f8   : > { %v15736_v55 = vadd.f32 %v7528_v28, %v15568_v37  ;;  %v8350_v37 = vsel %vm13246_vm2, %v8345_v1, %v15700_v62  ;;  %v7967_v62 = vadd.f32 %v15316_v59, %v15340_v49  ;;  %v9858_v28 = vrot.slane %v9857_v43, 4  ;;  %v9690_v59 = vld [vmem:[#allocation3 + $0x60] sm:$0xf]  ;;  %v15769_v60 = vpop.f32.mrf.mxu0 }
 0x3f9   : > { %v8496_v38 = vunpack.c.l.b16 %v8350_v37  ;;  %v9036_v1 = vpack.c.b16 %v9013_v29, %v9012_v50  ;;  %v9874_v43 = vshll.u32 %v9691_v18, 16  ;;  %v9848_v29 = vrot.slane %v9847_v52, 4 }
 0x3fa   : > { %v9878_v37 = vshrl.u32 %v9691_v18, 16  ;;  %v9865_v35 = vshrl.u32 %v9690_v59, 16  ;;  %v9868_v4 = vshll.u32 %v9690_v59, 16  ;;  %v8368_v50 = vor.u32 %v8367_v24, %v8364_v13 }
 0x3fb   : > { %10261 = vmatmul.bf16.gmra.mxu0 %v10157_v51  ;;  %v7026_v61 = vpop.f32.mrf.mxu2  ;;  %v8378_v51 = vor.u32 %v8377_v42, %v15750_v5  ;;  %v15774_v15 = vrot.slane %v9874_v43, 5  ;;  %v7968_v18 = vadd.f32 %v15342_v22, %v15363_v56  ;;  %v8064_v56 = vld [vmem:[#allocation3 + $0xa8] sm:$0xf] }
 0x3fc   : > { %9515 = vmatmul.bf16.gmra.mxu3 %v12946_v11  ;;  %v15753_v40 = vadd.f32 %v7026_v61, %v15586_v44  ;;  %v8517_v44 = vpack.c.b16 %v8497_v33, %v8496_v38  ;;  %v9863_v11 = vsel %vm13246_vm2, %v9858_v28, %v9862_v34  ;;  %v8381_v33 = vshll.u32 %v8063_v23, 16  ;;  %v8065_v34 = vld [vmem:[#allocation3 + $0xac] sm:$0xf] }
 0x3fd   : > { %v8610_v0 = vpop.f32.mrf.mxu1  ;;  %v8934_v61 = vrot.slane %v8932_v32, 4  ;;  %v10132_v38 = vunpack.c.l.b16 %v9863_v11  ;;  %v8379_v52 = vrot.slane %v8378_v51, 4  ;;  %v9870_v13 = vrot.slane %v9868_v4, 5 }
 0x3fe   : > { %v15761_v39 = vadd.f32 %v8610_v0, %v7967_v62  ;;  %v8798_v62 = vld [vmem:[#allocation3 + $0x78] sm:$0xe]  ;;  %v9880_v0 = vrot.slane %v9878_v37, 4  ;;  %v8383_v23 = vrot.slane %v8381_v33, 5  ;;  %v8395_v37 = vshll.u32 %v8065_v34, 16 }
 0x3ff   : > { %v7531_v2 = vpop.f32.mrf.mxu3  ;;  %v12396_v51 = vrot.slane %v8798_v62, 9  ;;  %v15796_v62 = vld [vmem:[#allocation3 + $0x88] sm:$0xf] }
 0x400   : > { %v15764_v49 = vadd.f32 %v7531_v2, %v15582_v53  ;;  %9156 = vmatmul.bf16.gmra.mxu2 %v9036_v1  ;;  %8649 = vmatmul.bf16.gmra.mxu1 %v8517_v44  ;;  %v9853_v53 = vsel %vm13246_vm2, %v9848_v29, %v15721_v21  ;;  %v8935_v1 = vrot.slane %v8800_v14, 5  ;;  %v9867_v21 = vrot.slane %v9865_v35, 4  ;;  %v9692_v29 = vld [vmem:[#allocation3 + $0x68] sm:$0x1] }
 0x401   : > { %v10131_v44 = vunpack.c.l.b16 %v9853_v53  ;;  %v8384_v22 = vsel %vm13246_vm2, %v8379_v52, %v8383_v23  ;;  %v8399_v14 = vshrl.u32 %v8065_v34, 16  ;;  %v8933_v33 = vsel %vm13399_vm5, %v12396_v51, %v8932_v32 }
 0x402   : > { %v8936_v43 = vsel %vm13399_vm5, %v8934_v61, %v8935_v1  ;;  %v9881_v4 = vor.u32 %v9880_v0, %v15774_v15  ;;  %v8386_v52 = vshrl.u32 %v8064_v56, 16  ;;  %v9014_v34 = vunpack.c.l.b16 %v8933_v33 }
 0x403   : > { %v9117_v42 = vpop.f32.mrf.mxu2  ;;  %v10158_v35 = vpack.c.b16 %v10132_v38, %v10131_v44  ;;  %v9015_v53 = vunpack.c.l.b16 %v8936_v43  ;;  %v9871_v32 = vor.u32 %v9870_v13, %v9867_v21  ;;  %v15798_v38 = vrot.slane %v8395_v37, 5  ;;  %v9694_v43 = vld [vmem:[#allocation3 + $0x70] sm:$0xf] }
 0x404   : > { %v15777_v28 = vadd.f32 %v9117_v42, %v15613_v63  ;;  %v8369_v63 = vrot.slane %v8368_v50, 4  ;;  %v12947_v42 = vld [vmem:[#allocation3 + $0x54] sm:$0xff]  ;;  %v8499_v50 = vunpack.c.l.b16 %v8384_v22  ;;  %v8401_v0 = vrot.slane %v8399_v14, 4  ;;  %v8066_v14 = vld [vmem:[#allocation3 + $0xb0] sm:$0x1] }
 0x405   : > { %v8612_v2 = vpop.f32.mrf.mxu1  ;;  %v9882_v51 = vrot.slane %v9881_v4, 4  ;;  %v8939_v22 = vrot.slane %v15796_v62, 5  ;;  %v8388_v33 = vrot.slane %v8386_v52, 4  ;;  %v9898_v4 = vshll.u32 %v9694_v43, 16  ;;  %v8803_v62 = vld [vmem:[#allocation3 + $0x8c] sm:$0x1] }
 0x406   : > { %v15781_v59 = vadd.f32 %v8612_v2, %v7968_v18  ;;  %v8374_v61 = vsel %vm13246_vm2, %v8369_v63, %v15750_v5  ;;  %v8389_v18 = vshll.u32 %v8064_v56, 16  ;;  %v15800_v2 = vpop.f32.mrf.mxu0  ;;  %v16579_v5 = vld [vmem:[#allocation9_spill] sm:$0xff]  ;;  %v9037_v63 = vpack.c.b16 %v9015_v53, %v9014_v34 }
 0x407   : > { %v7533_v24 = vpop.f32.mrf.mxu3  ;;  %v7969_v23 = vadd.f32 %v16579_v5, %v15382_v17  ;;  %v8402_v17 = vor.u32 %v8401_v0, %v15798_v38  ;;  %v9872_v53 = vrot.slane %v9871_v32, 4  ;;  %v8941_v52 = vrot.slane %v8939_v22, 4  ;;  %v8801_v0 = vld [vmem:[#allocation3 + $0x84] sm:$0xe] }
 0x408   : > { %v15786_v11 = vadd.f32 %v7533_v24, %v15608_v30  ;;  %v9884_v30 = vshll.u32 %v9692_v29, 16  ;;  %v8498_v24 = vunpack.c.l.b16 %v8374_v61 }
 0x40a   : > { %16578 = vst [vmem:[#allocation25_spill] sm:$0xff] %v15786_v11  ;;  %v9886_v56 = vrot.slane %v9884_v30, 5  ;;  %v8518_v37 = vpack.c.b16 %v8499_v50, %v8498_v24  ;;  %v9902_v30 = vshrl.u32 %v9694_v43, 16  ;;  %v8403_v24 = vrot.slane %v8402_v17, 4  ;;  %v16582_v43 = vld [vmem:[#allocation10_spill] sm:$0xff] }
 0x40b   : > { %10266 = vmatmul.bf16.gmra.mxu0 %v10158_v35  ;;  %v9119_v1 = vpop.f32.mrf.mxu2  ;;  %v8391_v35 = vrot.slane %v8389_v18, 5 }
 0x40c   : > { %9520 = vmatmul.bf16.gmra.mxu3 %v12947_v42  ;;  %v15803_v44 = vadd.f32 %v9119_v1, %v15636_v20  ;;  %v9693_v20 = vld [vmem:[#allocation3 + $0x6c] sm:$0xf]  ;;  %v9887_v61 = vsel %vm13246_vm2, %v9882_v51, %v9886_v56  ;;  %v8405_v1 = vshll.u32 %v8066_v14, 16  ;;  %v16581_v51 = vld [vmem:[#allocation12_spill] sm:$0xff]  ;;  %v8942_v56 = vrot.slane %v8803_v62, 5 }
 0x40d   : > { %v8615_v29 = vpop.f32.mrf.mxu1  ;;  %v9889_v50 = vshrl.u32 %v9693_v20, 16  ;;  %v9892_v34 = vshll.u32 %v9693_v20, 16  ;;  %v8392_v18 = vor.u32 %v8391_v35, %v8388_v33  ;;  %v12974_v35 = vld [vmem:[%s16484_s3 + $0x200] sm:$0xff]  ;;  %v9695_v62 = vld [vmem:[#allocation3 + $0x74] sm:$0x1] }
 0x40e   : > { %v15808_v13 = vadd.f32 %v8615_v29, %v7969_v23  ;;  %v10134_v23 = vunpack.c.l.b16 %v9887_v61  ;;  %v7970_v29 = vadd.f32 %v16582_v43, %v16581_v51  ;;  %v15829_v17 = vpop.f32.mrf.mxu0  ;;  %v8943_v61 = vsel %vm13399_vm5, %v8941_v52, %v8942_v56  ;;  %10762 = vmatpush.bf16.msra.mxu1 %v12974_v35  ;;  %v12948_v52 = vld [vmem:[#allocation3 + $0x60] sm:$0xff] }
 0x40f   : > { %v7536_v21 = vpop.f32.mrf.mxu3  ;;  %v9894_v33 = vrot.slane %v9892_v34, 5  ;;  %v9908_v56 = vshll.u32 %v9695_v62, 16 }
 0x410   : > { %v15811_v42 = vadd.f32 %v7536_v21, %v15629_v9  ;;  %9161 = vmatmul.bf16.gmra.mxu2 %v9037_v63  ;;  %8654 = vmatmul.bf16.gmra.mxu1 %v8518_v37  ;;  %v9877_v9 = vsel %vm13246_vm2, %v9872_v53, %v15774_v15  ;;  %v15819_v63 = vrot.slane %v9898_v4, 5  ;;  %v9904_v21 = vrot.slane %v9902_v30, 4  ;;  %v8068_v37 = vld [vmem:[#allocation3 + $0xb8] sm:$0xf] }
 0x411   : > { %v10133_v20 = vunpack.c.l.b16 %v9877_v9  ;;  %v9891_v15 = vrot.slane %v9889_v50, 4  ;;  %v12397_v53 = vrot.slane %v8801_v0, 9  ;;  %v8393_v30 = vrot.slane %v8392_v18, 4  ;;  %v8067_v50 = vld [vmem:[#allocation3 + $0xb4] sm:$0xf] }
 0x412   : > { %16580 = vst [vmem:[#allocation26_spill] sm:$0xff] %v15811_v42  ;;  %v8407_v42 = vrot.slane %v8405_v1, 5  ;;  %v8419_v34 = vshll.u32 %v8068_v37, 16  ;;  %v9905_v0 = vor.u32 %v9904_v21, %v15819_v63 }
 0x413   : > { %v9122_v5 = vpop.f32.mrf.mxu2  ;;  %v8940_v51 = vsel %vm13399_vm5, %v12397_v53, %v8939_v22  ;;  %v10159_v43 = vpack.c.b16 %v10134_v23, %v10133_v20  ;;  %v9895_v18 = vor.u32 %v9894_v33, %v9891_v15  ;;  %v16584_v20 = vld [vmem:[#allocation11_spill] sm:$0xff]  ;;  %v16585_v53 = vld [vmem:[#allocation13_spill] sm:$0xff] }
 0x414   : > { %v15822_v32 = vadd.f32 %v9122_v5, %v15663_v25  ;;  %v8408_v1 = vsel %vm13246_vm2, %v8403_v24, %v8407_v42  ;;  %v8423_v5 = vshrl.u32 %v8068_v37, 16  ;;  %v15846_v24 = vld [vmem:[#allocation3 + $0x94] sm:$0xf]  ;;  %v8410_v37 = vshrl.u32 %v8067_v50, 16 }
 0x415   : > { %v8617_v14 = vpop.f32.mrf.mxu1  ;;  %v8501_v42 = vunpack.c.l.b16 %v8408_v1  ;;  %v15848_v22 = vrot.slane %v8419_v34, 5  ;;  %v9906_v33 = vrot.slane %v9905_v0, 4  ;;  %v9896_v34 = vrot.slane %v9895_v18, 4  ;;  %v9697_v0 = vld [vmem:[#allocation3 + $0x7c] sm:$0xf] }
 0x416   : > { %v15831_v25 = vadd.f32 %v8617_v14, %v7970_v29  ;;  %v9017_v29 = vunpack.c.l.b16 %v8943_v61  ;;  %v8413_v14 = vshll.u32 %v8067_v50, 16  ;;  %v8425_v23 = vrot.slane %v8423_v5, 4  ;;  %v12988_v61 = vld [vmem:[%s16486_s5 + $0x30] sm:$0xff] }
 0x417   : > { %v7538_v4 = vpop.f32.mrf.mxu3  ;;  %v8946_v50 = vrot.slane %v15846_v24, 5  ;;  %11256 = vmatpush.bf16.msrb.mxu2 %v12988_v61  ;;  %v9901_v18 = vsel %vm13246_vm2, %v9896_v34, %v15819_v63  ;;  %v8804_v61 = vld [vmem:[#allocation3 + $0x90] sm:$0xe]  ;;  %v16589_v63 = vld [vmem:[#allocation15_spill] sm:$0xff] }
 0x418   : > { %v15836_v9 = vadd.f32 %v7538_v4, %v15658_v19  ;;  %v8398_v19 = vsel %vm13246_vm2, %v8393_v30, %v15798_v38  ;;  %v9016_v4 = vunpack.c.l.b16 %v8940_v51  ;;  %v7971_v38 = vadd.f32 %v16585_v53, %v16584_v20  ;;  %v9696_v30 = vld [vmem:[#allocation3 + $0x78] sm:$0xf] }
 0x419   : > { %v8500_v15 = vunpack.c.l.b16 %v8398_v19  ;;  %v9910_v51 = vrot.slane %v9908_v56, 5  ;;  %v8415_v20 = vrot.slane %v8413_v14, 5  ;;  %v8426_v53 = vor.u32 %v8425_v23, %v15848_v22 }
 0x41a   : > { %16583 = vst [vmem:[#allocation24_spill] sm:$0xff] %v15836_v9  ;;  %v9038_v62 = vpack.c.b16 %v9017_v29, %v9016_v4  ;;  %v9913_v29 = vshrl.u32 %v9696_v30, 16  ;;  %v15865_v4 = vpop.f32.mrf.mxu0  ;;  %v9922_v14 = vshll.u32 %v9697_v0, 16 }
 0x41b   : > { %10271 = vmatmul.bf16.gmra.mxu0 %v10159_v43  ;;  %v9124_v35 = vpop.f32.mrf.mxu2  ;;  %16587 = vst [vmem:[#allocation30_spill] sm:$0xff] %v15865_v4  ;;  %v9911_v56 = vsel %vm13246_vm2, %v9906_v33, %v9910_v51  ;;  %v8071_v51 = vld [vmem:[#allocation3 + $0xc4] sm:$0xf] }
 0x41c   : > { %9525 = vmatmul.bf16.gmra.mxu3 %v12948_v52  ;;  %v15851_v21 = vadd.f32 %v9124_v35, %v15683_v58  ;;  %v8519_v58 = vpack.c.b16 %v8501_v42, %v8500_v15  ;;  %v8069_v52 = vld [vmem:[#allocation3 + $0xbc] sm:$0x1]  ;;  %v8412_v35 = vrot.slane %v8410_v37, 4  ;;  %v8806_v42 = vld [vmem:[#allocation3 + $0x98] sm:$0x1]  ;;  %v9916_v37 = vshll.u32 %v9696_v30, 16 }
 0x41d   : > { %v8620_v1 = vpop.f32.mrf.mxu1  ;;  %v8429_v24 = vshll.u32 %v8069_v52, 16  ;;  %v8949_v9 = vrot.slane %v8806_v42, 5  ;;  %v10136_v33 = vunpack.c.l.b16 %v9911_v56  ;;  %v8443_v42 = vshll.u32 %v8071_v51, 16 }
 0x41e   : > { %v15859_v43 = vadd.f32 %v8620_v1, %v7971_v38  ;;  %v8948_v38 = vrot.slane %v8946_v50, 4  ;;  %v8416_v15 = vor.u32 %v8415_v20, %v8412_v35  ;;  %v10135_v1 = vunpack.c.l.b16 %v9901_v18  ;;  %v9698_v18 = vld [vmem:[#allocation3 + $0x80] sm:$0x1] }
 0x41f   : > { %v7541_v5 = vpop.f32.mrf.mxu3  ;;  %v8431_v30 = vrot.slane %v8429_v24, 5  ;;  %v9918_v4 = vrot.slane %v9916_v37, 5  ;;  %v8447_v24 = vshrl.u32 %v8071_v51, 16 }
 0x420   : > { %v15862_v19 = vadd.f32 %v7541_v5, %v15679_v27  ;;  %9166 = vmatmul.bf16.gmra.mxu2 %v9038_v62  ;;  %8659 = vmatmul.bf16.gmra.mxu1 %v8519_v58  ;;  %v9926_v27 = vshrl.u32 %v9697_v0, 16  ;;  %v8427_v5 = vrot.slane %v8426_v53, 4  ;;  %v9915_v62 = vrot.slane %v9913_v29, 4 }
 0x421   : > { %v15877_v0 = vrot.slane %v9922_v14, 5  ;;  %v12398_v53 = vrot.slane %v8804_v61, 9  ;;  %v8417_v29 = vrot.slane %v8416_v15, 4  ;;  %v10160_v37 = vpack.c.b16 %v10136_v33, %v10135_v1  ;;  %v8070_v14 = vld [vmem:[#allocation3 + $0xc0] sm:$0xf] }
 0x422   : > { %16586 = vst [vmem:[#allocation28_spill] sm:$0xff] %v15862_v19  ;;  %v16588_v19 = vld [vmem:[#allocation16_spill] sm:$0xff]  ;;  %v9928_v35 = vrot.slane %v9926_v27, 4  ;;  %v8432_v56 = vsel %vm13246_vm2, %v8427_v5, %v8431_v30  ;;  %v9932_v15 = vshll.u32 %v9698_v18, 16  ;;  %v8434_v33 = vshrl.u32 %v8070_v14, 16 }
 0x423   : > { %v9127_v23 = vpop.f32.mrf.mxu2  ;;  %v7972_v34 = vadd.f32 %v16589_v63, %v16588_v19  ;;  %v8947_v27 = vsel %vm13399_vm5, %v12398_v53, %v8946_v50  ;;  %v8503_v5 = vunpack.c.l.b16 %v8432_v56  ;;  %v9919_v63 = vor.u32 %v9918_v4, %v9915_v62  ;;  %v8808_v1 = vld [vmem:[#allocation3 + $0xa0] sm:$0xf] }
 0x424   : > { %v15873_v58 = vadd.f32 %v9127_v23, %v15710_v45  ;;  %v8950_v45 = vsel %vm13399_vm5, %v8948_v38, %v8949_v9  ;;  %v12949_v23 = vld [vmem:[#allocation3 + $0x6c] sm:$0xff]  ;;  %v8422_v9 = vsel %vm13246_vm2, %v8417_v29, %v15848_v22  ;;  %v9929_v38 = vor.u32 %v9928_v35, %v15877_v0 }
 0x425   : > { %v8622_v52 = vpop.f32.mrf.mxu1  ;;  %v9019_v61 = vunpack.c.l.b16 %v8950_v45  ;;  %v8437_v51 = vshll.u32 %v8070_v14, 16  ;;  %v15896_v50 = vrot.slane %v8443_v42, 5  ;;  %v9018_v22 = vunpack.c.l.b16 %v8947_v27  ;;  %v16592_v35 = vld [vmem:[#allocation18_spill] sm:$0xff]  ;;  %v8072_v42 = vld [vmem:[#allocation3 + $0xc8] sm:$0x1] }
 0x426   : > { %v15879_v11 = vadd.f32 %v8622_v52, %v7972_v34  ;;  %v8449_v52 = vrot.slane %v8447_v24, 4  ;;  %v8502_v29 = vunpack.c.l.b16 %v8422_v9  ;;  %v9930_v18 = vrot.slane %v9929_v38, 4  ;;  %v9699_v38 = vld [vmem:[#allocation3 + $0x84] sm:$0xf] }
 0x427   : > { %v7543_v20 = vpop.f32.mrf.mxu3  ;;  %v9934_v56 = vrot.slane %v9932_v15, 5  ;;  %v9039_v4 = vpack.c.b16 %v9019_v61, %v9018_v22  ;;  %v8953_v14 = vrot.slane %v8808_v1, 5  ;;  %v8439_v27 = vrot.slane %v8437_v51, 5  ;;  %v8809_v1 = vld [vmem:[#allocation3 + $0xa4] sm:$0x1] }
 0x428   : > { %16590 = vst [vmem:[#allocation29_spill] sm:$0xff] %v15879_v11  ;;  %v15884_v19 = vadd.f32 %v7543_v20, %v15703_v26  ;;  %v15894_v26 = vpop.f32.mrf.mxu0  ;;  %v16593_v20 = vld [vmem:[#allocation14_spill] sm:$0xff]  ;;  %v9700_v11 = vld [vmem:[#allocation3 + $0x88] sm:$0xf]  ;;  %v9920_v9 = vrot.slane %v9919_v63, 4  ;;  %v8453_v61 = vshll.u32 %v8072_v42, 16 }
 0x429   : > { %v7973_v53 = vadd.f32 %v16593_v20, %v16592_v35  ;;  %v9935_v15 = vsel %vm13246_vm2, %v9930_v18, %v9934_v56  ;;  %v9946_v22 = vshll.u32 %v9700_v11, 16  ;;  %v8955_v51 = vrot.slane %v8953_v14, 4  ;;  %v16596_v18 = vld [vmem:[#allocation17_spill] sm:$0xff] }
 0x42a   : > { %16591 = vst [vmem:[#allocation32_spill] sm:$0xff] %v15884_v19  ;;  %v8455_v42 = vrot.slane %v8453_v61, 5  ;;  %v9701_v61 = vld [vmem:[#allocation3 + $0x8c] sm:$0x1] }
 0x42b   : > { %10276 = vmatmul.bf16.gmra.mxu0 %v10160_v37  ;;  %v9129_v34 = vpop.f32.mrf.mxu2 }
 0x42c   : > { %9530 = vmatmul.bf16.gmra.mxu3 %v12949_v23  ;;  %v15899_v30 = vadd.f32 %v9129_v34, %v15731_v16  ;;  %v8520_v23 = vpack.c.b16 %v8503_v5, %v8502_v29  ;;  %v8436_v16 = vrot.slane %v8434_v33, 4  ;;  %v8450_v34 = vor.u32 %v8449_v52, %v15896_v50  ;;  %v8807_v33 = vld [vmem:[#allocation3 + $0x9c] sm:$0xe] }
 0x42d   : > { %v8625_v45 = vpop.f32.mrf.mxu1  ;;  %v9950_v5 = vshrl.u32 %v9700_v11, 16  ;;  %v10138_v11 = vunpack.c.l.b16 %v9935_v15 }
 0x42e   : > { %v15903_v37 = vadd.f32 %v8625_v45, %v7973_v53  ;;  %v8440_v20 = vor.u32 %v8439_v27, %v8436_v16  ;;  %v8451_v52 = vrot.slane %v8450_v34, 4  ;;  %v9937_v53 = vshrl.u32 %v9699_v38, 16  ;;  %v16595_v45 = vld [vmem:[#allocation19_spill] sm:$0xff] }
 0x42f   : > { %v7546_v62 = vpop.f32.mrf.mxu3  ;;  %v7974_v56 = vadd.f32 %v16596_v18, %v16595_v45  ;;  %v12399_v27 = vrot.slane %v8807_v33, 9  ;;  %v16598_v18 = vld [vmem:[#allocation20_spill] sm:$0xff] }
 0x430   : > { %v15906_v24 = vadd.f32 %v7546_v62, %v15724_v6  ;;  %9171 = vmatmul.bf16.gmra.mxu2 %v9039_v4  ;;  %8664 = vmatmul.bf16.gmra.mxu1 %v8520_v23  ;;  %v9925_v6 = vsel %vm13246_vm2, %v9920_v9, %v15877_v0  ;;  %v15914_v29 = vpop.f32.mrf.mxu0  ;;  %v9940_v4 = vshll.u32 %v9699_v38, 16  ;;  %v8956_v23 = vrot.slane %v8809_v1, 5  ;;  %v12950_v1 = vld [vmem:[#allocation3 + $0x78] sm:$0xff] }
 0x431   : > { %v15921_v0 = vrot.slane %v9946_v22, 5  ;;  %v9952_v9 = vrot.slane %v9950_v5, 4  ;;  %v10137_v34 = vunpack.c.l.b16 %v9925_v6  ;;  %v8456_v38 = vsel %vm13246_vm2, %v8451_v52, %v8455_v42 }
 0x432   : > { %16594 = vst [vmem:[#allocation33_spill] sm:$0xff] %v15906_v24  ;;  %v9939_v22 = vrot.slane %v9937_v53, 4  ;;  %v8954_v5 = vsel %vm13399_vm5, %v12399_v27, %v8953_v14  ;;  %v9956_v52 = vshll.u32 %v9701_v61, 16  ;;  %v16599_v14 = vld [vmem:[#allocation21_spill] sm:$0xff] }
 0x433   : > { %v9132_v35 = vpop.f32.mrf.mxu2  ;;  %v10161_v15 = vpack.c.b16 %v10138_v11, %v10137_v34  ;;  %v9020_v53 = vunpack.c.l.b16 %v8954_v5 }
 0x434   : > { %v15917_v63 = vadd.f32 %v9132_v35, %v15761_v39  ;;  %v8957_v39 = vsel %vm13399_vm5, %v8955_v51, %v8956_v23  ;;  %v8441_v35 = vrot.slane %v8440_v20, 4  ;;  %v8505_v51 = vunpack.c.l.b16 %v8456_v38  ;;  %v10419_v23 = vld [vmem:[#allocation3 + $0x1c] sm:$0xf]  ;;  %v9703_v38 = vld [vmem:[#allocation3 + $0x94] sm:$0xf] }
 0x435   : > { %v8627_v62 = vpop.f32.mrf.mxu1  ;;  %v9021_v33 = vunpack.c.l.b16 %v8957_v39  ;;  %v9958_v5 = vrot.slane %v9956_v52, 5 }
 0x436   : > { %v15923_v16 = vadd.f32 %v8627_v62, %v7974_v56  ;;  %v8446_v6 = vsel %vm13246_vm2, %v8441_v35, %v15896_v50  ;;  %v7975_v56 = vadd.f32 %v16599_v14, %v16598_v18  ;;  %v8811_v62 = vld [vmem:[#allocation3 + $0xac] sm:$0xf]  ;;  %v12987_v50 = vld [vmem:[%s16486_s5 + $0x28] sm:$0xff]  ;;  %v10418_v14 = vld [vmem:[#allocation3 + $0x18] sm:$0xe] }
 0x437   : > { %v7548_v24 = vpop.f32.mrf.mxu3  ;;  %v8504_v11 = vunpack.c.l.b16 %v8446_v6  ;;  %v9040_v34 = vpack.c.b16 %v9021_v33, %v9020_v53  ;;  %11257 = vmatpush.bf16.msrb.mxu2 %v12987_v50  ;;  %v8960_v61 = vrot.slane %v8811_v62, 5  ;;  %v10420_v6 = vld [vmem:[#allocation3 + $0x20] sm:$0x1]  ;;  %v9970_v33 = vshll.u32 %v9703_v38, 16  ;;  %v9702_v53 = vld [vmem:[#allocation3 + $0x90] sm:$0xf] }
 0x438   : > { %16597 = vst [vmem:[#allocation9_spill] sm:$0xff] %v15923_v16  ;;  %v15926_v19 = vadd.f32 %v7548_v24, %v15753_v40  ;;  %v9942_v40 = vrot.slane %v9940_v4, 5  ;;  %v9953_v24 = vor.u32 %v9952_v9, %v15921_v0  ;;  %v15946_v27 = vpop.f32.mrf.mxu0  ;;  %v16601_v62 = vld [vmem:[#allocation7_spill] sm:$0xff] }
 0x439   : > { %v8521_v35 = vpack.c.b16 %v8505_v51, %v8504_v11  ;;  %v8962_v18 = vrot.slane %v8960_v61, 4 }
 0x43a   : > { %v9943_v42 = vor.u32 %v9942_v40, %v9939_v22  ;;  %v9954_v9 = vrot.slane %v9953_v24, 4  ;;  %v8812_v22 = vld [vmem:[#allocation3 + $0xb0] sm:$0x1] }
 0x43b   : > { %10281 = vmatmul.bf16.gmra.mxu0 %v10161_v15  ;;  %v9134_v20 = vpop.f32.mrf.mxu2 }
 0x43c   : > { %9535 = vmatmul.bf16.gmra.mxu3 %v12950_v1  ;;  %v15939_v45 = vadd.f32 %v9134_v20, %v15781_v59  ;;  %v10516_v1 = vrot.slane %v10419_v23, 5  ;;  %v9944_v40 = vrot.slane %v9943_v42, 4  ;;  %v9959_v24 = vsel %vm13246_vm2, %v9954_v9, %v9958_v5  ;;  %v16602_v23 = vld [vmem:[#allocation22_spill] sm:$0xff] }
 0x43d   : > { %v8630_v4 = vpop.f32.mrf.mxu1  ;;  %v9974_v20 = vshrl.u32 %v9703_v38, 16  ;;  %v7976_v50 = vadd.f32 %v16602_v23, %v16601_v62  ;;  %v8963_v42 = vrot.slane %v8812_v22, 5  ;;  %v10140_v9 = vunpack.c.l.b16 %v9959_v24  ;;  %v15978_v23 = vld [vmem:[#allocation3 + $0x28] sm:$0xf] }
 0x43e   : > { %v15948_v59 = vadd.f32 %v8630_v4, %v7975_v56  ;;  %v10518_v52 = vrot.slane %v10516_v1, 4  ;;  %v10519_v56 = vrot.slane %v10420_v6, 5  ;;  %v8810_v4 = vld [vmem:[#allocation3 + $0xa8] sm:$0xe]  ;;  %v15963_v38 = vrot.slane %v9970_v33, 5 }
 0x43f   : > { %v9496_v39 = vpop.f32.mrf.mxu3  ;;  %v9976_v5 = vrot.slane %v9974_v20, 4  ;;  %v12611_v6 = vrot.slane %v10418_v14, 9  ;;  %v8964_v62 = vsel %vm13399_vm5, %v8962_v18, %v8963_v42 }
 0x440   : > { %v15951_v15 = vadd.f32 %v9496_v39, %v15777_v28  ;;  %9176 = vmatmul.bf16.gmra.mxu2 %v9040_v34  ;;  %8669 = vmatmul.bf16.gmra.mxu1 %v8521_v35  ;;  %v9949_v28 = vsel %vm13246_vm2, %v9944_v40, %v15921_v0  ;;  %v9961_v39 = vshrl.u32 %v9702_v53, 16  ;;  %v9964_v35 = vshll.u32 %v9702_v53, 16  ;;  %v15974_v24 = vpop.f32.mrf.mxu0  ;;  %v9704_v53 = vld [vmem:[#allocation3 + $0x98] sm:$0x1] }
 0x441   : > { %v10139_v40 = vunpack.c.l.b16 %v9949_v28  ;;  %v10520_v22 = vsel %vm13399_vm5, %v10518_v52, %v10519_v56  ;;  %v10517_v20 = vsel %vm13399_vm5, %v12611_v6, %v10516_v1  ;;  %v9977_v18 = vor.u32 %v9976_v5, %v15963_v38 }
 0x442   : > { %v9963_v28 = vrot.slane %v9961_v39, 4  ;;  %v9966_v14 = vrot.slane %v9964_v35, 5  ;;  %v10644_v52 = vunpack.c.l.b16 %v10520_v22  ;;  %v9980_v42 = vshll.u32 %v9704_v53, 16  ;;  %v12986_v35 = vld [vmem:[%s16486_s5 + $0x20] sm:$0xff] }
 0x443   : > { %v9137_v51 = vpop.f32.mrf.mxu2  ;;  %v10162_v33 = vpack.c.b16 %v10140_v9, %v10139_v40  ;;  %v10523_v1 = vrot.slane %v15978_v23, 5  ;;  %v16606_v40 = vld [vmem:[#allocation23_spill] sm:$0xff]  ;;  %v10643_v39 = vunpack.c.l.b16 %v10517_v20  ;;  %11258 = vmatpush.bf16.msrb.mxu2 %v12986_v35 }
 0x444   : > { %v15959_v11 = vadd.f32 %v9137_v51, %v15808_v13  ;;  %v12400_v51 = vrot.slane %v8810_v4, 9  ;;  %v8814_v4 = vld [vmem:[#allocation3 + $0xb8] sm:$0xf]  ;;  %v9967_v6 = vor.u32 %v9966_v14, %v9963_v28  ;;  %v12985_v28 = vld [vmem:[%s16486_s5 + $0x18] sm:$0xff]  ;;  %v8815_v14 = vld [vmem:[#allocation3 + $0xbc] sm:$0x1] }
 0x445   : > { %v8632_v34 = vpop.f32.mrf.mxu1  ;;  %v10675_v23 = vpack.c.b16 %v10644_v52, %v10643_v39  ;;  %v10525_v20 = vrot.slane %v10523_v1, 4  ;;  %v8813_v39 = vld [vmem:[#allocation3 + $0xb4] sm:$0xe] }
 0x446   : > { %16600 = vst [vmem:[#allocation12_spill] sm:$0xff] %v15959_v11  ;;  %v15965_v0 = vadd.f32 %v8632_v34, %v7976_v50  ;;  %v9023_v50 = vunpack.c.l.b16 %v8964_v62  ;;  %v10423_v62 = vld [vmem:[#allocation3 + $0x2c] sm:$0x1] }
 0x447   : > { %v9498_v16 = vpop.f32.mrf.mxu3  ;;  %11259 = vmatpush.bf16.msrb.mxu2 %v12985_v28 }
 0x448   : > { %16603 = vst [vmem:[#allocation10_spill] sm:$0xff] %v15965_v0  ;;  %v15968_v13 = vadd.f32 %v9498_v16, %v15803_v44  ;;  %v8961_v44 = vsel %vm13399_vm5, %v12400_v51, %v8960_v61  ;;  %v12951_v16 = vld [vmem:[#allocation3 + $0x84] sm:$0xff]  ;;  %v7977_v61 = vadd.f32 %v15588_v12, %v16606_v40  ;;  %v9978_v51 = vrot.slane %v9977_v18, 4 }
 0x449   : > { %v9022_v34 = vunpack.c.l.b16 %v8961_v44  ;;  %v9706_v44 = vld [vmem:[#allocation3 + $0xa0] sm:$0xf]  ;;  %v9982_v12 = vrot.slane %v9980_v42, 5  ;;  %v10526_v40 = vrot.slane %v10423_v62, 5  ;;  %v9968_v18 = vrot.slane %v9967_v6, 4 }
 0x44a   : > { %16604 = vst [vmem:[#allocation11_spill] sm:$0xff] %v15968_v13  ;;  %v9994_v52 = vshll.u32 %v9706_v44, 16  ;;  %v9705_v42 = vld [vmem:[#allocation3 + $0x9c] sm:$0xf] }
 0x44b   : > { %10286 = vmatmul.bf16.gmra.mxu0 %v10162_v33  ;;  %v9139_v56 = vpop.f32.mrf.mxu2  ;;  %v9041_v22 = vpack.c.b16 %v9023_v50, %v9022_v34  ;;  %v9983_v50 = vsel %vm13246_vm2, %v9978_v51, %v9982_v12  ;;  %v16002_v34 = vpop.f32.mrf.mxu0  ;;  %v9973_v35 = vsel %vm13246_vm2, %v9968_v18, %v15963_v38  ;;  %v10527_v6 = vsel %vm13399_vm5, %v10525_v20, %v10526_v40 }
 0x44c   : > { %9540 = vmatmul.bf16.gmra.mxu3 %v12951_v16  ;;  %v15985_v9 = vadd.f32 %v9139_v56, %v15831_v25  ;;  %v8967_v25 = vrot.slane %v8814_v4, 5  ;;  %v10421_v56 = vld [vmem:[#allocation3 + $0x24] sm:$0xe]  ;;  %v9998_v4 = vshrl.u32 %v9706_v44, 16  ;;  %v7978_v51 = vadd.f32 %v15619_v54, %v15593_v57  ;;  %v12983_v54 = vld [vmem:[%s16486_s5 + $0x8] sm:$0xff] }
 0x44d   : > { %v8635_v5 = vpop.f32.mrf.mxu1  ;;  %v9985_v12 = vshrl.u32 %v9705_v42, 16  ;;  %v9988_v28 = vshll.u32 %v9705_v42, 16  ;;  %v16017_v38 = vrot.slane %v9994_v52, 5  ;;  %v10141_v57 = vunpack.c.l.b16 %v9973_v35 }
 0x44e   : > { %16605 = vst [vmem:[#allocation13_spill] sm:$0xff] %v15985_v9  ;;  %v15992_v53 = vadd.f32 %v8635_v5, %v7977_v61  ;;  %v12612_v5 = vrot.slane %v10421_v56, 9  ;;  %v10000_v56 = vrot.slane %v9998_v4, 4  ;;  %v12680_v9 = vld [vmem:[%s13171_s18 + $0x51] sm:$0xff] }
 0x44f   : > { %v9501_v33 = vpop.f32.mrf.mxu3  ;;  %v9987_v35 = vrot.slane %v9985_v12, 4 }
 0x450   : > { %v15995_v16 = vadd.f32 %v9501_v33, %v15822_v32  ;;  %9181 = vmatmul.bf16.gmra.mxu2 %v9041_v22  ;;  %10763 = vmatmul.bf16.vlgmr.msra.gmra.mxu1 %v10675_v23  ;;  %v8969_v32 = vrot.slane %v8967_v25, 4  ;;  %v8970_v22 = vrot.slane %v8815_v14, 5  ;;  %v10142_v33 = vunpack.c.l.b16 %v9983_v50  ;;  %v12984_v23 = vld [vmem:[%s16486_s5 + $0x10] sm:$0xff]  ;;  %v9707_v50 = vld [vmem:[#allocation3 + $0xa4] sm:$0x1] }
 0x451   : > { %11260 = vmatpush.bf16.msrb.mxu2 %v12984_v23  ;;  %v10524_v42 = vsel %vm13399_vm5, %v12612_v5, %v10523_v1  ;;  %v16034_v23 = vld [vmem:[#allocation3 + $0x34] sm:$0xf]  ;;  %v16038_v5 = vld [vmem:[#allocation3 + $0xc4] sm:$0xf] }
 0x452   : > { %v8971_v40 = vsel %vm13399_vm5, %v8969_v32, %v8970_v22  ;;  %v10163_v4 = vpack.c.b16 %v10142_v33, %v10141_v57  ;;  %v12952_v32 = vld [vmem:[#allocation3 + $0x90] sm:$0xff]  ;;  %v10001_v22 = vor.u32 %v10000_v56, %v16017_v38  ;;  %v10645_v1 = vunpack.c.l.b16 %v10524_v42  ;;  %v16610_v33 = vld [vmem:[#allocation8_spill] sm:$0xff]  ;;  %v12982_v56 = vld [vmem:[%s16486_s5] sm:$0xff] }
 0x453   : > { %v9142_v61 = vpop.f32.mrf.mxu2  ;;  %v7979_v12 = vadd.f32 %v15651_v3, %v16610_v33  ;;  %v12677_v42 = vld [vmem:[%s13171_s18 + $0x31] sm:$0xff]  ;;  %v12679_v3 = vld [vmem:[%s13171_s18 + $0x49] sm:$0xff] }
 0x454   : > { %v16010_v62 = vadd.f32 %v9142_v61, %v15859_v43  ;;  %v12401_v43 = vrot.slane %v8813_v39, 9  ;;  %v10646_v61 = vunpack.c.l.b16 %v10527_v6  ;;  %v9025_v39 = vunpack.c.l.b16 %v8971_v40  ;;  %v16040_v6 = vpop.f32.mrf.mxu0  ;;  %v12676_v40 = vld [vmem:[%s13171_s18 + $0x21] sm:$0xff] }
 0x455   : > { %v8637_v44 = vpop.f32.mrf.mxu1  ;;  %11261 = vmatpush.bf16.msrb.mxu2 %v12983_v54 }
 0x456   : > { %16607 = vst [vmem:[#allocation16_spill] sm:$0xff] %v16010_v62  ;;  %v16019_v20 = vadd.f32 %v8637_v44, %v7978_v51  ;;  %v8968_v52 = vsel %vm13399_vm5, %v12401_v43, %v8967_v25  ;;  %v9990_v51 = vrot.slane %v9988_v28, 5  ;;  %v12675_v43 = vld [vmem:[%s13171_s18 + $0x19] sm:$0xff]  ;;  %v12682_v62 = vld [vmem:[%s13171_s18 + $0x69] sm:$0xff] }
 0x457   : > { %v9503_v18 = vpop.f32.mrf.mxu3  ;;  %v9024_v25 = vunpack.c.l.b16 %v8968_v52  ;;  %v11112_v11 = vadd.f32 %v12677_v42, %v12675_v43 }
 0x458   : > { %v16027_v14 = vadd.f32 %v9503_v18, %v15851_v21  ;;  %v10004_v21 = vshll.u32 %v9707_v50, 16  ;;  %v9709_v18 = vld [vmem:[#allocation3 + $0xac] sm:$0xf]  ;;  %v10676_v50 = vpack.c.b16 %v10646_v61, %v10645_v1  ;;  %v9991_v52 = vor.u32 %v9990_v51, %v9987_v35  ;;  %v10426_v51 = vld [vmem:[#allocation3 + $0x38] sm:$0x1] }
 0x459   : > { %v9042_v57 = vpack.c.b16 %v9025_v39, %v9024_v25  ;;  %11262 = vmatpush.bf16.msrb.mxu2 %v12982_v56  ;;  %v8974_v61 = vrot.slane %v16038_v5, 5  ;;  %v11115_v35 = vadd.f32 %v12682_v62, %v12680_v9  ;;  %11128 = vst [vmem:[#allocation6] sm:$0xff] %v11112_v11  ;;  %v9708_v25 = vld [vmem:[#allocation3 + $0xa8] sm:$0xf]  ;;  %v10018_v1 = vshll.u32 %v9709_v18, 16 }
 0x45a   : > { %16608 = vst [vmem:[#allocation15_spill] sm:$0xff] %v16027_v14  ;;  %v10006_v0 = vrot.slane %v10004_v21, 5  ;;  %v8818_v56 = vld [vmem:[#allocation3 + $0xc8] sm:$0x1]  ;;  %v10424_v62 = vld [vmem:[#allocation3 + $0x30] sm:$0xe] }
 0x45b   : > { %10291 = vmatmul.bf16.gmra.mxu0 %v10163_v4  ;;  %v16036_v44 = vpop.f32.mrf.mxu2  ;;  %v10002_v4 = vrot.slane %v10001_v22, 4  ;;  %v9992_v22 = vrot.slane %v9991_v52, 4  ;;  %v8976_v43 = vrot.slane %v8974_v61, 4  ;;  %v10533_v5 = vrot.slane %v10426_v51, 5  ;;  %11131 = vst [vmem:[#allocation6 + $0x18] sm:$0xff] %v11115_v35 }
 0x45c   : > { %16609 = vst [vmem:[#allocation18_spill] sm:$0xff] %v16036_v44  ;;  %9545 = vmatmul.bf16.gmra.mxu3 %v12952_v32  ;;  %v12678_v32 = vld [vmem:[%s13171_s18 + $0x39] sm:$0xff]  ;;  %v12681_v44 = vld [vmem:[%s13171_s18 + $0x61] sm:$0xff]  ;;  %v10012_v52 = vshll.u32 %v9708_v25, 16  ;;  %v16076_v42 = vpop.f32.mrf.mxu0 }
 0x45d   : > { %v8640_v54 = vpop.f32.mrf.mxu1  ;;  %v11113_v14 = vadd.f32 %v12678_v32, %v12676_v40  ;;  %v11114_v39 = vadd.f32 %v12681_v44, %v12679_v3  ;;  %v10007_v21 = vsel %vm13246_vm2, %v10002_v4, %v10006_v0  ;;  %v9997_v9 = vsel %vm13246_vm2, %v9992_v22, %v16017_v38 }
 0x45e   : > { %v16053_v28 = vadd.f32 %v8640_v54, %v7979_v12  ;;  %v10022_v12 = vshrl.u32 %v9709_v18, 16  ;;  %v16611_v44 = vrot.slane %v16034_v23, 5  ;;  %v8816_v18 = vld [vmem:[#allocation3 + $0xc0] sm:$0xe]  ;;  %v10144_v40 = vunpack.c.l.b16 %v10007_v21 }
 0x45f   : > { %v9506_v33 = vpop.f32.mrf.mxu3  ;;  %11129 = vst [vmem:[#allocation6 + $0x8] sm:$0xff] %v11113_v14  ;;  %v7980_v14 = vadd.f32 %v15676_v48, %v15641_v41  ;;  %v16074_v4 = vrot.slane %v10018_v1, 5  ;;  %v12402_v41 = vrot.slane %v8816_v18, 9  ;;  %v10428_v23 = vld [vmem:[#allocation3 + $0x40] sm:$0xf] }
 0x460   : > { %v16059_v13 = vadd.f32 %v9506_v33, %v15873_v58  ;;  %9186 = vmatmul.bf16.gmra.mxu2 %v9042_v57  ;;  %10768 = vmatmul.bf16.gmra.mxu1 %v10676_v50  ;;  %11130 = vst [vmem:[#allocation6 + $0x10] sm:$0xff] %v11114_v39  ;;  %v10532_v11 = vrot.slane %v16611_v44, 4  ;;  %v10009_v57 = vshrl.u32 %v9708_v25, 16  ;;  %v8977_v50 = vrot.slane %v8818_v56, 5  ;;  %v9710_v25 = vld [vmem:[#allocation3 + $0xb0] sm:$0x1] }
 0x461   : > { %v10024_v38 = vrot.slane %v10022_v12, 4  ;;  %v10143_v33 = vunpack.c.l.b16 %v9997_v9  ;;  %v16612_v22 = vmov %v16611_v44  ;;  %v8975_v1 = vsel %vm13399_vm5, %v12402_v41, %v8974_v61  ;;  %v12953_v12 = vld [vmem:[#allocation3 + $0x9c] sm:$0xff]  ;;  %v10429_v41 = vld [vmem:[#allocation3 + $0x44] sm:$0x1] }
 0x462   : > { %v8978_v48 = vsel %vm13399_vm5, %v8976_v43, %v8977_v50  ;;  %v10534_v35 = vsel %vm13399_vm5, %v10532_v11, %v10533_v5  ;;  %v10014_v56 = vrot.slane %v10012_v52, 5  ;;  %v10028_v44 = vshll.u32 %v9710_v25, 16 }
 0x463   : > { %v9147_v58 = vpop.f32.mrf.mxu2  ;;  %v10164_v51 = vpack.c.b16 %v10144_v40, %v10143_v33  ;;  %v9027_v9 = vunpack.c.l.b16 %v8978_v48  ;;  %v10648_v43 = vunpack.c.l.b16 %v10534_v35  ;;  %v9026_v11 = vunpack.c.l.b16 %v8975_v1 }
 0x464   : > { %v16070_v0 = vadd.f32 %v9147_v58, %v15903_v37  ;;  %v12613_v37 = vrot.slane %v10424_v62, 9  ;;  %v10025_v58 = vor.u32 %v10024_v38, %v16074_v4  ;;  %v7981_v5 = vadd.f32 %v15708_v10, %v15666_v8  ;;  %v16103_v48 = vpop.f32.mrf.mxu0  ;;  %v9711_v8 = vld [vmem:[#allocation3 + $0xb4] sm:$0xf] }
 0x465   : > { %v8642_v54 = vpop.f32.mrf.mxu1  ;;  %v10540_v25 = vrot.slane %v10429_v41, 5  ;;  %v12954_v41 = vld [vmem:[#allocation3 + $0xa8] sm:$0xff] }
 0x466   : > { %v16078_v3 = vadd.f32 %v8642_v54, %v7980_v14  ;;  %v10531_v21 = vsel %vm13399_vm5, %v12613_v37, %v16612_v22  ;;  %v10026_v40 = vrot.slane %v10025_v58, 4  ;;  %v9043_v54 = vpack.c.b16 %v9027_v9, %v9026_v11 }
 0x467   : > { %v9508_v32 = vpop.f32.mrf.mxu3  ;;  %v10647_v14 = vunpack.c.l.b16 %v10531_v21  ;;  %v10030_v37 = vrot.slane %v10028_v44, 5  ;;  %v10427_v44 = vld [vmem:[#allocation3 + $0x3c] sm:$0xe] }
 0x468   : > { %v16081_v39 = vadd.f32 %v9508_v32, %v15899_v30  ;;  %v10011_v30 = vrot.slane %v10009_v57, 4  ;;  %v9712_v57 = vld [vmem:[#allocation3 + $0xb8] sm:$0xf]  ;;  %v10537_v32 = vrot.slane %v10428_v23, 5 }
 0x469   : > { %v10677_v38 = vpack.c.b16 %v10648_v43, %v10647_v14  ;;  %v10042_v10 = vshll.u32 %v9712_v57, 16  ;;  %v10046_v35 = vshrl.u32 %v9712_v57, 16  ;;  %v10031_v22 = vsel %vm13246_vm2, %v10026_v40, %v10030_v37  ;;  %v11144_v43 = vld [vmem:[#allocation6] ss:$2 sm:$0xff]  ;;  %v11146_v14 = vld [vmem:[#allocation6 + $0x10] ss:$2 sm:$0xff] }
 0x46a   : > { %v10015_v61 = vor.u32 %v10014_v56, %v10011_v30  ;;  %v10539_v21 = vrot.slane %v10537_v32, 4  ;;  %v10033_v30 = vshrl.u32 %v9711_v8, 16  ;;  %v10036_v56 = vshll.u32 %v9711_v8, 16  ;;  %v9713_v37 = vld [vmem:[#allocation3 + $0xbc] sm:$0x1] }
 0x46b   : > { %10296 = vmatmul.bf16.gmra.mxu0 %v10164_v51  ;;  %v16094_v62 = vpop.f32.mrf.mxu2  ;;  %v10146_v9 = vunpack.c.l.b16 %v10031_v22  ;;  %v10044_v23 = vrot.slane %v10042_v10, 5  ;;  %v10048_v11 = vrot.slane %v10046_v35, 4  ;;  %v12614_v57 = vrot.slane %v10427_v44, 9 }
 0x46c   : > { %9550 = vmatmul.bf16.gmra.mxu3 %v12953_v12  ;;  %v10016_v51 = vrot.slane %v10015_v61, 4  ;;  %v11162_v61 = vld [vmem:[#allocation6 + $0x11] ss:$2 sm:$0xff]  ;;  %v10035_v10 = vrot.slane %v10033_v30, 4  ;;  %v10038_v35 = vrot.slane %v10036_v56, 5  ;;  %v16124_v22 = vpop.f32.mrf.mxu0 }
 0x46d   : > { %v8645_v18 = vpop.f32.mrf.mxu1  ;;  %v10538_v8 = vsel %vm13399_vm5, %v12614_v57, %v10537_v32 }
 0x46e   : > { %v16098_v52 = vadd.f32 %v8645_v18, %v7981_v5  ;;  %v10021_v12 = vsel %vm13246_vm2, %v10016_v51, %v16074_v4  ;;  %v11160_v18 = vld [vmem:[#allocation6 + $0x1] ss:$2 sm:$0xff]  ;;  %v10049_v51 = vor.u32 %v10048_v11, %v10044_v23  ;;  %v10039_v44 = vor.u32 %v10038_v35, %v10035_v10 }
 0x46f   : > { %v9511_v50 = vpop.f32.mrf.mxu3  ;;  %v9715_v11 = vld [vmem:[#allocation3 + $0xc4] sm:$0xf] }
 0x470   : > { %v16101_v33 = vadd.f32 %v9511_v50, %v15917_v63  ;;  %9191 = vmatmul.bf16.gmra.mxu2 %v9043_v54  ;;  %10773 = vmatmul.bf16.gmra.mxu1 %v10677_v38  ;;  %v7982_v63 = vadd.f32 %v15740_v46, %v15688_v36  ;;  %v10145_v46 = vunpack.c.l.b16 %v10021_v12  ;;  %v11175_v50 = vadd.f32 %v11160_v18, %v11144_v43 }
 0x471   : > { %v11176_v38 = vadd.f32 %v11162_v61, %v11146_v14  ;;  %v10649_v12 = vunpack.c.l.b16 %v10538_v8  ;;  %v10050_v32 = vrot.slane %v10049_v51, 4  ;;  %v10040_v18 = vrot.slane %v10039_v44, 4  ;;  %v10430_v8 = vld [vmem:[#allocation3 + $0x48] sm:$0xe]  ;;  %v12955_v44 = vld [vmem:[#allocation3 + $0xb4] sm:$0xff] }
 0x472   : > { %v10165_v54 = vpack.c.b16 %v10146_v9, %v10145_v46  ;;  %v10431_v9 = vld [vmem:[#allocation3 + $0x4c] sm:$0xf]  ;;  %v10066_v46 = vshll.u32 %v9715_v11, 16 }
 0x473   : > { %v9152_v1 = vpop.f32.mrf.mxu2  ;;  %v10544_v14 = vrot.slane %v10431_v9, 5 }
 0x474   : > { %v16113_v58 = vadd.f32 %v9152_v1, %v15948_v59  ;;  %v10541_v59 = vsel %vm13399_vm5, %v10539_v21, %v10540_v25  ;;  %v11183_v21 = vpack.c.bf16 %v11176_v38, %v11175_v50  ;;  %v7983_v25 = vadd.f32 %v15769_v60, %v15713_v7  ;;  %v9714_v60 = vld [vmem:[#allocation3 + $0xc0] sm:$0xf]  ;;  %v16136_v50 = vpop.f32.mrf.mxu0 }
 0x475   : > { %v8647_v5 = vpop.f32.mrf.mxu1  ;;  %v10070_v7 = vshrl.u32 %v9715_v11, 16  ;;  %v10057_v51 = vshrl.u32 %v9714_v60, 16 }
 0x476   : > { %v16115_v36 = vadd.f32 %v8647_v5, %v7982_v63  ;;  %v10052_v63 = vshll.u32 %v9713_v37, 16  ;;  %v7984_v37 = vadd.f32 %v15800_v2, %v15736_v55 }
 0x477   : > { %v9513_v40 = vpop.f32.mrf.mxu3  ;;  %v10059_v2 = vrot.slane %v10057_v51, 4  ;;  %v10435_v51 = vld [vmem:[#allocation3 + $0x5c] sm:$0x1] }
 0x478   : > { %v16118_v4 = vadd.f32 %v9513_v40, %v15939_v45  ;;  %v10650_v45 = vunpack.c.l.b16 %v10541_v59  ;;  %v10054_v5 = vrot.slane %v10052_v63, 5  ;;  %v10432_v40 = vld [vmem:[#allocation3 + $0x50] sm:$0x1]  ;;  %v10045_v59 = vsel %vm13246_vm2, %v10040_v18, %v10044_v23 }
 0x479   : > { %v10547_v10 = vrot.slane %v10432_v40, 5  ;;  %v10068_v63 = vrot.slane %v10066_v46, 5  ;;  %v10147_v23 = vunpack.c.l.b16 %v10045_v59  ;;  %v7985_v40 = vadd.f32 %v15829_v17, %v15764_v49 }
 0x47a   : > { %v10678_v56 = vpack.c.b16 %v10650_v45, %v10649_v12  ;;  %v10055_v61 = vsel %vm13246_vm2, %v10050_v32, %v10054_v5  ;;  %v10060_v45 = vshll.u32 %v9714_v60, 16  ;;  %v12615_v12 = vrot.slane %v10430_v8, 9  ;;  %v5506_v60 = vld [vmem:[#allocation3 + $0xcc] sm:$0x1] }
 0x47b   : > { %10301 = vmatmul.bf16.gmra.mxu0 %v10165_v54  ;;  %v16126_v1 = vpop.f32.mrf.mxu2  ;;  %v10546_v54 = vrot.slane %v10544_v14, 4 }
 0x47c   : > { %9555 = vmatmul.bf16.gmra.mxu3 %v12954_v41  ;;  %v10148_v41 = vunpack.c.l.b16 %v10055_v61  ;;  %v10545_v55 = vsel %vm13399_vm5, %v12615_v12, %v10544_v14  ;;  %v10062_v32 = vrot.slane %v10060_v45, 5 }
 0x47d   : > { %v8650_v43 = vpop.f32.mrf.mxu1  ;;  %v10548_v9 = vsel %vm13399_vm5, %v10546_v54, %v10547_v10  ;;  %v10651_v46 = vunpack.c.l.b16 %v10545_v55 }
 0x47e   : > { %v16130_v30 = vadd.f32 %v8650_v43, %v7983_v25  ;;  %v9716_v43 = vld [vmem:[#allocation3 + $0xc8] sm:$0x1]  ;;  %v10652_v11 = vunpack.c.l.b16 %v10548_v9  ;;  %v10063_v59 = vor.u32 %v10062_v32, %v10059_v2  ;;  %v12684_v32 = vld [vmem:[%s13171_s18 + $0x81] sm:$0xff] }
 0x47f   : > { %v10076_v18 = vshll.u32 %v9716_v43, 16  ;;  %v16615_v43 = vld [vmem:[#allocation30_spill] sm:$0xff]  ;;  %v12683_v2 = vld [vmem:[%s13171_s18 + $0x79] sm:$0xff] }
 0x480   : > { %11263 = vmatmul.bf16.vlgmr.msrb.gmra.mxu2 %v11183_v21  ;;  %10778 = vmatmul.bf16.gmra.mxu1 %v10678_v56  ;;  %v10072_v21 = vrot.slane %v10070_v7, 4  ;;  %v10434_v7 = vld [vmem:[#allocation3 + $0x58] sm:$0xf]  ;;  %v10679_v10 = vpack.c.b16 %v10652_v11, %v10651_v46  ;;  %v10064_v17 = vrot.slane %v10063_v59, 4 }
 0x481   : > { %v10551_v49 = vrot.slane %v10434_v7, 5  ;;  %v12690_v59 = vld [vmem:[%s13171_s18 + $0xc9] sm:$0xff] }
 0x482   : > { %v10073_v56 = vor.u32 %v10072_v21, %v10068_v63  ;;  %v10069_v21 = vsel %vm13246_vm2, %v10064_v17, %v10068_v63 }
 0x483   : > { %v9157_v57 = vpop.f32.mrf.mxu2  ;;  %v10553_v12 = vrot.slane %v10551_v49, 4  ;;  %v10149_v7 = vunpack.c.l.b16 %v10069_v21 }
 0x484   : > { %v16139_v38 = vadd.f32 %v9157_v57, %v15992_v53  ;;  %v10166_v53 = vpack.c.b16 %v10148_v41, %v10147_v23  ;;  %v10074_v14 = vrot.slane %v10073_v56, 4  ;;  %v16156_v41 = vpop.f32.mrf.mxu0  ;;  %v10433_v23 = vld [vmem:[#allocation3 + $0x54] sm:$0xe]  ;;  %v12685_v56 = vld [vmem:[%s13171_s18 + $0x91] sm:$0xff] }
 0x485   : > { %v8652_v35 = vpop.f32.mrf.mxu1  ;;  %v11116_v63 = vadd.f32 %v12685_v56, %v12683_v2  ;;  %v12956_v2 = vld [vmem:[#allocation3 + $0xc0] sm:$0xff] }
 0x486   : > { %v16143_v25 = vadd.f32 %v8652_v35, %v7984_v37  ;;  %v5507_v37 = vsel %vm14170_vm8, 0, %v5506_v60  ;;  %v12688_v60 = vld [vmem:[%s13171_s18 + $0xb1] sm:$0xff] }
 0x487   : > { %5508 = vst [vmem:[#allocation3 + $0xcc] sm:$0x1] %v5507_v37 }
 0x488   : > { %11132 = vst [vmem:[#allocation6 + $0x20] sm:$0xff] %v11116_v63 }
 0x48b   : > { %10306 = vmatmul.bf16.gmra.mxu0 %v10166_v53  ;;  %v9159_v5 = vpop.f32.mrf.mxu2  ;;  %v16614_v53 = vld [vmem:[#allocation25_spill] sm:$0xff] }
 0x48c   : > { %9560 = vmatmul.bf16.gmra.mxu3 %v12955_v44  ;;  %v16150_v61 = vadd.f32 %v9159_v5, %v16019_v20  ;;  %v10078_v20 = vrot.slane %v10076_v18, 5  ;;  %v7986_v44 = vadd.f32 %v16615_v43, %v16614_v53  ;;  %v10554_v5 = vrot.slane %v10435_v51, 5  ;;  %v12686_v18 = vld [vmem:[%s13171_s18 + $0x99] sm:$0xff]  ;;  %v9718_v53 = vld [vmem:[#allocation3 + $0xd0] sm:$0xf] }
 0x48d   : > { %v8655_v57 = vpop.f32.mrf.mxu1 }
 0x48e   : > { %v16158_v8 = vadd.f32 %v8655_v57, %v7985_v40  ;;  %v10079_v35 = vsel %vm13246_vm2, %v10074_v14, %v10078_v20  ;;  %v12687_v40 = vld [vmem:[%s13171_s18 + $0xa9] sm:$0xff]  ;;  %v12689_v57 = vld [vmem:[%s13171_s18 + $0xc1] sm:$0xff]  ;;  %v12616_v14 = vrot.slane %v10433_v23, 9  ;;  %v10555_v54 = vsel %vm13399_vm5, %v10553_v12, %v10554_v5 }
 0x48f   : > { %v10150_v55 = vunpack.c.l.b16 %v10079_v35  ;;  %v11118_v37 = vadd.f32 %v12689_v57, %v12687_v40  ;;  %v5562_v20 = vld [vmem:[#allocation3 + $0xd4] sm:$0x1]  ;;  %v9717_v17 = vld [vmem:[#allocation3 + $0xcc] sm:$0xf]  ;;  %v16181_v35 = vpop.f32.mrf.mxu0  ;;  %v10090_v12 = vshll.u32 %v9718_v53, 16  ;;  %v10654_v56 = vunpack.c.l.b16 %v10555_v54 }
 0x490   : > { %10783 = vmatmul.bf16.gmra.mxu1 %v10679_v10  ;;  %v11119_v10 = vadd.f32 %v12690_v59, %v12688_v60  ;;  %v5563_v21 = vsel %vm14197_vm10, 0, %v5562_v20  ;;  %v10081_v43 = vshrl.u32 %v9717_v17, 16  ;;  %v10552_v23 = vsel %vm13399_vm5, %v12616_v14, %v10551_v49  ;;  %v10437_v57 = vld [vmem:[#allocation3 + $0x64] sm:$0xf] }
 0x491   : > { %v10167_v51 = vpack.c.b16 %v10150_v55, %v10149_v7  ;;  %11134 = vst [vmem:[#allocation6 + $0x30] sm:$0xff] %v11118_v37  ;;  %v16617_v7 = vld [vmem:[#allocation26_spill] sm:$0xff]  ;;  %v10653_v49 = vunpack.c.l.b16 %v10552_v23  ;;  %v10558_v37 = vrot.slane %v10437_v57, 5 }
 0x492   : > { %11135 = vst [vmem:[#allocation6 + $0x38] sm:$0xff] %v11119_v10  ;;  %v7987_v60 = vadd.f32 %v15894_v26, %v16617_v7 }
 0x493   : > { %v9162_v45 = vpop.f32.mrf.mxu2  ;;  %5564 = vst [vmem:[#allocation3 + $0xd4] sm:$0x1] %v5563_v21  ;;  %v10680_v54 = vpack.c.b16 %v10654_v56, %v10653_v49  ;;  %v10560_v23 = vrot.slane %v10558_v37, 4 }
 0x494   : > { %v16165_v9 = vadd.f32 %v9162_v45, %v16053_v28  ;;  %v11117_v28 = vadd.f32 %v12686_v18, %v12684_v32  ;;  %v10094_v32 = vshrl.u32 %v9718_v53, 16  ;;  %v10092_v18 = vrot.slane %v10090_v12, 5 }
 0x495   : > { %v8657_v11 = vpop.f32.mrf.mxu1 }
 0x496   : > { %v16174_v46 = vadd.f32 %v8657_v11, %v7986_v44  ;;  %11133 = vst [vmem:[#allocation6 + $0x28] sm:$0xff] %v11117_v28  ;;  %v10084_v44 = vshll.u32 %v9717_v17, 16  ;;  %v10083_v11 = vrot.slane %v10081_v43, 4  ;;  %v10096_v40 = vrot.slane %v10094_v32, 4  ;;  %v10438_v43 = vld [vmem:[#allocation3 + $0x68] sm:$0x1] }
 0x497   : > { %v16194_v53 = vpop.f32.mrf.mxu0  ;;  %v10561_v49 = vrot.slane %v10438_v43, 5  ;;  %v16619_v43 = vld [vmem:[#allocation28_spill] sm:$0xff] }
 0x498   : > { %v10086_v5 = vrot.slane %v10084_v44, 5 }
 0x499   : > { %v11150_v21 = vld [vmem:[#allocation6 + $0x30] ss:$2 sm:$0xff] }
 0x49a   : > { %v10087_v59 = vor.u32 %v10086_v5, %v10083_v11  ;;  %v9719_v44 = vld [vmem:[#allocation3 + $0xd4] sm:$0x1]  ;;  %v16618_v5 = vld [vmem:[#allocation24_spill] sm:$0xff] }
 0x49b   : > { %10311 = vmatmul.bf16.gmra.mxu0 %v10167_v51  ;;  %v9164_v55 = vpop.f32.mrf.mxu2  ;;  %v10097_v51 = vor.u32 %v10096_v40, %v10092_v18  ;;  %v10100_v56 = vshll.u32 %v9719_v44, 16  ;;  %v10436_v40 = vld [vmem:[#allocation3 + $0x60] sm:$0xe] }
 0x49c   : > { %9565 = vmatmul.bf16.gmra.mxu3 %v12956_v2  ;;  %v16188_v63 = vadd.f32 %v9164_v55, %v16078_v3  ;;  %v10088_v17 = vrot.slane %v10087_v59, 4  ;;  %v11166_v3 = vld [vmem:[#allocation6 + $0x31] ss:$2 sm:$0xff]  ;;  %v7988_v55 = vadd.f32 %v15914_v29, %v16618_v5 }
 0x49d   : > { %v8660_v28 = vpop.f32.mrf.mxu1  ;;  %v11148_v10 = vld [vmem:[#allocation6 + $0x20] ss:$2 sm:$0xff]  ;;  %v11164_v20 = vld [vmem:[#allocation6 + $0x21] ss:$2 sm:$0xff]  ;;  %v11178_v26 = vadd.f32 %v11166_v3, %v11150_v21  ;;  %v10098_v32 = vrot.slane %v10097_v51, 4  ;;  %v10102_v57 = vrot.slane %v10100_v56, 5 }
 0x49e   : > { %v16192_v14 = vadd.f32 %v8660_v28, %v7987_v60  ;;  %v11177_v45 = vadd.f32 %v11164_v20, %v11148_v10  ;;  %v10093_v12 = vsel %vm13246_vm2, %v10088_v17, %v10092_v18  ;;  %v12617_v10 = vrot.slane %v10436_v40, 9 }
 0x49f   : > { %v10151_v28 = vunpack.c.l.b16 %v10093_v12  ;;  %v10562_v18 = vsel %vm13399_vm5, %v10560_v23, %v10561_v49  ;;  %v16211_v21 = vpop.f32.mrf.mxu0 }
 0x4a0   : > { %10788 = vmatmul.bf16.gmra.mxu1 %v10680_v54  ;;  %v11184_v7 = vpack.c.bf16 %v11178_v26, %v11177_v45  ;;  %v12957_v54 = vld [vmem:[#allocation3 + $0xcc] sm:$0xff]  ;;  %v10559_v29 = vsel %vm13399_vm5, %v12617_v10, %v10558_v37  ;;  %v10656_v17 = vunpack.c.l.b16 %v10562_v18  ;;  %v7989_v26 = vadd.f32 %v15946_v27, %v16619_v43 }
 0x4a1   : > { %v10655_v44 = vunpack.c.l.b16 %v10559_v29  ;;  %v10565_v37 = vrot.slane %v10440_v31, 5  ;;  %v10443_v29 = vld [vmem:[#allocation3 + $0x7c] sm:$0xf] }
 0x4a2   : > { %11268 = vmatmul.bf16.gmra.mxu2 %v11184_v7  ;;  %v10439_v7 = vld [vmem:[#allocation3 + $0x6c] sm:$0xe]  ;;  %v10572_v43 = vrot.slane %v10443_v29, 5 }
 0x4a3   : > { %v9167_v2 = vpop.f32.mrf.mxu2  ;;  %v10681_v12 = vpack.c.b16 %v10656_v17, %v10655_v44  ;;  %v10567_v5 = vrot.slane %v10565_v37, 4 }
 0x4a4   : > { %v16199_v11 = vadd.f32 %v9167_v2, %v16098_v52  ;;  %v10103_v52 = vsel %vm13246_vm2, %v10098_v32, %v10102_v57  ;;  %v10441_v32 = vld [vmem:[#allocation3 + $0x74] sm:$0x1]  ;;  %v12618_v57 = vrot.slane %v10439_v7, 9  ;;  %v10574_v31 = vrot.slane %v10572_v43, 4 }
 0x4a5   : > { %v8662_v60 = vpop.f32.mrf.mxu1  ;;  %v10152_v20 = vunpack.c.l.b16 %v10103_v52  ;;  %v16621_v52 = vld [vmem:[#allocation33_spill] sm:$0xff] }
 0x4a6   : > { %v16203_v59 = vadd.f32 %v8662_v60, %v7988_v55  ;;  %v10568_v60 = vrot.slane %v10441_v32, 5 }
 0x4a7   : > { %v10168_v51 = vpack.c.b16 %v10152_v20, %v10151_v28 }
 0x4a8   : > { %v10569_v28 = vsel %vm13399_vm5, %v10567_v5, %v10568_v60 }
 0x4a9   : > { %v10658_v10 = vunpack.c.l.b16 %v10569_v28  ;;  %v10447_v28 = vld [vmem:[#allocation3 + $0x8c] sm:$0x1] }
 0x4ab   : > { %v9169_v45 = vpop.f32.mrf.mxu2  ;;  %10316 = vmatmul.bf16.gmra.mxu0 %v10168_v51 }
 0x4ac   : > { %9570 = vmatmul.bf16.gmra.mxu3 %v12957_v54  ;;  %v16214_v3 = vadd.f32 %v9169_v45, %v16115_v36  ;;  %v16620_v36 = vld [vmem:[#allocation32_spill] sm:$0xff]  ;;  %v10566_v54 = vsel %vm13399_vm5, %v12618_v57, %v10565_v37 }
 0x4ad   : > { %v8665_v2 = vpop.f32.mrf.mxu1  ;;  %v7990_v40 = vadd.f32 %v15974_v24, %v16620_v36  ;;  %v7991_v24 = vadd.f32 %v16002_v34, %v16621_v52  ;;  %v10657_v20 = vunpack.c.l.b16 %v10566_v54 }
 0x4ae   : > { %v16218_v23 = vadd.f32 %v8665_v2, %v7989_v26  ;;  %v10444_v26 = vld [vmem:[#allocation3 + $0x80] sm:$0x1] }
 0x4af   : > { %v10682_v45 = vpack.c.b16 %v10658_v10, %v10657_v20  ;;  %v10575_v34 = vrot.slane %v10444_v26, 5  ;;  %v10445_v10 = vld [vmem:[#allocation3 + $0x84] sm:$0xe]  ;;  %v12693_v20 = vld [vmem:[%s13171_s18 + $0xf1] sm:$0xff] }
 0x4b0   : > { %10793 = vmatmul.bf16.gmra.mxu1 %v10681_v12  ;;  %v10442_v12 = vld [vmem:[#allocation3 + $0x78] sm:$0xe] }
 0x4b1   : > { %v10576_v5 = vsel %vm13399_vm5, %v10574_v31, %v10575_v34  ;;  %v12696_v26 = vld [vmem:[%s13171_s18 + $0x111] sm:$0xff]  ;;  %v12697_v31 = vld [vmem:[%s13171_s18 + $0x121] sm:$0xff]  ;;  %v12620_v34 = vrot.slane %v10445_v10, 9  ;;  %v10449_v10 = vld [vmem:[#allocation3 + $0x94] sm:$0xf] }
 0x4b3   : > { %v9172_v56 = vpop.f32.mrf.mxu2 }
 0x4b4   : > { %v16221_v55 = vadd.f32 %v9172_v56, %v16130_v30  ;;  %v12619_v56 = vrot.slane %v10442_v12, 9 }
 0x4b5   : > { %v8667_v27 = vpop.f32.mrf.mxu1 }
 0x4b6   : > { %v16225_v49 = vadd.f32 %v8667_v27, %v7990_v40  ;;  %v10573_v36 = vsel %vm13399_vm5, %v12619_v56, %v10572_v43  ;;  %v10660_v40 = vunpack.c.l.b16 %v10576_v5  ;;  %v12695_v43 = vld [vmem:[%s13171_s18 + $0x109] sm:$0xff] }
 0x4bb   : > { %v9174_v18 = vpop.f32.mrf.mxu2 }
 0x4bc   : > { %v16232_v30 = vadd.f32 %v9174_v18, %v16143_v25  ;;  %v7992_v25 = vadd.f32 %v16040_v6, %v15926_v19  ;;  %v10659_v19 = vunpack.c.l.b16 %v10573_v36  ;;  %v10446_v6 = vld [vmem:[#allocation3 + $0x88] sm:$0xf] }
 0x4bd   : > { %v8670_v17 = vpop.f32.mrf.mxu1  ;;  %v10579_v57 = vrot.slane %v10446_v6, 5 }
 0x4be   : > { %v16236_v51 = vadd.f32 %v8670_v17, %v7991_v24  ;;  %v10683_v60 = vpack.c.b16 %v10660_v40, %v10659_v19  ;;  %v12692_v24 = vld [vmem:[%s13171_s18 + $0xe1] sm:$0xff]  ;;  %v10582_v17 = vrot.slane %v10447_v28, 5  ;;  %v10354_v40 = vadd.f32 %v16076_v42, %v15951_v15 }
 0x4bf   : > { %v10581_v18 = vrot.slane %v10579_v57, 4  ;;  %v10580_v36 = vsel %vm13399_vm5, %v12620_v34, %v10579_v57 }
 0x4c0   : > { %10798 = vmatmul.bf16.gmra.mxu1 %v10682_v45  ;;  %v12694_v45 = vld [vmem:[%s13171_s18 + $0xf9] sm:$0xff]  ;;  %v10661_v57 = vunpack.c.l.b16 %v10580_v36  ;;  %v16623_v36 = vld [vmem:[#allocation15_spill] sm:$0xff] }
 0x4c1   : > { %v11121_v12 = vadd.f32 %v12694_v45, %v12692_v24  ;;  %v10583_v56 = vsel %vm13399_vm5, %v10581_v18, %v10582_v17  ;;  %v16281_v18 = vpop.f32.mrf.mxu0  ;;  %v10586_v24 = vrot.slane %v10449_v10, 5 }
 0x4c3   : > { %v9177_v44 = vpop.f32.mrf.mxu2  ;;  %11137 = vst [vmem:[#allocation6 + $0x48] sm:$0xff] %v11121_v12 }
 0x4c4   : > { %v16239_v2 = vadd.f32 %v9177_v44, %v16158_v8 }
 0x4c5   : > { %v8672_v37 = vpop.f32.mrf.mxu1 }
 0x4c6   : > { %v16243_v32 = vadd.f32 %v8672_v37, %v7992_v25  ;;  %v12698_v25 = vld [vmem:[%s13171_s18 + $0x129] sm:$0xff]  ;;  %v16263_v37 = vpop.f32.mrf.mxu3 }
 0x4c7   : > { %v11123_v5 = vadd.f32 %v12698_v25, %v12696_v26  ;;  %v10450_v25 = vld [vmem:[#allocation3 + $0x98] sm:$0x1] }
 0x4c9   : > { %11139 = vst [vmem:[#allocation6 + $0x58] sm:$0xff] %v11123_v5 }
 0x4cb   : > { %v9179_v8 = vpop.f32.mrf.mxu2 }
 0x4cc   : > { %v16250_v7 = vadd.f32 %v9179_v8, %v16174_v46  ;;  %v12691_v46 = vld [vmem:[%s13171_s18 + $0xd9] sm:$0xff]  ;;  %v10662_v8 = vunpack.c.l.b16 %v10583_v56  ;;  %v10588_v56 = vrot.slane %v10586_v24, 4 }
 0x4cd   : > { %v10764_v27 = vpop.f32.mrf.mxu1  ;;  %v11120_v44 = vadd.f32 %v12693_v20, %v12691_v46 }
 0x4ce   : > { %v10876_v6 = vadd.f32 %v10764_v27, %v10354_v40  ;;  %v10684_v46 = vpack.c.b16 %v10662_v8, %v10661_v57  ;;  %v10357_v40 = vadd.f32 %v16136_v50, %v16623_v36  ;;  %v10448_v8 = vld [vmem:[#allocation3 + $0x90] sm:$0xe] }
 0x4cf   : > { %11136 = vst [vmem:[#allocation6 + $0x40] sm:$0xff] %v11120_v44  ;;  %v12621_v10 = vrot.slane %v10448_v8, 9 }
 0x4d0   : > { %10803 = vmatmul.bf16.gmra.mxu1 %v10683_v60  ;;  %v16274_v60 = vld [vmem:[%s16485_s4] ss:$0 sm:$0xff] }
 0x4d1   : > { %v10976_v17 = vadd.f32 %v16274_v60, %v10876_v6 }
 0x4d3   : > { %v9182_v54 = vpop.f32.mrf.mxu2 }
 0x4d4   : > { %v16253_v52 = vadd.f32 %v9182_v54, %v16192_v14  ;;  %v11122_v14 = vadd.f32 %v12697_v31, %v12695_v43  ;;  %v10356_v54 = vadd.f32 %v16124_v22, %v15995_v16  ;;  %v16285_v43 = vpop.f32.mrf.mxu3  ;;  %v16622_v22 = vld [vmem:[#allocation11_spill] sm:$0xff] }
 0x4d5   : > { %v10766_v29 = vpop.f32.mrf.mxu1  ;;  %v10355_v44 = vadd.f32 %v16103_v48, %v16622_v22  ;;  %v16294_v48 = vpop.f32.mrf.mxu0 }
 0x4d6   : > { %11138 = vst [vmem:[#allocation6 + $0x50] sm:$0xff] %v11122_v14  ;;  %v11152_v27 = vld [vmem:[#allocation6 + $0x40] ss:$2 sm:$0xff]  ;;  %v11168_v20 = vld [vmem:[#allocation6 + $0x41] ss:$2 sm:$0xff] }
 0x4d7   : > { %v10877_v14 = vadd.f32 %v10766_v29, %v10355_v44 }
 0x4d9   : > { %v10977_v29 = vadd.f32 %v16274_v60, %v10877_v14 }
 0x4db   : > { %v9184_v19 = vpop.f32.mrf.mxu2 }
 0x4dc   : > { %v16277_v28 = vadd.f32 %v9184_v19, %v16203_v59  ;;  %v11179_v59 = vadd.f32 %v11168_v20, %v11152_v27  ;;  %v16302_v27 = vpop.f32.mrf.mxu3 }
 0x4dd   : > { %v10769_v15 = vpop.f32.mrf.mxu1  ;;  %v11154_v26 = vld [vmem:[#allocation6 + $0x50] ss:$2 sm:$0xff]  ;;  %v11170_v16 = vld [vmem:[#allocation6 + $0x51] ss:$2 sm:$0xff]  ;;  %v16307_v44 = vpop.f32.mrf.mxu0 }
 0x4de   : > { %v10878_v42 = vadd.f32 %v10769_v15, %v10356_v54  ;;  %v11180_v12 = vadd.f32 %v11170_v16, %v11154_v26  ;;  %v10589_v54 = vrot.slane %v10450_v25, 5 }
 0x4e0   : > { %v10978_v45 = vadd.f32 %v16274_v60, %v10878_v42  ;;  %10808 = vmatmul.bf16.gmra.mxu1 %v10684_v46  ;;  %v11185_v19 = vpack.c.bf16 %v11180_v12, %v11179_v59  ;;  %v10590_v15 = vsel %vm13399_vm5, %v10588_v56, %v10589_v54  ;;  %v10587_v42 = vsel %vm13399_vm5, %v12621_v10, %v10586_v24  ;;  %v10452_v59 = vld [vmem:[#allocation3 + $0xa0] sm:$0xf] }
 0x4e1   : > { %v10664_v46 = vunpack.c.l.b16 %v10590_v15  ;;  %v10593_v22 = vrot.slane %v10452_v59, 5  ;;  %v10360_v15 = vadd.f32 %v16194_v53, %v16101_v33  ;;  %v10359_v53 = vadd.f32 %v16181_v35, %v16081_v39 }
 0x4e2   : > { %v11008_v31 = vadd.f32 %v10978_v45, %v10976_v17  ;;  %11273 = vmatmul.bf16.gmra.mxu2 %v11185_v19  ;;  %v10663_v45 = vunpack.c.l.b16 %v10587_v42  ;;  %v10358_v19 = vadd.f32 %v16156_v41, %v16059_v13 }
 0x4e3   : > { %v9187_v34 = vpop.f32.mrf.mxu2  ;;  %v10595_v24 = vrot.slane %v10593_v22, 4 }
 0x4e4   : > { %v16290_v5 = vadd.f32 %v9187_v34, %v16218_v23  ;;  %11024 = vst [vmem:[#allocation5] sm:$0xff] %v11008_v31  ;;  %v10685_v16 = vpack.c.b16 %v10664_v46, %v10663_v45  ;;  %v10453_v31 = vld [vmem:[#allocation3 + $0xa4] sm:$0x1]  ;;  %v10451_v34 = vld [vmem:[#allocation3 + $0x9c] sm:$0xe]  ;;  %v16312_v56 = vpop.f32.mrf.mxu3 }
 0x4e5   : > { %v10771_v6 = vpop.f32.mrf.mxu1  ;;  %v10596_v14 = vrot.slane %v10453_v31, 5  ;;  %v12622_v36 = vrot.slane %v10451_v34, 9  ;;  %v16320_v54 = vpop.f32.mrf.mxu0  ;;  %v16333_v45 = vld [vmem:[%s16487_s6] ss:$0 sm:$0xff] }
 0x4e6   : > { %v10879_v57 = vadd.f32 %v10771_v6, %v10357_v40 }
 0x4e7   : > { %v10597_v40 = vsel %vm13399_vm5, %v10595_v24, %v10596_v14  ;;  %v10594_v8 = vsel %vm13399_vm5, %v12622_v36, %v10593_v22  ;;  %v10361_v14 = vadd.f32 %v16211_v21, %v16118_v4  ;;  %v10454_v36 = vld [vmem:[#allocation3 + $0xa8] sm:$0xe] }
 0x4e8   : > { %v10979_v23 = vadd.f32 %v16274_v60, %v10879_v57  ;;  %v10666_v6 = vunpack.c.l.b16 %v10597_v40 }
 0x4ea   : > { %v11009_v50 = vadd.f32 %v10979_v23, %v10977_v29  ;;  %v10665_v29 = vunpack.c.l.b16 %v10594_v8  ;;  %v10455_v23 = vld [vmem:[#allocation3 + $0xac] sm:$0xf] }
 0x4eb   : > { %v9189_v20 = vpop.f32.mrf.mxu2  ;;  %v10600_v13 = vrot.slane %v10455_v23, 5 }
 0x4ec   : > { %v16305_v17 = vadd.f32 %v9189_v20, %v16225_v49  ;;  %11025 = vst [vmem:[#allocation5 + $0x8] sm:$0xff] %v11009_v50  ;;  %v10686_v46 = vpack.c.b16 %v10666_v6, %v10665_v29  ;;  %v16327_v20 = vpop.f32.mrf.mxu3 }
 0x4ed   : > { %v10774_v26 = vpop.f32.mrf.mxu1  ;;  %v10602_v31 = vrot.slane %v10600_v13, 4  ;;  %v16342_v40 = vpop.f32.mrf.mxu0 }
 0x4ee   : > { %v10880_v57 = vadd.f32 %v10774_v26, %v10358_v19  ;;  %v12623_v19 = vrot.slane %v10454_v36, 9 }
 0x4f0   : > { %10813 = vmatmul.bf16.gmra.mxu1 %v10685_v16  ;;  %v10980_v41 = vadd.f32 %v16274_v60, %v10880_v57  ;;  %v10456_v16 = vld [vmem:[#allocation3 + $0xb0] sm:$0x1]  ;;  %v10601_v57 = vsel %vm13399_vm5, %v12623_v19, %v10600_v13  ;;  %v10457_v19 = vld [vmem:[#allocation3 + $0xb4] sm:$0xe] }
 0x4f1   : > { %v10603_v35 = vrot.slane %v10456_v16, 5  ;;  %v10667_v23 = vunpack.c.l.b16 %v10601_v57  ;;  %v12700_v13 = vld [vmem:[%s13171_s18 + $0x141] sm:$0xff] }
 0x4f3   : > { %v9192_v25 = vpop.f32.mrf.mxu2  ;;  %v11040_v59 = vld [vmem:[#allocation5] ss:$2 sm:$0xff]  ;;  %v11056_v33 = vld [vmem:[#allocation5 + $0x1] ss:$2 sm:$0xff]  ;;  %v10604_v6 = vsel %vm13399_vm5, %v10602_v31, %v10603_v35  ;;  %v12705_v35 = vld [vmem:[%s13171_s18 + $0x181] sm:$0xff] }
 0x4f4   : > { %v16310_v12 = vadd.f32 %v9192_v25, %v16236_v51  ;;  %v11071_v24 = vadd.f32 %v11056_v33, %v11040_v59  ;;  %v16354_v21 = vpop.f32.mrf.mxu3  ;;  %v10668_v29 = vunpack.c.l.b16 %v10604_v6  ;;  %v10459_v33 = vld [vmem:[#allocation3 + $0xbc] sm:$0x1]  ;;  %v12703_v31 = vld [vmem:[%s13171_s18 + $0x169] sm:$0xff] }
 0x4f5   : > { %v10776_v49 = vpop.f32.mrf.mxu1  ;;  %v12706_v6 = vld [vmem:[%s13171_s18 + $0x189] sm:$0xff]  ;;  %v10610_v57 = vrot.slane %v10459_v33, 5 }
 0x4f6   : > { %v10881_v25 = vadd.f32 %v10776_v49, %v10359_v53  ;;  %v12699_v53 = vld [vmem:[%s13171_s18 + $0x139] sm:$0xff] }
 0x4fb   : > { %v9194_v51 = vpop.f32.mrf.mxu2 }
 0x4fc   : > { %v16323_v10 = vadd.f32 %v9194_v51, %v16243_v32  ;;  %v10981_v51 = vadd.f32 %v16274_v60, %v10881_v25  ;;  %v12704_v25 = vld [vmem:[%s13171_s18 + $0x171] sm:$0xff] }
 0x4fd   : > { %v10779_v42 = vpop.f32.mrf.mxu1 }
 0x4fe   : > { %v10882_v50 = vadd.f32 %v10779_v42, %v10360_v15  ;;  %v10458_v42 = vld [vmem:[#allocation3 + $0xb8] sm:$0xf] }
 0x4ff   : > { %v10607_v59 = vrot.slane %v10458_v42, 5 }
 0x500   : > { %v10982_v32 = vadd.f32 %v16274_v60, %v10882_v50  ;;  %10818 = vmatmul.bf16.gmra.mxu1 %v10686_v46  ;;  %v10687_v46 = vpack.c.b16 %v10668_v29, %v10667_v23  ;;  %v16624_v29 = vld [vmem:[#allocation12_spill] sm:$0xff] }
 0x501   : > { %v9616_v23 = vadd.f32 %v16263_v37, %v16624_v29 }
 0x502   : > { %v11010_v26 = vadd.f32 %v10982_v32, %v10980_v41  ;;  %v16358_v41 = vpop.f32.mrf.mxu0 }
 0x503   : > { %v11264_v22 = vpop.f32.mrf.mxu2 }
 0x504   : > { %v11265_v34 = vadd.f32 %v16333_v45, %v11264_v22  ;;  %11026 = vst [vmem:[#allocation5 + $0x10] sm:$0xff] %v11010_v26  ;;  %v12701_v26 = vld [vmem:[%s13171_s18 + $0x151] sm:$0xff]  ;;  %v12702_v22 = vld [vmem:[%s13171_s18 + $0x159] sm:$0xff] }
 0x505   : > { %v10781_v39 = vpop.f32.mrf.mxu1 }
 0x506   : > { %v11284_v8 = vadd.f32 %v11265_v34, %v11071_v24  ;;  %v10883_v49 = vadd.f32 %v10781_v39, %v10361_v14  ;;  %v11124_v24 = vadd.f32 %v12701_v26, %v12699_v53  ;;  %v16367_v34 = vpop.f32.mrf.mxu3  ;;  %v10609_v39 = vrot.slane %v10607_v59, 4  ;;  %v16625_v53 = vld [vmem:[#allocation16_spill] sm:$0xff] }
 0x508   : > { %11292 = vst [vmem:[%s16347_s26] sm:$0xff] %v11284_v8  ;;  %v10983_v4 = vadd.f32 %v16274_v60, %v10883_v49  ;;  %v11125_v8 = vadd.f32 %v12702_v22, %v12700_v13  ;;  %v9618_v13 = vadd.f32 %v16302_v27, %v16625_v53  ;;  %v10362_v22 = vadd.f32 %v16281_v18, %v9616_v23 }
 0x509   : > { %11140 = vst [vmem:[#allocation6 + $0x60] sm:$0xff] %v11124_v24  ;;  %v10461_v24 = vld [vmem:[#allocation3 + $0xc4] sm:$0xf] }
 0x50a   : > { %v11011_v15 = vadd.f32 %v10983_v4, %v10981_v51  ;;  %v11126_v51 = vadd.f32 %v12705_v35, %v12703_v31  ;;  %11141 = vst [vmem:[#allocation6 + $0x68] sm:$0xff] %v11125_v8  ;;  %v16378_v26 = vpop.f32.mrf.mxu0  ;;  %v16626_v8 = vld [vmem:[#allocation29_spill] sm:$0xff] }
 0x50b   : > { %v11266_v32 = vpop.f32.mrf.mxu2 }
 0x50c   : > { %11027 = vst [vmem:[#allocation5 + $0x18] sm:$0xff] %v11011_v15  ;;  %v11267_v16 = vadd.f32 %v16333_v45, %v11266_v32  ;;  %v11127_v15 = vadd.f32 %v12706_v6, %v12704_v25  ;;  %v10611_v32 = vsel %vm13399_vm5, %v10609_v39, %v10610_v57  ;;  %v16628_v6 = vld [vmem:[#allocation13_spill] sm:$0xff] }
 0x50d   : > { %v10784_v50 = vpop.f32.mrf.mxu1  ;;  %11142 = vst [vmem:[#allocation6 + $0x70] sm:$0xff] %v11126_v51  ;;  %v10670_v31 = vunpack.c.l.b16 %v10611_v32 }
 0x50e   : > { %11143 = vst [vmem:[#allocation6 + $0x78] sm:$0xff] %v11127_v15  ;;  %v10884_v37 = vadd.f32 %v10784_v50, %v10362_v22  ;;  %v16384_v39 = vpop.f32.mrf.mxu3  ;;  %v10614_v15 = vrot.slane %v10461_v24, 5 }
 0x510   : > { %10823 = vmatmul.bf16.gmra.mxu1 %v10687_v46  ;;  %v12624_v46 = vrot.slane %v10457_v19, 9  ;;  %v10984_v23 = vadd.f32 %v16274_v60, %v10884_v37 }
 0x512   : > { %v10608_v33 = vsel %vm13399_vm5, %v12624_v46, %v10607_v59  ;;  %v9617_v59 = vadd.f32 %v16285_v43, %v16628_v6  ;;  %v10616_v43 = vrot.slane %v10614_v15, 4 }
 0x513   : > { %v11042_v14 = vld [vmem:[#allocation5 + $0x10] ss:$2 sm:$0xff]  ;;  %v11058_v36 = vld [vmem:[#allocation5 + $0x11] ss:$2 sm:$0xff]  ;;  %v10669_v25 = vunpack.c.l.b16 %v10608_v33  ;;  %v16394_v33 = vpop.f32.mrf.mxu0 }
 0x514   : > { %v11072_v49 = vadd.f32 %v11058_v36, %v11042_v14  ;;  %v11156_v14 = vld [vmem:[#allocation6 + $0x60] ss:$2 sm:$0xff]  ;;  %v11172_v36 = vld [vmem:[#allocation6 + $0x61] ss:$2 sm:$0xff]  ;;  %v10363_v32 = vadd.f32 %v16294_v48, %v9617_v59 }
 0x515   : > { %v10786_v4 = vpop.f32.mrf.mxu1  ;;  %v11181_v27 = vadd.f32 %v11172_v36, %v11156_v14  ;;  %v10688_v18 = vpack.c.b16 %v10670_v31, %v10669_v25  ;;  %v11158_v57 = vld [vmem:[#allocation6 + $0x70] ss:$2 sm:$0xff]  ;;  %v11174_v50 = vld [vmem:[#allocation6 + $0x71] ss:$2 sm:$0xff] }
 0x516   : > { %v11285_v42 = vadd.f32 %v11267_v16, %v11072_v49  ;;  %v10364_v16 = vadd.f32 %v16307_v44, %v9618_v13  ;;  %v16627_v49 = vld [vmem:[#allocation18_spill] sm:$0xff]  ;;  %v11182_v44 = vadd.f32 %v11174_v50, %v11158_v57  ;;  %v10462_v13 = vld [vmem:[#allocation3 + $0xc8] sm:$0x1]  ;;  %v10885_v22 = vadd.f32 %v10786_v4, %v10363_v32  ;;  %v16397_v24 = vpop.f32.mrf.mxu3 }
 0x517   : > { %v9240_v19 = vadd.f32 %v16627_v49, %v16626_v8  ;;  %v10617_v25 = vrot.slane %v10462_v13, 5  ;;  %v10465_v57 = vld [vmem:[#allocation3 + $0xd4] sm:$0x1] }
 0x518   : > { %11293 = vst [vmem:[%s16347_s26 + $0x8] sm:$0xff] %v11285_v42  ;;  %v11186_v46 = vpack.c.bf16 %v11182_v44, %v11181_v27  ;;  %v10985_v36 = vadd.f32 %v16274_v60, %v10885_v22 }
 0x519   : > { %v9619_v29 = vadd.f32 %v16312_v56, %v9240_v19  ;;  %v10618_v48 = vsel %vm13399_vm5, %v10616_v43, %v10617_v25  ;;  %v9622_v25 = vadd.f32 %v16367_v34, %v16113_v58 }
 0x51a   : > { %11278 = vmatmul.bf16.gmra.mxu2 %v11186_v46  ;;  %v10672_v8 = vunpack.c.l.b16 %v10618_v48 }
 0x51b   : > { %v10365_v31 = vadd.f32 %v16320_v54, %v9619_v29  ;;  %v10464_v54 = vld [vmem:[#allocation3 + $0xd0] sm:$0xf]  ;;  %v16405_v19 = vpop.f32.mrf.mxu0  ;;  %v10368_v47 = vadd.f32 %v16378_v26, %v9622_v25 }
 0x51c   : > { %v10621_v59 = vrot.slane %v10464_v54, 5 }
 0x51d   : > { %v10789_v35 = vpop.f32.mrf.mxu1 }
 0x51e   : > { %v10886_v51 = vadd.f32 %v10789_v35, %v10364_v16  ;;  %v10460_v16 = vld [vmem:[#allocation3 + $0xc0] sm:$0xe]  ;;  %v16407_v44 = vpop.f32.mrf.mxu3 }
 0x51f   : > { %v12625_v14 = vrot.slane %v10460_v16, 9 }
 0x520   : > { %v10986_v42 = vadd.f32 %v16274_v60, %v10886_v51  ;;  %10828 = vmatmul.bf16.gmra.mxu1 %v10688_v18  ;;  %v10463_v18 = vld [vmem:[#allocation3 + $0xcc] sm:$0xe] }
 0x521   : > { %v10615_v4 = vsel %vm13399_vm5, %v12625_v14, %v10614_v15  ;;  %v12626_v29 = vrot.slane %v10463_v18, 9  ;;  %v10624_v15 = vrot.slane %v10465_v57, 5 }
 0x522   : > { %v11012_v53 = vadd.f32 %v10986_v42, %v10984_v23  ;;  %v10671_v49 = vunpack.c.l.b16 %v10615_v4  ;;  %v10623_v23 = vrot.slane %v10621_v59, 4 }
 0x523   : > { %v10622_v43 = vsel %vm13399_vm5, %v12626_v29, %v10621_v59 }
 0x524   : > { %11028 = vst [vmem:[#allocation5 + $0x20] sm:$0xff] %v11012_v53  ;;  %v10689_v51 = vpack.c.b16 %v10672_v8, %v10671_v49  ;;  %v10625_v22 = vsel %vm13399_vm5, %v10623_v23, %v10624_v15 }
 0x525   : > { %v10791_v56 = vpop.f32.mrf.mxu1  ;;  %v11269_v50 = vpop.f32.mrf.mxu2  ;;  %v10674_v14 = vunpack.c.l.b16 %v10625_v22  ;;  %v9624_v22 = vadd.f32 %v16397_v24, %v16139_v38 }
 0x526   : > { %v10887_v37 = vadd.f32 %v10791_v56, %v10365_v31  ;;  %v11270_v42 = vadd.f32 %v16333_v45, %v11269_v50  ;;  %v9620_v31 = vadd.f32 %v16327_v20, %v16070_v0  ;;  %v10284_v56 = vpop.f32.mrf.mxu0  ;;  %v16630_v0 = vld [vmem:[#allocation10_spill] sm:$0xff] }
 0x527   : > { %v9244_v20 = vadd.f32 %v16126_v1, %v16630_v0 }
 0x528   : > { %v10987_v35 = vadd.f32 %v16274_v60, %v10887_v37  ;;  %v10673_v37 = vunpack.c.l.b16 %v10622_v43  ;;  %v10366_v48 = vadd.f32 %v16342_v40, %v9620_v31 }
 0x529   : > { %v9623_v34 = vadd.f32 %v16384_v39, %v9244_v20 }
 0x52a   : > { %v11013_v27 = vadd.f32 %v10987_v35, %v10985_v36  ;;  %v9541_v36 = vpop.f32.mrf.mxu3  ;;  %v16629_v35 = vld [vmem:[#allocation9_spill] sm:$0xff]  ;;  %v10690_v8 = vpack.c.b16 %v10674_v14, %v10673_v37  ;;  %v10370_v37 = vadd.f32 %v16405_v19, %v9624_v22 }
 0x52b   : > { %v9242_v4 = vadd.f32 %v16094_v62, %v16629_v35  ;;  %v10369_v18 = vadd.f32 %v16394_v33, %v9623_v34 }
 0x52c   : > { %11029 = vst [vmem:[#allocation5 + $0x28] sm:$0xff] %v11013_v27 }
 0x52d   : > { %v10794_v6 = vpop.f32.mrf.mxu1  ;;  %v9621_v49 = vadd.f32 %v16354_v21, %v9242_v4  ;;  %v9625_v4 = vadd.f32 %v16407_v44, %v16150_v61 }
 0x52e   : > { %v10888_v27 = vadd.f32 %v10794_v6, %v10366_v48 }
 0x52f   : > { %v10367_v62 = vadd.f32 %v16358_v41, %v9621_v49  ;;  %v10371_v24 = vadd.f32 %v10284_v56, %v9625_v4 }
 0x530   : > { %10833 = vmatmul.bf16.gmra.mxu1 %v10689_v51  ;;  %v10988_v59 = vadd.f32 %v16274_v60, %v10888_v27  ;;  %v10287_v51 = vpop.f32.mrf.mxu0 }
 0x532   : > { %v9543_v57 = vpop.f32.mrf.mxu3 }
 0x533   : > { %v11044_v46 = vld [vmem:[#allocation5 + $0x20] ss:$2 sm:$0xff]  ;;  %v11060_v32 = vld [vmem:[#allocation5 + $0x21] ss:$2 sm:$0xff] }
 0x534   : > { %v11073_v53 = vadd.f32 %v11060_v32, %v11044_v46  ;;  %v11271_v46 = vpop.f32.mrf.mxu2 }
 0x535   : > { %v10796_v13 = vpop.f32.mrf.mxu1  ;;  %v11272_v41 = vadd.f32 %v16333_v45, %v11271_v46 }
 0x536   : > { %v11286_v16 = vadd.f32 %v11270_v42, %v11073_v53  ;;  %v10889_v26 = vadd.f32 %v10796_v13, %v10367_v62 }
 0x538   : > { %11294 = vst [vmem:[%s16347_s26 + $0x10] sm:$0xff] %v11286_v16  ;;  %v10989_v21 = vadd.f32 %v16274_v60, %v10889_v26  ;;  %v10289_v23 = vpop.f32.mrf.mxu0  ;;  %v9626_v16 = vadd.f32 %v9541_v36, %v16165_v9 }
 0x53a   : > { %v9546_v42 = vpop.f32.mrf.mxu3  ;;  %v10372_v48 = vadd.f32 %v10287_v51, %v9626_v16 }
 0x53d   : > { %v10799_v54 = vpop.f32.mrf.mxu1 }
 0x53e   : > { %v10890_v58 = vadd.f32 %v10799_v54, %v10368_v47 }
 0x540   : > { %v10990_v40 = vadd.f32 %v16274_v60, %v10890_v58  ;;  %10838 = vmatmul.bf16.gmra.mxu1 %v10690_v8  ;;  %v10292_v33 = vpop.f32.mrf.mxu0  ;;  %v9627_v8 = vadd.f32 %v9543_v57, %v16188_v63  ;;  %v9628_v57 = vadd.f32 %v9546_v42, %v16199_v11 }
 0x542   : > { %v11014_v6 = vadd.f32 %v10990_v40, %v10988_v59  ;;  %v9548_v25 = vpop.f32.mrf.mxu3  ;;  %v10373_v19 = vadd.f32 %v10289_v23, %v9627_v8 }
 0x544   : > { %11030 = vst [vmem:[#allocation5 + $0x30] sm:$0xff] %v11014_v6 }
 0x545   : > { %v10801_v1 = vpop.f32.mrf.mxu1 }
 0x546   : > { %v10891_v50 = vadd.f32 %v10801_v1, %v10369_v18 }
 0x548   : > { %v10991_v39 = vadd.f32 %v16274_v60, %v10891_v50  ;;  %v10294_v47 = vpop.f32.mrf.mxu0 }
 0x54a   : > { %v11015_v29 = vadd.f32 %v10991_v39, %v10989_v21  ;;  %v9551_v36 = vpop.f32.mrf.mxu3  ;;  %v10374_v39 = vadd.f32 %v10292_v33, %v9628_v57 }
 0x54b   : > { %v9630_v21 = vadd.f32 %v9551_v36, %v16221_v55 }
 0x54c   : > { %11031 = vst [vmem:[#allocation5 + $0x38] sm:$0xff] %v11015_v29 }
 0x54d   : > { %v10804_v15 = vpop.f32.mrf.mxu1 }
 0x54e   : > { %v10892_v14 = vadd.f32 %v10804_v15, %v10370_v37 }
 0x550   : > { %v10992_v54 = vadd.f32 %v16274_v60, %v10892_v14  ;;  %v10297_v44 = vpop.f32.mrf.mxu0 }
 0x551   : > { %v10376_v23 = vadd.f32 %v10297_v44, %v9630_v21 }
 0x552   : > { %v9553_v63 = vpop.f32.mrf.mxu3 }
 0x553   : > { %v11046_v32 = vld [vmem:[#allocation5 + $0x30] ss:$2 sm:$0xff]  ;;  %v11062_v53 = vld [vmem:[#allocation5 + $0x31] ss:$2 sm:$0xff] }
 0x554   : > { %v11074_v13 = vadd.f32 %v11062_v53, %v11046_v32  ;;  %v9631_v53 = vadd.f32 %v9553_v63, %v16232_v30 }
 0x555   : > { %v10806_v43 = vpop.f32.mrf.mxu1 }
 0x556   : > { %v11287_v31 = vadd.f32 %v11272_v41, %v11074_v13  ;;  %v10893_v0 = vadd.f32 %v10806_v43, %v10371_v24  ;;  %v9629_v41 = vadd.f32 %v9548_v25, %v16214_v3 }
 0x558   : > { %11295 = vst [vmem:[%s16347_s26 + $0x18] sm:$0xff] %v11287_v31  ;;  %v10993_v58 = vadd.f32 %v16274_v60, %v10893_v0  ;;  %v10299_v51 = vpop.f32.mrf.mxu0  ;;  %v10375_v42 = vadd.f32 %v10294_v47, %v9629_v41 }
 0x559   : > { %v10377_v55 = vadd.f32 %v10299_v51, %v9631_v53 }
 0x55a   : > { %v9556_v50 = vpop.f32.mrf.mxu3 }
 0x55d   : > { %v10809_v35 = vpop.f32.mrf.mxu1 }
 0x55e   : > { %v10894_v27 = vadd.f32 %v10809_v35, %v10372_v48 }
 0x560   : > { %v10994_v38 = vadd.f32 %v16274_v60, %v10894_v27  ;;  %v10302_v15 = vpop.f32.mrf.mxu0 }
 0x562   : > { %v11016_v9 = vadd.f32 %v10994_v38, %v10992_v54  ;;  %v9558_v11 = vpop.f32.mrf.mxu3 }
 0x563   : > { %v9633_v44 = vadd.f32 %v9558_v11, %v16250_v7 }
 0x564   : > { %11032 = vst [vmem:[#allocation5 + $0x40] sm:$0xff] %v11016_v9  ;;  %v9632_v9 = vadd.f32 %v9556_v50, %v16239_v2 }
 0x565   : > { %v10811_v20 = vpop.f32.mrf.mxu1  ;;  %v11274_v40 = vpop.f32.mrf.mxu2 }
 0x566   : > { %v10895_v49 = vadd.f32 %v10811_v20, %v10373_v19  ;;  %v11275_v56 = vadd.f32 %v16333_v45, %v11274_v40  ;;  %v10378_v19 = vadd.f32 %v10302_v15, %v9632_v9 }
 0x568   : > { %v10995_v61 = vadd.f32 %v16274_v60, %v10895_v49  ;;  %v10304_v37 = vpop.f32.mrf.mxu0 }
 0x569   : > { %v10379_v2 = vadd.f32 %v10304_v37, %v9633_v44 }
 0x56a   : > { %v11017_v34 = vadd.f32 %v10995_v61, %v10993_v58  ;;  %v9561_v30 = vpop.f32.mrf.mxu3 }
 0x56b   : > { %v9634_v0 = vadd.f32 %v9561_v30, %v16253_v52 }
 0x56c   : > { %11033 = vst [vmem:[#allocation5 + $0x48] sm:$0xff] %v11017_v34 }
 0x56d   : > { %v10814_v59 = vpop.f32.mrf.mxu1  ;;  %v11276_v35 = vpop.f32.mrf.mxu2 }
 0x56e   : > { %v10896_v29 = vadd.f32 %v10814_v59, %v10374_v39  ;;  %v11277_v27 = vadd.f32 %v16333_v45, %v11276_v35 }
 0x570   : > { %v10996_v13 = vadd.f32 %v16274_v60, %v10896_v29  ;;  %v10307_v4 = vpop.f32.mrf.mxu0 }
 0x571   : > { %v10380_v58 = vadd.f32 %v10307_v4, %v9634_v0 }
 0x572   : > { %v9563_v38 = vpop.f32.mrf.mxu3 }
 0x573   : > { %v11048_v62 = vld [vmem:[#allocation5 + $0x40] ss:$2 sm:$0xff]  ;;  %v11064_v6 = vld [vmem:[#allocation5 + $0x41] ss:$2 sm:$0xff]  ;;  %v9635_v59 = vadd.f32 %v9563_v38, %v16277_v28 }
 0x574   : > { %v11075_v26 = vadd.f32 %v11064_v6, %v11048_v62 }
 0x575   : > { %v10816_v18 = vpop.f32.mrf.mxu1 }
 0x576   : > { %v11288_v1 = vadd.f32 %v11275_v56, %v11075_v26  ;;  %v10897_v31 = vadd.f32 %v10816_v18, %v10375_v42 }
 0x578   : > { %11296 = vst [vmem:[%s16347_s26 + $0x20] sm:$0xff] %v11288_v1  ;;  %v10997_v14 = vadd.f32 %v16274_v60, %v10897_v31  ;;  %v10309_v20 = vpop.f32.mrf.mxu0 }
 0x579   : > { %v10381_v52 = vadd.f32 %v10309_v20, %v9635_v59 }
 0x57a   : > { %v9566_v63 = vpop.f32.mrf.mxu3 }
 0x57b   : > { %v9636_v53 = vadd.f32 %v9566_v63, %v16290_v5 }
 0x57d   : > { %v10819_v46 = vpop.f32.mrf.mxu1 }
 0x57e   : > { %v10898_v32 = vadd.f32 %v10819_v46, %v10376_v23 }
 0x580   : > { %v10998_v43 = vadd.f32 %v16274_v60, %v10898_v32  ;;  %v10312_v6 = vpop.f32.mrf.mxu0 }
 0x581   : > { %v10382_v42 = vadd.f32 %v10312_v6, %v9636_v53 }
 0x582   : > { %v11018_v22 = vadd.f32 %v10998_v43, %v10996_v13  ;;  %v9568_v1 = vpop.f32.mrf.mxu3 }
 0x584   : > { %11034 = vst [vmem:[#allocation5 + $0x50] sm:$0xff] %v11018_v22 }
 0x585   : > { %v10821_v33 = vpop.f32.mrf.mxu1 }
 0x586   : > { %v10899_v16 = vadd.f32 %v10821_v33, %v10377_v55 }
 0x588   : > { %v10999_v3 = vadd.f32 %v16274_v60, %v10899_v16  ;;  %v10314_v21 = vpop.f32.mrf.mxu0  ;;  %v9637_v16 = vadd.f32 %v9568_v1, %v16305_v17 }
 0x58a   : > { %v11019_v25 = vadd.f32 %v10999_v3, %v10997_v14  ;;  %v9571_v23 = vpop.f32.mrf.mxu3  ;;  %v10383_v30 = vadd.f32 %v10314_v21, %v9637_v16 }
 0x58b   : > { %v9638_v11 = vadd.f32 %v9571_v23, %v16310_v12 }
 0x58c   : > { %11035 = vst [vmem:[#allocation5 + $0x58] sm:$0xff] %v11019_v25 }
 0x58d   : > { %v10824_v48 = vpop.f32.mrf.mxu1 }
 0x58e   : > { %v10900_v49 = vadd.f32 %v10824_v48, %v10378_v19 }
 0x590   : > { %v11000_v40 = vadd.f32 %v16274_v60, %v10900_v49  ;;  %v10317_v43 = vpop.f32.mrf.mxu0 }
 0x591   : > { %v10384_v22 = vadd.f32 %v10317_v43, %v9638_v11 }
 0x592   : > { %v9573_v55 = vpop.f32.mrf.mxu3 }
 0x593   : > { %v11050_v47 = vld [vmem:[#allocation5 + $0x50] ss:$2 sm:$0xff]  ;;  %v11066_v8 = vld [vmem:[#allocation5 + $0x51] ss:$2 sm:$0xff]  ;;  %v9639_v14 = vadd.f32 %v9573_v55, %v16323_v10 }
 0x594   : > { %v11076_v54 = vadd.f32 %v11066_v8, %v11050_v47 }
 0x595   : > { %v10826_v24 = vpop.f32.mrf.mxu1 }
 0x596   : > { %v11289_v36 = vadd.f32 %v11277_v27, %v11076_v54  ;;  %v10901_v62 = vadd.f32 %v10826_v24, %v10379_v2 }
 0x598   : > { %11297 = vst [vmem:[%s16347_s26 + $0x28] sm:$0xff] %v11289_v36  ;;  %v11001_v57 = vadd.f32 %v16274_v60, %v10901_v62  ;;  %v10319_v5 = vpop.f32.mrf.mxu0 }
 0x599   : > { %v10385_v12 = vadd.f32 %v10319_v5, %v9639_v14 }
 0x59d   : > { %v10829_v61 = vpop.f32.mrf.mxu1  ;;  %v11279_v39 = vpop.f32.mrf.mxu2 }
 0x59e   : > { %v10902_v34 = vadd.f32 %v10829_v61, %v10380_v58  ;;  %v11280_v29 = vadd.f32 %v16333_v45, %v11279_v39 }
 0x5a0   : > { %v11002_v56 = vadd.f32 %v16274_v60, %v10902_v34 }
 0x5a2   : > { %v11020_v51 = vadd.f32 %v11002_v56, %v11000_v40 }
 0x5a4   : > { %11036 = vst [vmem:[#allocation5 + $0x60] sm:$0xff] %v11020_v51 }
 0x5a5   : > { %v10831_v26 = vpop.f32.mrf.mxu1  ;;  %v11281_v10 = vpop.f32.mrf.mxu2 }
 0x5a6   : > { %v10903_v18 = vadd.f32 %v10831_v26, %v10381_v52  ;;  %v11282_v9 = vadd.f32 %v16333_v45, %v11281_v10 }
 0x5a8   : > { %v11003_v7 = vadd.f32 %v16274_v60, %v10903_v18 }
 0x5aa   : > { %v11021_v50 = vadd.f32 %v11003_v7, %v11001_v57 }
 0x5ac   : > { %11037 = vst [vmem:[#allocation5 + $0x68] sm:$0xff] %v11021_v50 }
 0x5ad   : > { %v10834_v28 = vpop.f32.mrf.mxu1 }
 0x5ae   : > { %v10904_v31 = vadd.f32 %v10834_v28, %v10382_v42 }
 0x5b0   : > { %v11004_v3 = vadd.f32 %v16274_v60, %v10904_v31 }
 0x5b3   : > { %v11052_v15 = vld [vmem:[#allocation5 + $0x60] ss:$2 sm:$0xff]  ;;  %v11068_v46 = vld [vmem:[#allocation5 + $0x61] ss:$2 sm:$0xff] }
 0x5b4   : > { %v11077_v41 = vadd.f32 %v11068_v46, %v11052_v15 }
 0x5b5   : > { %v10836_v32 = vpop.f32.mrf.mxu1 }
 0x5b6   : > { %v11290_v13 = vadd.f32 %v11280_v29, %v11077_v41  ;;  %v10905_v35 = vadd.f32 %v10836_v32, %v10383_v30 }
 0x5b8   : > { %11298 = vst [vmem:[%s16347_s26 + $0x30] sm:$0xff] %v11290_v13  ;;  %v11005_v47 = vadd.f32 %v16274_v60, %v10905_v35 }
 0x5bd   : > { %v10839_v33 = vpop.f32.mrf.mxu1 }
 0x5be   : > { %v10906_v37 = vadd.f32 %v10839_v33, %v10384_v22 }
 0x5c0   : > { %v11006_v25 = vadd.f32 %v16274_v60, %v10906_v37 }
 0x5c2   : > { %v11022_v48 = vadd.f32 %v11006_v25, %v11004_v3 }
 0x5c4   : > { %11038 = vst [vmem:[#allocation5 + $0x70] sm:$0xff] %v11022_v48 }
 0x5c5   : > { %v10841_v4 = vpop.f32.mrf.mxu1 }
 0x5c6   : > { %v10907_v27 = vadd.f32 %v10841_v4, %v10385_v12 }
 0x5c8   : > { %v11007_v17 = vadd.f32 %v16274_v60, %v10907_v27 }
 0x5ca   : > { %v11023_v8 = vadd.f32 %v11007_v17, %v11005_v47 }
 0x5cc   : > { %11039 = vst [vmem:[#allocation5 + $0x78] sm:$0xff] %v11023_v8 }
 0x5d3   : > { %v11054_v54 = vld [vmem:[#allocation5 + $0x70] ss:$2 sm:$0xff]  ;;  %v11070_v38 = vld [vmem:[#allocation5 + $0x71] ss:$2 sm:$0xff] }
 0x5d4   : > { %v11078_v24 = vadd.f32 %v11070_v38, %v11054_v54 }
 0x5d6   : > { %v11291_v36 = vadd.f32 %v11282_v9, %v11078_v24 }
 0x5d8   : > { %11299 = vst [vmem:[%s16347_s26 + $0x38] sm:$0xff] %v11291_v36 }
 0x5d9 PF: > { %s17_s24 = sadd.s32 1, %s13088_s24  }
 0x5da   : > { %p14_p4 = scmp.ge.s32.totalorder %s17_s24, 4  }
 0x5dc   :  { %16 = sbr.rel (!%p14_p4) target bundleno = 1 (0x1), region = 130 }

</bundles_post_ra>
